<compile_context>
chip_gen: v6e
topology: v6e:2x2x1
jax: 0.10.0
libtpu: 0.0.40
codegen_flags: <defaults>
</compile_context>

<pallas_src>
import jax
import jax.numpy as jnp
from jax import lax
from jax.experimental import pallas as pl
from jax.experimental.pallas import tpu as pltpu

EPS = 1e-5

_COMPILER_PARAMS = pltpu.CompilerParams(
    dimension_semantics=("parallel",),   # per-image steps are independent
)


# ---------------------------------------------------------------------------
# In-kernel helpers
# ---------------------------------------------------------------------------
def _border_zero(pad_ref):
    """Zero only the 1-pixel halo border of a (h+2, w+2, c) scratch."""
    hp2, wp2, c = pad_ref.shape
    zrow = jnp.zeros((1, wp2, c), pad_ref.dtype)
    pad_ref[0:1, :, :] = zrow
    pad_ref[hp2 - 1:hp2, :, :] = zrow
    zcol = jnp.zeros((hp2, 1, c), pad_ref.dtype)
    pad_ref[:, 0:1, :] = zcol
    pad_ref[:, wp2 - 1:wp2, :] = zcol


def _im2col_conv(pad_ref, col_ref, w_ref):
    """Build the K-folded im2col scratch (h*w, 9*c) bf16 from the padded tile
    and do ONE MXU dot against the resident (9*c, planes) bf16 weights.
    Returns the (h*w, planes) f32 accumulator."""
    hp2, wp2, c = pad_ref.shape
    h, w = hp2 - 2, wp2 - 2
    hw = h * w
    for k in range(9):                       # static unroll, 9 window copies
        ky, kx = divmod(k, 3)
        win = pad_ref[pl.ds(ky, h), pl.ds(kx, w), :].reshape(hw, c)
        col_ref[:, pl.ds(k * c, c)] = win.astype(col_ref.dtype)
    return jnp.dot(col_ref[...], w_ref[...],
                   preferred_element_type=jnp.float32)


def _emit_stats(stats_ref, acc):
    """Pack per-tile BN partial stats [sum; sum_sq] into one (2, planes) store."""
    stats_ref[0] = jnp.concatenate(
        [jnp.sum(acc, axis=0, keepdims=True),
         jnp.sum(acc * acc, axis=0, keepdims=True)], axis=0)


# ---------------------------------------------------------------------------
# Kernel 1: conv1 (K-folded fused im2col) + packed BN1 partial stats
# ---------------------------------------------------------------------------
def _conv1_stats_kernel(x_ref, w_ref, raw_ref, stats_ref, pad_ref, col_ref):
    hp2, wp2, _ = pad_ref.shape
    h, w = hp2 - 2, wp2 - 2
    _border_zero(pad_ref)
    pad_ref[pl.ds(1, h), pl.ds(1, w), :] = x_ref[0]           # interior overwrite
    acc = _im2col_conv(pad_ref, col_ref, w_ref)               # (h*w, planes) f32
    raw_ref[0] = acc.astype(raw_ref.dtype)                    # bf16 intermediate
    _emit_stats(stats_ref, acc)


# ---------------------------------------------------------------------------
# Kernel 2: apply BN1+ReLU, conv2 (K-folded fused im2col) + BN2 partial stats
# ---------------------------------------------------------------------------
def _bn1_relu_conv2_stats_kernel(raw1_ref, s1_ref, w_ref,
                                 raw2_ref, stats_ref, pad_ref, col_ref):
    hp2, wp2, planes = pad_ref.shape
    h, w = hp2 - 2, wp2 - 2
    act = jnp.maximum(
        raw1_ref[0].astype(jnp.float32) * s1_ref[0:1, :] + s1_ref[1:2, :], 0.0)
    _border_zero(pad_ref)
    pad_ref[pl.ds(1, h), pl.ds(1, w), :] = act.reshape(h, w, planes)
    acc = _im2col_conv(pad_ref, col_ref, w_ref)
    raw2_ref[0] = acc.astype(raw2_ref.dtype)
    _emit_stats(stats_ref, acc)


# ---------------------------------------------------------------------------
# Kernel 3: apply BN2 + residual add + ReLU
# ---------------------------------------------------------------------------
def _bn2_add_relu_kernel(raw2_ref, s2_ref, x_ref, out_ref):
    y = raw2_ref[0].astype(jnp.float32) * s2_ref[0:1, :] + s2_ref[1:2, :]
    out_ref[0] = jnp.maximum(y + x_ref[0], 0.0)               # identity: c == planes


# ---------------------------------------------------------------------------
# Plain-JAX glue
# ---------------------------------------------------------------------------
def _pack_weight(w_oihw):
    """(out, in, 3, 3) -> (9*in, out) bf16, row index = (ky*3+kx)*in + ci."""
    o, i, kh, kw = w_oihw.shape
    return (jnp.transpose(w_oihw, (2, 3, 1, 0))
            .reshape(kh * kw * i, o)
            .astype(jnp.bfloat16))


def _bn_scale_shift(stats, gamma, beta, count):
    """Reduce per-tile packed stats (n, 2, planes) -> per-channel (scale, shift).
    PyTorch training-mode BN: biased variance over (N, H, W), eps=1e-5."""
    total = jnp.sum(stats[:, 0, :], axis=0)
    total_sq = jnp.sum(stats[:, 1, :], axis=0)
    mean = total / count
    # TODO(synk): E[x^2]-mean^2 cancels when |mean| >> std; switch to a shifted
    #             two-pass variance if a tighter tolerance is ever required.
    var = jnp.maximum(total_sq / count - mean * mean, 0.0)
    scale = gamma * lax.rsqrt(var + EPS)
    shift = beta - mean * scale
    return jnp.stack([scale, shift], axis=0).astype(jnp.float32)   # (2, planes)


# ---------------------------------------------------------------------------
# BasicBlock forward
# ---------------------------------------------------------------------------
def basic_block_forward(x_nchw, w1, g1, b1, w2, g2, b2):
    n, c, h, w = x_nchw.shape
    planes = w1.shape[0]
    assert c == planes, "downsample is None => inplanes must equal planes"
    hw = h * w
    count = n * hw

    # Single NCHW->NHWC relayout feeding both conv1 and the identity branch.
    x_nhwc = jnp.transpose(x_nchw, (0, 2, 3, 1)).astype(jnp.float32)
    x_flat = x_nhwc.reshape(n, hw, c)            # free row-major reshape (view)

    w1p = _pack_weight(w1)                       # (9*c, planes) bf16
    w2p = _pack_weight(w2)                       # (9*planes, planes) bf16

    # --- pass 1: conv1 + packed partial BN1 stats --------------------------
    raw1, st1 = pl.pallas_call(
        _conv1_stats_kernel,
        grid=(n,),
        in_specs=[
            pl.BlockSpec((1, h, w, c), lambda i: (i, 0, 0, 0)),
            pl.BlockSpec((9 * c, planes), lambda i: (0, 0)),       # resident
        ],
        out_specs=(
            pl.BlockSpec((1, hw, planes), lambda i: (i, 0, 0)),
            pl.BlockSpec((1, 2, planes), lambda i: (i, 0, 0)),
        ),
        out_shape=(
            jax.ShapeDtypeStruct((n, hw, planes), jnp.bfloat16),
            jax.ShapeDtypeStruct((n, 2, planes), jnp.float32),
        ),
        scratch_shapes=[
            pltpu.VMEM((h + 2, w + 2, c), jnp.float32),            # halo
            pltpu.VMEM((hw, 9 * c), jnp.bfloat16),                 # im2col
        ],
        compiler_params=_COMPILER_PARAMS,
    )(x_nhwc, w1p)

    s1 = _bn_scale_shift(st1, g1, b1, count)                       # (2, planes)

    # --- pass 2: BN1+ReLU apply, conv2 + packed partial BN2 stats ----------
    raw2, st2 = pl.pallas_call(
        _bn1_relu_conv2_stats_kernel,
        grid=(n,),
        in_specs=[
            pl.BlockSpec((1, hw, planes), lambda i: (i, 0, 0)),
            pl.BlockSpec((2, planes), lambda i: (0, 0)),           # resident
            pl.BlockSpec((9 * planes, planes), lambda i: (0, 0)),  # resident
        ],
        out_specs=(
            pl.BlockSpec((1, hw, planes), lambda i: (i, 0, 0)),
            pl.BlockSpec((1, 2, planes), lambda i: (i, 0, 0)),
        ),
        out_shape=(
            jax.ShapeDtypeStruct((n, hw, planes), jnp.bfloat16),
            jax.ShapeDtypeStruct((n, 2, planes), jnp.float32),
        ),
        scratch_shapes=[
            pltpu.VMEM((h + 2, w + 2, planes), jnp.float32),
            pltpu.VMEM((hw, 9 * planes), jnp.bfloat16),
        ],
        compiler_params=_COMPILER_PARAMS,
    )(raw1, s1, w2p)

    s2 = _bn_scale_shift(st2, g2, b2, count)                       # (2, planes)

    # --- pass 3: BN2 apply + residual add + ReLU ---------------------------
    out_flat = pl.pallas_call(
        _bn2_add_relu_kernel,
        grid=(n,),
        in_specs=[
            pl.BlockSpec((1, hw, planes), lambda i: (i, 0, 0)),
            pl.BlockSpec((2, planes), lambda i: (0, 0)),           # resident
            pl.BlockSpec((1, hw, c), lambda i: (i, 0, 0)),
        ],
        out_specs=pl.BlockSpec((1, hw, planes), lambda i: (i, 0, 0)),
        out_shape=jax.ShapeDtypeStruct((n, hw, planes), jnp.float32),
        compiler_params=_COMPILER_PARAMS,
    )(raw2, s2, x_flat)

    out_nhwc = out_flat.reshape(n, h, w, planes)                   # free reshape
    return jnp.transpose(out_nhwc, (0, 3, 1, 2))                   # back to NCHW


# ---------------------------------------------------------------------------
# Pure-JAX reference (f32) for validation
# ---------------------------------------------------------------------------
def _reference_forward(x, w1, g1, b1, w2, g2, b2):
    def conv(a, w_):
        return lax.conv_general_dilated(a, w_, (1, 1), ((1, 1), (1, 1)),
                                        dimension_numbers=("NCHW", "OIHW", "NCHW"))

    def bn(a, g, b):
        mean = jnp.mean(a, axis=(0, 2, 3), keepdims=True)
        var = jnp.mean((a - mean) ** 2, axis=(0, 2, 3), keepdims=True)
        return ((a - mean) * lax.rsqrt(var + EPS) * g.reshape(1, -1, 1, 1)
                + b.reshape(1, -1, 1, 1))

    out = jnp.maximum(bn(conv(x, w1), g1, b1), 0.0)
    out = bn(conv(out, w2), g2, b2) + x
    return jnp.maximum(out, 0.0)


# ---------------------------------------------------------------------------
# Main
# ---------------------------------------------------------------------------
if __name__ == "__main__":
    N, C, H, W = 2, 4, 16, 16     # inplanes = planes = 4, stride = 1, downsample = None
    planes = C

    key = jax.random.PRNGKey(0)
    kx_, kw1, kw2 = jax.random.split(key, 3)

    x = jax.random.normal(kx_, (N, C, H, W), dtype=jnp.float32)
    w1 = jax.random.normal(kw1, (planes, C, 3, 3), dtype=jnp.float32) * 0.1
    w2 = jax.random.normal(kw2, (planes, planes, 3, 3), dtype=jnp.float32) * 0.1
    g1 = jnp.ones((planes,), jnp.float32)
    b1 = jnp.zeros((planes,), jnp.float32)
    g2 = jnp.ones((planes,), jnp.float32)
    b2 = jnp.zeros((planes,), jnp.float32)

    out = jax.jit(basic_block_forward)(x, w1, g1, b1, w2, g2, b2)
    out = jax.block_until_ready(out)

    assert out.shape == (N, planes, H, W)
    assert bool(jnp.all(jnp.isfinite(out)))
    assert bool(jnp.all(out >= 0.0))   # final ReLU

    ref = _reference_forward(x, w1, g1, b1, w2, g2, b2)
    max_err = float(jnp.max(jnp.abs(out - ref)))
    # bf16 MXU operands + bf16 raw1/raw2 intermediates vs an all-f32 reference.
    assert max_err < 2e-1, f"max abs error vs f32 reference: {max_err}"

    print("KERNEL_OK")
</pallas_src>

<mosaic_0001>
module attributes {stable_mosaic.version = 11 : i64} {
  func.func @_conv1_stats_kernel(%arg0: i32, %arg1: memref<1x16x16x4xf32, #tpu.memory_space<vmem>>, %arg2: memref<36x4xbf16, #tpu.memory_space<vmem>>, %arg3: memref<1x256x4xbf16, #tpu.memory_space<vmem>>, %arg4: memref<1x2x4xf32, #tpu.memory_space<vmem>>, %arg5: memref<18x18x4xf32, #tpu.memory_space<vmem>>, %arg6: memref<256x36xbf16, #tpu.memory_space<vmem>>) attributes {dimension_semantics = [#tpu.dimension_semantics<parallel>], iteration_bounds = array<i64: 2>, scalar_prefetch = 0 : i64, scratch_operands = 2 : i64, tpu.core_type = #tpu.core_type<tc>, window_params = [{transform_indices = @transform_0, window_bounds = array<i64: 1, 16, 16, 4>}, {pipeline_mode = #tpu.pipeline_mode<synchronous>, transform_indices = @transform_1, window_bounds = array<i64: 36, 4>}, {transform_indices = @transform_2, window_bounds = array<i64: 1, 256, 4>}, {transform_indices = @transform_3, window_bounds = array<i64: 1, 2, 4>}]} {
    %cst = arith.constant 0.000000e+00 : f32
    %0 = vector.broadcast %cst : f32 to vector<1x18x4xf32>
    %c0 = arith.constant 0 : index
    %c0_0 = arith.constant 0 : index
    %c0_1 = arith.constant 0 : index
    %1 = vector.load %arg5[%c0, %c0_0, %c0_1] : memref<18x18x4xf32, #tpu.memory_space<vmem>>, vector<1x18x4xf32>
    tpu.vector_store %arg5[%c0, %c0_0, %c0_1], %0 {strides = array<i32>} : memref<18x18x4xf32, #tpu.memory_space<vmem>>, vector<1x18x4xf32>,
    %c17 = arith.constant 17 : index
    %c0_2 = arith.constant 0 : index
    %c0_3 = arith.constant 0 : index
    %2 = vector.load %arg5[%c17, %c0_2, %c0_3] : memref<18x18x4xf32, #tpu.memory_space<vmem>>, vector<1x18x4xf32>
    tpu.vector_store %arg5[%c17, %c0_2, %c0_3], %0 {strides = array<i32>} : memref<18x18x4xf32, #tpu.memory_space<vmem>>, vector<1x18x4xf32>,
    %cst_4 = arith.constant 0.000000e+00 : f32
    %3 = vector.broadcast %cst_4 : f32 to vector<18x1x4xf32>
    %c0_5 = arith.constant 0 : index
    %c0_6 = arith.constant 0 : index
    %c0_7 = arith.constant 0 : index
    %4 = vector.load %arg5[%c0_5, %c0_6, %c0_7] : memref<18x18x4xf32, #tpu.memory_space<vmem>>, vector<18x1x4xf32>
    tpu.vector_store %arg5[%c0_5, %c0_6, %c0_7], %3 {strides = array<i32>} : memref<18x18x4xf32, #tpu.memory_space<vmem>>, vector<18x1x4xf32>,
    %c0_8 = arith.constant 0 : index
    %c17_9 = arith.constant 17 : index
    %c0_10 = arith.constant 0 : index
    %5 = vector.load %arg5[%c0_8, %c17_9, %c0_10] : memref<18x18x4xf32, #tpu.memory_space<vmem>>, vector<18x1x4xf32>
    tpu.vector_store %arg5[%c0_8, %c17_9, %c0_10], %3 {strides = array<i32>} : memref<18x18x4xf32, #tpu.memory_space<vmem>>, vector<18x1x4xf32>,
    %c0_11 = arith.constant 0 : index
    %c0_12 = arith.constant 0 : index
    %c0_13 = arith.constant 0 : index
    %c0_14 = arith.constant 0 : index
    %6 = vector.load %arg1[%c0_11, %c0_12, %c0_13, %c0_14] : memref<1x16x16x4xf32, #tpu.memory_space<vmem>>, vector<1x16x16x4xf32>
    %7 = vector.shape_cast %6 : vector<1x16x16x4xf32> to vector<16x16x4xf32>
    %c1 = arith.constant 1 : index
    %c1_15 = arith.constant 1 : index
    %c0_16 = arith.constant 0 : index
    %8 = vector.load %arg5[%c1, %c1_15, %c0_16] : memref<18x18x4xf32, #tpu.memory_space<vmem>>, vector<16x16x4xf32>
    tpu.vector_store %arg5[%c1, %c1_15, %c0_16], %7 {strides = array<i32>} : memref<18x18x4xf32, #tpu.memory_space<vmem>>, vector<16x16x4xf32>,
    %c0_17 = arith.constant 0 : index
    %c0_18 = arith.constant 0 : index
    %c0_19 = arith.constant 0 : index
    %9 = vector.load %arg5[%c0_17, %c0_18, %c0_19] : memref<18x18x4xf32, #tpu.memory_space<vmem>>, vector<16x16x4xf32>
    %10 = vector.shape_cast %9 : vector<16x16x4xf32> to vector<256x4xf32>
    %11 = arith.truncf %10 : vector<256x4xf32> to vector<256x4xbf16>
    %c0_20 = arith.constant 0 : index
    %c0_21 = arith.constant 0 : index
    %12 = vector.load %arg6[%c0_20, %c0_21] : memref<256x36xbf16, #tpu.memory_space<vmem>>, vector<256x4xbf16>
    tpu.vector_store %arg6[%c0_20, %c0_21], %11 {strides = array<i32>} : memref<256x36xbf16, #tpu.memory_space<vmem>>, vector<256x4xbf16>,
    %c0_22 = arith.constant 0 : index
    %c1_23 = arith.constant 1 : index
    %c0_24 = arith.constant 0 : index
    %13 = vector.load %arg5[%c0_22, %c1_23, %c0_24] : memref<18x18x4xf32, #tpu.memory_space<vmem>>, vector<16x16x4xf32>
    %14 = vector.shape_cast %13 : vector<16x16x4xf32> to vector<256x4xf32>
    %15 = arith.truncf %14 : vector<256x4xf32> to vector<256x4xbf16>
    %c0_25 = arith.constant 0 : index
    %c4 = arith.constant 4 : index
    %16 = vector.load %arg6[%c0_25, %c4] : memref<256x36xbf16, #tpu.memory_space<vmem>>, vector<256x4xbf16>
    tpu.vector_store %arg6[%c0_25, %c4], %15 {strides = array<i32>} : memref<256x36xbf16, #tpu.memory_space<vmem>>, vector<256x4xbf16>,
    %c0_26 = arith.constant 0 : index
    %c2 = arith.constant 2 : index
    %c0_27 = arith.constant 0 : index
    %17 = vector.load %arg5[%c0_26, %c2, %c0_27] : memref<18x18x4xf32, #tpu.memory_space<vmem>>, vector<16x16x4xf32>
    %18 = vector.shape_cast %17 : vector<16x16x4xf32> to vector<256x4xf32>
    %19 = arith.truncf %18 : vector<256x4xf32> to vector<256x4xbf16>
    %c0_28 = arith.constant 0 : index
    %c8 = arith.constant 8 : index
    %20 = vector.load %arg6[%c0_28, %c8] : memref<256x36xbf16, #tpu.memory_space<vmem>>, vector<256x4xbf16>
    tpu.vector_store %arg6[%c0_28, %c8], %19 {strides = array<i32>} : memref<256x36xbf16, #tpu.memory_space<vmem>>, vector<256x4xbf16>,
    %c1_29 = arith.constant 1 : index
    %c0_30 = arith.constant 0 : index
    %c0_31 = arith.constant 0 : index
    %21 = vector.load %arg5[%c1_29, %c0_30, %c0_31] : memref<18x18x4xf32, #tpu.memory_space<vmem>>, vector<16x16x4xf32>
    %22 = vector.shape_cast %21 : vector<16x16x4xf32> to vector<256x4xf32>
    %23 = arith.truncf %22 : vector<256x4xf32> to vector<256x4xbf16>
    %c0_32 = arith.constant 0 : index
    %c12 = arith.constant 12 : index
    %24 = vector.load %arg6[%c0_32, %c12] : memref<256x36xbf16, #tpu.memory_space<vmem>>, vector<256x4xbf16>
    tpu.vector_store %arg6[%c0_32, %c12], %23 {strides = array<i32>} : memref<256x36xbf16, #tpu.memory_space<vmem>>, vector<256x4xbf16>,
    %c1_33 = arith.constant 1 : index
    %c1_34 = arith.constant 1 : index
    %c0_35 = arith.constant 0 : index
    %25 = vector.load %arg5[%c1_33, %c1_34, %c0_35] : memref<18x18x4xf32, #tpu.memory_space<vmem>>, vector<16x16x4xf32>
    %26 = vector.shape_cast %25 : vector<16x16x4xf32> to vector<256x4xf32>
    %27 = arith.truncf %26 : vector<256x4xf32> to vector<256x4xbf16>
    %c0_36 = arith.constant 0 : index
    %c16 = arith.constant 16 : index
    %28 = vector.load %arg6[%c0_36, %c16] : memref<256x36xbf16, #tpu.memory_space<vmem>>, vector<256x4xbf16>
    tpu.vector_store %arg6[%c0_36, %c16], %27 {strides = array<i32>} : memref<256x36xbf16, #tpu.memory_space<vmem>>, vector<256x4xbf16>,
    %c1_37 = arith.constant 1 : index
    %c2_38 = arith.constant 2 : index
    %c0_39 = arith.constant 0 : index
    %29 = vector.load %arg5[%c1_37, %c2_38, %c0_39] : memref<18x18x4xf32, #tpu.memory_space<vmem>>, vector<16x16x4xf32>
    %30 = vector.shape_cast %29 : vector<16x16x4xf32> to vector<256x4xf32>
    %31 = arith.truncf %30 : vector<256x4xf32> to vector<256x4xbf16>
    %c0_40 = arith.constant 0 : index
    %c20 = arith.constant 20 : index
    %32 = vector.load %arg6[%c0_40, %c20] : memref<256x36xbf16, #tpu.memory_space<vmem>>, vector<256x4xbf16>
    tpu.vector_store %arg6[%c0_40, %c20], %31 {strides = array<i32>} : memref<256x36xbf16, #tpu.memory_space<vmem>>, vector<256x4xbf16>,
    %c2_41 = arith.constant 2 : index
    %c0_42 = arith.constant 0 : index
    %c0_43 = arith.constant 0 : index
    %33 = vector.load %arg5[%c2_41, %c0_42, %c0_43] : memref<18x18x4xf32, #tpu.memory_space<vmem>>, vector<16x16x4xf32>
    %34 = vector.shape_cast %33 : vector<16x16x4xf32> to vector<256x4xf32>
    %35 = arith.truncf %34 : vector<256x4xf32> to vector<256x4xbf16>
    %c0_44 = arith.constant 0 : index
    %c24 = arith.constant 24 : index
    %36 = vector.load %arg6[%c0_44, %c24] : memref<256x36xbf16, #tpu.memory_space<vmem>>, vector<256x4xbf16>
    tpu.vector_store %arg6[%c0_44, %c24], %35 {strides = array<i32>} : memref<256x36xbf16, #tpu.memory_space<vmem>>, vector<256x4xbf16>,
    %c2_45 = arith.constant 2 : index
    %c1_46 = arith.constant 1 : index
    %c0_47 = arith.constant 0 : index
    %37 = vector.load %arg5[%c2_45, %c1_46, %c0_47] : memref<18x18x4xf32, #tpu.memory_space<vmem>>, vector<16x16x4xf32>
    %38 = vector.shape_cast %37 : vector<16x16x4xf32> to vector<256x4xf32>
    %39 = arith.truncf %38 : vector<256x4xf32> to vector<256x4xbf16>
    %c0_48 = arith.constant 0 : index
    %c28 = arith.constant 28 : index
    %40 = vector.load %arg6[%c0_48, %c28] : memref<256x36xbf16, #tpu.memory_space<vmem>>, vector<256x4xbf16>
    tpu.vector_store %arg6[%c0_48, %c28], %39 {strides = array<i32>} : memref<256x36xbf16, #tpu.memory_space<vmem>>, vector<256x4xbf16>,
    %c2_49 = arith.constant 2 : index
    %c2_50 = arith.constant 2 : index
    %c0_51 = arith.constant 0 : index
    %41 = vector.load %arg5[%c2_49, %c2_50, %c0_51] : memref<18x18x4xf32, #tpu.memory_space<vmem>>, vector<16x16x4xf32>
    %42 = vector.shape_cast %41 : vector<16x16x4xf32> to vector<256x4xf32>
    %43 = arith.truncf %42 : vector<256x4xf32> to vector<256x4xbf16>
    %c0_52 = arith.constant 0 : index
    %c32 = arith.constant 32 : index
    %44 = vector.load %arg6[%c0_52, %c32] : memref<256x36xbf16, #tpu.memory_space<vmem>>, vector<256x4xbf16>
    tpu.vector_store %arg6[%c0_52, %c32], %43 {strides = array<i32>} : memref<256x36xbf16, #tpu.memory_space<vmem>>, vector<256x4xbf16>,
    %c0_53 = arith.constant 0 : index
    %c0_54 = arith.constant 0 : index
    %45 = vector.load %arg6[%c0_53, %c0_54] : memref<256x36xbf16, #tpu.memory_space<vmem>>, vector<256x36xbf16>
    %c0_55 = arith.constant 0 : index
    %c0_56 = arith.constant 0 : index
    %46 = vector.load %arg2[%c0_55, %c0_56] : memref<36x4xbf16, #tpu.memory_space<vmem>>, vector<36x4xbf16>
    %cst_57 = arith.constant dense<0.000000e+00> : vector<256x4xf32>
    %47 = tpu.matmul %45, %46, %cst_57 {dimension_numbers = #tpu.dot_dimension_numbers<[1], [0], [0], [1], [0, 0, 1, 1], [], []>} : vector<256x36xbf16>, vector<36x4xbf16>, vector<256x4xf32> -> vector<256x4xf32>
    %48 = arith.truncf %47 : vector<256x4xf32> to vector<256x4xbf16>
    %c0_58 = arith.constant 0 : index
    %c0_59 = arith.constant 0 : index
    %c0_60 = arith.constant 0 : index
    %49 = vector.load %arg3[%c0_58, %c0_59, %c0_60] : memref<1x256x4xbf16, #tpu.memory_space<vmem>>, vector<1x256x4xbf16>
    %50 = vector.shape_cast %49 : vector<1x256x4xbf16> to vector<256x4xbf16>
    %51 = vector.shape_cast %48 : vector<256x4xbf16> to vector<1x256x4xbf16>
    tpu.vector_store %arg3[%c0_58, %c0_59, %c0_60], %51 {strides = array<i32>} : memref<1x256x4xbf16, #tpu.memory_space<vmem>>, vector<1x256x4xbf16>,
    %cst_61 = arith.constant dense<0.000000e+00> : vector<4xf32>
    %52 = vector.multi_reduction <add>, %47, %cst_61 [0] : vector<256x4xf32> to vector<4xf32>
    %53 = vector.shape_cast %52 : vector<4xf32> to vector<1x4xf32>
    %54 = arith.mulf %47, %47 : vector<256x4xf32>
    %cst_62 = arith.constant dense<0.000000e+00> : vector<4xf32>
    %55 = vector.multi_reduction <add>, %54, %cst_62 [0] : vector<256x4xf32> to vector<4xf32>
    %56 = vector.shape_cast %55 : vector<4xf32> to vector<1x4xf32>
    %57 = tpu.concatenate %53, %56 in 0 : vector<1x4xf32>, vector<1x4xf32> -> vector<2x4xf32>
    %c0_63 = arith.constant 0 : index
    %c0_64 = arith.constant 0 : index
    %c0_65 = arith.constant 0 : index
    %58 = vector.load %arg4[%c0_63, %c0_64, %c0_65] : memref<1x2x4xf32, #tpu.memory_space<vmem>>, vector<1x2x4xf32>
    %59 = vector.shape_cast %58 : vector<1x2x4xf32> to vector<2x4xf32>
    %60 = vector.shape_cast %57 : vector<2x4xf32> to vector<1x2x4xf32>
    tpu.vector_store %arg4[%c0_63, %c0_64, %c0_65], %60 {strides = array<i32>} : memref<1x2x4xf32, #tpu.memory_space<vmem>>, vector<1x2x4xf32>,
    return
  }
  func.func @transform_0(%arg0: i32) -> (i32, i32, i32, i32) {
    %c0_i32 = arith.constant 0 : i32
    %c0_i32_0 = arith.constant 0 : i32
    %c0_i32_1 = arith.constant 0 : i32
    %c0_i32_2 = arith.constant 0 : i32
    return %arg0, %c0_i32, %c0_i32_0, %c0_i32_1 : i32, i32, i32, i32
  }
  func.func @transform_1(%arg0: i32) -> (i32, i32) {
    %c0_i32 = arith.constant 0 : i32
    %c0_i32_0 = arith.constant 0 : i32
    %c0_i32_1 = arith.constant 0 : i32
    return %c0_i32, %c0_i32_0 : i32, i32
  }
  func.func @transform_2(%arg0: i32) -> (i32, i32, i32) {
    %c0_i32 = arith.constant 0 : i32
    %c0_i32_0 = arith.constant 0 : i32
    %c0_i32_1 = arith.constant 0 : i32
    return %arg0, %c0_i32, %c0_i32_0 : i32, i32, i32
  }
  func.func @transform_3(%arg0: i32) -> (i32, i32, i32) {
    %c0_i32 = arith.constant 0 : i32
    %c0_i32_0 = arith.constant 0 : i32
    %c0_i32_1 = arith.constant 0 : i32
    return %arg0, %c0_i32, %c0_i32_0 : i32, i32, i32
  }
}

module attributes {stable_mosaic.version = 11 : i64} {
  func.func @_bn2_add_relu_kernel(%arg0: i32, %arg1: memref<1x256x4xbf16, #tpu.memory_space<vmem>>, %arg2: memref<2x4xf32, #tpu.memory_space<vmem>>, %arg3: memref<1x256x4xf32, #tpu.memory_space<vmem>>, %arg4: memref<1x256x4xf32, #tpu.memory_space<vmem>>) attributes {dimension_semantics = [#tpu.dimension_semantics<parallel>], iteration_bounds = array<i64: 2>, scalar_prefetch = 0 : i64, scratch_operands = 0 : i64, tpu.core_type = #tpu.core_type<tc>, window_params = [{transform_indices = @transform_0, window_bounds = array<i64: 1, 256, 4>}, {pipeline_mode = #tpu.pipeline_mode<synchronous>, transform_indices = @transform_1, window_bounds = array<i64: 2, 4>}, {transform_indices = @transform_2, window_bounds = array<i64: 1, 256, 4>}, {transform_indices = @transform_3, window_bounds = array<i64: 1, 256, 4>}]} {
    %c0 = arith.constant 0 : index
    %c0_0 = arith.constant 0 : index
    %c0_1 = arith.constant 0 : index
    %0 = vector.load %arg1[%c0, %c0_0, %c0_1] : memref<1x256x4xbf16, #tpu.memory_space<vmem>>, vector<1x256x4xbf16>
    %1 = vector.shape_cast %0 : vector<1x256x4xbf16> to vector<256x4xbf16>
    %2 = arith.extf %1 : vector<256x4xbf16> to vector<256x4xf32>
    %c0_2 = arith.constant 0 : index
    %c0_3 = arith.constant 0 : index
    %3 = vector.load %arg2[%c0_2, %c0_3] : memref<2x4xf32, #tpu.memory_space<vmem>>, vector<1x4xf32>
    %4 = vector.broadcast %3 : vector<1x4xf32> to vector<256x4xf32>
    %5 = arith.mulf %2, %4 : vector<256x4xf32>
    %c1 = arith.constant 1 : index
    %c0_4 = arith.constant 0 : index
    %6 = vector.load %arg2[%c1, %c0_4] : memref<2x4xf32, #tpu.memory_space<vmem>>, vector<1x4xf32>
    %7 = vector.broadcast %6 : vector<1x4xf32> to vector<256x4xf32>
    %8 = arith.addf %5, %7 : vector<256x4xf32>
    %c0_5 = arith.constant 0 : index
    %c0_6 = arith.constant 0 : index
    %c0_7 = arith.constant 0 : index
    %9 = vector.load %arg3[%c0_5, %c0_6, %c0_7] : memref<1x256x4xf32, #tpu.memory_space<vmem>>, vector<1x256x4xf32>
    %10 = vector.shape_cast %9 : vector<1x256x4xf32> to vector<256x4xf32>
    %11 = arith.addf %8, %10 : vector<256x4xf32>
    %cst = arith.constant 0.000000e+00 : f32
    %12 = vector.broadcast %cst : f32 to vector<256x4xf32>
    %13 = arith.maximumf %11, %12 : vector<256x4xf32>
    %c0_8 = arith.constant 0 : index
    %c0_9 = arith.constant 0 : index
    %c0_10 = arith.constant 0 : index
    %14 = vector.load %arg4[%c0_8, %c0_9, %c0_10] : memref<1x256x4xf32, #tpu.memory_space<vmem>>, vector<1x256x4xf32>
    %15 = vector.shape_cast %14 : vector<1x256x4xf32> to vector<256x4xf32>
    %16 = vector.shape_cast %13 : vector<256x4xf32> to vector<1x256x4xf32>
    tpu.vector_store %arg4[%c0_8, %c0_9, %c0_10], %16 {strides = array<i32>} : memref<1x256x4xf32, #tpu.memory_space<vmem>>, vector<1x256x4xf32>,
    return
  }
  func.func @transform_0(%arg0: i32) -> (i32, i32, i32) {
    %c0_i32 = arith.constant 0 : i32
    %c0_i32_0 = arith.constant 0 : i32
    %c0_i32_1 = arith.constant 0 : i32
    return %arg0, %c0_i32, %c0_i32_0 : i32, i32, i32
  }
  func.func @transform_1(%arg0: i32) -> (i32, i32) {
    %c0_i32 = arith.constant 0 : i32
    %c0_i32_0 = arith.constant 0 : i32
    %c0_i32_1 = arith.constant 0 : i32
    return %c0_i32, %c0_i32_0 : i32, i32
  }
  func.func @transform_2(%arg0: i32) -> (i32, i32, i32) {
    %c0_i32 = arith.constant 0 : i32
    %c0_i32_0 = arith.constant 0 : i32
    %c0_i32_1 = arith.constant 0 : i32
    return %arg0, %c0_i32, %c0_i32_0 : i32, i32, i32
  }
  func.func @transform_3(%arg0: i32) -> (i32, i32, i32) {
    %c0_i32 = arith.constant 0 : i32
    %c0_i32_0 = arith.constant 0 : i32
    %c0_i32_1 = arith.constant 0 : i32
    return %arg0, %c0_i32, %c0_i32_0 : i32, i32, i32
  }
}

module attributes {stable_mosaic.version = 11 : i64} {
  func.func @_bn1_relu_conv2_stats_kernel(%arg0: i32, %arg1: memref<1x256x4xbf16, #tpu.memory_space<vmem>>, %arg2: memref<2x4xf32, #tpu.memory_space<vmem>>, %arg3: memref<36x4xbf16, #tpu.memory_space<vmem>>, %arg4: memref<1x256x4xbf16, #tpu.memory_space<vmem>>, %arg5: memref<1x2x4xf32, #tpu.memory_space<vmem>>, %arg6: memref<18x18x4xf32, #tpu.memory_space<vmem>>, %arg7: memref<256x36xbf16, #tpu.memory_space<vmem>>) attributes {dimension_semantics = [#tpu.dimension_semantics<parallel>], iteration_bounds = array<i64: 2>, scalar_prefetch = 0 : i64, scratch_operands = 2 : i64, tpu.core_type = #tpu.core_type<tc>, window_params = [{transform_indices = @transform_0, window_bounds = array<i64: 1, 256, 4>}, {pipeline_mode = #tpu.pipeline_mode<synchronous>, transform_indices = @transform_1, window_bounds = array<i64: 2, 4>}, {pipeline_mode = #tpu.pipeline_mode<synchronous>, transform_indices = @transform_2, window_bounds = array<i64: 36, 4>}, {transform_indices = @transform_3, window_bounds = array<i64: 1, 256, 4>}, {transform_indices = @transform_4, window_bounds = array<i64: 1, 2, 4>}]} {
    %c0 = arith.constant 0 : index
    %c0_0 = arith.constant 0 : index
    %c0_1 = arith.constant 0 : index
    %0 = vector.load %arg1[%c0, %c0_0, %c0_1] : memref<1x256x4xbf16, #tpu.memory_space<vmem>>, vector<1x256x4xbf16>
    %1 = vector.shape_cast %0 : vector<1x256x4xbf16> to vector<256x4xbf16>
    %2 = arith.extf %1 : vector<256x4xbf16> to vector<256x4xf32>
    %c0_2 = arith.constant 0 : index
    %c0_3 = arith.constant 0 : index
    %3 = vector.load %arg2[%c0_2, %c0_3] : memref<2x4xf32, #tpu.memory_space<vmem>>, vector<1x4xf32>
    %4 = vector.broadcast %3 : vector<1x4xf32> to vector<256x4xf32>
    %5 = arith.mulf %2, %4 : vector<256x4xf32>
    %c1 = arith.constant 1 : index
    %c0_4 = arith.constant 0 : index
    %6 = vector.load %arg2[%c1, %c0_4] : memref<2x4xf32, #tpu.memory_space<vmem>>, vector<1x4xf32>
    %7 = vector.broadcast %6 : vector<1x4xf32> to vector<256x4xf32>
    %8 = arith.addf %5, %7 : vector<256x4xf32>
    %cst = arith.constant 0.000000e+00 : f32
    %9 = vector.broadcast %cst : f32 to vector<256x4xf32>
    %10 = arith.maximumf %8, %9 : vector<256x4xf32>
    %cst_5 = arith.constant 0.000000e+00 : f32
    %11 = vector.broadcast %cst_5 : f32 to vector<1x18x4xf32>
    %c0_6 = arith.constant 0 : index
    %c0_7 = arith.constant 0 : index
    %c0_8 = arith.constant 0 : index
    %12 = vector.load %arg6[%c0_6, %c0_7, %c0_8] : memref<18x18x4xf32, #tpu.memory_space<vmem>>, vector<1x18x4xf32>
    tpu.vector_store %arg6[%c0_6, %c0_7, %c0_8], %11 {strides = array<i32>} : memref<18x18x4xf32, #tpu.memory_space<vmem>>, vector<1x18x4xf32>,
    %c17 = arith.constant 17 : index
    %c0_9 = arith.constant 0 : index
    %c0_10 = arith.constant 0 : index
    %13 = vector.load %arg6[%c17, %c0_9, %c0_10] : memref<18x18x4xf32, #tpu.memory_space<vmem>>, vector<1x18x4xf32>
    tpu.vector_store %arg6[%c17, %c0_9, %c0_10], %11 {strides = array<i32>} : memref<18x18x4xf32, #tpu.memory_space<vmem>>, vector<1x18x4xf32>,
    %cst_11 = arith.constant 0.000000e+00 : f32
    %14 = vector.broadcast %cst_11 : f32 to vector<18x1x4xf32>
    %c0_12 = arith.constant 0 : index
    %c0_13 = arith.constant 0 : index
    %c0_14 = arith.constant 0 : index
    %15 = vector.load %arg6[%c0_12, %c0_13, %c0_14] : memref<18x18x4xf32, #tpu.memory_space<vmem>>, vector<18x1x4xf32>
    tpu.vector_store %arg6[%c0_12, %c0_13, %c0_14], %14 {strides = array<i32>} : memref<18x18x4xf32, #tpu.memory_space<vmem>>, vector<18x1x4xf32>,
    %c0_15 = arith.constant 0 : index
    %c17_16 = arith.constant 17 : index
    %c0_17 = arith.constant 0 : index
    %16 = vector.load %arg6[%c0_15, %c17_16, %c0_17] : memref<18x18x4xf32, #tpu.memory_space<vmem>>, vector<18x1x4xf32>
    tpu.vector_store %arg6[%c0_15, %c17_16, %c0_17], %14 {strides = array<i32>} : memref<18x18x4xf32, #tpu.memory_space<vmem>>, vector<18x1x4xf32>,
    %17 = vector.shape_cast %10 : vector<256x4xf32> to vector<16x16x4xf32>
    %c1_18 = arith.constant 1 : index
    %c1_19 = arith.constant 1 : index
    %c0_20 = arith.constant 0 : index
    %18 = vector.load %arg6[%c1_18, %c1_19, %c0_20] : memref<18x18x4xf32, #tpu.memory_space<vmem>>, vector<16x16x4xf32>
    tpu.vector_store %arg6[%c1_18, %c1_19, %c0_20], %17 {strides = array<i32>} : memref<18x18x4xf32, #tpu.memory_space<vmem>>, vector<16x16x4xf32>,
    %c0_21 = arith.constant 0 : index
    %c0_22 = arith.constant 0 : index
    %c0_23 = arith.constant 0 : index
    %19 = vector.load %arg6[%c0_21, %c0_22, %c0_23] : memref<18x18x4xf32, #tpu.memory_space<vmem>>, vector<16x16x4xf32>
    %20 = vector.shape_cast %19 : vector<16x16x4xf32> to vector<256x4xf32>
    %21 = arith.truncf %20 : vector<256x4xf32> to vector<256x4xbf16>
    %c0_24 = arith.constant 0 : index
    %c0_25 = arith.constant 0 : index
    %22 = vector.load %arg7[%c0_24, %c0_25] : memref<256x36xbf16, #tpu.memory_space<vmem>>, vector<256x4xbf16>
    tpu.vector_store %arg7[%c0_24, %c0_25], %21 {strides = array<i32>} : memref<256x36xbf16, #tpu.memory_space<vmem>>, vector<256x4xbf16>,
    %c0_26 = arith.constant 0 : index
    %c1_27 = arith.constant 1 : index
    %c0_28 = arith.constant 0 : index
    %23 = vector.load %arg6[%c0_26, %c1_27, %c0_28] : memref<18x18x4xf32, #tpu.memory_space<vmem>>, vector<16x16x4xf32>
    %24 = vector.shape_cast %23 : vector<16x16x4xf32> to vector<256x4xf32>
    %25 = arith.truncf %24 : vector<256x4xf32> to vector<256x4xbf16>
    %c0_29 = arith.constant 0 : index
    %c4 = arith.constant 4 : index
    %26 = vector.load %arg7[%c0_29, %c4] : memref<256x36xbf16, #tpu.memory_space<vmem>>, vector<256x4xbf16>
    tpu.vector_store %arg7[%c0_29, %c4], %25 {strides = array<i32>} : memref<256x36xbf16, #tpu.memory_space<vmem>>, vector<256x4xbf16>,
    %c0_30 = arith.constant 0 : index
    %c2 = arith.constant 2 : index
    %c0_31 = arith.constant 0 : index
    %27 = vector.load %arg6[%c0_30, %c2, %c0_31] : memref<18x18x4xf32, #tpu.memory_space<vmem>>, vector<16x16x4xf32>
    %28 = vector.shape_cast %27 : vector<16x16x4xf32> to vector<256x4xf32>
    %29 = arith.truncf %28 : vector<256x4xf32> to vector<256x4xbf16>
    %c0_32 = arith.constant 0 : index
    %c8 = arith.constant 8 : index
    %30 = vector.load %arg7[%c0_32, %c8] : memref<256x36xbf16, #tpu.memory_space<vmem>>, vector<256x4xbf16>
    tpu.vector_store %arg7[%c0_32, %c8], %29 {strides = array<i32>} : memref<256x36xbf16, #tpu.memory_space<vmem>>, vector<256x4xbf16>,
    %c1_33 = arith.constant 1 : index
    %c0_34 = arith.constant 0 : index
    %c0_35 = arith.constant 0 : index
    %31 = vector.load %arg6[%c1_33, %c0_34, %c0_35] : memref<18x18x4xf32, #tpu.memory_space<vmem>>, vector<16x16x4xf32>
    %32 = vector.shape_cast %31 : vector<16x16x4xf32> to vector<256x4xf32>
    %33 = arith.truncf %32 : vector<256x4xf32> to vector<256x4xbf16>
    %c0_36 = arith.constant 0 : index
    %c12 = arith.constant 12 : index
    %34 = vector.load %arg7[%c0_36, %c12] : memref<256x36xbf16, #tpu.memory_space<vmem>>, vector<256x4xbf16>
    tpu.vector_store %arg7[%c0_36, %c12], %33 {strides = array<i32>} : memref<256x36xbf16, #tpu.memory_space<vmem>>, vector<256x4xbf16>,
    %c1_37 = arith.constant 1 : index
    %c1_38 = arith.constant 1 : index
    %c0_39 = arith.constant 0 : index
    %35 = vector.load %arg6[%c1_37, %c1_38, %c0_39] : memref<18x18x4xf32, #tpu.memory_space<vmem>>, vector<16x16x4xf32>
    %36 = vector.shape_cast %35 : vector<16x16x4xf32> to vector<256x4xf32>
    %37 = arith.truncf %36 : vector<256x4xf32> to vector<256x4xbf16>
    %c0_40 = arith.constant 0 : index
    %c16 = arith.constant 16 : index
    %38 = vector.load %arg7[%c0_40, %c16] : memref<256x36xbf16, #tpu.memory_space<vmem>>, vector<256x4xbf16>
    tpu.vector_store %arg7[%c0_40, %c16], %37 {strides = array<i32>} : memref<256x36xbf16, #tpu.memory_space<vmem>>, vector<256x4xbf16>,
    %c1_41 = arith.constant 1 : index
    %c2_42 = arith.constant 2 : index
    %c0_43 = arith.constant 0 : index
    %39 = vector.load %arg6[%c1_41, %c2_42, %c0_43] : memref<18x18x4xf32, #tpu.memory_space<vmem>>, vector<16x16x4xf32>
    %40 = vector.shape_cast %39 : vector<16x16x4xf32> to vector<256x4xf32>
    %41 = arith.truncf %40 : vector<256x4xf32> to vector<256x4xbf16>
    %c0_44 = arith.constant 0 : index
    %c20 = arith.constant 20 : index
    %42 = vector.load %arg7[%c0_44, %c20] : memref<256x36xbf16, #tpu.memory_space<vmem>>, vector<256x4xbf16>
    tpu.vector_store %arg7[%c0_44, %c20], %41 {strides = array<i32>} : memref<256x36xbf16, #tpu.memory_space<vmem>>, vector<256x4xbf16>,
    %c2_45 = arith.constant 2 : index
    %c0_46 = arith.constant 0 : index
    %c0_47 = arith.constant 0 : index
    %43 = vector.load %arg6[%c2_45, %c0_46, %c0_47] : memref<18x18x4xf32, #tpu.memory_space<vmem>>, vector<16x16x4xf32>
    %44 = vector.shape_cast %43 : vector<16x16x4xf32> to vector<256x4xf32>
    %45 = arith.truncf %44 : vector<256x4xf32> to vector<256x4xbf16>
    %c0_48 = arith.constant 0 : index
    %c24 = arith.constant 24 : index
    %46 = vector.load %arg7[%c0_48, %c24] : memref<256x36xbf16, #tpu.memory_space<vmem>>, vector<256x4xbf16>
    tpu.vector_store %arg7[%c0_48, %c24], %45 {strides = array<i32>} : memref<256x36xbf16, #tpu.memory_space<vmem>>, vector<256x4xbf16>,
    %c2_49 = arith.constant 2 : index
    %c1_50 = arith.constant 1 : index
    %c0_51 = arith.constant 0 : index
    %47 = vector.load %arg6[%c2_49, %c1_50, %c0_51] : memref<18x18x4xf32, #tpu.memory_space<vmem>>, vector<16x16x4xf32>
    %48 = vector.shape_cast %47 : vector<16x16x4xf32> to vector<256x4xf32>
    %49 = arith.truncf %48 : vector<256x4xf32> to vector<256x4xbf16>
    %c0_52 = arith.constant 0 : index
    %c28 = arith.constant 28 : index
    %50 = vector.load %arg7[%c0_52, %c28] : memref<256x36xbf16, #tpu.memory_space<vmem>>, vector<256x4xbf16>
    tpu.vector_store %arg7[%c0_52, %c28], %49 {strides = array<i32>} : memref<256x36xbf16, #tpu.memory_space<vmem>>, vector<256x4xbf16>,
    %c2_53 = arith.constant 2 : index
    %c2_54 = arith.constant 2 : index
    %c0_55 = arith.constant 0 : index
    %51 = vector.load %arg6[%c2_53, %c2_54, %c0_55] : memref<18x18x4xf32, #tpu.memory_space<vmem>>, vector<16x16x4xf32>
    %52 = vector.shape_cast %51 : vector<16x16x4xf32> to vector<256x4xf32>
    %53 = arith.truncf %52 : vector<256x4xf32> to vector<256x4xbf16>
    %c0_56 = arith.constant 0 : index
    %c32 = arith.constant 32 : index
    %54 = vector.load %arg7[%c0_56, %c32] : memref<256x36xbf16, #tpu.memory_space<vmem>>, vector<256x4xbf16>
    tpu.vector_store %arg7[%c0_56, %c32], %53 {strides = array<i32>} : memref<256x36xbf16, #tpu.memory_space<vmem>>, vector<256x4xbf16>,
    %c0_57 = arith.constant 0 : index
    %c0_58 = arith.constant 0 : index
    %55 = vector.load %arg7[%c0_57, %c0_58] : memref<256x36xbf16, #tpu.memory_space<vmem>>, vector<256x36xbf16>
    %c0_59 = arith.constant 0 : index
    %c0_60 = arith.constant 0 : index
    %56 = vector.load %arg3[%c0_59, %c0_60] : memref<36x4xbf16, #tpu.memory_space<vmem>>, vector<36x4xbf16>
    %cst_61 = arith.constant dense<0.000000e+00> : vector<256x4xf32>
    %57 = tpu.matmul %55, %56, %cst_61 {dimension_numbers = #tpu.dot_dimension_numbers<[1], [0], [0], [1], [0, 0, 1, 1], [], []>} : vector<256x36xbf16>, vector<36x4xbf16>, vector<256x4xf32> -> vector<256x4xf32>
    %58 = arith.truncf %57 : vector<256x4xf32> to vector<256x4xbf16>
    %c0_62 = arith.constant 0 : index
    %c0_63 = arith.constant 0 : index
    %c0_64 = arith.constant 0 : index
    %59 = vector.load %arg4[%c0_62, %c0_63, %c0_64] : memref<1x256x4xbf16, #tpu.memory_space<vmem>>, vector<1x256x4xbf16>
    %60 = vector.shape_cast %59 : vector<1x256x4xbf16> to vector<256x4xbf16>
    %61 = vector.shape_cast %58 : vector<256x4xbf16> to vector<1x256x4xbf16>
    tpu.vector_store %arg4[%c0_62, %c0_63, %c0_64], %61 {strides = array<i32>} : memref<1x256x4xbf16, #tpu.memory_space<vmem>>, vector<1x256x4xbf16>,
    %cst_65 = arith.constant dense<0.000000e+00> : vector<4xf32>
    %62 = vector.multi_reduction <add>, %57, %cst_65 [0] : vector<256x4xf32> to vector<4xf32>
    %63 = vector.shape_cast %62 : vector<4xf32> to vector<1x4xf32>
    %64 = arith.mulf %57, %57 : vector<256x4xf32>
    %cst_66 = arith.constant dense<0.000000e+00> : vector<4xf32>
    %65 = vector.multi_reduction <add>, %64, %cst_66 [0] : vector<256x4xf32> to vector<4xf32>
    %66 = vector.shape_cast %65 : vector<4xf32> to vector<1x4xf32>
    %67 = tpu.concatenate %63, %66 in 0 : vector<1x4xf32>, vector<1x4xf32> -> vector<2x4xf32>
    %c0_67 = arith.constant 0 : index
    %c0_68 = arith.constant 0 : index
    %c0_69 = arith.constant 0 : index
    %68 = vector.load %arg5[%c0_67, %c0_68, %c0_69] : memref<1x2x4xf32, #tpu.memory_space<vmem>>, vector<1x2x4xf32>
    %69 = vector.shape_cast %68 : vector<1x2x4xf32> to vector<2x4xf32>
    %70 = vector.shape_cast %67 : vector<2x4xf32> to vector<1x2x4xf32>
    tpu.vector_store %arg5[%c0_67, %c0_68, %c0_69], %70 {strides = array<i32>} : memref<1x2x4xf32, #tpu.memory_space<vmem>>, vector<1x2x4xf32>,
    return
  }
  func.func @transform_0(%arg0: i32) -> (i32, i32, i32) {
    %c0_i32 = arith.constant 0 : i32
    %c0_i32_0 = arith.constant 0 : i32
    %c0_i32_1 = arith.constant 0 : i32
    return %arg0, %c0_i32, %c0_i32_0 : i32, i32, i32
  }
  func.func @transform_1(%arg0: i32) -> (i32, i32) {
    %c0_i32 = arith.constant 0 : i32
    %c0_i32_0 = arith.constant 0 : i32
    %c0_i32_1 = arith.constant 0 : i32
    return %c0_i32, %c0_i32_0 : i32, i32
  }
  func.func @transform_2(%arg0: i32) -> (i32, i32) {
    %c0_i32 = arith.constant 0 : i32
    %c0_i32_0 = arith.constant 0 : i32
    %c0_i32_1 = arith.constant 0 : i32
    return %c0_i32, %c0_i32_0 : i32, i32
  }
  func.func @transform_3(%arg0: i32) -> (i32, i32, i32) {
    %c0_i32 = arith.constant 0 : i32
    %c0_i32_0 = arith.constant 0 : i32
    %c0_i32_1 = arith.constant 0 : i32
    return %arg0, %c0_i32, %c0_i32_0 : i32, i32, i32
  }
  func.func @transform_4(%arg0: i32) -> (i32, i32, i32) {
    %c0_i32 = arith.constant 0 : i32
    %c0_i32_0 = arith.constant 0 : i32
    %c0_i32_1 = arith.constant 0 : i32
    return %arg0, %c0_i32, %c0_i32_0 : i32, i32, i32
  }
}

</mosaic_0001>

<bundles_post_ra>
// kernel: basic_block_forward.5
= control target key start
LH: loop header
LB: loop body
LE: loop exit
PB: predicated region body
PF: predicated region fallthrough
CT: control target
= control target key end

     0   :  { %s658_s12 = smov 0   ;;  %s878_s0 = inlined_call_operand.vmem [shape: bf16[2,256,4], index: 0, kind: input, shape index: {}]   ;;  %s879_s1 = inlined_call_operand.vmem [shape: f32[2,4], index: 1, kind: input, shape index: {}]   ;;  %s880_s2 = inlined_call_operand.vmem [shape: f32[2,256,4], index: 2, kind: input, shape index: {}]   ;;  %s881_s3 = inlined_call_operand.vmem [shape: f32[2,256,4], index: 3, kind: output, shape index: {}]  }
   0x1 LB: > { %s525_s13 = sadd.s32 4294967295, %s636_s12   ;;  %p529_p0 = scmp.ge.s32.totalorder %s636_s12, 1  ;;  %s636_s12 = sphi %s658_s12, %s13_s12  }
   0x2   : > { %p147_p1 = scmp.lt.s32.totalorder %s636_s12, 3 }
   0x4   : > { %p148_p2 = pnand %p529_p0, %p147_p1 }
   0x5   : > { %p176_p3 = scmp.lt.s32.totalorder (!%p148_p2), %s525_s13, 1 }
   0x6   : > { %151 = sbr.rel (%p148_p2) target bundleno = 58 (0x3a), region = 32 }
   0xb   : > { %s883_s13 = smov (!%p176_p3, %s525_s13), 1  ;;  %v679_v1 = vld [vmem:[%s879_s1] ss:$0 sm:$0xff]  ;;  %v692_v5 = vld [vmem:[%s879_s1 + $0x1] ss:$0 sm:$0xff]  ;;  %vm425_vm0 = vcmask 31744  }
   0xc   : > { %s540_s14 = sshll.u32 %s883_s13, 7  ;;  %s541_s15 = sshll.u32 %s883_s13, 8 }
   0xd   : > { %s673_s18 = scalar_lea.vmem %s878_s0, %s540_s14  ;;  %s686_s23 = scalar_lea.vmem %s880_s2, %s541_s15 }
   0xe   : > { %v544_v0 = vld [vmem:[%s673_s18] sm:$0xff]   ;;  %v607_v4 = vld [vmem:[%s673_s18 + $0x8] sm:$0xff]   ;;  %v608_v8 = vld [vmem:[%s673_s18 + $0x10] sm:$0xff]   ;;  %s723_s28 = scalar_lea.vmem %s881_s3, %s541_s15 }
   0xf   : > { %v545_v2 = vunpack.c.l.bf16 %v544_v0  ;;  %v546_v3 = vunpack.c.h.bf16 %v544_v0  ;;  %v549_v6 = vunpack.c.l.bf16 %v607_v4  ;;  %v550_v7 = vunpack.c.h.bf16 %v607_v4  ;;  %v609_v13 = vld [vmem:[%s673_s18 + $0x18] sm:$0xff]   ;;  %v329_v14 = vld [vmem:[%s686_s23] sm:$0xff]  ;;  %v330_v15 = vld [vmem:[%s686_s23 + $0x8] sm:$0xff] }
  0x10   : > { %v553_v11 = vunpack.c.l.bf16 %v608_v8  ;;  %v554_v12 = vunpack.c.h.bf16 %v608_v8  ;;  %v557_v18 = vunpack.c.l.bf16 %v609_v13  ;;  %v558_v19 = vunpack.c.h.bf16 %v609_v13  ;;  %v331_v22 = vld [vmem:[%s686_s23 + $0x10] sm:$0xff]  ;;  %v332_v23 = vld [vmem:[%s686_s23 + $0x18] sm:$0xff]  ;;  %v333_v28 = vld [vmem:[%s686_s23 + $0x20] sm:$0xff] }
  0x11   : > { %v260_v9 = vmul.f32 %v545_v2, %v679_v1  ;;  %v261_v10 = vmul.f32 %v546_v3, %v679_v1  ;;  %v262_v16 = vmul.f32 %v549_v6, %v679_v1  ;;  %v263_v17 = vmul.f32 %v550_v7, %v679_v1  ;;  %v334_v29 = vld [vmem:[%s686_s23 + $0x28] sm:$0xff]  ;;  %v335_v36 = vld [vmem:[%s686_s23 + $0x30] sm:$0xff]  ;;  %v336_v37 = vld [vmem:[%s686_s23 + $0x38] sm:$0xff] }
  0x12   : > { %v264_v24 = vmul.f32 %v553_v11, %v679_v1  ;;  %v265_v25 = vmul.f32 %v554_v12, %v679_v1  ;;  %v266_v30 = vmul.f32 %v557_v18, %v679_v1  ;;  %v267_v31 = vmul.f32 %v558_v19, %v679_v1  ;;  %v610_v42 = vld [vmem:[%s673_s18 + $0x20] sm:$0xff]   ;;  %v611_v47 = vld [vmem:[%s673_s18 + $0x28] sm:$0xff]   ;;  %v612_v52 = vld [vmem:[%s673_s18 + $0x30] sm:$0xff]  }
  0x13   : > { %v297_v20 = vadd.f32 %v692_v5, %v260_v9  ;;  %v298_v21 = vadd.f32 %v692_v5, %v261_v10  ;;  %v299_v26 = vadd.f32 %v692_v5, %v262_v16  ;;  %v300_v27 = vadd.f32 %v692_v5, %v263_v17  ;;  %v613_v57 = vld [vmem:[%s673_s18 + $0x38] sm:$0xff]   ;;  %v337_v3 = vld [vmem:[%s686_s23 + $0x40] sm:$0xff]  ;;  %v338_v4 = vld [vmem:[%s686_s23 + $0x48] sm:$0xff] }
  0x14   : > { %v301_v34 = vadd.f32 %v692_v5, %v264_v24  ;;  %v302_v35 = vadd.f32 %v692_v5, %v265_v25  ;;  %v303_v40 = vadd.f32 %v692_v5, %v266_v30  ;;  %v304_v41 = vadd.f32 %v692_v5, %v267_v31  ;;  %v339_v12 = vld [vmem:[%s686_s23 + $0x50] sm:$0xff]  ;;  %v340_v13 = vld [vmem:[%s686_s23 + $0x58] sm:$0xff]  ;;  %v341_v18 = vld [vmem:[%s686_s23 + $0x60] sm:$0xff] }
  0x15   : > { %v361_v32 = vadd.f32 %v329_v14, %v297_v20  ;;  %v362_v33 = vadd.f32 %v330_v15, %v298_v21  ;;  %v363_v38 = vadd.f32 %v331_v22, %v299_v26  ;;  %v364_v39 = vadd.f32 %v332_v23, %v300_v27  ;;  %v342_v19 = vld [vmem:[%s686_s23 + $0x68] sm:$0xff]  ;;  %v343_v26 = vld [vmem:[%s686_s23 + $0x70] sm:$0xff]  ;;  %v344_v27 = vld [vmem:[%s686_s23 + $0x78] sm:$0xff] }
  0x16   : > { %v365_v45 = vadd.f32 %v333_v28, %v301_v34  ;;  %v366_v46 = vadd.f32 %v334_v29, %v302_v35  ;;  %v367_v50 = vadd.f32 %v335_v36, %v303_v40  ;;  %v368_v51 = vadd.f32 %v336_v37, %v304_v41  ;;  %v615_v37 = vld [vmem:[%s673_s18 + $0x48] sm:$0xff]  }
  0x17   : > { %v393_v43 = vmax.f32 %v361_v32, 0.0  ;;  %v394_v44 = vmax.f32 %v362_v33, 0.0  ;;  %v395_v48 = vmax.f32 %v363_v38, 0.0  ;;  %v396_v49 = vmax.f32 %v364_v39, 0.0  ;;  %v614_v32 = vld [vmem:[%s673_s18 + $0x40] sm:$0xff]  }
  0x18   : > { %v397_v53 = vmax.f32 %v365_v45, 0.0  ;;  %v398_v54 = vmax.f32 %v366_v46, 0.0  ;;  %v561_v55 = vunpack.c.l.bf16 %v610_v42  ;;  %v562_v56 = vunpack.c.h.bf16 %v610_v42  ;;  %v616_v42 = vld [vmem:[%s673_s18 + $0x50] sm:$0xff]  }
  0x19   : > { %426 = vst.msk [vmem:[%s723_s28] sm:$0xff] %vm425_vm0, %v393_v43  ;;  %427 = vst.msk [vmem:[%s723_s28 + $0x8] sm:$0xff] %vm425_vm0, %v394_v44  ;;  %v399_v58 = vmax.f32 %v367_v50, 0.0  ;;  %v400_v59 = vmax.f32 %v368_v51, 0.0  ;;  %v565_v60 = vunpack.c.l.bf16 %v611_v47  ;;  %v566_v61 = vunpack.c.h.bf16 %v611_v47  ;;  %v617_v47 = vld [vmem:[%s673_s18 + $0x58] sm:$0xff]  }
  0x1a   : > { %428 = vst.msk [vmem:[%s723_s28 + $0x10] sm:$0xff] %vm425_vm0, %v395_v48  ;;  %429 = vst.msk [vmem:[%s723_s28 + $0x18] sm:$0xff] %vm425_vm0, %v396_v49  ;;  %v268_v62 = vmul.f32 %v561_v55, %v679_v1  ;;  %v269_v63 = vmul.f32 %v562_v56, %v679_v1  ;;  %v569_v0 = vunpack.c.l.bf16 %v612_v52  ;;  %v570_v2 = vunpack.c.h.bf16 %v612_v52  ;;  %v345_v56 = vld [vmem:[%s686_s23 + $0x80] sm:$0xff] }
  0x1b   : > { %430 = vst.msk [vmem:[%s723_s28 + $0x20] sm:$0xff] %vm425_vm0, %v397_v53  ;;  %431 = vst.msk [vmem:[%s723_s28 + $0x28] sm:$0xff] %vm425_vm0, %v398_v54  ;;  %v270_v6 = vmul.f32 %v565_v60, %v679_v1  ;;  %v271_v7 = vmul.f32 %v566_v61, %v679_v1  ;;  %v573_v8 = vunpack.c.l.bf16 %v613_v57  ;;  %v574_v9 = vunpack.c.h.bf16 %v613_v57  ;;  %v346_v57 = vld [vmem:[%s686_s23 + $0x88] sm:$0xff] }
  0x1c   : > { %432 = vst.msk [vmem:[%s723_s28 + $0x30] sm:$0xff] %vm425_vm0, %v399_v58  ;;  %433 = vst.msk [vmem:[%s723_s28 + $0x38] sm:$0xff] %vm425_vm0, %v400_v59  ;;  %v305_v10 = vadd.f32 %v692_v5, %v268_v62  ;;  %v306_v11 = vadd.f32 %v692_v5, %v269_v63  ;;  %v272_v14 = vmul.f32 %v569_v0, %v679_v1  ;;  %v577_v45 = vunpack.c.l.bf16 %v614_v32  ;;  %v347_v0 = vld [vmem:[%s686_s23 + $0x90] sm:$0xff] }
  0x1d   : > { %v273_v15 = vmul.f32 %v570_v2, %v679_v1  ;;  %v307_v16 = vadd.f32 %v692_v5, %v270_v6  ;;  %v308_v17 = vadd.f32 %v692_v5, %v271_v7  ;;  %v274_v20 = vmul.f32 %v573_v8, %v679_v1  ;;  %v348_v2 = vld [vmem:[%s686_s23 + $0x98] sm:$0xff]  ;;  %v349_v8 = vld [vmem:[%s686_s23 + $0xa0] sm:$0xff] }
  0x1e   : > { %v275_v21 = vmul.f32 %v574_v9, %v679_v1  ;;  %v369_v22 = vadd.f32 %v337_v3, %v305_v10  ;;  %v370_v23 = vadd.f32 %v338_v4, %v306_v11  ;;  %v309_v24 = vadd.f32 %v692_v5, %v272_v14  ;;  %v350_v9 = vld [vmem:[%s686_s23 + $0xa8] sm:$0xff] }
  0x1f   : > { %v310_v25 = vadd.f32 %v692_v5, %v273_v15  ;;  %v371_v28 = vadd.f32 %v339_v12, %v307_v16  ;;  %v372_v29 = vadd.f32 %v340_v13, %v308_v17  ;;  %v311_v30 = vadd.f32 %v692_v5, %v274_v20  ;;  %v351_v16 = vld [vmem:[%s686_s23 + $0xb0] sm:$0xff]  ;;  %v352_v17 = vld [vmem:[%s686_s23 + $0xb8] sm:$0xff] }
  0x20   : > { %v312_v31 = vadd.f32 %v692_v5, %v275_v21  ;;  %v401_v33 = vmax.f32 %v369_v22, 0.0  ;;  %v402_v34 = vmax.f32 %v370_v23, 0.0  ;;  %v373_v35 = vadd.f32 %v341_v18, %v309_v24  ;;  %v618_v22 = vld [vmem:[%s673_s18 + $0x60] sm:$0xff]  }
  0x21   : > { %v374_v36 = vadd.f32 %v342_v19, %v310_v25  ;;  %v403_v38 = vmax.f32 %v371_v28, 0.0  ;;  %v404_v39 = vmax.f32 %v372_v29, 0.0  ;;  %v375_v40 = vadd.f32 %v343_v26, %v311_v30 }
  0x22   : > { %v376_v41 = vadd.f32 %v344_v27, %v312_v31  ;;  %434 = vst.msk [vmem:[%s723_s28 + $0x40] sm:$0xff] %vm425_vm0, %v401_v33  ;;  %435 = vst.msk [vmem:[%s723_s28 + $0x48] sm:$0xff] %vm425_vm0, %v402_v34  ;;  %v405_v43 = vmax.f32 %v373_v35, 0.0  ;;  %v578_v46 = vunpack.c.h.bf16 %v614_v32  ;;  %v581_v50 = vunpack.c.l.bf16 %v615_v37  ;;  %v619_v27 = vld [vmem:[%s673_s18 + $0x68] sm:$0xff]   ;;  %v620_v32 = vld [vmem:[%s673_s18 + $0x70] sm:$0xff]  }
  0x23   : > { %v406_v44 = vmax.f32 %v374_v36, 0.0  ;;  %436 = vst.msk [vmem:[%s723_s28 + $0x50] sm:$0xff] %vm425_vm0, %v403_v38  ;;  %437 = vst.msk [vmem:[%s723_s28 + $0x58] sm:$0xff] %vm425_vm0, %v404_v39  ;;  %v407_v48 = vmax.f32 %v375_v40, 0.0  ;;  %v582_v51 = vunpack.c.h.bf16 %v615_v37  ;;  %v276_v52 = vmul.f32 %v577_v45, %v679_v1  ;;  %v621_v37 = vld [vmem:[%s673_s18 + $0x78] sm:$0xff]  }
  0x24   : > { %v408_v49 = vmax.f32 %v376_v41, 0.0  ;;  %438 = vst.msk [vmem:[%s723_s28 + $0x60] sm:$0xff] %vm425_vm0, %v405_v43  ;;  %v277_v53 = vmul.f32 %v578_v46, %v679_v1  ;;  %v585_v54 = vunpack.c.l.bf16 %v616_v42  ;;  %v586_v55 = vunpack.c.h.bf16 %v616_v42  ;;  %v353_v46 = vld [vmem:[%s686_s23 + $0xc0] sm:$0xff] }
  0x25   : > { %439 = vst.msk [vmem:[%s723_s28 + $0x68] sm:$0xff] %vm425_vm0, %v406_v44  ;;  %440 = vst.msk [vmem:[%s723_s28 + $0x70] sm:$0xff] %vm425_vm0, %v407_v48  ;;  %v278_v58 = vmul.f32 %v581_v50, %v679_v1  ;;  %v279_v59 = vmul.f32 %v582_v51, %v679_v1  ;;  %v589_v60 = vunpack.c.l.bf16 %v617_v47  ;;  %v590_v61 = vunpack.c.h.bf16 %v617_v47  ;;  %v354_v47 = vld [vmem:[%s686_s23 + $0xc8] sm:$0xff] }
  0x26   : > { %441 = vst.msk [vmem:[%s723_s28 + $0x78] sm:$0xff] %vm425_vm0, %v408_v49  ;;  %v313_v62 = vadd.f32 %v692_v5, %v276_v52  ;;  %v314_v63 = vadd.f32 %v692_v5, %v277_v53  ;;  %v280_v3 = vmul.f32 %v585_v54, %v679_v1  ;;  %v281_v4 = vmul.f32 %v586_v55, %v679_v1  ;;  %v355_v54 = vld [vmem:[%s686_s23 + $0xd0] sm:$0xff]  ;;  %v356_v55 = vld [vmem:[%s686_s23 + $0xd8] sm:$0xff] }
  0x27   : > { %v315_v6 = vadd.f32 %v692_v5, %v278_v58  ;;  %v316_v7 = vadd.f32 %v692_v5, %v279_v59  ;;  %v282_v10 = vmul.f32 %v589_v60, %v679_v1  ;;  %v283_v11 = vmul.f32 %v590_v61, %v679_v1  ;;  %v357_v60 = vld [vmem:[%s686_s23 + $0xe0] sm:$0xff]  ;;  %v358_v61 = vld [vmem:[%s686_s23 + $0xe8] sm:$0xff] }
  0x28   : > { %v377_v12 = vadd.f32 %v345_v56, %v313_v62  ;;  %v378_v13 = vadd.f32 %v346_v57, %v314_v63  ;;  %v317_v14 = vadd.f32 %v692_v5, %v280_v3  ;;  %v318_v15 = vadd.f32 %v692_v5, %v281_v4 }
  0x29   : > { %v379_v18 = vadd.f32 %v347_v0, %v315_v6  ;;  %v380_v19 = vadd.f32 %v348_v2, %v316_v7  ;;  %v319_v20 = vadd.f32 %v692_v5, %v282_v10  ;;  %v320_v21 = vadd.f32 %v692_v5, %v283_v11  ;;  %v359_v6 = vld [vmem:[%s686_s23 + $0xf0] sm:$0xff]  ;;  %v360_v7 = vld [vmem:[%s686_s23 + $0xf8] sm:$0xff] }
  0x2a   : > { %v409_v23 = vmax.f32 %v377_v12, 0.0  ;;  %v410_v24 = vmax.f32 %v378_v13, 0.0  ;;  %v381_v25 = vadd.f32 %v349_v8, %v317_v14  ;;  %v382_v26 = vadd.f32 %v350_v9, %v318_v15 }
  0x2b   : > { %v411_v28 = vmax.f32 %v379_v18, 0.0  ;;  %v412_v29 = vmax.f32 %v380_v19, 0.0  ;;  %v383_v30 = vadd.f32 %v351_v16, %v319_v20  ;;  %v384_v31 = vadd.f32 %v352_v17, %v320_v21 }
  0x2c   : > { %442 = vst.msk [vmem:[%s723_s28 + $0x80] sm:$0xff] %vm425_vm0, %v409_v23  ;;  %443 = vst.msk [vmem:[%s723_s28 + $0x88] sm:$0xff] %vm425_vm0, %v410_v24  ;;  %v413_v33 = vmax.f32 %v381_v25, 0.0  ;;  %v414_v34 = vmax.f32 %v382_v26, 0.0  ;;  %v593_v35 = vunpack.c.l.bf16 %v618_v22  ;;  %v594_v36 = vunpack.c.h.bf16 %v618_v22 }
  0x2d   : > { %444 = vst.msk [vmem:[%s723_s28 + $0x90] sm:$0xff] %vm425_vm0, %v411_v28  ;;  %445 = vst.msk [vmem:[%s723_s28 + $0x98] sm:$0xff] %vm425_vm0, %v412_v29  ;;  %v415_v38 = vmax.f32 %v383_v30, 0.0  ;;  %v416_v39 = vmax.f32 %v384_v31, 0.0  ;;  %v597_v40 = vunpack.c.l.bf16 %v619_v27  ;;  %v598_v41 = vunpack.c.h.bf16 %v619_v27 }
  0x2e   : > { %446 = vst.msk [vmem:[%s723_s28 + $0xa0] sm:$0xff] %vm425_vm0, %v413_v33  ;;  %447 = vst.msk [vmem:[%s723_s28 + $0xa8] sm:$0xff] %vm425_vm0, %v414_v34  ;;  %v284_v42 = vmul.f32 %v593_v35, %v679_v1  ;;  %v285_v43 = vmul.f32 %v594_v36, %v679_v1  ;;  %v601_v44 = vunpack.c.l.bf16 %v620_v32  ;;  %v602_v45 = vunpack.c.h.bf16 %v620_v32 }
  0x2f   : > { %448 = vst.msk [vmem:[%s723_s28 + $0xb0] sm:$0xff] %vm425_vm0, %v415_v38  ;;  %449 = vst.msk [vmem:[%s723_s28 + $0xb8] sm:$0xff] %vm425_vm0, %v416_v39  ;;  %v286_v48 = vmul.f32 %v597_v40, %v679_v1  ;;  %v287_v49 = vmul.f32 %v598_v41, %v679_v1  ;;  %v605_v50 = vunpack.c.l.bf16 %v621_v37  ;;  %v606_v51 = vunpack.c.h.bf16 %v621_v37 }
  0x30   : > { %v321_v52 = vadd.f32 %v692_v5, %v284_v42  ;;  %v322_v53 = vadd.f32 %v692_v5, %v285_v43  ;;  %v288_v56 = vmul.f32 %v601_v44, %v679_v1  ;;  %v289_v57 = vmul.f32 %v602_v45, %v679_v1 }
  0x31   : > { %v323_v58 = vadd.f32 %v692_v5, %v286_v48  ;;  %v324_v59 = vadd.f32 %v692_v5, %v287_v49  ;;  %v290_v62 = vmul.f32 %v605_v50, %v679_v1  ;;  %v291_v63 = vmul.f32 %v606_v51, %v679_v1 }
  0x32   : > { %v385_v0 = vadd.f32 %v353_v46, %v321_v52  ;;  %v386_v2 = vadd.f32 %v354_v47, %v322_v53  ;;  %v325_v3 = vadd.f32 %v692_v5, %v288_v56  ;;  %v326_v4 = vadd.f32 %v692_v5, %v289_v57 }
  0x33   : > { %v387_v8 = vadd.f32 %v355_v54, %v323_v58  ;;  %v388_v9 = vadd.f32 %v356_v55, %v324_v59  ;;  %v327_v10 = vadd.f32 %v692_v5, %v290_v62  ;;  %v328_v11 = vadd.f32 %v692_v5, %v291_v63 }
  0x34   : > { %v417_v12 = vmax.f32 %v385_v0, 0.0  ;;  %v418_v1 = vmax.f32 %v386_v2, 0.0  ;;  %v389_v13 = vadd.f32 %v357_v60, %v325_v3  ;;  %v390_v14 = vadd.f32 %v358_v61, %v326_v4 }
  0x35   : > { %v419_v15 = vmax.f32 %v387_v8, 0.0  ;;  %v420_v16 = vmax.f32 %v388_v9, 0.0  ;;  %v391_v17 = vadd.f32 %v359_v6, %v327_v10  ;;  %v392_v18 = vadd.f32 %v360_v7, %v328_v11 }
  0x36   : > { %450 = vst.msk [vmem:[%s723_s28 + $0xc0] sm:$0xff] %vm425_vm0, %v417_v12  ;;  %451 = vst.msk [vmem:[%s723_s28 + $0xc8] sm:$0xff] %vm425_vm0, %v418_v1  ;;  %v421_v19 = vmax.f32 %v389_v13, 0.0  ;;  %v422_v20 = vmax.f32 %v390_v14, 0.0 }
  0x37   : > { %452 = vst.msk [vmem:[%s723_s28 + $0xd0] sm:$0xff] %vm425_vm0, %v419_v15  ;;  %453 = vst.msk [vmem:[%s723_s28 + $0xd8] sm:$0xff] %vm425_vm0, %v420_v16  ;;  %v423_v5 = vmax.f32 %v391_v17, 0.0  ;;  %v424_v21 = vmax.f32 %v392_v18, 0.0 }
  0x38   : > { %454 = vst.msk [vmem:[%s723_s28 + $0xe0] sm:$0xff] %vm425_vm0, %v421_v19  ;;  %455 = vst.msk [vmem:[%s723_s28 + $0xe8] sm:$0xff] %vm425_vm0, %v422_v20 }
  0x39   : > { %456 = vst.msk [vmem:[%s723_s28 + $0xf0] sm:$0xff] %vm425_vm0, %v423_v5  ;;  %457 = vst.msk [vmem:[%s723_s28 + $0xf8] sm:$0xff] %vm425_vm0, %v424_v21 }
  0x3a PF: > { %s13_s12 = sadd.s32 1, %s636_s12  }
  0x3b   : > { %p10_p4 = scmp.ge.s32.totalorder %s13_s12, 4  }
  0x3d   :  { %12 = sbr.rel (!%p10_p4) target bundleno = 1 (0x1), region = 65 }

// kernel: basic_block_forward.3
= control target key start
LH: loop header
LB: loop body
LE: loop exit
PB: predicated region body
PF: predicated region fallthrough
CT: control target
= control target key end

     0   :  { %s4136_s12 = smov 0   ;;  %s5165_s0 = inlined_call_operand.vmem [shape: f32[2,16,16,4], index: 0, kind: input, shape index: {}]   ;;  %s5166_s1 = inlined_call_operand.vmem [shape: bf16[36,4], index: 1, kind: input, shape index: {}]   ;;  %s5167_s2 = inlined_call_operand.vmem [shape: bf16[2,256,4], index: 2, kind: output, shape index: {0}]   ;;  %s5168_s3 = inlined_call_operand.vmem [shape: f32[2,2,4], index: 3, kind: output, shape index: {1}]  }
   0x1 LB: > { %s3309_s13 = sadd.s32 4294967295, %s4105_s12   ;;  %p3313_p0 = scmp.ge.s32.totalorder %s4105_s12, 1  ;;  %s4105_s12 = sphi %s4136_s12, %s14_s12  }
   0x2   : > { %p140_p1 = scmp.lt.s32.totalorder %s4105_s12, 3 }
   0x4   : > { %p141_p2 = pnand %p3313_p0, %p140_p1 }
   0x5   : > { %p4146_p3 = scmp.lt.s32.totalorder (!%p141_p2), %s3309_s13, 1  ;;  %s4108_s19 = smov (!%p141_p2), 4  }
   0x6   : > { %144 = sbr.rel (%p141_p2) target bundleno = 896 (0x380), region = 28  ;;  %s4109_s20 = smov (!%p141_p2), 8  }
   0x7   : > { %s4110_s21 = smov (!%p141_p2), 12   ;;  %s4111_s22 = smov (!%p141_p2), 16  }
   0x8   : > { %s4112_s23 = smov (!%p141_p2), 20   ;;  %s4113_s24 = smov (!%p141_p2), 24  }
   0x9   : > { %s4114_s27 = smov (!%p141_p2), 28   ;;  %s4115_s5 = smov (!%p141_p2), 32  }
   0xb   : > { %vm183_vm0 = vcmask 31744   ;;  %vm192_vm1 = vcmask 24576   ;;  %vm186_vm2 = vcmask 25600   ;;  %v4107_v0 = vmov 0.0   ;;  %s5171_s13 = smov (!%p4146_p3, %s3309_s13), 1 }
   0xc   : > { %184 = vst.msk [vmem:[#allocation2] sm:$0xff] %vm183_vm0, %v4107_v0  ;;  %185 = vst.msk [vmem:[#allocation2 + $0x8] sm:$0xff] %vm183_vm0, %v4107_v0  ;;  %s3676_s15 = sshll.u32 %s5171_s13, 8  ;;  %vm454_vm3 = vcmask 27648   ;;  %vm711_vm4 = vcmask 60448   ;;  %vm968_vm5 = vcmask 93248  }
   0xd   : > { %189 = vst.msk [vmem:[#allocation2 + $0x198] sm:$0xff] %vm183_vm0, %v4107_v0  ;;  %190 = vst.msk [vmem:[#allocation2 + $0x1a0] sm:$0xff] %vm183_vm0, %v4107_v0  ;;  %s4202_s18 = scalar_lea.vmem %s5165_s0, %s3676_s15  ;;  %vm2725_vm6 = vcmask 1041408   ;;  %vm1225_vm7 = vcmask 126048   ;;  %vm1482_vm8 = vcmask 158848   ;;  %vm1739_vm9 = vcmask 191648  }
   0xe   : > { %194 = vst.msk [vmem:[#allocation2 + $0x18] sm:$0x1] %vm192_vm1, %v4107_v0  ;;  %195 = vst.msk [vmem:[#allocation2 + $0x30] sm:$0x1] %vm192_vm1, %v4107_v0  ;;  %v229_v1 = vld [vmem:[%s4202_s18] sm:$0xff]  ;;  %v231_v2 = vld [vmem:[%s4202_s18 + $0x10] sm:$0xff] }
   0xf   : > { %196 = vst.msk [vmem:[#allocation2 + $0x48] sm:$0x1] %vm192_vm1, %v4107_v0  ;;  %197 = vst.msk [vmem:[#allocation2 + $0x60] sm:$0x1] %vm192_vm1, %v4107_v0  ;;  %v230_v3 = vld [vmem:[%s4202_s18 + $0x8] sm:$0xff]  ;;  %v233_v4 = vld [vmem:[%s4202_s18 + $0x20] sm:$0xff] }
  0x10   : > { %198 = vst.msk [vmem:[#allocation2 + $0x78] sm:$0x1] %vm192_vm1, %v4107_v0  ;;  %199 = vst.msk [vmem:[#allocation2 + $0x90] sm:$0x1] %vm192_vm1, %v4107_v0  ;;  %v232_v5 = vld [vmem:[%s4202_s18 + $0x18] sm:$0xff]  ;;  %v235_v6 = vld [vmem:[%s4202_s18 + $0x30] sm:$0xff] }
  0x11   : > { %200 = vst.msk [vmem:[#allocation2 + $0xa8] sm:$0x1] %vm192_vm1, %v4107_v0  ;;  %201 = vst.msk [vmem:[#allocation2 + $0xc0] sm:$0x1] %vm192_vm1, %v4107_v0  ;;  %v234_v9 = vld [vmem:[%s4202_s18 + $0x28] sm:$0xff]  ;;  %v237_v11 = vld [vmem:[%s4202_s18 + $0x40] sm:$0xff] }
  0x12   : > { %202 = vst.msk [vmem:[#allocation2 + $0xd8] sm:$0x1] %vm192_vm1, %v4107_v0  ;;  %203 = vst.msk [vmem:[#allocation2 + $0xf0] sm:$0x1] %vm192_vm1, %v4107_v0  ;;  %v236_v12 = vld [vmem:[%s4202_s18 + $0x38] sm:$0xff]  ;;  %v239_v13 = vld [vmem:[%s4202_s18 + $0x50] sm:$0xff] }
  0x13   : > { %204 = vst.msk [vmem:[#allocation2 + $0x108] sm:$0x1] %vm192_vm1, %v4107_v0  ;;  %205 = vst.msk [vmem:[#allocation2 + $0x120] sm:$0x1] %vm192_vm1, %v4107_v0  ;;  %v487_v7 = vld [vmem:[#allocation2 + $0x1] sm:$0xff]  ;;  %v240_v16 = vld [vmem:[%s4202_s18 + $0x58] sm:$0xff] }
  0x14   : > { %206 = vst.msk [vmem:[#allocation2 + $0x138] sm:$0x1] %vm192_vm1, %v4107_v0  ;;  %207 = vst.msk [vmem:[#allocation2 + $0x150] sm:$0x1] %vm192_vm1, %v4107_v0  ;;  %v3710_v10 = vpack.c.bf16 %v487_v7, %v487_v7  ;;  %v238_v14 = vld [vmem:[%s4202_s18 + $0x48] sm:$0xff]  ;;  %v241_v15 = vld [vmem:[%s4202_s18 + $0x60] sm:$0xff] }
  0x15   : > { %208 = vst.msk [vmem:[#allocation2 + $0x168] sm:$0x1] %vm192_vm1, %v4107_v0  ;;  %209 = vst.msk [vmem:[#allocation2 + $0x180] sm:$0x1] %vm192_vm1, %v4107_v0  ;;  %v243_v18 = vld [vmem:[%s4202_s18 + $0x70] sm:$0xff]  ;;  %v242_v19 = vld [vmem:[%s4202_s18 + $0x68] sm:$0xff] }
  0x16   : > { %212 = vst.msk [vmem:[#allocation2 + $0x29] sm:$0x1] %vm192_vm1, %v4107_v0  ;;  %213 = vst.msk [vmem:[#allocation2 + $0x41] sm:$0x1] %vm192_vm1, %v4107_v0  ;;  %615 = vrot.lane.b32.xlu0 %v3710_v10, %s4108_s19  ;;  %v245_v20 = vld [vmem:[%s4202_s18 + $0x80] sm:$0xff]  ;;  %v244_v21 = vld [vmem:[%s4202_s18 + $0x78] sm:$0xff] }
  0x17   : > { %214 = vst.msk [vmem:[#allocation2 + $0x59] sm:$0x1] %vm192_vm1, %v4107_v0  ;;  %215 = vst.msk [vmem:[#allocation2 + $0x71] sm:$0x1] %vm192_vm1, %v4107_v0  ;;  %v247_v22 = vld [vmem:[%s4202_s18 + $0x90] sm:$0xff]  ;;  %v246_v23 = vld [vmem:[%s4202_s18 + $0x88] sm:$0xff] }
  0x18   : > { %216 = vst.msk [vmem:[#allocation2 + $0x89] sm:$0x1] %vm192_vm1, %v4107_v0  ;;  %217 = vst.msk [vmem:[#allocation2 + $0xa1] sm:$0x1] %vm192_vm1, %v4107_v0  ;;  %v249_v24 = vld [vmem:[%s4202_s18 + $0xa0] sm:$0xff]  ;;  %v248_v25 = vld [vmem:[%s4202_s18 + $0x98] sm:$0xff] }
  0x19   : > { %218 = vst.msk [vmem:[#allocation2 + $0xb9] sm:$0x1] %vm192_vm1, %v4107_v0  ;;  %219 = vst.msk [vmem:[#allocation2 + $0xd1] sm:$0x1] %vm192_vm1, %v4107_v0  ;;  %v251_v26 = vld [vmem:[%s4202_s18 + $0xb0] sm:$0xff]  ;;  %v250_v33 = vld [vmem:[%s4202_s18 + $0xa8] sm:$0xff] }
  0x1a   : > { %220 = vst.msk [vmem:[#allocation2 + $0xe9] sm:$0x1] %vm192_vm1, %v4107_v0  ;;  %221 = vst.msk [vmem:[#allocation2 + $0x101] sm:$0x1] %vm192_vm1, %v4107_v0  ;;  %v253_v34 = vld [vmem:[%s4202_s18 + $0xc0] sm:$0xff]  ;;  %v252_v41 = vld [vmem:[%s4202_s18 + $0xb8] sm:$0xff] }
  0x1b   : > { %222 = vst.msk [vmem:[#allocation2 + $0x119] sm:$0x1] %vm192_vm1, %v4107_v0  ;;  %223 = vst.msk [vmem:[#allocation2 + $0x131] sm:$0x1] %vm192_vm1, %v4107_v0  ;;  %v255_v42 = vld [vmem:[%s4202_s18 + $0xd0] sm:$0xff]  ;;  %v254_v43 = vld [vmem:[%s4202_s18 + $0xc8] sm:$0xff] }
  0x1c   : > { %224 = vst.msk [vmem:[#allocation2 + $0x149] sm:$0x1] %vm192_vm1, %v4107_v0  ;;  %225 = vst.msk [vmem:[#allocation2 + $0x161] sm:$0x1] %vm192_vm1, %v4107_v0  ;;  %v257_v45 = vld [vmem:[%s4202_s18 + $0xe0] sm:$0xff]  ;;  %v256_v46 = vld [vmem:[%s4202_s18 + $0xd8] sm:$0xff] }
  0x1d   : > { %226 = vst.msk [vmem:[#allocation2 + $0x179] sm:$0x1] %vm192_vm1, %v4107_v0  ;;  %227 = vst.msk [vmem:[#allocation2 + $0x191] sm:$0x1] %vm192_vm1, %v4107_v0  ;;  %v258_v48 = vld [vmem:[%s4202_s18 + $0xe8] sm:$0xff]  ;;  %vm1997_vm10 = vcmask 224448  }
  0x1e   : > { %187 = vst.msk [vmem:[#allocation2 + $0x10] sm:$0x3] %vm186_vm2, %v4107_v0  ;;  %191 = vst.msk [vmem:[#allocation2 + $0x1a8] sm:$0x3] %vm186_vm2, %v4107_v0  ;;  %v295_v63 = vld [vmem:[#allocation2 + $0x8] sm:$0xff]  ;;  %vm2254_vm11 = vcmask 257248  }
  0x1f   : > { %193 = vst.msk [vmem:[#allocation2] sm:$0x1] %vm192_vm1, %v4107_v0  ;;  %210 = vst.msk [vmem:[#allocation2 + $0x198] sm:$0x1] %vm192_vm1, %v4107_v0  ;;  %vm2511_vm12 = vcmask 290048   ;;  %vm2676_vm13 = vcmask 293888  }
  0x20   : > { %211 = vst.msk [vmem:[#allocation2 + $0x11] sm:$0x1] %vm192_vm1, %v4107_v0  ;;  %228 = vst.msk [vmem:[#allocation2 + $0x1a9] sm:$0x1] %vm192_vm1, %v4107_v0  ;;  %s3677_s6 = sshll.u32 %s5171_s13, 7  ;;  %s3318_s10 = sshll.u32 %s5171_s13, 1 }
  0x21   : > { %262 = vst.msk [vmem:[#allocation2 + $0x19] sm:$0xff] %vm183_vm0, %v229_v1  ;;  %264 = vst.msk [vmem:[#allocation2 + $0x31] sm:$0xff] %vm183_vm0, %v231_v2  ;;  %v3679_v2 = vpack.c.bf16 %v295_v63, %v295_v63  ;;  %s4966_s9 = scalar_lea.vmem %s5167_s2, %s3677_s6  ;;  %vm3220_vm14 = vcmask 1040384   ;;  %s181_s15 = scalar_lea.vmem %s5168_s3, %s3318_s10 }
  0x22   : > { %263 = vst.msk [vmem:[#allocation2 + $0x21] sm:$0xff] %vm183_vm0, %v230_v3  ;;  %266 = vst.msk [vmem:[#allocation2 + $0x49] sm:$0xff] %vm183_vm0, %v233_v4 }
  0x23   : > { %265 = vst.msk [vmem:[#allocation2 + $0x39] sm:$0xff] %vm183_vm0, %v232_v5  ;;  %268 = vst.msk [vmem:[#allocation2 + $0x61] sm:$0xff] %vm183_vm0, %v235_v6 }
  0x24   : > { %267 = vst.msk [vmem:[#allocation2 + $0x51] sm:$0xff] %vm183_vm0, %v234_v9  ;;  %270 = vst.msk [vmem:[#allocation2 + $0x79] sm:$0xff] %vm183_vm0, %v237_v11 }
  0x25   : > { %v488_v8 = vld [vmem:[#allocation2 + $0x9] sm:$0xff]  ;;  %269 = vst.msk [vmem:[#allocation2 + $0x69] sm:$0xff] %vm183_vm0, %v236_v12  ;;  %272 = vst.msk [vmem:[#allocation2 + $0x91] sm:$0xff] %vm183_vm0, %v239_v13 }
  0x26   : > { %v3711_v17 = vpack.c.bf16 %v488_v8, %v488_v8  ;;  %271 = vst.msk [vmem:[#allocation2 + $0x81] sm:$0xff] %vm183_vm0, %v238_v14  ;;  %274 = vst.msk [vmem:[#allocation2 + $0xa9] sm:$0xff] %vm183_vm0, %v241_v15  ;;  %v294_v60 = vld [vmem:[#allocation2] sm:$0xff] }
  0x27   : > { %273 = vst.msk [vmem:[#allocation2 + $0x99] sm:$0xff] %vm183_vm0, %v240_v16  ;;  %276 = vst.msk [vmem:[#allocation2 + $0xc1] sm:$0xff] %vm183_vm0, %v243_v18  ;;  %v3678_v62 = vpack.c.bf16 %v294_v60, %v294_v60 }
  0x28   : > { %275 = vst.msk [vmem:[#allocation2 + $0xb1] sm:$0xff] %vm183_vm0, %v242_v19  ;;  %278 = vst.msk [vmem:[#allocation2 + $0xd9] sm:$0xff] %vm183_vm0, %v245_v20  ;;  %v489_v27 = vld [vmem:[#allocation2 + $0x19] sm:$0xff]  ;;  %v491_v28 = vld [vmem:[#allocation2 + $0x31] sm:$0xff]  ;;  %617 = vrot.lane.b32.xlu0 %v3711_v17, %s4108_s19 }
  0x29   : > { %277 = vst.msk [vmem:[#allocation2 + $0xc9] sm:$0xff] %vm183_vm0, %v244_v21  ;;  %280 = vst.msk [vmem:[#allocation2 + $0xf1] sm:$0xff] %vm183_vm0, %v247_v22  ;;  %v490_v29 = vld [vmem:[#allocation2 + $0x21] sm:$0xff]  ;;  %v4250_v30 = vpack.c.bf16 %v489_v27, %v489_v27  ;;  %v4252_v31 = vpack.c.bf16 %v491_v28, %v491_v28  ;;  %v493_v32 = vld [vmem:[#allocation2 + $0x49] sm:$0xff] }
  0x2a   : > { %279 = vst.msk [vmem:[#allocation2 + $0xe1] sm:$0xff] %vm183_vm0, %v246_v23  ;;  %282 = vst.msk [vmem:[#allocation2 + $0x109] sm:$0xff] %vm183_vm0, %v249_v24  ;;  %v4258_v35 = vpack.c.bf16 %v490_v29, %v490_v29  ;;  %v492_v36 = vld [vmem:[#allocation2 + $0x39] sm:$0xff]  ;;  %v4264_v37 = vpack.c.bf16 %v493_v32, %v493_v32  ;;  %v495_v38 = vld [vmem:[#allocation2 + $0x61] sm:$0xff] }
  0x2b   : > { %281 = vst.msk [vmem:[#allocation2 + $0xf9] sm:$0xff] %vm183_vm0, %v248_v25  ;;  %284 = vst.msk [vmem:[#allocation2 + $0x121] sm:$0xff] %vm183_vm0, %v251_v26  ;;  %619 = vrot.lane.b32.xlu1 %v4250_v30, %s4108_s19  ;;  %v4268_v39 = vpack.c.bf16 %v492_v36, %v492_v36  ;;  %v494_v40 = vld [vmem:[#allocation2 + $0x51] sm:$0xff]  ;;  %v3718_v44 = vpack.c.bf16 %v495_v38, %v495_v38  ;;  %v497_v47 = vld [vmem:[#allocation2 + $0x79] sm:$0xff] }
  0x2c   : > { %283 = vst.msk [vmem:[#allocation2 + $0x111] sm:$0xff] %vm183_vm0, %v250_v33  ;;  %286 = vst.msk [vmem:[#allocation2 + $0x139] sm:$0xff] %vm183_vm0, %v253_v34  ;;  %623 = vrot.lane.b32.xlu0 %v4252_v31, %s4108_s19  ;;  %v4285_v49 = vpack.c.bf16 %v494_v40, %v494_v40  ;;  %v496_v50 = vld [vmem:[#allocation2 + $0x69] sm:$0xff]  ;;  %v3720_v51 = vpack.c.bf16 %v497_v47, %v497_v47  ;;  %v499_v52 = vld [vmem:[#allocation2 + $0x91] sm:$0xff] }
  0x2d   : > { %285 = vst.msk [vmem:[#allocation2 + $0x129] sm:$0xff] %vm183_vm0, %v252_v41  ;;  %288 = vst.msk [vmem:[#allocation2 + $0x151] sm:$0xff] %vm183_vm0, %v255_v42  ;;  %v3719_v53 = vpack.c.bf16 %v496_v50, %v496_v50  ;;  %v498_v54 = vld [vmem:[#allocation2 + $0x81] sm:$0xff]  ;;  %v3722_v55 = vpack.c.bf16 %v499_v52, %v499_v52  ;;  %v501_v56 = vld [vmem:[#allocation2 + $0xa9] sm:$0xff] }
  0x2e   : > { %287 = vst.msk [vmem:[#allocation2 + $0x141] sm:$0xff] %vm183_vm0, %v254_v43  ;;  %290 = vst.msk [vmem:[#allocation2 + $0x169] sm:$0xff] %vm183_vm0, %v257_v45  ;;  %v3721_v57 = vpack.c.bf16 %v498_v54, %v498_v54  ;;  %v500_v58 = vld [vmem:[#allocation2 + $0x99] sm:$0xff]  ;;  %v3724_v59 = vpack.c.bf16 %v501_v56, %v501_v56  ;;  %v503_v61 = vld [vmem:[#allocation2 + $0xc1] sm:$0xff] }
  0x2f   : > { %621 = vrot.lane.b32.xlu1 %v4258_v35, %s4108_s19  ;;  %289 = vst.msk [vmem:[#allocation2 + $0x159] sm:$0xff] %vm183_vm0, %v256_v46  ;;  %291 = vst.msk [vmem:[#allocation2 + $0x171] sm:$0xff] %vm183_vm0, %v258_v48  ;;  %v296_v0 = vld [vmem:[#allocation2 + $0x18] sm:$0xff]  ;;  %v3723_v1 = vpack.c.bf16 %v500_v58, %v500_v58  ;;  %v298_v4 = vld [vmem:[#allocation2 + $0x30] sm:$0xff]  ;;  %v3726_v10 = vpack.c.bf16 %v503_v61, %v503_v61 }
  0x30   : > { %627 = vrot.lane.b32.xlu0 %v4264_v37, %s4108_s19  ;;  %v4295_v3 = vpack.c.bf16 %v296_v0, %v296_v0  ;;  %v297_v5 = vld [vmem:[#allocation2 + $0x20] sm:$0xff]  ;;  %v502_v6 = vld [vmem:[#allocation2 + $0xb1] sm:$0xff]  ;;  %455 = vst.msk [vmem:[#allocation3] sm:$0xf] %vm454_vm3, %v3678_v62  ;;  %v4298_v7 = vpack.c.bf16 %v298_v4, %v298_v4  ;;  %v300_v9 = vld [vmem:[#allocation2 + $0x48] sm:$0xff] }
  0x31   : > { %v4300_v8 = vpack.c.bf16 %v297_v5, %v297_v5  ;;  %v4303_v11 = vld [vmem:[#allocation2 + $0xd9] sm:$0xff]  ;;  %456 = vst.msk [vmem:[#allocation3 + $0x4] sm:$0xf] %vm454_vm3, %v3679_v2  ;;  %v4308_v12 = vpack.c.bf16 %v300_v9, %v300_v9  ;;  %v4310_v15 = vld [vmem:[#allocation2 + $0xc9] sm:$0xff]  ;;  %v3725_v21 = vpack.c.bf16 %v502_v6, %v502_v6  ;;  %v507_v28 = vld [vmem:[#allocation2 + $0xf1] sm:$0xff] }
  0x32   : > { %457 = vst.msk [vmem:[#allocation3 + $0x8] sm:$0xf] %vm454_vm3, %v4295_v3  ;;  %v299_v13 = vld [vmem:[#allocation2 + $0x38] sm:$0xff]  ;;  %v302_v14 = vld [vmem:[#allocation2 + $0x60] sm:$0xff]  ;;  %459 = vst.msk [vmem:[#allocation3 + $0x10] sm:$0xf] %vm454_vm3, %v4298_v7  ;;  %v3728_v40 = vpack.c.bf16 %v4303_v11, %v4303_v11  ;;  %v3727_v54 = vpack.c.bf16 %v4310_v15, %v4310_v15  ;;  %v3730_v63 = vpack.c.bf16 %v507_v28, %v507_v28 }
  0x33   : > { %625 = vrot.lane.b32.xlu1 %v4268_v39, %s4108_s19  ;;  %458 = vst.msk [vmem:[#allocation3 + $0xc] sm:$0xf] %vm454_vm3, %v4300_v8  ;;  %v4316_v16 = vpack.c.bf16 %v299_v13, %v299_v13  ;;  %v4318_v17 = vpack.c.bf16 %v302_v14, %v302_v14  ;;  %v301_v18 = vld [vmem:[#allocation2 + $0x50] sm:$0xff]  ;;  %v304_v19 = vld [vmem:[#allocation2 + $0x78] sm:$0xff]  ;;  %v303_v20 = vld [vmem:[#allocation2 + $0x68] sm:$0xff] }
  0x34   : > { %631 = vrot.lane.b32.xlu0 %v3718_v44, %s4108_s19  ;;  %461 = vst.msk [vmem:[#allocation3 + $0x18] sm:$0xf] %vm454_vm3, %v4308_v12  ;;  %v4323_v22 = vpack.c.bf16 %v301_v18, %v301_v18  ;;  %v4325_v23 = vpack.c.bf16 %v304_v19, %v304_v19  ;;  %v4327_v24 = vpack.c.bf16 %v303_v20, %v303_v20  ;;  %v306_v25 = vld [vmem:[#allocation2 + $0x90] sm:$0xff]  ;;  %v305_v26 = vld [vmem:[#allocation2 + $0x80] sm:$0xff]  ;;  %v308_v27 = vld [vmem:[#allocation2 + $0xa8] sm:$0xff] }
  0x35   : > { %460 = vst.msk [vmem:[#allocation3 + $0x14] sm:$0xf] %vm454_vm3, %v4316_v16  ;;  %463 = vst.msk [vmem:[#allocation3 + $0x20] sm:$0xf] %vm454_vm3, %v4318_v17  ;;  %v4333_v29 = vpack.c.bf16 %v306_v25, %v306_v25  ;;  %v4335_v32 = vpack.c.bf16 %v305_v26, %v305_v26  ;;  %v4337_v33 = vpack.c.bf16 %v308_v27, %v308_v27  ;;  %v307_v34 = vld [vmem:[#allocation2 + $0x98] sm:$0xff]  ;;  %v310_v36 = vld [vmem:[#allocation2 + $0xc0] sm:$0xff] }
  0x36   : > { %v309_v38 = vld [vmem:[#allocation2 + $0xb0] sm:$0xff]  ;;  %462 = vst.msk [vmem:[#allocation3 + $0x1c] sm:$0xf] %vm454_vm3, %v4323_v22  ;;  %465 = vst.msk [vmem:[#allocation3 + $0x28] sm:$0xf] %vm454_vm3, %v4325_v23  ;;  %v4348_v41 = vpack.c.bf16 %v307_v34, %v307_v34  ;;  %v4350_v42 = vpack.c.bf16 %v310_v36, %v310_v36  ;;  %v312_v44 = vld [vmem:[#allocation2 + $0xd8] sm:$0xff] }
  0x37   : > { %629 = vrot.lane.b32.xlu1 %v4285_v49, %s4108_s19  ;;  %464 = vst.msk [vmem:[#allocation3 + $0x24] sm:$0xf] %vm454_vm3, %v4327_v24  ;;  %v4352_v43 = vpack.c.bf16 %v309_v38, %v309_v38  ;;  %v311_v45 = vld [vmem:[#allocation2 + $0xc8] sm:$0xff]  ;;  %v314_v46 = vld [vmem:[#allocation2 + $0xf0] sm:$0xff]  ;;  %467 = vst.msk [vmem:[#allocation3 + $0x30] sm:$0xf] %vm454_vm3, %v4333_v29  ;;  %v4360_v47 = vpack.c.bf16 %v312_v44, %v312_v44 }
  0x38   : > { %635 = vrot.lane.b32.xlu0 %v3720_v51, %s4108_s19  ;;  %466 = vst.msk [vmem:[#allocation3 + $0x2c] sm:$0xf] %vm454_vm3, %v4335_v32  ;;  %469 = vst.msk [vmem:[#allocation3 + $0x38] sm:$0xf] %vm454_vm3, %v4337_v33  ;;  %v4362_v48 = vpack.c.bf16 %v311_v45, %v311_v45  ;;  %v4364_v50 = vpack.c.bf16 %v314_v46, %v314_v46  ;;  %v313_v51 = vld [vmem:[#allocation2 + $0xe0] sm:$0xff]  ;;  %v316_v52 = vld [vmem:[#allocation2 + $0x108] sm:$0xff] }
  0x39   : > { %468 = vst.msk [vmem:[#allocation3 + $0x34] sm:$0xf] %vm454_vm3, %v4348_v41  ;;  %471 = vst.msk [vmem:[#allocation3 + $0x40] sm:$0xf] %vm454_vm3, %v4350_v42  ;;  %v3700_v56 = vpack.c.bf16 %v316_v52, %v316_v52  ;;  %v318_v58 = vld [vmem:[#allocation2 + $0x120] sm:$0xff]  ;;  %v509_v0 = vld [vmem:[#allocation2 + $0x109] sm:$0xff] }
  0x3a   : > { %470 = vst.msk [vmem:[#allocation3 + $0x3c] sm:$0xf] %vm454_vm3, %v4352_v43  ;;  %v506_v60 = vld [vmem:[#allocation2 + $0xe1] sm:$0xff]  ;;  %473 = vst.msk [vmem:[#allocation3 + $0x48] sm:$0xf] %vm454_vm3, %v4360_v47  ;;  %v3702_v61 = vpack.c.bf16 %v318_v58, %v318_v58  ;;  %v320_v4 = vld [vmem:[#allocation2 + $0x138] sm:$0xff] }
  0x3b   : > { %633 = vrot.lane.b32.xlu1 %v3719_v53, %s4108_s19  ;;  %v315_v53 = vld [vmem:[#allocation2 + $0xf8] sm:$0xff]  ;;  %472 = vst.msk [vmem:[#allocation3 + $0x44] sm:$0xf] %vm454_vm3, %v4362_v48  ;;  %475 = vst.msk [vmem:[#allocation3 + $0x50] sm:$0xf] %vm454_vm3, %v4364_v50  ;;  %v3729_v2 = vpack.c.bf16 %v506_v60, %v506_v60  ;;  %v3704_v9 = vpack.c.bf16 %v320_v4, %v320_v4  ;;  %v511_v11 = vld [vmem:[#allocation2 + $0x121] sm:$0xff] }
  0x3c   : > { %639 = vrot.lane.b32.xlu0 %v3722_v55, %s4108_s19  ;;  %v4375_v55 = vpack.c.bf16 %v313_v51, %v313_v51  ;;  %477 = vst.msk [vmem:[#allocation3 + $0x58] sm:$0xf] %vm454_vm3, %v3700_v56  ;;  %479 = vst.msk [vmem:[#allocation3 + $0x60] sm:$0xf] %vm454_vm3, %v3702_v61  ;;  %v508_v6 = vld [vmem:[#allocation2 + $0xf9] sm:$0xff]  ;;  %v322_v15 = vld [vmem:[#allocation2 + $0x150] sm:$0xff] }
  0x3d   : > { %481 = vst.msk [vmem:[#allocation3 + $0x68] sm:$0xf] %vm454_vm3, %v3704_v9  ;;  %v321_v13 = vld [vmem:[#allocation2 + $0x140] sm:$0xff]  ;;  %v3731_v14 = vpack.c.bf16 %v508_v6, %v508_v6  ;;  %v510_v19 = vld [vmem:[#allocation2 + $0x111] sm:$0xff]  ;;  %v3706_v20 = vpack.c.bf16 %v322_v15, %v322_v15  ;;  %v324_v28 = vld [vmem:[#allocation2 + $0x168] sm:$0xff] }
  0x3e   : > { %474 = vst.msk [vmem:[#allocation3 + $0x4c] sm:$0xf] %vm454_vm3, %v4375_v55  ;;  %v3705_v18 = vpack.c.bf16 %v321_v13, %v321_v13  ;;  %v513_v25 = vld [vmem:[#allocation2 + $0x139] sm:$0xff]  ;;  %v3733_v27 = vpack.c.bf16 %v510_v19, %v510_v19  ;;  %v512_v36 = vld [vmem:[#allocation2 + $0x129] sm:$0xff]  ;;  %v3708_v38 = vpack.c.bf16 %v324_v28, %v324_v28  ;;  %v515_v44 = vld [vmem:[#allocation2 + $0x151] sm:$0xff] }
  0x3f   : > { %637 = vrot.lane.b32.xlu1 %v3721_v57, %s4108_s19  ;;  %v4377_v57 = vpack.c.bf16 %v315_v53, %v315_v53  ;;  %483 = vst.msk [vmem:[#allocation3 + $0x70] sm:$0xf] %vm454_vm3, %v3706_v20  ;;  %v323_v26 = vld [vmem:[#allocation2 + $0x158] sm:$0xff]  ;;  %v325_v45 = vld [vmem:[#allocation2 + $0x170] sm:$0xff]  ;;  %v3735_v46 = vpack.c.bf16 %v512_v36, %v512_v36  ;;  %v514_v52 = vld [vmem:[#allocation2 + $0x141] sm:$0xff]  ;;  %v3738_v53 = vpack.c.bf16 %v515_v44, %v515_v44 }
  0x40   : > { %643 = vrot.lane.b32.xlu0 %v3724_v59, %s4108_s19  ;;  %v317_v59 = vld [vmem:[#allocation2 + $0x110] sm:$0xff]  ;;  %482 = vst.msk [vmem:[#allocation3 + $0x6c] sm:$0xf] %vm454_vm3, %v3705_v18  ;;  %v3707_v34 = vpack.c.bf16 %v323_v26, %v323_v26  ;;  %485 = vst.msk [vmem:[#allocation3 + $0x78] sm:$0xf] %vm454_vm3, %v3708_v38  ;;  %v3709_v51 = vpack.c.bf16 %v325_v45, %v325_v45  ;;  %v3737_v56 = vpack.c.bf16 %v514_v52, %v514_v52  ;;  %v516_v58 = vld [vmem:[#allocation2 + $0x159] sm:$0xff] }
  0x41   : > { %v3701_v62 = vpack.c.bf16 %v317_v59, %v317_v59  ;;  %476 = vst.msk [vmem:[#allocation3 + $0x54] sm:$0xf] %vm454_vm3, %v4377_v57  ;;  %v744_v60 = vld [vmem:[#allocation2 + $0x2] sm:$0xff]  ;;  %v3739_v61 = vpack.c.bf16 %v516_v58, %v516_v58  ;;  %v751_v20 = vld [vmem:[#allocation2 + $0x52] sm:$0xff]  ;;  %v758_v44 = vld [vmem:[#allocation2 + $0xaa] sm:$0xff] }
  0x42   : > { %484 = vst.msk [vmem:[#allocation3 + $0x74] sm:$0xf] %vm454_vm3, %v3707_v34  ;;  %486 = vst.msk [vmem:[#allocation3 + $0x7c] sm:$0xf] %vm454_vm3, %v3709_v51  ;;  %v747_v9 = vld [vmem:[#allocation2 + $0x22] sm:$0xff]  ;;  %v4438_v26 = vpack.c.bf16 %v751_v20, %v751_v20  ;;  %v756_v34 = vld [vmem:[#allocation2 + $0x92] sm:$0xff]  ;;  %v3756_v51 = vpack.c.bf16 %v758_v44, %v758_v44 }
  0x43   : > { %641 = vrot.lane.b32.xlu1 %v3723_v1, %s4108_s19  ;;  %478 = vst.msk [vmem:[#allocation3 + $0x5c] sm:$0xf] %vm454_vm3, %v3701_v62  ;;  %v319_v1 = vld [vmem:[#allocation2 + $0x128] sm:$0xff]  ;;  %v518_v62 = vld [vmem:[#allocation2 + $0x171] sm:$0xff]  ;;  %v4422_v13 = vpack.c.bf16 %v747_v9, %v747_v9  ;;  %v762_v58 = vld [vmem:[#allocation2 + $0xda] sm:$0xff] }
  0x44   : > { %647 = vrot.lane.b32.xlu0 %v3726_v10, %s4108_s19  ;;  %v3703_v5 = vpack.c.bf16 %v319_v1, %v319_v1  ;;  %v3732_v10 = vpack.c.bf16 %v509_v0, %v509_v0  ;;  %v746_v0 = vld [vmem:[#allocation2 + $0x1a] sm:$0xff]  ;;  %v3741_v1 = vpack.c.bf16 %v518_v62, %v518_v62  ;;  %v752_v18 = vld [vmem:[#allocation2 + $0x62] sm:$0xff]  ;;  %v764_v62 = vld [vmem:[#allocation2 + $0xf2] sm:$0xff] }
  0x45   : > { %v4414_v4 = vpack.c.bf16 %v746_v0, %v746_v0  ;;  %v755_v38 = vld [vmem:[#allocation2 + $0x82] sm:$0xff]  ;;  %v772_v44 = vld [vmem:[#allocation2 + $0x152] sm:$0xff] }
  0x46   : > { %480 = vst.msk [vmem:[#allocation3 + $0x64] sm:$0xf] %vm454_vm3, %v3703_v5  ;;  %v748_v5 = vld [vmem:[#allocation2 + $0x32] sm:$0xff]  ;;  %v4454_v45 = vpack.c.bf16 %v755_v38, %v755_v38  ;;  %v760_v52 = vld [vmem:[#allocation2 + $0xc2] sm:$0xff] }
  0x47   : > { %645 = vrot.lane.b32.xlu1 %v3725_v21, %s4108_s19  ;;  %v3734_v21 = vpack.c.bf16 %v511_v11, %v511_v11  ;;  %v750_v11 = vld [vmem:[#allocation2 + $0x4a] sm:$0xff]  ;;  %v763_v0 = vld [vmem:[#allocation2 + $0xe2] sm:$0xff] }
  0x48   : > { %651 = vrot.lane.b32.xlu0 %v3728_v40, %s4108_s19  ;;  %v3736_v40 = vpack.c.bf16 %v513_v25, %v513_v25  ;;  %v4426_v15 = vpack.c.bf16 %v750_v11, %v750_v11  ;;  %v754_v25 = vld [vmem:[#allocation2 + $0x7a] sm:$0xff]  ;;  %v768_v11 = vld [vmem:[#allocation2 + $0x122] sm:$0xff] }
  0x49   : > { %v4442_v28 = vpack.c.bf16 %v754_v25, %v754_v25  ;;  %v3766_v20 = vpack.c.bf16 %v768_v11, %v768_v11  ;;  %v770_v25 = vld [vmem:[#allocation2 + $0x13a] sm:$0xff] }
  0x4a   : > { %v3768_v38 = vpack.c.bf16 %v770_v25, %v770_v25 }
  0x4b   : > { %649 = vrot.lane.b32.xlu1 %v3727_v54, %s4108_s19  ;;  %v517_v54 = vld [vmem:[#allocation2 + $0x169] sm:$0xff] }
  0x4c   : > { %655 = vrot.lane.b32.xlu0 %v3730_v63, %s4108_s19  ;;  %v3740_v59 = vpack.c.bf16 %v517_v54, %v517_v54  ;;  %v3742_v63 = vpack.c.bf16 %v744_v60, %v744_v60  ;;  %v759_v54 = vld [vmem:[#allocation2 + $0xb2] sm:$0xff]  ;;  %v761_v60 = vld [vmem:[#allocation2 + $0xca] sm:$0xff] }
  0x4f   : > { %653 = vrot.lane.b32.xlu1 %v3729_v2, %s4108_s19  ;;  %v745_v2 = vld [vmem:[#allocation2 + $0xa] sm:$0xff] }
  0x50   : > { %659 = vrot.lane.b32.xlu0 %v3732_v10, %s4108_s19  ;;  %v3743_v6 = vpack.c.bf16 %v745_v2, %v745_v2  ;;  %v4419_v10 = vpack.c.bf16 %v748_v5, %v748_v5  ;;  %v766_v2 = vld [vmem:[#allocation2 + $0x10a] sm:$0xff]  ;;  %v3761_v5 = vpack.c.bf16 %v763_v0, %v763_v0 }
  0x51   : > { %v3764_v9 = vpack.c.bf16 %v766_v2, %v766_v2 }
  0x53   : > { %657 = vrot.lane.b32.xlu1 %v3731_v14, %s4108_s19  ;;  %v749_v14 = vld [vmem:[#allocation2 + $0x3a] sm:$0xff] }
  0x54   : > { %663 = vrot.lane.b32.xlu0 %v3734_v21, %s4108_s19  ;;  %v4430_v19 = vpack.c.bf16 %v749_v14, %v749_v14  ;;  %v4434_v21 = vpack.c.bf16 %v752_v18, %v752_v18  ;;  %v767_v18 = vld [vmem:[#allocation2 + $0x112] sm:$0xff] }
  0x57   : > { %661 = vrot.lane.b32.xlu1 %v3733_v27, %s4108_s19  ;;  %v753_v27 = vld [vmem:[#allocation2 + $0x6a] sm:$0xff] }
  0x58   : > { %667 = vrot.lane.b32.xlu0 %v3736_v40, %s4108_s19  ;;  %v4446_v36 = vpack.c.bf16 %v753_v27, %v753_v27  ;;  %v4450_v40 = vpack.c.bf16 %v756_v34, %v756_v34  ;;  %v3765_v27 = vpack.c.bf16 %v767_v18, %v767_v18  ;;  %v769_v34 = vld [vmem:[#allocation2 + $0x12a] sm:$0xff] }
  0x5b   : > { %665 = vrot.lane.b32.xlu1 %v3735_v46, %s4108_s19  ;;  %v757_v46 = vld [vmem:[#allocation2 + $0x9a] sm:$0xff] }
  0x5c   : > { %671 = vrot.lane.b32.xlu0 %v3738_v53, %s4108_s19  ;;  %v4460_v53 = vpack.c.bf16 %v757_v46, %v757_v46 }
  0x5f   : > { %669 = vrot.lane.b32.xlu1 %v3737_v56, %s4108_s19  ;;  %v3758_v56 = vpack.c.bf16 %v760_v52, %v760_v52  ;;  %v771_v52 = vld [vmem:[#allocation2 + $0x142] sm:$0xff] }
  0x60   : > { %675 = vrot.lane.b32.xlu0 %v3740_v59, %s4108_s19  ;;  %v3757_v59 = vpack.c.bf16 %v759_v54, %v759_v54  ;;  %v3770_v54 = vpack.c.bf16 %v772_v44, %v772_v44 }
  0x63   : > { %673 = vrot.lane.b32.xlu1 %v3739_v61, %s4108_s19  ;;  %v3760_v61 = vpack.c.bf16 %v762_v58, %v762_v58 }
  0x64   : > { %872 = vrot.lane.b32.xlu0 %v3742_v63, %s4109_s20  ;;  %v3759_v63 = vpack.c.bf16 %v761_v60, %v761_v60  ;;  %v773_v60 = vld [vmem:[#allocation2 + $0x15a] sm:$0xff] }
  0x65   : > { %v3771_v0 = vpack.c.bf16 %v773_v60, %v773_v60 }
  0x67   : > { %677 = vrot.lane.b32.xlu1 %v3741_v1, %s4108_s19  ;;  %v3762_v1 = vpack.c.bf16 %v764_v62, %v764_v62 }
  0x68   : > { %876 = vrot.lane.b32.xlu0 %v4414_v4, %s4109_s20 }
  0x6b   : > { %874 = vrot.lane.b32.xlu1 %v3743_v6, %s4109_s20  ;;  %v765_v6 = vld [vmem:[#allocation2 + $0xfa] sm:$0xff] }
  0x6c   : > { %880 = vrot.lane.b32.xlu0 %v4419_v10, %s4109_s20  ;;  %v3763_v14 = vpack.c.bf16 %v765_v6, %v765_v6 }
  0x6f   : > { %878 = vrot.lane.b32.xlu1 %v4422_v13, %s4109_s20 }
  0x70   : > { %884 = vrot.lane.b32.xlu0 %v4426_v15, %s4109_s20 }
  0x73   : > { %882 = vrot.lane.b32.xlu1 %v4430_v19, %s4109_s20 }
  0x74   : > { %888 = vrot.lane.b32.xlu0 %v4434_v21, %s4109_s20 }
  0x77   : > { %886 = vrot.lane.b32.xlu1 %v4438_v26, %s4109_s20 }
  0x78   : > { %892 = vrot.lane.b32.xlu0 %v4442_v28, %s4109_s20 }
  0x7b   : > { %890 = vrot.lane.b32.xlu1 %v4446_v36, %s4109_s20 }
  0x7c   : > { %896 = vrot.lane.b32.xlu0 %v4450_v40, %s4109_s20 }
  0x7f   : > { %894 = vrot.lane.b32.xlu1 %v4454_v45, %s4109_s20 }
  0x80   : > { %900 = vrot.lane.b32.xlu0 %v3756_v51, %s4109_s20  ;;  %v3767_v51 = vpack.c.bf16 %v769_v34, %v769_v34 }
  0x83   : > { %898 = vrot.lane.b32.xlu1 %v4460_v53, %s4109_s20 }
  0x84   : > { %904 = vrot.lane.b32.xlu0 %v3758_v56, %s4109_s20  ;;  %v774_v56 = vld [vmem:[#allocation2 + $0x16a] sm:$0xff] }
  0x85   : > { %v3772_v62 = vpack.c.bf16 %v774_v56, %v774_v56 }
  0x87   : > { %902 = vrot.lane.b32.xlu1 %v3757_v59, %s4109_s20  ;;  %v3769_v59 = vpack.c.bf16 %v771_v52, %v771_v52 }
  0x88   : > { %908 = vrot.lane.b32.xlu0 %v3760_v61, %s4109_s20  ;;  %v616_v46 = vpop.permute.xlu0 %615 }
  0x89   : > { %712 = vst.msk [vmem:[#allocation3] sm:$0xf] %vm711_vm4, %v616_v46 }
  0x8b   : > { %906 = vrot.lane.b32.xlu1 %v3759_v63, %s4109_s20 }
  0x8c   : > { %912 = vrot.lane.b32.xlu0 %v3762_v1, %s4109_s20  ;;  %v775_v1 = vld [vmem:[#allocation2 + $0x172] sm:$0xff] }
  0x8d   : > { %v3773_v6 = vpack.c.bf16 %v775_v1, %v775_v1 }
  0x8f   : > { %910 = vrot.lane.b32.xlu1 %v3761_v5, %s4109_s20 }
  0x90   : > { %916 = vrot.lane.b32.xlu0 %v3764_v9, %s4109_s20 }
  0x93   : > { %914 = vrot.lane.b32.xlu1 %v3763_v14, %s4109_s20 }
  0x94   : > { %920 = vrot.lane.b32.xlu0 %v3766_v20, %s4109_s20 }
  0x97   : > { %918 = vrot.lane.b32.xlu1 %v3765_v27, %s4109_s20 }
  0x98   : > { %924 = vrot.lane.b32.xlu0 %v3768_v38, %s4109_s20 }
  0x9a   : > { %v618_v58 = vpop.permute.xlu0 %617 }
  0x9b   : > { %922 = vrot.lane.b32.xlu1 %v3767_v51, %s4109_s20  ;;  %713 = vst.msk [vmem:[#allocation3 + $0x4] sm:$0xf] %vm711_vm4, %v618_v58 }
  0x9c   : > { %928 = vrot.lane.b32.xlu0 %v3770_v54, %s4109_s20 }
  0x9d   : > { %v620_v61 = vpop.permute.xlu1 %619 }
  0x9e   : > { %714 = vst.msk [vmem:[#allocation3 + $0x8] sm:$0xf] %vm711_vm4, %v620_v61  ;;  %v624_v63 = vpop.permute.xlu0 %623 }
  0x9f   : > { %926 = vrot.lane.b32.xlu1 %v3769_v59, %s4109_s20  ;;  %716 = vst.msk [vmem:[#allocation3 + $0x10] sm:$0xf] %vm711_vm4, %v624_v63 }
  0xa0   : > { %932 = vrot.lane.b32.xlu0 %v3772_v62, %s4109_s20 }
  0xa1   : > { %v622_v2 = vpop.permute.xlu1 %621 }
  0xa2   : > { %715 = vst.msk [vmem:[#allocation3 + $0xc] sm:$0xf] %vm711_vm4, %v622_v2  ;;  %v628_v5 = vpop.permute.xlu0 %627  ;;  %v4080_v2 = vld [vmem:[%s5166_s1 + $0x10] ss:$0 sps:$4 sm:$0x33]  }
  0xa3   : > { %930 = vrot.lane.b32.xlu1 %v3771_v0, %s4109_s20  ;;  %718 = vst.msk [vmem:[#allocation3 + $0x18] sm:$0xf] %vm711_vm4, %v628_v5  ;;  %4061 = vmatprep.subr.msk.bf16.mxu0 %vm2725_vm6, %v4080_v2 }
  0xa4   : > { %1129 = vrot.lane.b32.xlu0 %v4295_v3, %s4110_s21  ;;  %4062 = vmatprep.subr.msk.bf16.mxu1 %vm2725_vm6, %v4080_v2 }
  0xa5   : > { %v626_v9 = vpop.permute.xlu1 %625 }
  0xa6   : > { %717 = vst.msk [vmem:[#allocation3 + $0x14] sm:$0xf] %vm711_vm4, %v626_v9  ;;  %v632_v11 = vpop.permute.xlu0 %631 }
  0xa7   : > { %934 = vrot.lane.b32.xlu1 %v3773_v6, %s4109_s20  ;;  %720 = vst.msk [vmem:[#allocation3 + $0x20] sm:$0xf] %vm711_vm4, %v632_v11 }
  0xa8   : > { %1133 = vrot.lane.b32.xlu0 %v4298_v7, %s4110_s21 }
  0xa9   : > { %v630_v14 = vpop.permute.xlu1 %629 }
  0xaa   : > { %719 = vst.msk [vmem:[#allocation3 + $0x1c] sm:$0xf] %vm711_vm4, %v630_v14  ;;  %v636_v18 = vpop.permute.xlu0 %635 }
  0xab   : > { %1131 = vrot.lane.b32.xlu1 %v4300_v8, %s4110_s21  ;;  %722 = vst.msk [vmem:[#allocation3 + $0x28] sm:$0xf] %vm711_vm4, %v636_v18 }
  0xac   : > { %1137 = vrot.lane.b32.xlu0 %v4308_v12, %s4110_s21 }
  0xad   : > { %v634_v3 = vpop.permute.xlu1 %633 }
  0xae   : > { %721 = vst.msk [vmem:[#allocation3 + $0x24] sm:$0xf] %vm711_vm4, %v634_v3  ;;  %v640_v20 = vpop.permute.xlu0 %639  ;;  %v1265_v3 = vld [vmem:[#allocation2 + $0x69] sm:$0xff] }
  0xaf   : > { %1135 = vrot.lane.b32.xlu1 %v4316_v16, %s4110_s21  ;;  %724 = vst.msk [vmem:[#allocation3 + $0x30] sm:$0xf] %vm711_vm4, %v640_v20 }
  0xb0   : > { %1141 = vrot.lane.b32.xlu0 %v4318_v17, %s4110_s21 }
  0xb1   : > { %v638_v25 = vpop.permute.xlu1 %637 }
  0xb2   : > { %723 = vst.msk [vmem:[#allocation3 + $0x2c] sm:$0xf] %vm711_vm4, %v638_v25  ;;  %v644_v8 = vpop.permute.xlu0 %643 }
  0xb3   : > { %1139 = vrot.lane.b32.xlu1 %v4323_v22, %s4110_s21  ;;  %726 = vst.msk [vmem:[#allocation3 + $0x38] sm:$0xf] %vm711_vm4, %v644_v8  ;;  %v3813_v8 = vpack.c.bf16 %v1265_v3, %v1265_v3 }
  0xb4   : > { %1145 = vrot.lane.b32.xlu0 %v4325_v23, %s4110_s21 }
  0xb5   : > { %v642_v27 = vpop.permute.xlu1 %641 }
  0xb6   : > { %725 = vst.msk [vmem:[#allocation3 + $0x34] sm:$0xf] %vm711_vm4, %v642_v27  ;;  %v648_v34 = vpop.permute.xlu0 %647 }
  0xb7   : > { %1143 = vrot.lane.b32.xlu1 %v4327_v24, %s4110_s21  ;;  %728 = vst.msk [vmem:[#allocation3 + $0x40] sm:$0xf] %vm711_vm4, %v648_v34 }
  0xb8   : > { %1149 = vrot.lane.b32.xlu0 %v4333_v29, %s4110_s21 }
  0xb9   : > { %v646_v38 = vpop.permute.xlu1 %645 }
  0xba   : > { %727 = vst.msk [vmem:[#allocation3 + $0x3c] sm:$0xf] %vm711_vm4, %v646_v38  ;;  %v652_v44 = vpop.permute.xlu0 %651 }
  0xbb   : > { %1147 = vrot.lane.b32.xlu1 %v4335_v32, %s4110_s21  ;;  %730 = vst.msk [vmem:[#allocation3 + $0x48] sm:$0xf] %vm711_vm4, %v652_v44 }
  0xbc   : > { %1153 = vrot.lane.b32.xlu0 %v4337_v33, %s4110_s21 }
  0xbd   : > { %v650_v46 = vpop.permute.xlu1 %649 }
  0xbe   : > { %729 = vst.msk [vmem:[#allocation3 + $0x44] sm:$0xf] %vm711_vm4, %v650_v46  ;;  %v656_v51 = vpop.permute.xlu0 %655 }
  0xbf   : > { %1151 = vrot.lane.b32.xlu1 %v4348_v41, %s4110_s21  ;;  %732 = vst.msk [vmem:[#allocation3 + $0x50] sm:$0xf] %vm711_vm4, %v656_v51 }
  0xc0   : > { %1157 = vrot.lane.b32.xlu0 %v4350_v42, %s4110_s21 }
  0xc1   : > { %v654_v52 = vpop.permute.xlu1 %653 }
  0xc2   : > { %731 = vst.msk [vmem:[#allocation3 + $0x4c] sm:$0xf] %vm711_vm4, %v654_v52  ;;  %v660_v54 = vpop.permute.xlu0 %659 }
  0xc3   : > { %1155 = vrot.lane.b32.xlu1 %v4352_v43, %s4110_s21  ;;  %734 = vst.msk [vmem:[#allocation3 + $0x58] sm:$0xf] %vm711_vm4, %v660_v54 }
  0xc4   : > { %1161 = vrot.lane.b32.xlu0 %v4360_v47, %s4110_s21 }
  0xc5   : > { %v658_v56 = vpop.permute.xlu1 %657 }
  0xc6   : > { %733 = vst.msk [vmem:[#allocation3 + $0x54] sm:$0xf] %vm711_vm4, %v658_v56  ;;  %v664_v58 = vpop.permute.xlu0 %663 }
  0xc7   : > { %1159 = vrot.lane.b32.xlu1 %v4362_v48, %s4110_s21  ;;  %736 = vst.msk [vmem:[#allocation3 + $0x60] sm:$0xf] %vm711_vm4, %v664_v58  ;;  %v2037_v58 = vld [vmem:[#allocation2 + $0x81] sm:$0xff] }
  0xc8   : > { %1388 = vrot.lane.b32.xlu0 %v4258_v35, %s4111_s22 }
  0xc9   : > { %v662_v59 = vpop.permute.xlu1 %661 }
  0xca   : > { %735 = vst.msk [vmem:[#allocation3 + $0x5c] sm:$0xf] %vm711_vm4, %v662_v59  ;;  %v668_v60 = vpop.permute.xlu0 %667 }
  0xcb   : > { %1386 = vrot.lane.b32.xlu1 %v4250_v30, %s4111_s22  ;;  %738 = vst.msk [vmem:[#allocation3 + $0x68] sm:$0xf] %vm711_vm4, %v668_v60 }
  0xcc   : > { %1392 = vrot.lane.b32.xlu0 %v4268_v39, %s4111_s22 }
  0xcd   : > { %v666_v61 = vpop.permute.xlu1 %665 }
  0xce   : > { %737 = vst.msk [vmem:[#allocation3 + $0x64] sm:$0xf] %vm711_vm4, %v666_v61  ;;  %v672_v62 = vpop.permute.xlu0 %671 }
  0xcf   : > { %1390 = vrot.lane.b32.xlu1 %v4252_v31, %s4111_s22  ;;  %740 = vst.msk [vmem:[#allocation3 + $0x70] sm:$0xf] %vm711_vm4, %v672_v62 }
  0xd0   : > { %1645 = vrot.lane.b32.xlu0 %v4422_v13, %s4112_s23 }
  0xd1   : > { %v670_v35 = vpop.permute.xlu1 %669 }
  0xd2   : > { %739 = vst.msk [vmem:[#allocation3 + $0x6c] sm:$0xf] %vm711_vm4, %v670_v35  ;;  %v676_v30 = vpop.permute.xlu0 %675 }
  0xd3   : > { %1643 = vrot.lane.b32.xlu1 %v4414_v4, %s4112_s23  ;;  %742 = vst.msk [vmem:[#allocation3 + $0x78] sm:$0xf] %vm711_vm4, %v676_v30 }
  0xd4   : > { %1649 = vrot.lane.b32.xlu0 %v4430_v19, %s4112_s23 }
  0xd5   : > { %v674_v63 = vpop.permute.xlu1 %673 }
  0xd6   : > { %741 = vst.msk [vmem:[#allocation3 + $0x74] sm:$0xf] %vm711_vm4, %v674_v63  ;;  %v873_v0 = vpop.permute.xlu0 %872 }
  0xd7   : > { %1647 = vrot.lane.b32.xlu1 %v4419_v10, %s4112_s23  ;;  %969 = vst.msk [vmem:[#allocation3] sm:$0xf] %vm968_vm5, %v873_v0  ;;  %v1269_v0 = vld [vmem:[#allocation2 + $0x99] sm:$0xff] }
  0xd8   : > { %1903 = vrot.lane.b32.xlu0 %v4316_v16, %s4113_s24 }
  0xd9   : > { %v678_v13 = vpop.permute.xlu1 %677 }
  0xda   : > { %743 = vst.msk [vmem:[#allocation3 + $0x7c] sm:$0xf] %vm711_vm4, %v678_v13  ;;  %v877_v4 = vpop.permute.xlu0 %876  ;;  %v1268_v13 = vld [vmem:[#allocation2 + $0x91] sm:$0xff] }
  0xdb   : > { %1901 = vrot.lane.b32.xlu1 %v4298_v7, %s4113_s24  ;;  %971 = vst.msk [vmem:[#allocation3 + $0x8] sm:$0xf] %vm968_vm5, %v877_v4  ;;  %v2727_v7 = vsel %vm2725_vm6, %v4080_v2, 0  ;;  %v3816_v2 = vpack.c.bf16 %v1268_v13, %v1268_v13 }
  0xdc   : > { %1907 = vrot.lane.b32.xlu0 %v4323_v22, %s4113_s24  ;;  %4018 = vmatpush3.bf16.msra.mxu0 %v2727_v7  ;;  %v4081_v22 = vld [vmem:[%s5166_s1 + $0x8] sm:$0xff]  }
  0xdd   : > { %v875_v1 = vpop.permute.xlu1 %874  ;;  %4058 = vmatpush3.bf16.msra.mxu1 %v2727_v7  ;;  %4019 = vmatprep.subr.bf16.mxu0 %v4081_v22 }
  0xde   : > { %970 = vst.msk [vmem:[#allocation3 + $0x4] sm:$0xf] %vm968_vm5, %v875_v1  ;;  %v881_v16 = vpop.permute.xlu0 %880  ;;  %4056 = vmatprep.subr.bf16.mxu1 %v4081_v22 }
  0xdf   : > { %1905 = vrot.lane.b32.xlu1 %v4308_v12, %s4113_s24  ;;  %973 = vst.msk [vmem:[#allocation3 + $0x10] sm:$0xf] %vm968_vm5, %v881_v16 }
  0xe0   : > { %2160 = vrot.lane.b32.xlu0 %v4268_v39, %s4114_s27  ;;  %4020 = vmatpush3.bf16.msra.mxu0 %v4081_v22  ;;  %v4082_v39 = vld [vmem:[%s5166_s1] sm:$0xff]  }
  0xe1   : > { %v879_v5 = vpop.permute.xlu1 %878  ;;  %4059 = vmatpush3.bf16.msra.mxu1 %v4081_v22  ;;  %4021 = vmatprep.subr.bf16.mxu0 %v4082_v39 }
  0xe2   : > { %972 = vst.msk [vmem:[#allocation3 + $0xc] sm:$0xf] %vm968_vm5, %v879_v5  ;;  %v885_v12 = vpop.permute.xlu0 %884  ;;  %4057 = vmatprep.subr.bf16.mxu1 %v4082_v39 }
  0xe3   : > { %2158 = vrot.lane.b32.xlu1 %v4252_v31, %s4114_s27  ;;  %975 = vst.msk [vmem:[#allocation3 + $0x18] sm:$0xf] %vm968_vm5, %v885_v12 }
  0xe4   : > { %2164 = vrot.lane.b32.xlu0 %v4285_v49, %s4114_s27  ;;  %4022 = vmatpush3.bf16.msra.mxu0 %v4082_v39  ;;  %v1263_v49 = vld [vmem:[#allocation2 + $0x51] sm:$0xff] }
  0xe5   : > { %v883_v6 = vpop.permute.xlu1 %882  ;;  %4060 = vmatpush3.bf16.msra.mxu1 %v4082_v39  ;;  %v3811_v18 = vpack.c.bf16 %v1263_v49, %v1263_v49 }
  0xe6   : > { %974 = vst.msk [vmem:[#allocation3 + $0x14] sm:$0xf] %vm968_vm5, %v883_v6  ;;  %v889_v31 = vpop.permute.xlu0 %888 }
  0xe7   : > { %2162 = vrot.lane.b32.xlu1 %v4264_v37, %s4114_s27  ;;  %977 = vst.msk [vmem:[#allocation3 + $0x20] sm:$0xf] %vm968_vm5, %v889_v31  ;;  %v1262_v37 = vld [vmem:[#allocation2 + $0x49] sm:$0xff] }
  0xe8   : > { %2417 = vrot.lane.b32.xlu0 %v4430_v19, %s4115_s5  ;;  %v3810_v20 = vpack.c.bf16 %v1262_v37, %v1262_v37 }
  0xe9   : > { %v887_v9 = vpop.permute.xlu1 %886 }
  0xea   : > { %976 = vst.msk [vmem:[#allocation3 + $0x1c] sm:$0xf] %vm968_vm5, %v887_v9  ;;  %v893_v11 = vpop.permute.xlu0 %892  ;;  %v2296_v9 = vld [vmem:[#allocation2 + $0x9a] sm:$0xff] }
  0xeb   : > { %2415 = vrot.lane.b32.xlu1 %v4419_v10, %s4115_s5  ;;  %979 = vst.msk [vmem:[#allocation3 + $0x28] sm:$0xf] %vm968_vm5, %v893_v11  ;;  %v1264_v10 = vld [vmem:[#allocation2 + $0x61] sm:$0xff]  ;;  %v2295_v11 = vld [vmem:[#allocation2 + $0x92] sm:$0xff] }
  0xec   : > { %2421 = vrot.lane.b32.xlu0 %v4438_v26, %s4115_s5  ;;  %v3812_v34 = vpack.c.bf16 %v1264_v10, %v1264_v10  ;;  %v3942_v3 = vpack.c.bf16 %v2295_v11, %v2295_v11 }
  0xed   : > { %v891_v14 = vpop.permute.xlu1 %890 }
  0xee   : > { %978 = vst.msk [vmem:[#allocation3 + $0x24] sm:$0xf] %vm968_vm5, %v891_v14  ;;  %v897_v19 = vpop.permute.xlu0 %896  ;;  %v2298_v14 = vld [vmem:[#allocation2 + $0xb2] sm:$0xff] }
  0xef   : > { %2419 = vrot.lane.b32.xlu1 %v4426_v15, %s4115_s5  ;;  %981 = vst.msk [vmem:[#allocation3 + $0x30] sm:$0xf] %vm968_vm5, %v897_v19  ;;  %v2297_v19 = vld [vmem:[#allocation2 + $0xaa] sm:$0xff]  ;;  %v3945_v10 = vpack.c.bf16 %v2298_v14, %v2298_v14 }
  0xf0   : > { %1396 = vrot.lane.b32.xlu0 %v3811_v18, %s4111_s22 }
  0xf1   : > { %v895_v25 = vpop.permute.xlu1 %894 }
  0xf2   : > { %980 = vst.msk [vmem:[#allocation3 + $0x2c] sm:$0xf] %vm968_vm5, %v895_v25  ;;  %v901_v27 = vpop.permute.xlu0 %900 }
  0xf3   : > { %1394 = vrot.lane.b32.xlu1 %v3810_v20, %s4111_s22  ;;  %983 = vst.msk [vmem:[#allocation3 + $0x38] sm:$0xf] %vm968_vm5, %v901_v27 }
  0xf4   : > { %1400 = vrot.lane.b32.xlu0 %v3813_v8, %s4111_s22 }
  0xf5   : > { %v899_v38 = vpop.permute.xlu1 %898 }
  0xf6   : > { %982 = vst.msk [vmem:[#allocation3 + $0x34] sm:$0xf] %vm968_vm5, %v899_v38  ;;  %v905_v44 = vpop.permute.xlu0 %904 }
  0xf7   : > { %1398 = vrot.lane.b32.xlu1 %v3812_v34, %s4111_s22  ;;  %985 = vst.msk [vmem:[#allocation3 + $0x40] sm:$0xf] %vm968_vm5, %v905_v44  ;;  %v1272_v44 = vld [vmem:[#allocation2 + $0xc1] sm:$0xff] }
  0xf8   : > { %1653 = vrot.lane.b32.xlu0 %v4438_v26, %s4112_s23 }
  0xf9   : > { %v903_v46 = vpop.permute.xlu1 %902 }
  0xfa   : > { %984 = vst.msk [vmem:[#allocation3 + $0x3c] sm:$0xf] %vm968_vm5, %v903_v46  ;;  %v909_v51 = vpop.permute.xlu0 %908 }
  0xfb   : > { %1651 = vrot.lane.b32.xlu1 %v4426_v15, %s4112_s23  ;;  %987 = vst.msk [vmem:[#allocation3 + $0x48] sm:$0xf] %vm968_vm5, %v909_v51 }
  0xfc   : > { %1657 = vrot.lane.b32.xlu0 %v4446_v36, %s4112_s23 }
  0xfd   : > { %v907_v52 = vpop.permute.xlu1 %906 }
  0xfe   : > { %986 = vst.msk [vmem:[#allocation3 + $0x44] sm:$0xf] %vm968_vm5, %v907_v52  ;;  %v913_v54 = vpop.permute.xlu0 %912 }
  0xff   : > { %1655 = vrot.lane.b32.xlu1 %v4434_v21, %s4112_s23  ;;  %989 = vst.msk [vmem:[#allocation3 + $0x50] sm:$0xf] %vm968_vm5, %v913_v54  ;;  %v3820_v54 = vpack.c.bf16 %v1272_v44, %v1272_v44 }
 0x100   : > { %1911 = vrot.lane.b32.xlu0 %v4327_v24, %s4113_s24  ;;  %v2036_v24 = vld [vmem:[#allocation2 + $0x79] sm:$0xff] }
 0x101   : > { %v911_v26 = vpop.permute.xlu1 %910 }
 0x102   : > { %988 = vst.msk [vmem:[#allocation3 + $0x4c] sm:$0xf] %vm968_vm5, %v911_v26  ;;  %v917_v15 = vpop.permute.xlu0 %916 }
 0x103   : > { %1909 = vrot.lane.b32.xlu1 %v4318_v17, %s4113_s24  ;;  %991 = vst.msk [vmem:[#allocation3 + $0x58] sm:$0xf] %vm968_vm5, %v917_v15  ;;  %v3909_v17 = vpack.c.bf16 %v2037_v58, %v2037_v58  ;;  %v1530_v15 = vld [vmem:[#allocation2 + $0xca] sm:$0xff]  ;;  %v1529_v58 = vld [vmem:[#allocation2 + $0xc2] sm:$0xff] }
 0x104   : > { %1915 = vrot.lane.b32.xlu0 %v4335_v32, %s4113_s24  ;;  %v3908_v32 = vpack.c.bf16 %v2036_v24, %v2036_v24  ;;  %v3853_v24 = vpack.c.bf16 %v1530_v15, %v1530_v15 }
 0x105   : > { %v915_v56 = vpop.permute.xlu1 %914 }
 0x106   : > { %990 = vst.msk [vmem:[#allocation3 + $0x54] sm:$0xf] %vm968_vm5, %v915_v56  ;;  %v921_v59 = vpop.permute.xlu0 %920 }
 0x107   : > { %1913 = vrot.lane.b32.xlu1 %v4325_v23, %s4113_s24  ;;  %993 = vst.msk [vmem:[#allocation3 + $0x60] sm:$0xf] %vm968_vm5, %v921_v59 }
 0x108   : > { %2168 = vrot.lane.b32.xlu0 %v3813_v8, %s4114_s27  ;;  %v3944_v8 = vpack.c.bf16 %v2297_v19, %v2297_v19 }
 0x109   : > { %v919_v60 = vpop.permute.xlu1 %918 }
 0x10a   : > { %992 = vst.msk [vmem:[#allocation3 + $0x5c] sm:$0xf] %vm968_vm5, %v919_v60  ;;  %v925_v61 = vpop.permute.xlu0 %924 }
 0x10b   : > { %2166 = vrot.lane.b32.xlu1 %v3812_v34, %s4114_s27  ;;  %995 = vst.msk [vmem:[#allocation3 + $0x68] sm:$0xf] %vm968_vm5, %v925_v61  ;;  %v1273_v34 = vld [vmem:[#allocation2 + $0xc9] sm:$0xff] }
 0x10c   : > { %2172 = vrot.lane.b32.xlu0 %v3909_v17, %s4114_s27  ;;  %v3821_v51 = vpack.c.bf16 %v1273_v34, %v1273_v34 }
 0x10d   : > { %v923_v62 = vpop.permute.xlu1 %922 }
 0x10e   : > { %994 = vst.msk [vmem:[#allocation3 + $0x64] sm:$0xf] %vm968_vm5, %v923_v62  ;;  %v929_v23 = vpop.permute.xlu0 %928 }
 0x10f   : > { %2170 = vrot.lane.b32.xlu1 %v3908_v32, %s4114_s27  ;;  %997 = vst.msk [vmem:[#allocation3 + $0x70] sm:$0xf] %vm968_vm5, %v929_v23 }
 0x110   : > { %2425 = vrot.lane.b32.xlu0 %v4446_v36, %s4115_s5 }
 0x111   : > { %v927_v35 = vpop.permute.xlu1 %926 }
 0x112   : > { %996 = vst.msk [vmem:[#allocation3 + $0x6c] sm:$0xf] %vm968_vm5, %v927_v35  ;;  %v933_v30 = vpop.permute.xlu0 %932 }
 0x113   : > { %2423 = vrot.lane.b32.xlu1 %v4434_v21, %s4115_s5  ;;  %999 = vst.msk [vmem:[#allocation3 + $0x78] sm:$0xf] %vm968_vm5, %v933_v30  ;;  %v3817_v21 = vpack.c.bf16 %v1269_v0, %v1269_v0  ;;  %v2045_v30 = vld [vmem:[#allocation2 + $0xe1] sm:$0xff] }
 0x114   : > { %2429 = vrot.lane.b32.xlu0 %v4454_v45, %s4115_s5 }
 0x115   : > { %v931_v63 = vpop.permute.xlu1 %930 }
 0x116   : > { %998 = vst.msk [vmem:[#allocation3 + $0x74] sm:$0xf] %vm968_vm5, %v931_v63  ;;  %v1130_v36 = vpop.permute.xlu0 %1129  ;;  %v2044_v63 = vld [vmem:[#allocation2 + $0xd9] sm:$0xff] }
 0x117   : > { %2427 = vrot.lane.b32.xlu1 %v4442_v28, %s4115_s5  ;;  %1226 = vst.msk [vmem:[#allocation3] sm:$0xf] %vm1225_vm7, %v1130_v36  ;;  %v3916_v13 = vpack.c.bf16 %v2044_v63, %v2044_v63 }
 0x118   : > { %1404 = vrot.lane.b32.xlu0 %v3909_v17, %s4111_s22  ;;  %v3852_v17 = vpack.c.bf16 %v1529_v58, %v1529_v58 }
 0x119   : > { %v935_v4 = vpop.permute.xlu1 %934 }
 0x11a   : > { %1000 = vst.msk [vmem:[#allocation3 + $0x7c] sm:$0xf] %vm968_vm5, %v935_v4  ;;  %v1134_v1 = vpop.permute.xlu0 %1133 }
 0x11b   : > { %1402 = vrot.lane.b32.xlu1 %v3908_v32, %s4111_s22  ;;  %1228 = vst.msk [vmem:[#allocation3 + $0x8] sm:$0xf] %vm1225_vm7, %v1134_v1  ;;  %v2301_v1 = vld [vmem:[#allocation2 + $0xda] sm:$0xff] }
 0x11c   : > { %1408 = vrot.lane.b32.xlu0 %v3817_v21, %s4111_s22 }
 0x11d   : > { %v1132_v16 = vpop.permute.xlu1 %1131 }
 0x11e   : > { %1227 = vst.msk [vmem:[#allocation3 + $0x4] sm:$0xf] %vm1225_vm7, %v1132_v16  ;;  %v1138_v7 = vpop.permute.xlu0 %1137 }
 0x11f   : > { %1406 = vrot.lane.b32.xlu1 %v3816_v2, %s4111_s22  ;;  %1230 = vst.msk [vmem:[#allocation3 + $0x10] sm:$0xf] %vm1225_vm7, %v1138_v7 }
 0x120   : > { %1661 = vrot.lane.b32.xlu0 %v4454_v45, %s4112_s23 }
 0x121   : > { %v1136_v5 = vpop.permute.xlu1 %1135 }
 0x122   : > { %1229 = vst.msk [vmem:[#allocation3 + $0xc] sm:$0xf] %vm1225_vm7, %v1136_v5  ;;  %v1142_v22 = vpop.permute.xlu0 %1141  ;;  %v3948_v5 = vpack.c.bf16 %v2301_v1, %v2301_v1 }
 0x123   : > { %1659 = vrot.lane.b32.xlu1 %v4442_v28, %s4112_s23  ;;  %1232 = vst.msk [vmem:[#allocation3 + $0x18] sm:$0xf] %vm1225_vm7, %v1142_v22 }
 0x124   : > { %1665 = vrot.lane.b32.xlu0 %v4460_v53, %s4112_s23 }
 0x125   : > { %v1140_v12 = vpop.permute.xlu1 %1139 }
 0x126   : > { %1231 = vst.msk [vmem:[#allocation3 + $0x14] sm:$0xf] %vm1225_vm7, %v1140_v12  ;;  %v1146_v6 = vpop.permute.xlu0 %1145 }
 0x127   : > { %1663 = vrot.lane.b32.xlu1 %v4450_v40, %s4112_s23  ;;  %1234 = vst.msk [vmem:[#allocation3 + $0x20] sm:$0xf] %vm1225_vm7, %v1146_v6  ;;  %v2041_v40 = vld [vmem:[#allocation2 + $0xb1] sm:$0xff] }
 0x128   : > { %1919 = vrot.lane.b32.xlu0 %v4348_v41, %s4113_s24  ;;  %v2040_v41 = vld [vmem:[#allocation2 + $0xa9] sm:$0xff] }
 0x129   : > { %v1144_v45 = vpop.permute.xlu1 %1143  ;;  %v3912_v49 = vpack.c.bf16 %v2040_v41, %v2040_v41 }
 0x12a   : > { %1233 = vst.msk [vmem:[#allocation3 + $0x1c] sm:$0xf] %vm1225_vm7, %v1144_v45  ;;  %v1150_v28 = vpop.permute.xlu0 %1149 }
 0x12b   : > { %1917 = vrot.lane.b32.xlu1 %v4333_v29, %s4113_s24  ;;  %1236 = vst.msk [vmem:[#allocation3 + $0x28] sm:$0xf] %vm1225_vm7, %v1150_v28  ;;  %v3913_v29 = vpack.c.bf16 %v2041_v40, %v2041_v40 }
 0x12c   : > { %1923 = vrot.lane.b32.xlu0 %v4352_v43, %s4113_s24 }
 0x12d   : > { %v1148_v53 = vpop.permute.xlu1 %1147 }
 0x12e   : > { %1235 = vst.msk [vmem:[#allocation3 + $0x24] sm:$0xf] %vm1225_vm7, %v1148_v53  ;;  %v1154_v39 = vpop.permute.xlu0 %1153  ;;  %v1276_v53 = vld [vmem:[#allocation2 + $0xf1] sm:$0xff] }
 0x12f   : > { %1921 = vrot.lane.b32.xlu1 %v4337_v33, %s4113_s24  ;;  %1238 = vst.msk [vmem:[#allocation3 + $0x30] sm:$0xf] %vm1225_vm7, %v1154_v39  ;;  %v3943_v33 = vpack.c.bf16 %v2296_v9, %v2296_v9  ;;  %v3824_v41 = vpack.c.bf16 %v1276_v53, %v1276_v53 }
 0x130   : > { %2176 = vrot.lane.b32.xlu0 %v3817_v21, %s4114_s27 }
 0x131   : > { %v1152_v31 = vpop.permute.xlu1 %1151 }
 0x132   : > { %1237 = vst.msk [vmem:[#allocation3 + $0x2c] sm:$0xf] %vm1225_vm7, %v1152_v31  ;;  %v1158_v43 = vpop.permute.xlu0 %1157 }
 0x133   : > { %2174 = vrot.lane.b32.xlu1 %v3816_v2, %s4114_s27  ;;  %1240 = vst.msk [vmem:[#allocation3 + $0x38] sm:$0xf] %vm1225_vm7, %v1158_v43 }
 0x134   : > { %2180 = vrot.lane.b32.xlu0 %v3913_v29, %s4114_s27 }
 0x135   : > { %v1156_v37 = vpop.permute.xlu1 %1155 }
 0x136   : > { %1239 = vst.msk [vmem:[#allocation3 + $0x34] sm:$0xf] %vm1225_vm7, %v1156_v37  ;;  %v1162_v18 = vpop.permute.xlu0 %1161  ;;  %v260_v37 = vld [vmem:[%s4202_s18 + $0xf8] sm:$0xff] }
 0x137   : > { %2178 = vrot.lane.b32.xlu1 %v3912_v49, %s4114_s27  ;;  %1242 = vst.msk [vmem:[#allocation3 + $0x40] sm:$0xf] %vm1225_vm7, %v1162_v18  ;;  %v1534_v18 = vld [vmem:[#allocation2 + $0xfa] sm:$0xff] }
 0x138   : > { %2433 = vrot.lane.b32.xlu0 %v3943_v33, %s4115_s5  ;;  %v1789_v33 = vld [vmem:[#allocation2 + $0xf0] sm:$0xff]  ;;  %293 = vst.msk [vmem:[#allocation2 + $0x189] sm:$0xff] %vm183_vm0, %v260_v37  ;;  %v1796_v37 = vld [vmem:[#allocation2 + $0x140] sm:$0xff] }
 0x139   : > { %v1160_v20 = vpop.permute.xlu1 %1159  ;;  %v3886_v19 = vpack.c.bf16 %v1789_v33, %v1789_v33 }
 0x13a   : > { %1241 = vst.msk [vmem:[#allocation3 + $0x3c] sm:$0xf] %vm1225_vm7, %v1160_v20  ;;  %v1389_v25 = vpop.permute.xlu0 %1388  ;;  %v1791_v20 = vld [vmem:[#allocation2 + $0x108] sm:$0xff] }
 0x13b   : > { %2431 = vrot.lane.b32.xlu1 %v3942_v3, %s4115_s5  ;;  %1484 = vst.msk [vmem:[#allocation3 + $0x4] sm:$0xf] %vm1482_vm8, %v1389_v25  ;;  %v3857_v25 = vpack.c.bf16 %v1534_v18, %v1534_v18  ;;  %v3888_v34 = vpack.c.bf16 %v1791_v20, %v1791_v20 }
 0x13c   : > { %2437 = vrot.lane.b32.xlu0 %v3945_v10, %s4115_s5 }
 0x13d   : > { %v1387_v27 = vpop.permute.xlu1 %1386 }
 0x13e   : > { %1483 = vst.msk [vmem:[#allocation3] sm:$0xf] %vm1482_vm8, %v1387_v27  ;;  %v1393_v38 = vpop.permute.xlu0 %1392 }
 0x13f   : > { %2435 = vrot.lane.b32.xlu1 %v3944_v8, %s4115_s5  ;;  %1486 = vst.msk [vmem:[#allocation3 + $0xc] sm:$0xf] %vm1482_vm8, %v1393_v38 }
 0x140   : > { %1412 = vrot.lane.b32.xlu0 %v3913_v29, %s4111_s22  ;;  %v1533_v29 = vld [vmem:[#allocation2 + $0xf2] sm:$0xff] }
 0x141   : > { %v1391_v46 = vpop.permute.xlu1 %1390 }
 0x142   : > { %1485 = vst.msk [vmem:[#allocation3 + $0x8] sm:$0xf] %vm1482_vm8, %v1391_v46  ;;  %v1646_v52 = vpop.permute.xlu0 %1645  ;;  %v1792_v46 = vld [vmem:[#allocation2 + $0x110] sm:$0xff] }
 0x143   : > { %1410 = vrot.lane.b32.xlu1 %v3912_v49, %s4111_s22  ;;  %1741 = vst.msk [vmem:[#allocation3 + $0x4] sm:$0xf] %vm1739_vm9, %v1646_v52  ;;  %v259_v49 = vld [vmem:[%s4202_s18 + $0xf0] sm:$0xff] }
 0x144   : > { %1416 = vrot.lane.b32.xlu0 %v3821_v51, %s4111_s22  ;;  %292 = vst.msk [vmem:[#allocation2 + $0x181] sm:$0xff] %vm183_vm0, %v259_v49  ;;  %v2048_v52 = vld [vmem:[#allocation2 + $0x109] sm:$0xff] }
 0x145   : > { %v1644_v26 = vpop.permute.xlu1 %1643 }
 0x146   : > { %1740 = vst.msk [vmem:[#allocation3] sm:$0xf] %vm1739_vm9, %v1644_v26  ;;  %v1650_v56 = vpop.permute.xlu0 %1649  ;;  %v3889_v26 = vpack.c.bf16 %v1792_v46, %v1792_v46 }
 0x147   : > { %1414 = vrot.lane.b32.xlu1 %v3820_v54, %s4111_s22  ;;  %1743 = vst.msk [vmem:[#allocation3 + $0xc] sm:$0xf] %vm1739_vm9, %v1650_v56  ;;  %v3920_v56 = vpack.c.bf16 %v2048_v52, %v2048_v52 }
 0x148   : > { %1669 = vrot.lane.b32.xlu0 %v3945_v10, %s4112_s23 }
 0x149   : > { %v1648_v59 = vpop.permute.xlu1 %1647 }
 0x14a   : > { %1742 = vst.msk [vmem:[#allocation3 + $0x8] sm:$0xf] %vm1739_vm9, %v1648_v59  ;;  %v1904_v60 = vpop.permute.xlu0 %1903  ;;  %v2049_v59 = vld [vmem:[#allocation2 + $0x111] sm:$0xff] }
 0x14b   : > { %1667 = vrot.lane.b32.xlu1 %v3944_v8, %s4112_s23  ;;  %1999 = vst.msk [vmem:[#allocation3 + $0x4] sm:$0xf] %vm1997_vm10, %v1904_v60  ;;  %v1790_v8 = vld [vmem:[#allocation2 + $0xf8] sm:$0xff]  ;;  %v2305_v60 = vld [vmem:[#allocation2 + $0x10a] sm:$0xff] }
 0x14c   : > { %1673 = vrot.lane.b32.xlu0 %v3853_v24, %s4112_s23  ;;  %v3887_v44 = vpack.c.bf16 %v1790_v8, %v1790_v8  ;;  %v2053_v8 = vld [vmem:[#allocation2 + $0x141] sm:$0xff] }
 0x14d   : > { %v1902_v61 = vpop.permute.xlu1 %1901  ;;  %v3925_v46 = vpack.c.bf16 %v2053_v8, %v2053_v8 }
 0x14e   : > { %1998 = vst.msk [vmem:[#allocation3] sm:$0xf] %vm1997_vm10, %v1902_v61  ;;  %v1908_v32 = vpop.permute.xlu0 %1907  ;;  %v3921_v61 = vpack.c.bf16 %v2049_v59, %v2049_v59 }
 0x14f   : > { %1671 = vrot.lane.b32.xlu1 %v3852_v17, %s4112_s23  ;;  %2001 = vst.msk [vmem:[#allocation3 + $0xc] sm:$0xf] %vm1997_vm10, %v1908_v32 }
 0x150   : > { %1927 = vrot.lane.b32.xlu0 %v4362_v48, %s4113_s24 }
 0x151   : > { %v1906_v62 = vpop.permute.xlu1 %1905 }
 0x152   : > { %2000 = vst.msk [vmem:[#allocation3 + $0x8] sm:$0xf] %vm1997_vm10, %v1906_v62  ;;  %v2161_v23 = vpop.permute.xlu0 %2160 }
 0x153   : > { %1925 = vrot.lane.b32.xlu1 %v4350_v42, %s4113_s24  ;;  %2256 = vst.msk [vmem:[#allocation3 + $0x4] sm:$0xf] %vm2254_vm11, %v2161_v23  ;;  %v3917_v42 = vpack.c.bf16 %v2045_v30, %v2045_v30  ;;  %v3952_v23 = vpack.c.bf16 %v2305_v60, %v2305_v60  ;;  %v2306_v30 = vld [vmem:[#allocation2 + $0x112] sm:$0xff] }
 0x154   : > { %1931 = vrot.lane.b32.xlu0 %v4375_v55, %s4113_s24 }
 0x155   : > { %v2159_v35 = vpop.permute.xlu1 %2158 }
 0x156   : > { %2255 = vst.msk [vmem:[#allocation3] sm:$0xf] %vm2254_vm11, %v2159_v35  ;;  %v2165_v48 = vpop.permute.xlu0 %2164 }
 0x157   : > { %1929 = vrot.lane.b32.xlu1 %v4360_v47, %s4113_s24  ;;  %2258 = vst.msk [vmem:[#allocation3 + $0xc] sm:$0xf] %vm2254_vm11, %v2165_v48  ;;  %v2302_v47 = vld [vmem:[#allocation2 + $0xe2] sm:$0xff] }
 0x158   : > { %2184 = vrot.lane.b32.xlu0 %v3821_v51, %s4114_s27  ;;  %v3949_v16 = vpack.c.bf16 %v2302_v47, %v2302_v47 }
 0x159   : > { %v2163_v0 = vpop.permute.xlu1 %2162 }
 0x15a   : > { %2257 = vst.msk [vmem:[#allocation3 + $0x8] sm:$0xf] %vm2254_vm11, %v2163_v0  ;;  %v2418_v36 = vpop.permute.xlu0 %2417  ;;  %v1023_v0 = vld [vmem:[#allocation2 + $0x120] sm:$0xff] }
 0x15b   : > { %2182 = vrot.lane.b32.xlu1 %v3820_v54, %s4114_s27  ;;  %2513 = vst.msk [vmem:[#allocation3 + $0x4] sm:$0xf] %vm2511_vm12, %v2418_v36  ;;  %v3953_v36 = vpack.c.bf16 %v2306_v30, %v2306_v30 }
 0x15c   : > { %2188 = vrot.lane.b32.xlu0 %v3917_v42, %s4114_s27 }
 0x15d   : > { %v2416_v4 = vpop.permute.xlu1 %2415 }
 0x15e   : > { %2512 = vst.msk [vmem:[#allocation3] sm:$0xf] %vm2511_vm12, %v2416_v4  ;;  %v2422_v21 = vpop.permute.xlu0 %2421  ;;  %v3796_v4 = vpack.c.bf16 %v1023_v0, %v1023_v0  ;;  %v1285_v0 = vld [vmem:[#allocation2 + $0x159] sm:$0xff] }
 0x15f   : > { %2186 = vrot.lane.b32.xlu1 %v3916_v13, %s4114_s27  ;;  %2515 = vst.msk [vmem:[#allocation3 + $0xc] sm:$0xf] %vm2511_vm12, %v2422_v21  ;;  %v1024_v21 = vld [vmem:[#allocation2 + $0x128] sm:$0xff] }
 0x160   : > { %2441 = vrot.lane.b32.xlu0 %v3853_v24, %s4115_s5 }
 0x161   : > { %v2420_v2 = vpop.permute.xlu1 %2419 }
 0x162   : > { %2514 = vst.msk [vmem:[#allocation3 + $0x8] sm:$0xf] %vm2511_vm12, %v2420_v2  ;;  %v1397_v7 = vpop.permute.xlu0 %1396  ;;  %v1280_v2 = vld [vmem:[#allocation2 + $0x121] sm:$0xff] }
 0x163   : > { %2439 = vrot.lane.b32.xlu1 %v3852_v17, %s4115_s5  ;;  %1488 = vst.msk [vmem:[#allocation3 + $0x14] sm:$0xf] %vm1482_vm8, %v1397_v7  ;;  %v3797_v7 = vpack.c.bf16 %v1024_v21, %v1024_v21 }
 0x164   : > { %2445 = vrot.lane.b32.xlu0 %v3949_v16, %s4115_s5 }
 0x165   : > { %v1395_v22 = vpop.permute.xlu1 %1394  ;;  %v4083_v12 = vld [vmem:[#allocation3] sm:$0xff]  }
 0x166   : > { %1487 = vst.msk [vmem:[#allocation3 + $0x10] sm:$0xf] %vm1482_vm8, %v1395_v22  ;;  %4023 = vmatprep.mubr.msk.bf16.mxu0 %vm2676_vm13, %v4083_v12  ;;  %v1401_v6 = vpop.permute.xlu0 %1400  ;;  %v3828_v22 = vpack.c.bf16 %v1280_v2, %v1280_v2  ;;  %v1542_v2 = vld [vmem:[#allocation2 + $0x15a] sm:$0xff] }
 0x167   : > { %2443 = vrot.lane.b32.xlu1 %v3948_v5, %s4115_s5  ;;  %1490 = vst.msk [vmem:[#allocation3 + $0x1c] sm:$0xf] %vm1482_vm8, %v1401_v6  ;;  %v1281_v6 = vld [vmem:[#allocation2 + $0x129] sm:$0xff] }
 0x168   : > { %1165 = vrot.lane.b32.xlu0 %v4364_v50, %s4110_s21 }
 0x169   : > { %v1399_v45 = vpop.permute.xlu1 %1398  ;;  %v4084_v28 = vld [vmem:[#allocation3 + $0x8] sm:$0xff]  }
 0x16a   : > { %1489 = vst.msk [vmem:[#allocation3 + $0x18] sm:$0xf] %vm1482_vm8, %v1399_v45  ;;  %4024 = vmatmul.mubr.msk.bf16.vlgmr.msra.gmra.mxu0 %vm2676_vm13, %v4084_v28  ;;  %v1654_v40 = vpop.permute.xlu0 %1653  ;;  %v1537_v28 = vld [vmem:[#allocation2 + $0x122] sm:$0xff] }
 0x16b   : > { %1163 = vrot.lane.b32.xlu1 %v4375_v55, %s4110_s21  ;;  %1745 = vst.msk [vmem:[#allocation3 + $0x14] sm:$0xf] %vm1739_vm9, %v1654_v40  ;;  %v1277_v55 = vld [vmem:[#allocation2 + $0xf9] sm:$0xff]  ;;  %v3829_v40 = vpack.c.bf16 %v1281_v6, %v1281_v6 }
 0x16c   : > { %1418 = vrot.lane.b32.xlu0 %v3916_v13, %s4111_s22  ;;  %v3825_v43 = vpack.c.bf16 %v1277_v55, %v1277_v55  ;;  %v1538_v55 = vld [vmem:[#allocation2 + $0x12a] sm:$0xff] }
 0x16d   : > { %v1652_v39 = vpop.permute.xlu1 %1651 }
 0x16e   : > { %1744 = vst.msk [vmem:[#allocation3 + $0x10] sm:$0xf] %vm1739_vm9, %v1652_v39  ;;  %v1658_v50 = vpop.permute.xlu0 %1657 }
 0x16f   : > { %1167 = vrot.lane.b32.xlu1 %v4377_v57, %s4110_s21  ;;  %1747 = vst.msk [vmem:[#allocation3 + $0x1c] sm:$0xf] %vm1739_vm9, %v1658_v50  ;;  %v3856_v57 = vpack.c.bf16 %v1533_v29, %v1533_v29  ;;  %v1795_v29 = vld [vmem:[#allocation2 + $0x138] sm:$0xff] }
 0x170   : > { %1422 = vrot.lane.b32.xlu0 %v3824_v41, %s4111_s22 }
 0x171   : > { %v1656_v31 = vpop.permute.xlu1 %1655 }
 0x172   : > { %1746 = vst.msk [vmem:[#allocation3 + $0x18] sm:$0xf] %vm1739_vm9, %v1656_v31  ;;  %v1912_v9 = vpop.permute.xlu0 %1911 }
 0x173   : > { %1420 = vrot.lane.b32.xlu1 %v3917_v42, %s4111_s22  ;;  %2003 = vst.msk [vmem:[#allocation3 + $0x14] sm:$0xf] %vm1997_vm10, %v1912_v9 }
 0x174   : > { %1675 = vrot.lane.b32.xlu0 %v3948_v5, %s4112_s23 }
 0x175   : > { %v1910_v11 = vpop.permute.xlu1 %1909 }
 0x176   : > { %2002 = vst.msk [vmem:[#allocation3 + $0x10] sm:$0xf] %vm1997_vm10, %v1910_v11  ;;  %v1916_v14 = vpop.permute.xlu0 %1915  ;;  %v3892_v11 = vpack.c.bf16 %v1795_v29, %v1795_v29 }
 0x177   : > { %1424 = vrot.lane.b32.xlu1 %v3825_v43, %s4111_s22  ;;  %2005 = vst.msk [vmem:[#allocation3 + $0x1c] sm:$0xf] %vm1997_vm10, %v1916_v14  ;;  %v2052_v14 = vld [vmem:[#allocation2 + $0x139] sm:$0xff] }
 0x178   : > { %1679 = vrot.lane.b32.xlu0 %v3856_v57, %s4112_s23 }
 0x179   : > { %v1914_v3 = vpop.permute.xlu1 %1913 }
 0x17a   : > { %2004 = vst.msk [vmem:[#allocation3 + $0x18] sm:$0xf] %vm1997_vm10, %v1914_v3  ;;  %v2169_v10 = vpop.permute.xlu0 %2168  ;;  %v3893_v3 = vpack.c.bf16 %v1796_v37, %v1796_v37 }
 0x17b   : > { %1677 = vrot.lane.b32.xlu1 %v3949_v16, %s4112_s23  ;;  %2260 = vst.msk [vmem:[#allocation3 + $0x14] sm:$0xf] %vm2254_vm11, %v2169_v10  ;;  %v3924_v10 = vpack.c.bf16 %v2052_v14, %v2052_v14 }
 0x17c   : > { %1933 = vrot.lane.b32.xlu0 %v3886_v19, %s4113_s24 }
 0x17d   : > { %v2167_v27 = vpop.permute.xlu1 %2166 }
 0x17e   : > { %2259 = vst.msk [vmem:[#allocation3 + $0x10] sm:$0xf] %vm2254_vm11, %v2167_v27  ;;  %v2173_v38 = vpop.permute.xlu0 %2172 }
 0x17f   : > { %1681 = vrot.lane.b32.xlu1 %v3857_v25, %s4112_s23  ;;  %2262 = vst.msk [vmem:[#allocation3 + $0x1c] sm:$0xf] %vm2254_vm11, %v2173_v38  ;;  %v2309_v38 = vld [vmem:[#allocation2 + $0x13a] sm:$0xff] }
 0x180   : > { %1937 = vrot.lane.b32.xlu0 %v3888_v34, %s4113_s24  ;;  %v3956_v52 = vpack.c.bf16 %v2309_v38, %v2309_v38  ;;  %v1032_v38 = vld [vmem:[#allocation2 + $0x188] sm:$0xff] }
 0x181   : > { %v2171_v51 = vpop.permute.xlu1 %2170 }
 0x182   : > { %2261 = vst.msk [vmem:[#allocation3 + $0x18] sm:$0xf] %vm2254_vm11, %v2171_v51  ;;  %v2426_v54 = vpop.permute.xlu0 %2425 }
 0x183   : > { %1935 = vrot.lane.b32.xlu1 %v3887_v44, %s4113_s24  ;;  %2517 = vst.msk [vmem:[#allocation3 + $0x14] sm:$0xf] %vm2511_vm12, %v2426_v54 }
 0x184   : > { %2190 = vrot.lane.b32.xlu0 %v3824_v41, %s4114_s27  ;;  %v3860_v41 = vpack.c.bf16 %v1537_v28, %v1537_v28 }
 0x185   : > { %v2424_v15 = vpop.permute.xlu1 %2423 }
 0x186   : > { %2516 = vst.msk [vmem:[#allocation3 + $0x10] sm:$0xf] %vm2511_vm12, %v2424_v15  ;;  %v2430_v58 = vpop.permute.xlu0 %2429 }
 0x187   : > { %1939 = vrot.lane.b32.xlu1 %v3889_v26, %s4113_s24  ;;  %2519 = vst.msk [vmem:[#allocation3 + $0x1c] sm:$0xf] %vm2511_vm12, %v2430_v58 }
 0x188   : > { %2194 = vrot.lane.b32.xlu0 %v3920_v56, %s4114_s27 }
 0x189   : > { %v2428_v24 = vpop.permute.xlu1 %2427 }
 0x18a   : > { %2518 = vst.msk [vmem:[#allocation3 + $0x18] sm:$0xf] %vm2511_vm12, %v2428_v24  ;;  %v1405_v17 = vpop.permute.xlu0 %1404 }
 0x18b   : > { %2192 = vrot.lane.b32.xlu1 %v3825_v43, %s4114_s27  ;;  %1492 = vst.msk [vmem:[#allocation3 + $0x24] sm:$0xf] %vm1482_vm8, %v1405_v17  ;;  %v3861_v43 = vpack.c.bf16 %v1538_v55, %v1538_v55 }
 0x18c   : > { %2447 = vrot.lane.b32.xlu0 %v3856_v57, %s4115_s5 }
 0x18d   : > { %v1403_v32 = vpop.permute.xlu1 %1402  ;;  %v4085_v62 = vld [vmem:[#allocation3 + $0x10] sm:$0xff]  }
 0x18e   : > { %1491 = vst.msk [vmem:[#allocation3 + $0x20] sm:$0xf] %vm1482_vm8, %v1403_v32  ;;  %4027 = vmatprep.mubr.msk.bf16.mxu0 %vm2676_vm13, %v4085_v62  ;;  %v1409_v35 = vpop.permute.xlu0 %1408  ;;  %v1284_v62 = vld [vmem:[#allocation2 + $0x151] sm:$0xff] }
 0x18f   : > { %2196 = vrot.lane.b32.xlu1 %v3921_v61, %s4114_s27  ;;  %1494 = vst.msk [vmem:[#allocation3 + $0x2c] sm:$0xf] %vm1482_vm8, %v1409_v35 }
 0x190   : > { %2451 = vrot.lane.b32.xlu0 %v3952_v23, %s4115_s5 }
 0x191   : > { %v1407_v48 = vpop.permute.xlu1 %1406  ;;  %v4086_v63 = vld [vmem:[#allocation3 + $0x18] sm:$0xff]  }
 0x192   : > { %1493 = vst.msk [vmem:[#allocation3 + $0x28] sm:$0xf] %vm1482_vm8, %v1407_v48  ;;  %4028 = vmatmul.mubr.msk.bf16.gmra.mxu0 %vm2676_vm13, %v4086_v63  ;;  %v1662_v42 = vpop.permute.xlu0 %1661  ;;  %v3832_v48 = vpack.c.bf16 %v1284_v62, %v1284_v62  ;;  %v1546_v62 = vld [vmem:[#allocation2 + $0x18a] sm:$0xff] }
 0x193   : > { %2449 = vrot.lane.b32.xlu1 %v3857_v25, %s4115_s5  ;;  %1749 = vst.msk [vmem:[#allocation3 + $0x24] sm:$0xf] %vm1739_vm9, %v1662_v42 }
 0x194   : > { %1169 = vrot.lane.b32.xlu0 %v3888_v34, %s4110_s21 }
 0x195   : > { %v1660_v13 = vpop.permute.xlu1 %1659 }
 0x196   : > { %1748 = vst.msk [vmem:[#allocation3 + $0x20] sm:$0xf] %vm1739_vm9, %v1660_v13  ;;  %v1666_v47 = vpop.permute.xlu0 %1665 }
 0x197   : > { %2453 = vrot.lane.b32.xlu1 %v3953_v36, %s4115_s5  ;;  %1751 = vst.msk [vmem:[#allocation3 + $0x2c] sm:$0xf] %vm1739_vm9, %v1666_v47 }
 0x198   : > { %1173 = vrot.lane.b32.xlu0 %v3796_v4, %s4110_s21 }
 0x199   : > { %v1664_v1 = vpop.permute.xlu1 %1663 }
 0x19a   : > { %1750 = vst.msk [vmem:[#allocation3 + $0x28] sm:$0xf] %vm1739_vm9, %v1664_v1  ;;  %v1920_v16 = vpop.permute.xlu0 %1919 }
 0x19b   : > { %1171 = vrot.lane.b32.xlu1 %v3889_v26, %s4110_s21  ;;  %2007 = vst.msk [vmem:[#allocation3 + $0x24] sm:$0xf] %vm1997_vm10, %v1920_v16  ;;  %v2310_v26 = vld [vmem:[#allocation2 + $0x142] sm:$0xff] }
 0x19c   : > { %1426 = vrot.lane.b32.xlu0 %v3920_v56, %s4111_s22  ;;  %v1027_v56 = vld [vmem:[#allocation2 + $0x150] sm:$0xff]  ;;  %v3957_v59 = vpack.c.bf16 %v2310_v26, %v2310_v26 }
 0x19d   : > { %v1918_v5 = vpop.permute.xlu1 %1917  ;;  %v3800_v60 = vpack.c.bf16 %v1027_v56, %v1027_v56  ;;  %v1289_v56 = vld [vmem:[#allocation2 + $0x189] sm:$0xff] }
 0x19e   : > { %2006 = vst.msk [vmem:[#allocation3 + $0x20] sm:$0xf] %vm1997_vm10, %v1918_v5  ;;  %v1924_v12 = vpop.permute.xlu0 %1923  ;;  %v3865_v5 = vpack.c.bf16 %v1542_v2, %v1542_v2 }
 0x19f   : > { %1175 = vrot.lane.b32.xlu1 %v3797_v7, %s4110_s21  ;;  %2009 = vst.msk [vmem:[#allocation3 + $0x2c] sm:$0xf] %vm1997_vm10, %v1924_v12 }
 0x1a0   : > { %1430 = vrot.lane.b32.xlu0 %v3828_v22, %s4111_s22 }
 0x1a1   : > { %v1922_v45 = vpop.permute.xlu1 %1921 }
 0x1a2   : > { %2008 = vst.msk [vmem:[#allocation3 + $0x28] sm:$0xf] %vm1997_vm10, %v1922_v45  ;;  %v2177_v53 = vpop.permute.xlu0 %2176 }
 0x1a3   : > { %1428 = vrot.lane.b32.xlu1 %v3921_v61, %s4111_s22  ;;  %2264 = vst.msk [vmem:[#allocation3 + $0x24] sm:$0xf] %vm2254_vm11, %v2177_v53  ;;  %v1028_v61 = vld [vmem:[#allocation2 + $0x158] sm:$0xff]  ;;  %v1800_v53 = vld [vmem:[#allocation2 + $0x170] sm:$0xff] }
 0x1a4   : > { %1683 = vrot.lane.b32.xlu0 %v3952_v23, %s4112_s23  ;;  %v3801_v35 = vpack.c.bf16 %v1028_v61, %v1028_v61 }
 0x1a5   : > { %v2175_v39 = vpop.permute.xlu1 %2174 }
 0x1a6   : > { %2263 = vst.msk [vmem:[#allocation3 + $0x20] sm:$0xf] %vm2254_vm11, %v2175_v39  ;;  %v2181_v50 = vpop.permute.xlu0 %2180 }
 0x1a7   : > { %1432 = vrot.lane.b32.xlu1 %v3829_v40, %s4111_s22  ;;  %2266 = vst.msk [vmem:[#allocation3 + $0x2c] sm:$0xf] %vm2254_vm11, %v2181_v50  ;;  %v3897_v50 = vpack.c.bf16 %v1800_v53, %v1800_v53 }
 0x1a8   : > { %1687 = vrot.lane.b32.xlu0 %v3860_v41, %s4112_s23 }
 0x1a9   : > { %v2179_v31 = vpop.permute.xlu1 %2178 }
 0x1aa   : > { %2265 = vst.msk [vmem:[#allocation3 + $0x28] sm:$0xf] %vm2254_vm11, %v2179_v31  ;;  %v2434_v9 = vpop.permute.xlu0 %2433 }
 0x1ab   : > { %1685 = vrot.lane.b32.xlu1 %v3953_v36, %s4112_s23  ;;  %2521 = vst.msk [vmem:[#allocation3 + $0x24] sm:$0xf] %vm2511_vm12, %v2434_v9  ;;  %v1541_v36 = vld [vmem:[#allocation2 + $0x152] sm:$0xff] }
 0x1ac   : > { %1941 = vrot.lane.b32.xlu0 %v3796_v4, %s4113_s24  ;;  %v3833_v4 = vpack.c.bf16 %v1285_v0, %v1285_v0  ;;  %v3864_v21 = vpack.c.bf16 %v1541_v36, %v1541_v36 }
 0x1ad   : > { %v2432_v49 = vpop.permute.xlu1 %2431 }
 0x1ae   : > { %2520 = vst.msk [vmem:[#allocation3 + $0x20] sm:$0xf] %vm2511_vm12, %v2432_v49  ;;  %v2438_v57 = vpop.permute.xlu0 %2437 }
 0x1af   : > { %1689 = vrot.lane.b32.xlu1 %v3861_v43, %s4112_s23  ;;  %2523 = vst.msk [vmem:[#allocation3 + $0x2c] sm:$0xf] %vm2511_vm12, %v2438_v57 }
 0x1b0   : > { %1945 = vrot.lane.b32.xlu0 %v3892_v11, %s4113_s24 }
 0x1b1   : > { %v2436_v33 = vpop.permute.xlu1 %2435 }
 0x1b2   : > { %2522 = vst.msk [vmem:[#allocation3 + $0x28] sm:$0xf] %vm2511_vm12, %v2436_v33  ;;  %v1413_v18 = vpop.permute.xlu0 %1412 }
 0x1b3   : > { %1943 = vrot.lane.b32.xlu1 %v3797_v7, %s4113_s24  ;;  %1496 = vst.msk [vmem:[#allocation3 + $0x34] sm:$0xf] %vm1482_vm8, %v1413_v18  ;;  %v1799_v7 = vld [vmem:[#allocation2 + $0x168] sm:$0xff] }
 0x1b4   : > { %2198 = vrot.lane.b32.xlu0 %v3828_v22, %s4114_s27  ;;  %v3896_v45 = vpack.c.bf16 %v1799_v7, %v1799_v7 }
 0x1b5   : > { %v1411_v19 = vpop.permute.xlu1 %1410  ;;  %v4087_v20 = vld [vmem:[#allocation3 + $0x20] sm:$0xff]  }
 0x1b6   : > { %1495 = vst.msk [vmem:[#allocation3 + $0x30] sm:$0xf] %vm1482_vm8, %v1411_v19  ;;  %4031 = vmatprep.mubr.msk.bf16.mxu0 %vm2676_vm13, %v4087_v20  ;;  %v1417_v25 = vpop.permute.xlu0 %1416  ;;  %v1031_v20 = vld [vmem:[#allocation2 + $0x180] sm:$0xff] }
 0x1b7   : > { %1947 = vrot.lane.b32.xlu1 %v3893_v3, %s4113_s24  ;;  %1498 = vst.msk [vmem:[#allocation3 + $0x3c] sm:$0xf] %vm1482_vm8, %v1417_v25 }
 0x1b8   : > { %2202 = vrot.lane.b32.xlu0 %v3924_v10, %s4114_s27 }
 0x1b9   : > { %v1415_v27 = vpop.permute.xlu1 %1414  ;;  %v4088_v34 = vld [vmem:[#allocation3 + $0x28] sm:$0xff]  }
 0x1ba   : > { %1497 = vst.msk [vmem:[#allocation3 + $0x38] sm:$0xf] %vm1482_vm8, %v1415_v27  ;;  %4032 = vmatmul.mubr.msk.bf16.gmra.mxu0 %vm2676_vm13, %v4088_v34  ;;  %v1670_v44 = vpop.permute.xlu0 %1669  ;;  %v3804_v27 = vpack.c.bf16 %v1031_v20, %v1031_v20 }
 0x1bb   : > { %2200 = vrot.lane.b32.xlu1 %v3829_v40, %s4114_s27  ;;  %1753 = vst.msk [vmem:[#allocation3 + $0x34] sm:$0xf] %vm1739_vm9, %v1670_v44 }
 0x1bc   : > { %2455 = vrot.lane.b32.xlu0 %v3860_v41, %s4115_s5  ;;  %v2056_v41 = vld [vmem:[#allocation2 + $0x169] sm:$0xff] }
 0x1bd   : > { %v1668_v51 = vpop.permute.xlu1 %1667  ;;  %v3928_v29 = vpack.c.bf16 %v2056_v41, %v2056_v41  ;;  %v2318_v41 = vld [vmem:[#allocation2 + $0x1a2] sm:$0xff] }
 0x1be   : > { %1752 = vst.msk [vmem:[#allocation3 + $0x30] sm:$0xf] %vm1739_vm9, %v1668_v51  ;;  %v1674_v54 = vpop.permute.xlu0 %1673  ;;  %v3805_v51 = vpack.c.bf16 %v1032_v38, %v1032_v38 }
 0x1bf   : > { %2204 = vrot.lane.b32.xlu1 %v3925_v46, %s4114_s27  ;;  %1755 = vst.msk [vmem:[#allocation3 + $0x3c] sm:$0xf] %vm1739_vm9, %v1674_v54 }
 0x1c0   : > { %2459 = vrot.lane.b32.xlu0 %v3956_v52, %s4115_s5 }
 0x1c1   : > { %v1672_v15 = vpop.permute.xlu1 %1671 }
 0x1c2   : > { %1754 = vst.msk [vmem:[#allocation3 + $0x38] sm:$0xf] %vm1739_vm9, %v1672_v15  ;;  %v1928_v58 = vpop.permute.xlu0 %1927 }
 0x1c3   : > { %2457 = vrot.lane.b32.xlu1 %v3861_v43, %s4115_s5  ;;  %2011 = vst.msk [vmem:[#allocation3 + $0x34] sm:$0xf] %vm1997_vm10, %v1928_v58  ;;  %v2057_v43 = vld [vmem:[#allocation2 + $0x171] sm:$0xff] }
 0x1c4   : > { %1177 = vrot.lane.b32.xlu0 %v3892_v11, %s4110_s21  ;;  %v2313_v11 = vld [vmem:[#allocation2 + $0x16a] sm:$0xff]  ;;  %v3929_v57 = vpack.c.bf16 %v2057_v43, %v2057_v43 }
 0x1c5   : > { %v1926_v24 = vpop.permute.xlu1 %1925  ;;  %v3960_v14 = vpack.c.bf16 %v2313_v11, %v2313_v11 }
 0x1c6   : > { %2010 = vst.msk [vmem:[#allocation3 + $0x30] sm:$0xf] %vm1997_vm10, %v1926_v24  ;;  %v1932_v17 = vpop.permute.xlu0 %1931  ;;  %v3837_v24 = vpack.c.bf16 %v1289_v56, %v1289_v56 }
 0x1c7   : > { %2461 = vrot.lane.b32.xlu1 %v3957_v59, %s4115_s5  ;;  %2013 = vst.msk [vmem:[#allocation3 + $0x3c] sm:$0xf] %vm1997_vm10, %v1932_v17 }
 0x1c8   : > { %1181 = vrot.lane.b32.xlu0 %v3800_v60, %s4110_s21 }
 0x1c9   : > { %v1930_v32 = vpop.permute.xlu1 %1929 }
 0x1ca   : > { %2012 = vst.msk [vmem:[#allocation3 + $0x38] sm:$0xf] %vm1997_vm10, %v1930_v32  ;;  %v2185_v23 = vpop.permute.xlu0 %2184 }
 0x1cb   : > { %1179 = vrot.lane.b32.xlu1 %v3893_v3, %s4110_s21  ;;  %2268 = vst.msk [vmem:[#allocation3 + $0x34] sm:$0xf] %vm2254_vm11, %v2185_v23  ;;  %v2314_v3 = vld [vmem:[#allocation2 + $0x172] sm:$0xff] }
 0x1cc   : > { %1434 = vrot.lane.b32.xlu0 %v3924_v10, %s4111_s22  ;;  %v3961_v10 = vpack.c.bf16 %v2314_v3, %v2314_v3 }
 0x1cd   : > { %v2183_v30 = vpop.permute.xlu1 %2182 }
 0x1ce   : > { %2267 = vst.msk [vmem:[#allocation3 + $0x30] sm:$0xf] %vm2254_vm11, %v2183_v30  ;;  %v2189_v63 = vpop.permute.xlu0 %2188  ;;  %v3869_v30 = vpack.c.bf16 %v1546_v62, %v1546_v62 }
 0x1cf   : > { %1183 = vrot.lane.b32.xlu1 %v3801_v35, %s4110_s21  ;;  %2270 = vst.msk [vmem:[#allocation3 + $0x3c] sm:$0xf] %vm2254_vm11, %v2189_v63 }
 0x1d0   : > { %1438 = vrot.lane.b32.xlu0 %v3832_v48, %s4111_s22 }
 0x1d1   : > { %v2187_v42 = vpop.permute.xlu1 %2186 }
 0x1d2   : > { %2269 = vst.msk [vmem:[#allocation3 + $0x38] sm:$0xf] %vm2254_vm11, %v2187_v42  ;;  %v2442_v13 = vpop.permute.xlu0 %2441 }
 0x1d3   : > { %1436 = vrot.lane.b32.xlu1 %v3925_v46, %s4111_s22  ;;  %2525 = vst.msk [vmem:[#allocation3 + $0x34] sm:$0xf] %vm2511_vm12, %v2442_v13  ;;  %v1288_v46 = vld [vmem:[#allocation2 + $0x181] sm:$0xff] }
 0x1d4   : > { %1691 = vrot.lane.b32.xlu0 %v3956_v52, %s4112_s23  ;;  %v3836_v26 = vpack.c.bf16 %v1288_v46, %v1288_v46  ;;  %v1804_v13 = vld [vmem:[#allocation2 + $0x1a0] sm:$0xff] }
 0x1d5   : > { %v2440_v47 = vpop.permute.xlu1 %2439 }
 0x1d6   : > { %2524 = vst.msk [vmem:[#allocation3 + $0x30] sm:$0xf] %vm2511_vm12, %v2440_v47  ;;  %v2446_v1 = vpop.permute.xlu0 %2445 }
 0x1d7   : > { %1440 = vrot.lane.b32.xlu1 %v3833_v4, %s4111_s22  ;;  %2527 = vst.msk [vmem:[#allocation3 + $0x3c] sm:$0xf] %vm2511_vm12, %v2446_v1  ;;  %v3901_v1 = vpack.c.bf16 %v1804_v13, %v1804_v13 }
 0x1d8   : > { %1695 = vrot.lane.b32.xlu0 %v3864_v21, %s4112_s23 }
 0x1d9   : > { %v2444_v16 = vpop.permute.xlu1 %2443 }
 0x1da   : > { %2526 = vst.msk [vmem:[#allocation3 + $0x38] sm:$0xf] %vm2511_vm12, %v2444_v16  ;;  %v1166_v22 = vpop.permute.xlu0 %1165 }
 0x1db   : > { %1693 = vrot.lane.b32.xlu1 %v3957_v59, %s4112_s23  ;;  %1244 = vst.msk [vmem:[#allocation3 + $0x48] sm:$0xf] %vm1225_vm7, %v1166_v22  ;;  %v1545_v59 = vld [vmem:[#allocation2 + $0x182] sm:$0xff] }
 0x1dc   : > { %1949 = vrot.lane.b32.xlu0 %v3800_v60, %s4113_s24  ;;  %v3868_v61 = vpack.c.bf16 %v1545_v59, %v1545_v59  ;;  %v2061_v22 = vld [vmem:[#allocation2 + $0x1a1] sm:$0xff] }
 0x1dd   : > { %v1164_v12 = vpop.permute.xlu1 %1163  ;;  %v4089_v6 = vld [vmem:[#allocation3 + $0x30] sm:$0xff]  }
 0x1de   : > { %1243 = vst.msk [vmem:[#allocation3 + $0x44] sm:$0xf] %vm1225_vm7, %v1164_v12  ;;  %4035 = vmatprep.mubr.msk.bf16.mxu0 %vm2676_vm13, %v4089_v6  ;;  %v1419_v28 = vpop.permute.xlu0 %1418  ;;  %v2317_v6 = vld [vmem:[#allocation2 + $0x19a] sm:$0xff] }
 0x1df   : > { %1697 = vrot.lane.b32.xlu1 %v3865_v5, %s4112_s23  ;;  %1499 = vst.msk [vmem:[#allocation3 + $0x40] sm:$0xf] %vm1482_vm8, %v1419_v28 }
 0x1e0   : > { %1953 = vrot.lane.b32.xlu0 %v3896_v45, %s4113_s24 }
 0x1e1   : > { %v1168_v40 = vpop.permute.xlu1 %1167  ;;  %v4090_v39 = vld [vmem:[#allocation3 + $0x38] sm:$0xff]  }
 0x1e2   : > { %1245 = vst.msk [vmem:[#allocation3 + $0x4c] sm:$0xf] %vm1225_vm7, %v1168_v40  ;;  %4036 = vmatmul.mubr.msk.bf16.gmra.mxu0 %vm2676_vm13, %v4090_v39  ;;  %v1423_v55 = vpop.permute.xlu0 %1422  ;;  %v3964_v40 = vpack.c.bf16 %v2317_v6, %v2317_v6 }
 0x1e3   : > { %1951 = vrot.lane.b32.xlu1 %v3801_v35, %s4113_s24  ;;  %1501 = vst.msk [vmem:[#allocation3 + $0x48] sm:$0xf] %vm1482_vm8, %v1423_v55  ;;  %v1803_v35 = vld [vmem:[#allocation2 + $0x198] sm:$0xff]  ;;  %v3965_v55 = vpack.c.bf16 %v2318_v41, %v2318_v41 }
 0x1e4   : > { %2206 = vrot.lane.b32.xlu0 %v3832_v48, %s4114_s27  ;;  %v3900_v42 = vpack.c.bf16 %v1803_v35, %v1803_v35 }
 0x1e5   : > { %v1421_v31 = vpop.permute.xlu1 %1420 }
 0x1e6   : > { %1500 = vst.msk [vmem:[#allocation3 + $0x44] sm:$0xf] %vm1482_vm8, %v1421_v31  ;;  %v1676_v9 = vpop.permute.xlu0 %1675 }
 0x1e7   : > { %1955 = vrot.lane.b32.xlu1 %v3897_v50, %s4113_s24  ;;  %1756 = vst.msk [vmem:[#allocation3 + $0x40] sm:$0xf] %vm1739_vm9, %v1676_v9 }
 0x1e8   : > { %2210 = vrot.lane.b32.xlu0 %v3928_v29, %s4114_s27 }
 0x1e9   : > { %v1425_v49 = vpop.permute.xlu1 %1424 }
 0x1ea   : > { %1502 = vst.msk [vmem:[#allocation3 + $0x4c] sm:$0xf] %vm1482_vm8, %v1425_v49  ;;  %v1680_v37 = vpop.permute.xlu0 %1679 }
 0x1eb   : > { %2208 = vrot.lane.b32.xlu1 %v3833_v4, %s4114_s27  ;;  %1758 = vst.msk [vmem:[#allocation3 + $0x48] sm:$0xf] %vm1739_vm9, %v1680_v37 }
 0x1ec   : > { %2463 = vrot.lane.b32.xlu0 %v3864_v21, %s4115_s5  ;;  %v2060_v21 = vld [vmem:[#allocation2 + $0x199] sm:$0xff] }
 0x1ed   : > { %v1678_v33 = vpop.permute.xlu1 %1677  ;;  %v3932_v7 = vpack.c.bf16 %v2060_v21, %v2060_v21 }
 0x1ee   : > { %1757 = vst.msk [vmem:[#allocation3 + $0x44] sm:$0xf] %vm1739_vm9, %v1678_v33  ;;  %v1934_v18 = vpop.permute.xlu0 %1933 }
 0x1ef   : > { %2212 = vrot.lane.b32.xlu1 %v3929_v57, %s4114_s27  ;;  %2014 = vst.msk [vmem:[#allocation3 + $0x40] sm:$0xf] %vm1997_vm10, %v1934_v18 }
 0x1f0   : > { %2467 = vrot.lane.b32.xlu0 %v3960_v14, %s4115_s5 }
 0x1f1   : > { %v1682_v19 = vpop.permute.xlu1 %1681 }
 0x1f2   : > { %1759 = vst.msk [vmem:[#allocation3 + $0x4c] sm:$0xf] %vm1739_vm9, %v1682_v19  ;;  %v1938_v25 = vpop.permute.xlu0 %1937 }
 0x1f3   : > { %2465 = vrot.lane.b32.xlu1 %v3865_v5, %s4115_s5  ;;  %2016 = vst.msk [vmem:[#allocation3 + $0x48] sm:$0xf] %vm1997_vm10, %v1938_v25 }
 0x1f4   : > { %1185 = vrot.lane.b32.xlu0 %v3896_v45, %s4110_s21  ;;  %v3933_v45 = vpack.c.bf16 %v2061_v22, %v2061_v22 }
 0x1f5   : > { %v1936_v8 = vpop.permute.xlu1 %1935 }
 0x1f6   : > { %2015 = vst.msk [vmem:[#allocation3 + $0x44] sm:$0xf] %vm1997_vm10, %v1936_v8  ;;  %v2191_v34 = vpop.permute.xlu0 %2190 }
 0x1f7   : > { %2469 = vrot.lane.b32.xlu1 %v3961_v10, %s4115_s5  ;;  %2271 = vst.msk [vmem:[#allocation3 + $0x40] sm:$0xf] %vm2254_vm11, %v2191_v34 }
 0x1f8   : > { %1189 = vrot.lane.b32.xlu0 %v3804_v27, %s4110_s21 }
 0x1f9   : > { %v1940_v44 = vpop.permute.xlu1 %1939 }
 0x1fa   : > { %2017 = vst.msk [vmem:[#allocation3 + $0x4c] sm:$0xf] %vm1997_vm10, %v1940_v44  ;;  %v2195_v52 = vpop.permute.xlu0 %2194 }
 0x1fb   : > { %1187 = vrot.lane.b32.xlu1 %v3897_v50, %s4110_s21  ;;  %2273 = vst.msk [vmem:[#allocation3 + $0x48] sm:$0xf] %vm2254_vm11, %v2195_v52 }
 0x1fc   : > { %1442 = vrot.lane.b32.xlu0 %v3928_v29, %s4111_s22 }
 0x1fd   : > { %v2193_v54 = vpop.permute.xlu1 %2192 }
 0x1fe   : > { %2272 = vst.msk [vmem:[#allocation3 + $0x44] sm:$0xf] %vm2254_vm11, %v2193_v54  ;;  %v2448_v15 = vpop.permute.xlu0 %2447 }
 0x1ff   : > { %1191 = vrot.lane.b32.xlu1 %v3805_v51, %s4110_s21  ;;  %2528 = vst.msk [vmem:[#allocation3 + $0x40] sm:$0xf] %vm2511_vm12, %v2448_v15 }
 0x200   : > { %1446 = vrot.lane.b32.xlu0 %v3836_v26, %s4111_s22 }
 0x201   : > { %v2197_v58 = vpop.permute.xlu1 %2196 }
 0x202   : > { %2274 = vst.msk [vmem:[#allocation3 + $0x4c] sm:$0xf] %vm2254_vm11, %v2197_v58  ;;  %v2452_v60 = vpop.permute.xlu0 %2451 }
 0x203   : > { %1444 = vrot.lane.b32.xlu1 %v3929_v57, %s4111_s22  ;;  %2530 = vst.msk [vmem:[#allocation3 + $0x48] sm:$0xf] %vm2511_vm12, %v2452_v60 }
 0x204   : > { %1699 = vrot.lane.b32.xlu0 %v3960_v14, %s4112_s23 }
 0x205   : > { %v2450_v17 = vpop.permute.xlu1 %2449 }
 0x206   : > { %2529 = vst.msk [vmem:[#allocation3 + $0x44] sm:$0xf] %vm2511_vm12, %v2450_v17  ;;  %v1170_v32 = vpop.permute.xlu0 %1169 }
 0x207   : > { %1448 = vrot.lane.b32.xlu1 %v3837_v24, %s4111_s22  ;;  %1246 = vst.msk [vmem:[#allocation3 + $0x50] sm:$0xf] %vm1225_vm7, %v1170_v32 }
 0x208   : > { %1703 = vrot.lane.b32.xlu0 %v3868_v61, %s4112_s23 }
 0x209   : > { %v2454_v23 = vpop.permute.xlu1 %2453 }
 0x20a   : > { %2531 = vst.msk [vmem:[#allocation3 + $0x4c] sm:$0xf] %vm2511_vm12, %v2454_v23  ;;  %v1174_v48 = vpop.permute.xlu0 %1173 }
 0x20b   : > { %1701 = vrot.lane.b32.xlu1 %v3961_v10, %s4112_s23  ;;  %1248 = vst.msk [vmem:[#allocation3 + $0x58] sm:$0xf] %vm1225_vm7, %v1174_v48 }
 0x20c   : > { %1957 = vrot.lane.b32.xlu0 %v3804_v27, %s4113_s24 }
 0x20d   : > { %v1172_v63 = vpop.permute.xlu1 %1171  ;;  %v4091_v0 = vld [vmem:[#allocation3 + $0x40] sm:$0xff]  }
 0x20e   : > { %1247 = vst.msk [vmem:[#allocation3 + $0x54] sm:$0xf] %vm1225_vm7, %v1172_v63  ;;  %4039 = vmatprep.mubr.msk.bf16.mxu1 %vm2676_vm13, %v4091_v0  ;;  %v1427_v36 = vpop.permute.xlu0 %1426 }
 0x20f   : > { %1705 = vrot.lane.b32.xlu1 %v3869_v30, %s4112_s23  ;;  %1503 = vst.msk [vmem:[#allocation3 + $0x50] sm:$0xf] %vm1482_vm8, %v1427_v36 }
 0x210   : > { %1961 = vrot.lane.b32.xlu0 %v3900_v42, %s4113_s24 }
 0x211   : > { %v1176_v4 = vpop.permute.xlu1 %1175  ;;  %v4092_v47 = vld [vmem:[#allocation3 + $0x48] sm:$0xff]  }
 0x212   : > { %1249 = vst.msk [vmem:[#allocation3 + $0x5c] sm:$0xf] %vm1225_vm7, %v1176_v4  ;;  %4040 = vmatmul.mubr.msk.bf16.vlgmr.msra.gmra.mxu1 %vm2676_vm13, %v4092_v47  ;;  %v1431_v2 = vpop.permute.xlu0 %1430 }
 0x213   : > { %1959 = vrot.lane.b32.xlu1 %v3805_v51, %s4113_s24  ;;  %1505 = vst.msk [vmem:[#allocation3 + $0x58] sm:$0xf] %vm1482_vm8, %v1431_v2 }
 0x214   : > { %2214 = vrot.lane.b32.xlu0 %v3836_v26, %s4114_s27 }
 0x215   : > { %v1429_v16 = vpop.permute.xlu1 %1428 }
 0x216   : > { %1504 = vst.msk [vmem:[#allocation3 + $0x54] sm:$0xf] %vm1482_vm8, %v1429_v16  ;;  %v1684_v5 = vpop.permute.xlu0 %1683 }
 0x217   : > { %1963 = vrot.lane.b32.xlu1 %v3901_v1, %s4113_s24  ;;  %1760 = vst.msk [vmem:[#allocation3 + $0x50] sm:$0xf] %vm1739_vm9, %v1684_v5 }
 0x218   : > { %2218 = vrot.lane.b32.xlu0 %v3932_v7, %s4114_s27 }
 0x219   : > { %v1433_v12 = vpop.permute.xlu1 %1432 }
 0x21a   : > { %1506 = vst.msk [vmem:[#allocation3 + $0x5c] sm:$0xf] %vm1482_vm8, %v1433_v12  ;;  %v1688_v28 = vpop.permute.xlu0 %1687 }
 0x21b   : > { %2216 = vrot.lane.b32.xlu1 %v3837_v24, %s4114_s27  ;;  %1762 = vst.msk [vmem:[#allocation3 + $0x58] sm:$0xf] %vm1739_vm9, %v1688_v28 }
 0x21c   : > { %2471 = vrot.lane.b32.xlu0 %v3868_v61, %s4115_s5 }
 0x21d   : > { %v1686_v53 = vpop.permute.xlu1 %1685 }
 0x21e   : > { %1761 = vst.msk [vmem:[#allocation3 + $0x54] sm:$0xf] %vm1739_vm9, %v1686_v53  ;;  %v1942_v39 = vpop.permute.xlu0 %1941 }
 0x21f   : > { %2220 = vrot.lane.b32.xlu1 %v3933_v45, %s4114_s27  ;;  %2018 = vst.msk [vmem:[#allocation3 + $0x50] sm:$0xf] %vm1997_vm10, %v1942_v39 }
 0x220   : > { %2475 = vrot.lane.b32.xlu0 %v3964_v40, %s4115_s5 }
 0x221   : > { %v1690_v50 = vpop.permute.xlu1 %1689 }
 0x222   : > { %1763 = vst.msk [vmem:[#allocation3 + $0x5c] sm:$0xf] %vm1739_vm9, %v1690_v50  ;;  %v1946_v31 = vpop.permute.xlu0 %1945 }
 0x223   : > { %2473 = vrot.lane.b32.xlu1 %v3869_v30, %s4115_s5  ;;  %2020 = vst.msk [vmem:[#allocation3 + $0x58] sm:$0xf] %vm1997_vm10, %v1946_v31 }
 0x225   : > { %v1944_v29 = vpop.permute.xlu1 %1943 }
 0x226   : > { %2019 = vst.msk [vmem:[#allocation3 + $0x54] sm:$0xf] %vm1997_vm10, %v1944_v29  ;;  %v2199_v9 = vpop.permute.xlu0 %2198 }
 0x227   : > { %2477 = vrot.lane.b32.xlu1 %v3965_v55, %s4115_s5  ;;  %2275 = vst.msk [vmem:[#allocation3 + $0x50] sm:$0xf] %vm2254_vm11, %v2199_v9 }
 0x229   : > { %v1948_v43 = vpop.permute.xlu1 %1947 }
 0x22a   : > { %2021 = vst.msk [vmem:[#allocation3 + $0x5c] sm:$0xf] %vm1997_vm10, %v1948_v43  ;;  %v4025_v49 = vpop.f32.mrf.mxu0  ;;  %v2203_v11 = vpop.permute.xlu0 %2202 }
 0x22b   : > { %v3968_v57 = vpack.c.bf16 %v4025_v49, %v4025_v49  ;;  %2277 = vst.msk [vmem:[#allocation3 + $0x58] sm:$0xf] %vm2254_vm11, %v2203_v11  ;;  %v3121_v10 = vmul.f32 %v4025_v49, %v4025_v49  ;;  %v3053_v52 = vsel %vm183_vm0, %v4025_v49, 0.0 }
 0x22c   : > { %v2763_v33 = vpop.f32.mrf.mxu0 }
 0x22d   : > { %v2201_v37 = vpop.permute.xlu1 %2200  ;;  %3020 = vst.msk [vmem:[%s4966_s9 + $0x8] sm:$0xf] %vm454_vm3, %v3968_v57  ;;  %v3966_v14 = vpack.c.bf16 %v2763_v33, %v2763_v33  ;;  %v3119_v19 = vmul.f32 %v2763_v33, %v2763_v33  ;;  %v3050_v27 = vsel %vm183_vm0, %v2763_v33, 0.0  ;;  %v3154_v24 = vsel %vm183_vm0, %v3121_v10, 0.0 }
 0x22e   : > { %2276 = vst.msk [vmem:[#allocation3 + $0x54] sm:$0xf] %vm2254_vm11, %v2201_v37  ;;  %v4026_v18 = vpop.f32.mrf.mxu0  ;;  %v2456_v3 = vpop.permute.xlu0 %2455 }
 0x22f   : > { %3018 = vst.msk [vmem:[%s4966_s9] sm:$0xf] %vm454_vm3, %v3966_v14  ;;  %v3969_v20 = vpack.c.bf16 %v4026_v18, %v4026_v18  ;;  %v3151_v54 = vsel %vm183_vm0, %v3119_v19, 0.0  ;;  %v3122_v26 = vmul.f32 %v4026_v18, %v4026_v18  ;;  %v3055_v60 = vsel %vm183_vm0, %v4026_v18, 0.0 }
 0x230   : > { %2532 = vst.msk [vmem:[#allocation3 + $0x50] sm:$0xf] %vm2511_vm12, %v2456_v3  ;;  %v2766_v8 = vpop.f32.mrf.mxu0 }
 0x231   : > { %v2205_v25 = vpop.permute.xlu1 %2204  ;;  %3021 = vst.msk [vmem:[%s4966_s9 + $0xc] sm:$0xf] %vm454_vm3, %v3969_v20  ;;  %v3967_v34 = vpack.c.bf16 %v2766_v8, %v2766_v8  ;;  %v3051_v38 = vsel %vm183_vm0, %v2766_v8, 0.0  ;;  %v3120_v44 = vmul.f32 %v2766_v8, %v2766_v8  ;;  %v3156_v62 = vsel %vm183_vm0, %v3122_v26, 0.0 }
 0x232   : > { %2278 = vst.msk [vmem:[#allocation3 + $0x5c] sm:$0xf] %vm2254_vm11, %v2205_v25  ;;  %v3052_v46 = vadd.f32 %v3051_v38, %v3050_v27  ;;  %v2460_v51 = vpop.permute.xlu0 %2459 }
 0x233   : > { %3019 = vst.msk [vmem:[%s4966_s9 + $0x4] sm:$0xf] %vm454_vm3, %v3967_v34  ;;  %v3152_v15 = vsel %vm183_vm0, %v3120_v44, 0.0 }
 0x234   : > { %2534 = vst.msk [vmem:[#allocation3 + $0x58] sm:$0xf] %vm2511_vm12, %v2460_v51  ;;  %v3054_v56 = vadd.f32 %v3053_v52, %v3052_v46  ;;  %v3153_v58 = vadd.f32 %v3152_v15, %v3151_v54 }
 0x235   : > { %v2458_v59 = vpop.permute.xlu1 %2457 }
 0x236   : > { %2533 = vst.msk [vmem:[#allocation3 + $0x54] sm:$0xf] %vm2511_vm12, %v2458_v59  ;;  %v3155_v17 = vadd.f32 %v3154_v24, %v3153_v58  ;;  %v1178_v61 = vpop.permute.xlu0 %1177  ;;  %v3056_v32 = vadd.f32 %v3055_v60, %v3054_v56 }
 0x237   : > { %1250 = vst.msk [vmem:[#allocation3 + $0x60] sm:$0xf] %vm1225_vm7, %v1178_v61 }
 0x238   : > { %v3157_v35 = vadd.f32 %v3156_v62, %v3155_v17 }
 0x239   : > { %v2462_v23 = vpop.permute.xlu1 %2461 }
 0x23a   : > { %2535 = vst.msk [vmem:[#allocation3 + $0x5c] sm:$0xf] %vm2511_vm12, %v2462_v23  ;;  %v1182_v30 = vpop.permute.xlu0 %1181 }
 0x23b   : > { %1252 = vst.msk [vmem:[#allocation3 + $0x68] sm:$0xf] %vm1225_vm7, %v1182_v30 }
 0x23d   : > { %v1180_v48 = vpop.permute.xlu1 %1179  ;;  %v4093_v63 = vld [vmem:[#allocation3 + $0x50] sm:$0xff]  }
 0x23e   : > { %1251 = vst.msk [vmem:[#allocation3 + $0x64] sm:$0xf] %vm1225_vm7, %v1180_v48  ;;  %4043 = vmatprep.mubr.msk.bf16.mxu1 %vm2676_vm13, %v4093_v63  ;;  %v1435_v0 = vpop.permute.xlu0 %1434 }
 0x23f   : > { %1507 = vst.msk [vmem:[#allocation3 + $0x60] sm:$0xf] %vm1482_vm8, %v1435_v0 }
 0x241   : > { %v1184_v42 = vpop.permute.xlu1 %1183  ;;  %v4094_v36 = vld [vmem:[#allocation3 + $0x58] sm:$0xff]  }
 0x242   : > { %1253 = vst.msk [vmem:[#allocation3 + $0x6c] sm:$0xf] %vm1225_vm7, %v1184_v42  ;;  %4044 = vmatmul.mubr.msk.bf16.gmra.mxu1 %vm2676_vm13, %v4094_v36  ;;  %v1439_v13 = vpop.permute.xlu0 %1438 }
 0x243   : > { %1509 = vst.msk [vmem:[#allocation3 + $0x68] sm:$0xf] %vm1482_vm8, %v1439_v13 }
 0x245   : > { %v1437_v4 = vpop.permute.xlu1 %1436 }
 0x246   : > { %1508 = vst.msk [vmem:[#allocation3 + $0x64] sm:$0xf] %vm1482_vm8, %v1437_v4  ;;  %v1692_v47 = vpop.permute.xlu0 %1691 }
 0x247   : > { %1764 = vst.msk [vmem:[#allocation3 + $0x60] sm:$0xf] %vm1739_vm9, %v1692_v47 }
 0x249   : > { %v1441_v21 = vpop.permute.xlu1 %1440 }
 0x24a   : > { %1510 = vst.msk [vmem:[#allocation3 + $0x6c] sm:$0xf] %vm1482_vm8, %v1441_v21  ;;  %v1696_v1 = vpop.permute.xlu0 %1695 }
 0x24b   : > { %1766 = vst.msk [vmem:[#allocation3 + $0x68] sm:$0xf] %vm1739_vm9, %v1696_v1 }
 0x24d   : > { %v1694_v2 = vpop.permute.xlu1 %1693 }
 0x24e   : > { %1765 = vst.msk [vmem:[#allocation3 + $0x64] sm:$0xf] %vm1739_vm9, %v1694_v2  ;;  %v1950_v16 = vpop.permute.xlu0 %1949 }
 0x24f   : > { %2022 = vst.msk [vmem:[#allocation3 + $0x60] sm:$0xf] %vm1997_vm10, %v1950_v16 }
 0x251   : > { %v1698_v7 = vpop.permute.xlu1 %1697 }
 0x252   : > { %1767 = vst.msk [vmem:[#allocation3 + $0x6c] sm:$0xf] %vm1739_vm9, %v1698_v7  ;;  %v4029_v5 = vpop.f32.mrf.mxu0  ;;  %v1954_v22 = vpop.permute.xlu0 %1953 }
 0x253   : > { %v3972_v12 = vpack.c.bf16 %v4029_v5, %v4029_v5  ;;  %2024 = vst.msk [vmem:[#allocation3 + $0x68] sm:$0xf] %vm1997_vm10, %v1954_v22  ;;  %v3125_v49 = vmul.f32 %v4029_v5, %v4029_v5  ;;  %v3061_v18 = vsel %vm183_vm0, %v4029_v5, 0.0 }
 0x254   : > { %v2779_v45 = vpop.f32.mrf.mxu0 }
 0x255   : > { %v1952_v6 = vpop.permute.xlu1 %1951  ;;  %3024 = vst.msk [vmem:[%s4966_s9 + $0x18] sm:$0xf] %vm454_vm3, %v3972_v12  ;;  %v3970_v28 = vpack.c.bf16 %v2779_v45, %v2779_v45  ;;  %v3057_v53 = vsel %vm183_vm0, %v2779_v45, 0.0  ;;  %v3123_v40 = vmul.f32 %v2779_v45, %v2779_v45  ;;  %v3162_v8 = vsel %vm183_vm0, %v3125_v49, 0.0 }
 0x256   : > { %2023 = vst.msk [vmem:[#allocation3 + $0x64] sm:$0xf] %vm1997_vm10, %v1952_v6  ;;  %v3058_v39 = vadd.f32 %v3057_v53, %v3056_v32  ;;  %v4030_v41 = vpop.f32.mrf.mxu0  ;;  %v2207_v50 = vpop.permute.xlu0 %2206 }
 0x257   : > { %3022 = vst.msk [vmem:[%s4966_s9 + $0x10] sm:$0xf] %vm454_vm3, %v3970_v28  ;;  %v3158_v55 = vsel %vm183_vm0, %v3123_v40, 0.0  ;;  %v3973_v31 = vpack.c.bf16 %v4030_v41, %v4030_v41  ;;  %v3126_v3 = vmul.f32 %v4030_v41, %v4030_v41  ;;  %v3063_v27 = vsel %vm183_vm0, %v4030_v41, 0.0 }
 0x258   : > { %2279 = vst.msk [vmem:[#allocation3 + $0x60] sm:$0xf] %vm2254_vm11, %v2207_v50  ;;  %v3159_v29 = vadd.f32 %v3158_v55, %v3157_v35  ;;  %v2782_v43 = vpop.f32.mrf.mxu0 }
 0x259   : > { %v1956_v9 = vpop.permute.xlu1 %1955  ;;  %3025 = vst.msk [vmem:[%s4966_s9 + $0x1c] sm:$0xf] %vm454_vm3, %v3973_v31  ;;  %v3971_v11 = vpack.c.bf16 %v2782_v43, %v2782_v43  ;;  %v3059_v57 = vsel %vm183_vm0, %v2782_v43, 0.0  ;;  %v3124_v37 = vmul.f32 %v2782_v43, %v2782_v43  ;;  %v3164_v46 = vsel %vm183_vm0, %v3126_v3, 0.0 }
 0x25a   : > { %2025 = vst.msk [vmem:[#allocation3 + $0x6c] sm:$0xf] %vm1997_vm10, %v1956_v9  ;;  %v3060_v33 = vadd.f32 %v3059_v57, %v3058_v39  ;;  %v2211_v14 = vpop.permute.xlu0 %2210 }
 0x25b   : > { %3023 = vst.msk [vmem:[%s4966_s9 + $0x14] sm:$0xf] %vm454_vm3, %v3971_v11  ;;  %v3160_v19 = vsel %vm183_vm0, %v3124_v37, 0.0 }
 0x25c   : > { %2281 = vst.msk [vmem:[#allocation3 + $0x68] sm:$0xf] %vm2254_vm11, %v2211_v14  ;;  %v3062_v20 = vadd.f32 %v3061_v18, %v3060_v33  ;;  %v3161_v10 = vadd.f32 %v3160_v19, %v3159_v29 }
 0x25d   : > { %v2209_v25 = vpop.permute.xlu1 %2208 }
 0x25e   : > { %2280 = vst.msk [vmem:[#allocation3 + $0x64] sm:$0xf] %vm2254_vm11, %v2209_v25  ;;  %v3163_v34 = vadd.f32 %v3162_v8, %v3161_v10  ;;  %v2464_v38 = vpop.permute.xlu0 %2463  ;;  %v3064_v44 = vadd.f32 %v3063_v27, %v3062_v20 }
 0x25f   : > { %2536 = vst.msk [vmem:[#allocation3 + $0x60] sm:$0xf] %vm2511_vm12, %v2464_v38 }
 0x260   : > { %v3165_v52 = vadd.f32 %v3164_v46, %v3163_v34 }
 0x261   : > { %v2213_v51 = vpop.permute.xlu1 %2212 }
 0x262   : > { %2282 = vst.msk [vmem:[#allocation3 + $0x6c] sm:$0xf] %vm2254_vm11, %v2213_v51  ;;  %v2468_v54 = vpop.permute.xlu0 %2467 }
 0x263   : > { %2538 = vst.msk [vmem:[#allocation3 + $0x68] sm:$0xf] %vm2511_vm12, %v2468_v54 }
 0x265   : > { %v2466_v26 = vpop.permute.xlu1 %2465 }
 0x266   : > { %2537 = vst.msk [vmem:[#allocation3 + $0x64] sm:$0xf] %vm2511_vm12, %v2466_v26  ;;  %v1186_v15 = vpop.permute.xlu0 %1185 }
 0x267   : > { %1254 = vst.msk [vmem:[#allocation3 + $0x70] sm:$0xf] %vm1225_vm7, %v1186_v15 }
 0x269   : > { %v2470_v56 = vpop.permute.xlu1 %2469 }
 0x26a   : > { %2539 = vst.msk [vmem:[#allocation3 + $0x6c] sm:$0xf] %vm2511_vm12, %v2470_v56  ;;  %v1190_v58 = vpop.permute.xlu0 %1189 }
 0x26b   : > { %1256 = vst.msk [vmem:[#allocation3 + $0x78] sm:$0xf] %vm1225_vm7, %v1190_v58 }
 0x26d   : > { %v1188_v59 = vpop.permute.xlu1 %1187  ;;  %v4095_v24 = vld [vmem:[#allocation3 + $0x60] sm:$0xff]  }
 0x26e   : > { %1255 = vst.msk [vmem:[#allocation3 + $0x74] sm:$0xf] %vm1225_vm7, %v1188_v59  ;;  %4047 = vmatprep.mubr.msk.bf16.mxu1 %vm2676_vm13, %v4095_v24  ;;  %v1443_v60 = vpop.permute.xlu0 %1442 }
 0x26f   : > { %1511 = vst.msk [vmem:[#allocation3 + $0x70] sm:$0xf] %vm1482_vm8, %v1443_v60 }
 0x271   : > { %v1192_v17 = vpop.permute.xlu1 %1191  ;;  %v4096_v61 = vld [vmem:[#allocation3 + $0x68] sm:$0xff]  }
 0x272   : > { %1257 = vst.msk [vmem:[#allocation3 + $0x7c] sm:$0xf] %vm1225_vm7, %v1192_v17  ;;  %4048 = vmatmul.mubr.msk.bf16.gmra.mxu1 %vm2676_vm13, %v4096_v61  ;;  %v1447_v32 = vpop.permute.xlu0 %1446 }
 0x273   : > { %1513 = vst.msk [vmem:[#allocation3 + $0x78] sm:$0xf] %vm1482_vm8, %v1447_v32 }
 0x275   : > { %v1445_v62 = vpop.permute.xlu1 %1444 }
 0x276   : > { %1512 = vst.msk [vmem:[#allocation3 + $0x74] sm:$0xf] %vm1482_vm8, %v1445_v62  ;;  %v1700_v23 = vpop.permute.xlu0 %1699 }
 0x277   : > { %1768 = vst.msk [vmem:[#allocation3 + $0x70] sm:$0xf] %vm1739_vm9, %v1700_v23 }
 0x279   : > { %v1449_v35 = vpop.permute.xlu1 %1448 }
 0x27a   : > { %1514 = vst.msk [vmem:[#allocation3 + $0x7c] sm:$0xf] %vm1482_vm8, %v1449_v35  ;;  %v4033_v30 = vpop.f32.mrf.mxu0  ;;  %v1704_v48 = vpop.permute.xlu0 %1703 }
 0x27b   : > { %v3976_v63 = vpack.c.bf16 %v4033_v30, %v4033_v30  ;;  %1770 = vst.msk [vmem:[#allocation3 + $0x78] sm:$0xf] %vm1739_vm9, %v1704_v48  ;;  %v3129_v12 = vmul.f32 %v4033_v30, %v4033_v30  ;;  %v3069_v39 = vsel %vm183_vm0, %v4033_v30, 0.0 }
 0x27c   : > { %v2795_v42 = vpop.f32.mrf.mxu0 }
 0x27d   : > { %v1702_v0 = vpop.permute.xlu1 %1701  ;;  %3028 = vst.msk [vmem:[%s4966_s9 + $0x28] sm:$0xf] %vm454_vm3, %v3976_v63  ;;  %v3974_v36 = vpack.c.bf16 %v2795_v42, %v2795_v42  ;;  %v3065_v13 = vsel %vm183_vm0, %v2795_v42, 0.0  ;;  %v3127_v4 = vmul.f32 %v2795_v42, %v2795_v42  ;;  %v3170_v9 = vsel %vm183_vm0, %v3129_v12, 0.0 }
 0x27e   : > { %1769 = vst.msk [vmem:[#allocation3 + $0x74] sm:$0xf] %vm1739_vm9, %v1702_v0  ;;  %v3066_v47 = vadd.f32 %v3065_v13, %v3064_v44  ;;  %v4034_v21 = vpop.f32.mrf.mxu0  ;;  %v1958_v1 = vpop.permute.xlu0 %1957 }
 0x27f   : > { %3026 = vst.msk [vmem:[%s4966_s9 + $0x20] sm:$0xf] %vm454_vm3, %v3974_v36  ;;  %v3166_v2 = vsel %vm183_vm0, %v3127_v4, 0.0  ;;  %v3977_v16 = vpack.c.bf16 %v4034_v21, %v4034_v21  ;;  %v3130_v41 = vmul.f32 %v4034_v21, %v4034_v21  ;;  %v3071_v43 = vsel %vm183_vm0, %v4034_v21, 0.0 }
 0x280   : > { %2026 = vst.msk [vmem:[#allocation3 + $0x70] sm:$0xf] %vm1997_vm10, %v1958_v1  ;;  %v3167_v7 = vadd.f32 %v3166_v2, %v3165_v52  ;;  %v2798_v22 = vpop.f32.mrf.mxu0 }
 0x281   : > { %v1706_v5 = vpop.permute.xlu1 %1705  ;;  %3029 = vst.msk [vmem:[%s4966_s9 + $0x2c] sm:$0xf] %vm454_vm3, %v3977_v16  ;;  %v3975_v6 = vpack.c.bf16 %v2798_v22, %v2798_v22  ;;  %v3067_v45 = vsel %vm183_vm0, %v2798_v22, 0.0  ;;  %v3128_v28 = vmul.f32 %v2798_v22, %v2798_v22  ;;  %v3172_v37 = vsel %vm183_vm0, %v3130_v41, 0.0 }
 0x282   : > { %1771 = vst.msk [vmem:[#allocation3 + $0x7c] sm:$0xf] %vm1739_vm9, %v1706_v5  ;;  %v3068_v53 = vadd.f32 %v3067_v45, %v3066_v47  ;;  %v1962_v40 = vpop.permute.xlu0 %1961 }
 0x283   : > { %3027 = vst.msk [vmem:[%s4966_s9 + $0x24] sm:$0xf] %vm454_vm3, %v3975_v6  ;;  %v3168_v50 = vsel %vm183_vm0, %v3128_v28, 0.0 }
 0x284   : > { %2028 = vst.msk [vmem:[#allocation3 + $0x78] sm:$0xf] %vm1997_vm10, %v1962_v40  ;;  %v3070_v55 = vadd.f32 %v3069_v39, %v3068_v53  ;;  %v3169_v31 = vadd.f32 %v3168_v50, %v3167_v7 }
 0x285   : > { %v1960_v29 = vpop.permute.xlu1 %1959 }
 0x286   : > { %2027 = vst.msk [vmem:[#allocation3 + $0x74] sm:$0xf] %vm1997_vm10, %v1960_v29  ;;  %v3171_v49 = vadd.f32 %v3170_v9, %v3169_v31  ;;  %v2215_v11 = vpop.permute.xlu0 %2214  ;;  %v3072_v57 = vadd.f32 %v3071_v43, %v3070_v55 }
 0x287   : > { %2283 = vst.msk [vmem:[#allocation3 + $0x70] sm:$0xf] %vm2254_vm11, %v2215_v11 }
 0x288   : > { %v3173_v14 = vadd.f32 %v3172_v37, %v3171_v49 }
 0x289   : > { %v1964_v33 = vpop.permute.xlu1 %1963 }
 0x28a   : > { %2029 = vst.msk [vmem:[#allocation3 + $0x7c] sm:$0xf] %vm1997_vm10, %v1964_v33  ;;  %v2219_v18 = vpop.permute.xlu0 %2218 }
 0x28b   : > { %2285 = vst.msk [vmem:[#allocation3 + $0x78] sm:$0xf] %vm2254_vm11, %v2219_v18 }
 0x28d   : > { %v2217_v3 = vpop.permute.xlu1 %2216 }
 0x28e   : > { %2284 = vst.msk [vmem:[#allocation3 + $0x74] sm:$0xf] %vm2254_vm11, %v2217_v3  ;;  %v2472_v19 = vpop.permute.xlu0 %2471 }
 0x28f   : > { %2540 = vst.msk [vmem:[#allocation3 + $0x70] sm:$0xf] %vm2511_vm12, %v2472_v19 }
 0x291   : > { %v2221_v20 = vpop.permute.xlu1 %2220 }
 0x292   : > { %2286 = vst.msk [vmem:[#allocation3 + $0x7c] sm:$0xf] %vm2254_vm11, %v2221_v20  ;;  %v2476_v10 = vpop.permute.xlu0 %2475 }
 0x293   : > { %2542 = vst.msk [vmem:[#allocation3 + $0x78] sm:$0xf] %vm2511_vm12, %v2476_v10 }
 0x295   : > { %v2474_v25 = vpop.permute.xlu1 %2473 }
 0x296   : > { %2541 = vst.msk [vmem:[#allocation3 + $0x74] sm:$0xf] %vm2511_vm12, %v2474_v25 }
 0x299   : > { %v2478_v8 = vpop.permute.xlu1 %2477 }
 0x29a   : > { %2543 = vst.msk [vmem:[#allocation3 + $0x7c] sm:$0xf] %vm2511_vm12, %v2478_v8 }
 0x29d   : > { %v4097_v27 = vld [vmem:[#allocation3 + $0x70] sm:$0xff]  }
 0x29e   : > { %4051 = vmatprep.mubr.msk.bf16.mxu1 %vm2676_vm13, %v4097_v27 }
 0x2a1   : > { %v4098_v34 = vld [vmem:[#allocation3 + $0x78] sm:$0xff]  }
 0x2a2   : > { %v4037_v38 = vpop.f32.mrf.mxu0  ;;  %4052 = vmatmul.mubr.msk.bf16.gmra.mxu1 %vm2676_vm13, %v4098_v34 }
 0x2a3   : > { %v3980_v44 = vpack.c.bf16 %v4037_v38, %v4037_v38  ;;  %v3133_v60 = vmul.f32 %v4037_v38, %v4037_v38  ;;  %v3077_v23 = vsel %vm183_vm0, %v4037_v38, 0.0 }
 0x2a4   : > { %v2811_v46 = vpop.f32.mrf.mxu0 }
 0x2a5   : > { %3032 = vst.msk [vmem:[%s4966_s9 + $0x38] sm:$0xf] %vm454_vm3, %v3980_v44  ;;  %v3978_v51 = vpack.c.bf16 %v2811_v46, %v2811_v46  ;;  %v3073_v52 = vsel %vm183_vm0, %v2811_v46, 0.0  ;;  %v3131_v54 = vmul.f32 %v2811_v46, %v2811_v46  ;;  %v3178_v0 = vsel %vm183_vm0, %v3133_v60, 0.0 }
 0x2a6   : > { %v3074_v26 = vadd.f32 %v3073_v52, %v3072_v57  ;;  %v4038_v15 = vpop.f32.mrf.mxu0 }
 0x2a7   : > { %3030 = vst.msk [vmem:[%s4966_s9 + $0x30] sm:$0xf] %vm454_vm3, %v3978_v51  ;;  %v3174_v56 = vsel %vm183_vm0, %v3131_v54, 0.0  ;;  %v3981_v58 = vpack.c.bf16 %v4038_v15, %v4038_v15  ;;  %v3134_v35 = vmul.f32 %v4038_v15, %v4038_v15  ;;  %v3079_v42 = vsel %vm183_vm0, %v4038_v15, 0.0 }
 0x2a8   : > { %v3175_v59 = vadd.f32 %v3174_v56, %v3173_v14  ;;  %v2814_v24 = vpop.f32.mrf.mxu0 }
 0x2a9   : > { %3033 = vst.msk [vmem:[%s4966_s9 + $0x3c] sm:$0xf] %vm454_vm3, %v3981_v58  ;;  %v3979_v17 = vpack.c.bf16 %v2814_v24, %v2814_v24  ;;  %v3075_v61 = vsel %vm183_vm0, %v2814_v24, 0.0  ;;  %v3132_v32 = vmul.f32 %v2814_v24, %v2814_v24  ;;  %v3180_v4 = vsel %vm183_vm0, %v3134_v35, 0.0 }
 0x2aa   : > { %v3076_v62 = vadd.f32 %v3075_v61, %v3074_v26 }
 0x2ab   : > { %3031 = vst.msk [vmem:[%s4966_s9 + $0x34] sm:$0xf] %vm454_vm3, %v3979_v17  ;;  %v3176_v30 = vsel %vm183_vm0, %v3132_v32, 0.0 }
 0x2ac   : > { %v3078_v48 = vadd.f32 %v3077_v23, %v3076_v62  ;;  %v3177_v63 = vadd.f32 %v3176_v30, %v3175_v59 }
 0x2ae   : > { %v3179_v36 = vadd.f32 %v3178_v0, %v3177_v63  ;;  %v3080_v13 = vadd.f32 %v3079_v42, %v3078_v48 }
 0x2b0   : > { %v3181_v47 = vadd.f32 %v3180_v4, %v3179_v36 }
 0x2d2   : > { %v4041_v21 = vpop.f32.mrf.mxu1 }
 0x2d3   : > { %v3984_v1 = vpack.c.bf16 %v4041_v21, %v4041_v21  ;;  %v3137_v40 = vmul.f32 %v4041_v21, %v4041_v21  ;;  %v3085_v31 = vsel %vm183_vm0, %v4041_v21, 0.0 }
 0x2d4   : > { %v2827_v2 = vpop.f32.mrf.mxu1 }
 0x2d5   : > { %3036 = vst.msk [vmem:[%s4966_s9 + $0x48] sm:$0xf] %vm454_vm3, %v3984_v1  ;;  %v3982_v16 = vpack.c.bf16 %v2827_v2, %v2827_v2  ;;  %v3081_v7 = vsel %vm183_vm0, %v2827_v2, 0.0  ;;  %v3135_v5 = vmul.f32 %v2827_v2, %v2827_v2  ;;  %v3186_v11 = vsel %vm183_vm0, %v3137_v40, 0.0 }
 0x2d6   : > { %v3082_v22 = vadd.f32 %v3081_v7, %v3080_v13  ;;  %v4042_v12 = vpop.f32.mrf.mxu1 }
 0x2d7   : > { %3034 = vst.msk [vmem:[%s4966_s9 + $0x40] sm:$0xf] %vm454_vm3, %v3982_v16  ;;  %v3182_v6 = vsel %vm183_vm0, %v3135_v5, 0.0  ;;  %v3985_v45 = vpack.c.bf16 %v4042_v12, %v4042_v12  ;;  %v3138_v29 = vmul.f32 %v4042_v12, %v4042_v12  ;;  %v3087_v57 = vsel %vm183_vm0, %v4042_v12, 0.0 }
 0x2d8   : > { %v3183_v28 = vadd.f32 %v3182_v6, %v3181_v47  ;;  %v2830_v53 = vpop.f32.mrf.mxu1 }
 0x2d9   : > { %3037 = vst.msk [vmem:[%s4966_s9 + $0x4c] sm:$0xf] %vm454_vm3, %v3985_v45  ;;  %v3983_v39 = vpack.c.bf16 %v2830_v53, %v2830_v53  ;;  %v3083_v41 = vsel %vm183_vm0, %v2830_v53, 0.0  ;;  %v3136_v50 = vmul.f32 %v2830_v53, %v2830_v53  ;;  %v3188_v14 = vsel %vm183_vm0, %v3138_v29, 0.0 }
 0x2da   : > { %v3084_v55 = vadd.f32 %v3083_v41, %v3082_v22 }
 0x2db   : > { %3035 = vst.msk [vmem:[%s4966_s9 + $0x44] sm:$0xf] %vm454_vm3, %v3983_v39  ;;  %v3184_v9 = vsel %vm183_vm0, %v3136_v50, 0.0 }
 0x2dc   : > { %v3086_v43 = vadd.f32 %v3085_v31, %v3084_v55  ;;  %v3185_v49 = vadd.f32 %v3184_v9, %v3183_v28 }
 0x2de   : > { %v3187_v37 = vadd.f32 %v3186_v11, %v3185_v49  ;;  %v3088_v33 = vadd.f32 %v3087_v57, %v3086_v43 }
 0x2e0   : > { %v3189_v18 = vadd.f32 %v3188_v14, %v3187_v37 }
 0x302   : > { %v4045_v3 = vpop.f32.mrf.mxu1 }
 0x303   : > { %v3988_v19 = vpack.c.bf16 %v4045_v3, %v4045_v3  ;;  %v3141_v52 = vmul.f32 %v4045_v3, %v4045_v3  ;;  %v3093_v58 = vsel %vm183_vm0, %v4045_v3, 0.0 }
 0x304   : > { %v2843_v20 = vpop.f32.mrf.mxu1 }
 0x305   : > { %3040 = vst.msk [vmem:[%s4966_s9 + $0x58] sm:$0xf] %vm454_vm3, %v3988_v19  ;;  %v3986_v10 = vpack.c.bf16 %v2843_v20, %v2843_v20  ;;  %v3089_v25 = vsel %vm183_vm0, %v2843_v20, 0.0  ;;  %v3139_v8 = vmul.f32 %v2843_v20, %v2843_v20  ;;  %v3194_v61 = vsel %vm183_vm0, %v3141_v52, 0.0 }
 0x306   : > { %v3090_v27 = vadd.f32 %v3089_v25, %v3088_v33  ;;  %v4046_v34 = vpop.f32.mrf.mxu1 }
 0x307   : > { %3038 = vst.msk [vmem:[%s4966_s9 + $0x50] sm:$0xf] %vm454_vm3, %v3986_v10  ;;  %v3190_v38 = vsel %vm183_vm0, %v3139_v8, 0.0  ;;  %v3989_v44 = vpack.c.bf16 %v4046_v34, %v4046_v34  ;;  %v3142_v59 = vmul.f32 %v4046_v34, %v4046_v34  ;;  %v3095_v32 = vsel %vm183_vm0, %v4046_v34, 0.0 }
 0x308   : > { %v3191_v46 = vadd.f32 %v3190_v38, %v3189_v18  ;;  %v2846_v51 = vpop.f32.mrf.mxu1 }
 0x309   : > { %3041 = vst.msk [vmem:[%s4966_s9 + $0x5c] sm:$0xf] %vm454_vm3, %v3989_v44  ;;  %v3987_v54 = vpack.c.bf16 %v2846_v51, %v2846_v51  ;;  %v3091_v26 = vsel %vm183_vm0, %v2846_v51, 0.0  ;;  %v3140_v15 = vmul.f32 %v2846_v51, %v2846_v51  ;;  %v3196_v35 = vsel %vm183_vm0, %v3142_v59, 0.0 }
 0x30a   : > { %v3092_v56 = vadd.f32 %v3091_v26, %v3090_v27 }
 0x30b   : > { %3039 = vst.msk [vmem:[%s4966_s9 + $0x54] sm:$0xf] %vm454_vm3, %v3987_v54  ;;  %v3192_v24 = vsel %vm183_vm0, %v3140_v15, 0.0 }
 0x30c   : > { %v3094_v60 = vadd.f32 %v3093_v58, %v3092_v56  ;;  %v3193_v17 = vadd.f32 %v3192_v24, %v3191_v46 }
 0x30e   : > { %v3195_v62 = vadd.f32 %v3194_v61, %v3193_v17  ;;  %v3096_v23 = vadd.f32 %v3095_v32, %v3094_v60 }
 0x310   : > { %v3197_v30 = vadd.f32 %v3196_v35, %v3195_v62 }
 0x332   : > { %v4049_v48 = vpop.f32.mrf.mxu1 }
 0x333   : > { %v3992_v63 = vpack.c.bf16 %v4049_v48, %v4049_v48  ;;  %v3145_v45 = vmul.f32 %v4049_v48, %v4049_v48  ;;  %v3101_v53 = vsel %vm183_vm0, %v4049_v48, 0.0 }
 0x334   : > { %v2859_v0 = vpop.f32.mrf.mxu1 }
 0x335   : > { %3044 = vst.msk [vmem:[%s4966_s9 + $0x68] sm:$0xf] %vm454_vm3, %v3992_v63  ;;  %v3990_v42 = vpack.c.bf16 %v2859_v0, %v2859_v0  ;;  %v3143_v21 = vmul.f32 %v2859_v0, %v2859_v0  ;;  %v3097_v1 = vsel %vm183_vm0, %v2859_v0, 0.0  ;;  %v3202_v41 = vsel %vm183_vm0, %v3145_v45, 0.0 }
 0x336   : > { %v4050_v36 = vpop.f32.mrf.mxu1  ;;  %v3098_v5 = vadd.f32 %v3097_v1, %v3096_v23 }
 0x337   : > { %3042 = vst.msk [vmem:[%s4966_s9 + $0x60] sm:$0xf] %vm454_vm3, %v3990_v42  ;;  %v3993_v13 = vpack.c.bf16 %v4050_v36, %v4050_v36  ;;  %v3198_v16 = vsel %vm183_vm0, %v3143_v21, 0.0  ;;  %v3146_v50 = vmul.f32 %v4050_v36, %v4050_v36  ;;  %v3103_v9 = vsel %vm183_vm0, %v4050_v36, 0.0 }
 0x338   : > { %v2862_v4 = vpop.f32.mrf.mxu1  ;;  %v3199_v12 = vadd.f32 %v3198_v16, %v3197_v30 }
 0x339   : > { %3045 = vst.msk [vmem:[%s4966_s9 + $0x6c] sm:$0xf] %vm454_vm3, %v3993_v13  ;;  %v3991_v47 = vpack.c.bf16 %v2862_v4, %v2862_v4  ;;  %v3144_v2 = vmul.f32 %v2862_v4, %v2862_v4  ;;  %v3099_v7 = vsel %vm183_vm0, %v2862_v4, 0.0  ;;  %v3204_v33 = vsel %vm183_vm0, %v3146_v50, 0.0 }
 0x33a   : > { %v3100_v6 = vadd.f32 %v3099_v7, %v3098_v5 }
 0x33b   : > { %3043 = vst.msk [vmem:[%s4966_s9 + $0x64] sm:$0xf] %vm454_vm3, %v3991_v47  ;;  %v3200_v22 = vsel %vm183_vm0, %v3144_v2, 0.0 }
 0x33c   : > { %v3201_v28 = vadd.f32 %v3200_v22, %v3199_v12  ;;  %v3102_v40 = vadd.f32 %v3101_v53, %v3100_v6 }
 0x33e   : > { %v3203_v31 = vadd.f32 %v3202_v41, %v3201_v28  ;;  %v3104_v57 = vadd.f32 %v3103_v9, %v3102_v40 }
 0x340   : > { %v3205_v19 = vadd.f32 %v3204_v33, %v3203_v31 }
 0x362   : > { %v4053_v39 = vpop.f32.mrf.mxu1 }
 0x363   : > { %v3996_v55 = vpack.c.bf16 %v4053_v39, %v4053_v39  ;;  %v3149_v10 = vmul.f32 %v4053_v39, %v4053_v39  ;;  %v3109_v44 = vsel %vm183_vm0, %v4053_v39, 0.0 }
 0x364   : > { %v2875_v29 = vpop.f32.mrf.mxu1 }
 0x365   : > { %3048 = vst.msk [vmem:[%s4966_s9 + $0x78] sm:$0xf] %vm454_vm3, %v3996_v55  ;;  %v3994_v43 = vpack.c.bf16 %v2875_v29, %v2875_v29  ;;  %v3105_v49 = vsel %vm183_vm0, %v2875_v29, 0.0  ;;  %v3147_v11 = vmul.f32 %v2875_v29, %v2875_v29  ;;  %v3210_v26 = vsel %vm183_vm0, %v3149_v10, 0.0 }
 0x366   : > { %v4054_v37 = vpop.f32.mrf.mxu1  ;;  %v3106_v3 = vadd.f32 %v3105_v49, %v3104_v57 }
 0x367   : > { %3046 = vst.msk [vmem:[%s4966_s9 + $0x70] sm:$0xf] %vm454_vm3, %v3994_v43  ;;  %v3206_v14 = vsel %vm183_vm0, %v3147_v11, 0.0  ;;  %v3997_v18 = vpack.c.bf16 %v4054_v37, %v4054_v37  ;;  %v3150_v46 = vmul.f32 %v4054_v37, %v4054_v37  ;;  %v3111_v15 = vsel %vm183_vm0, %v4054_v37, 0.0 }
 0x368   : > { %v2878_v20 = vpop.f32.mrf.mxu1  ;;  %v3207_v34 = vadd.f32 %v3206_v14, %v3205_v19 }
 0x369   : > { %3049 = vst.msk [vmem:[%s4966_s9 + $0x7c] sm:$0xf] %vm454_vm3, %v3997_v18  ;;  %v3995_v25 = vpack.c.bf16 %v2878_v20, %v2878_v20  ;;  %v3107_v8 = vsel %vm183_vm0, %v2878_v20, 0.0  ;;  %v3148_v27 = vmul.f32 %v2878_v20, %v2878_v20  ;;  %v3212_v59 = vsel %vm183_vm0, %v3150_v46, 0.0 }
 0x36a   : > { %v3108_v38 = vadd.f32 %v3107_v8, %v3106_v3 }
 0x36b   : > { %3047 = vst.msk [vmem:[%s4966_s9 + $0x74] sm:$0xf] %vm454_vm3, %v3995_v25  ;;  %v3208_v51 = vsel %vm183_vm0, %v3148_v27, 0.0 }
 0x36c   : > { %v3110_v52 = vadd.f32 %v3109_v44, %v3108_v38  ;;  %v3209_v54 = vadd.f32 %v3208_v51, %v3207_v34 }
 0x36e   : > { %v3112_v56 = vadd.f32 %v3111_v15, %v3110_v52  ;;  %v3211_v58 = vadd.f32 %v3210_v26, %v3209_v54 }
 0x370   : > { %v3113_v24 = vrot.slane %v3112_v56, 4  ;;  %v3213_v60 = vadd.f32 %v3212_v59, %v3211_v58 }
 0x372   : > { %v3114_v17 = vadd.f32 %v3113_v24, %v3112_v56  ;;  %v3214_v61 = vrot.slane %v3213_v60, 4 }
 0x374   : > { %v3115_v32 = vrot.slane %v3114_v17, 2  ;;  %v3215_v62 = vadd.f32 %v3214_v61, %v3213_v60 }
 0x376   : > { %v3116_v23 = vadd.f32 %v3115_v32, %v3114_v17  ;;  %v3216_v35 = vrot.slane %v3215_v62, 2 }
 0x378   : > { %v3117_v30 = vrot.slane %v3116_v23, 1  ;;  %v3217_v48 = vadd.f32 %v3216_v35, %v3215_v62 }
 0x37a   : > { %v3218_v63 = vrot.slane %v3217_v48, 1  ;;  %v3118_v0 = vadd.f32 %v3117_v30, %v3116_v23 }
 0x37c   : > { %v3219_v42 = vadd.f32 %v3218_v63, %v3217_v48 }
 0x37e   : > { %v3221_v36 = vsel %vm3220_vm14, %v3118_v0, %v3219_v42 }
 0x37f   : > { %3222 = vst.msk [vmem:[%s181_s15] sm:$0x3] %vm186_vm2, %v3221_v36 }
 0x380 PF: > { %s14_s12 = sadd.s32 1, %s4105_s12  }
 0x381   : > { %p11_p4 = scmp.ge.s32.totalorder %s14_s12, 4  }
 0x383   :  { %13 = sbr.rel (!%p11_p4) target bundleno = 1 (0x1), region = 73 }

// kernel: basic_block_forward.4
= control target key start
LH: loop header
LB: loop body
LE: loop exit
PB: predicated region body
PF: predicated region fallthrough
CT: control target
= control target key end

     0   :  { %s4389_s15 = smov 0   ;;  %s5483_s0 = inlined_call_operand.vmem [shape: bf16[2,256,4], index: 0, kind: input, shape index: {}]   ;;  %s5484_s1 = inlined_call_operand.vmem [shape: f32[2,4], index: 1, kind: input, shape index: {}]   ;;  %s5485_s2 = inlined_call_operand.vmem [shape: bf16[36,4], index: 2, kind: input, shape index: {}]   ;;  %s5486_s3 = inlined_call_operand.vmem [shape: bf16[2,256,4], index: 3, kind: output, shape index: {0}]   ;;  %s5487_s4 = inlined_call_operand.vmem [shape: f32[2,2,4], index: 4, kind: output, shape index: {1}]  }
   0x1 LB: > { %s3474_s16 = sadd.s32 4294967295, %s4353_s15   ;;  %p3478_p0 = scmp.ge.s32.totalorder %s4353_s15, 1  ;;  %s4353_s15 = sphi %s4389_s15, %s15_s15  }
   0x2   : > { %p165_p1 = scmp.lt.s32.totalorder %s4353_s15, 3 }
   0x4   : > { %p166_p2 = pnand %p3478_p0, %p165_p1 }
   0x5   : > { %p4399_p3 = scmp.lt.s32.totalorder (!%p166_p2), %s3474_s16, 1  ;;  %s4356_s26 = smov (!%p166_p2), 4  }
   0x6   : > { %169 = sbr.rel (%p166_p2) target bundleno = 896 (0x380), region = 32  ;;  %s4357_s27 = smov (!%p166_p2), 8  }
   0x7   : > { %s4358_s28 = smov (!%p166_p2), 12   ;;  %s4359_s29 = smov (!%p166_p2), 16  }
   0x8   : > { %s4360_s30 = smov (!%p166_p2), 20   ;;  %s4361_s5 = smov (!%p166_p2), 24  }
   0x9   : > { %s4362_s8 = smov (!%p166_p2), 28   ;;  %s4363_s13 = smov (!%p166_p2), 32  }
   0xb   : > { %vm380_vm0 = vcmask 31744   ;;  %vm389_vm1 = vcmask 24576   ;;  %vm383_vm2 = vcmask 25600   ;;  %v4355_v0 = vmov 0.0   ;;  %s5490_s16 = smov (!%p4399_p3, %s3474_s16), 1 }
   0xc   : > { %381 = vst.msk [vmem:[#allocation2] sm:$0xff] %vm380_vm0, %v4355_v0  ;;  %382 = vst.msk [vmem:[#allocation2 + $0x8] sm:$0xff] %vm380_vm0, %v4355_v0  ;;  %s3843_s18 = sshll.u32 %s5490_s16, 7  ;;  %v4462_v1 = vld [vmem:[%s5484_s1] ss:$0 sm:$0xff]  ;;  %vm619_vm3 = vcmask 27648  }
   0xd   : > { %386 = vst.msk [vmem:[#allocation2 + $0x198] sm:$0xff] %vm380_vm0, %v4355_v0  ;;  %387 = vst.msk [vmem:[#allocation2 + $0x1a0] sm:$0xff] %vm380_vm0, %v4355_v0  ;;  %s4457_s21 = scalar_lea.vmem %s5483_s0, %s3843_s18  ;;  %v4472_v13 = vld [vmem:[%s5484_s1 + $0x1] ss:$0 sm:$0xff]  ;;  %vm876_vm4 = vcmask 60448   ;;  %vm1133_vm5 = vcmask 93248   ;;  %s5284_s23 = scalar_lea.vmem %s5486_s3, %s3843_s18 }
   0xe   : > { %391 = vst.msk [vmem:[#allocation2 + $0x18] sm:$0x1] %vm389_vm1, %v4355_v0  ;;  %392 = vst.msk [vmem:[#allocation2 + $0x30] sm:$0x1] %vm389_vm1, %v4355_v0  ;;  %v4166_v2 = vld [vmem:[%s4457_s21] sm:$0xff]   ;;  %v4229_v3 = vld [vmem:[%s4457_s21 + $0x8] sm:$0xff]  }
   0xf   : > { %393 = vst.msk [vmem:[#allocation2 + $0x48] sm:$0x1] %vm389_vm1, %v4355_v0  ;;  %394 = vst.msk [vmem:[#allocation2 + $0x60] sm:$0x1] %vm389_vm1, %v4355_v0  ;;  %v4230_v4 = vld [vmem:[%s4457_s21 + $0x10] sm:$0xff]   ;;  %v4167_v5 = vunpack.c.l.bf16 %v4166_v2  ;;  %v4168_v6 = vunpack.c.h.bf16 %v4166_v2  ;;  %v4171_v7 = vunpack.c.l.bf16 %v4229_v3  ;;  %v4231_v9 = vld [vmem:[%s4457_s21 + $0x18] sm:$0xff]   ;;  %v4172_v14 = vunpack.c.h.bf16 %v4229_v3 }
  0x10   : > { %395 = vst.msk [vmem:[#allocation2 + $0x78] sm:$0x1] %vm389_vm1, %v4355_v0  ;;  %396 = vst.msk [vmem:[#allocation2 + $0x90] sm:$0x1] %vm389_vm1, %v4355_v0  ;;  %v4175_v8 = vunpack.c.l.bf16 %v4230_v4  ;;  %v4232_v10 = vld [vmem:[%s4457_s21 + $0x20] sm:$0xff]   ;;  %v4179_v15 = vunpack.c.l.bf16 %v4231_v9  ;;  %v4176_v16 = vunpack.c.h.bf16 %v4230_v4  ;;  %v4233_v34 = vld [vmem:[%s4457_s21 + $0x28] sm:$0xff]   ;;  %v4180_v48 = vunpack.c.h.bf16 %v4231_v9 }
  0x11   : > { %397 = vst.msk [vmem:[#allocation2 + $0xa8] sm:$0x1] %vm389_vm1, %v4355_v0  ;;  %398 = vst.msk [vmem:[#allocation2 + $0xc0] sm:$0x1] %vm389_vm1, %v4355_v0  ;;  %v4183_v17 = vunpack.c.l.bf16 %v4232_v10  ;;  %v279_v20 = vmul.f32 %v4167_v5, %v4462_v1  ;;  %v281_v21 = vmul.f32 %v4171_v7, %v4462_v1  ;;  %v280_v22 = vmul.f32 %v4168_v6, %v4462_v1  ;;  %v4234_v39 = vld [vmem:[%s4457_s21 + $0x30] sm:$0xff]   ;;  %v4494_v40 = vld [vmem:[%s4457_s21 + $0x38] sm:$0xff]  }
  0x12   : > { %399 = vst.msk [vmem:[#allocation2 + $0xd8] sm:$0x1] %vm389_vm1, %v4355_v0  ;;  %400 = vst.msk [vmem:[#allocation2 + $0xf0] sm:$0x1] %vm389_vm1, %v4355_v0  ;;  %v283_v23 = vmul.f32 %v4175_v8, %v4462_v1  ;;  %v282_v24 = vmul.f32 %v4172_v14, %v4462_v1  ;;  %v285_v25 = vmul.f32 %v4179_v15, %v4462_v1  ;;  %v4497_v45 = vld [vmem:[%s4457_s21 + $0x40] sm:$0xff]   ;;  %v4187_v49 = vunpack.c.l.bf16 %v4233_v34  ;;  %s3483_s18 = sshll.u32 %s5490_s16, 1 }
  0x13   : > { %401 = vst.msk [vmem:[#allocation2 + $0x108] sm:$0x1] %vm389_vm1, %v4355_v0  ;;  %402 = vst.msk [vmem:[#allocation2 + $0x120] sm:$0x1] %vm389_vm1, %v4355_v0  ;;  %v652_v11 = vld [vmem:[#allocation2 + $0x1] sm:$0xff]  ;;  %v316_v26 = vadd.f32 %v4472_v13, %v279_v20  ;;  %v318_v27 = vadd.f32 %v4472_v13, %v281_v21  ;;  %v284_v28 = vmul.f32 %v4176_v16, %v4462_v1  ;;  %v4184_v50 = vunpack.c.h.bf16 %v4232_v10 }
  0x14   : > { %403 = vst.msk [vmem:[#allocation2 + $0x138] sm:$0x1] %vm389_vm1, %v4355_v0  ;;  %404 = vst.msk [vmem:[#allocation2 + $0x150] sm:$0x1] %vm389_vm1, %v4355_v0  ;;  %v3877_v18 = vpack.c.bf16 %v652_v11, %v652_v11  ;;  %v287_v29 = vmul.f32 %v4183_v17, %v4462_v1  ;;  %v317_v30 = vadd.f32 %v4472_v13, %v280_v22  ;;  %v4191_v51 = vunpack.c.l.bf16 %v4234_v39  ;;  %v4237_v11 = vld [vmem:[%s4457_s21 + $0x48] sm:$0xff]  }
  0x15   : > { %405 = vst.msk [vmem:[#allocation2 + $0x168] sm:$0x1] %vm389_vm1, %v4355_v0  ;;  %406 = vst.msk [vmem:[#allocation2 + $0x180] sm:$0x1] %vm389_vm1, %v4355_v0  ;;  %v320_v31 = vadd.f32 %v4472_v13, %v283_v23  ;;  %v319_v32 = vadd.f32 %v4472_v13, %v282_v24  ;;  %v322_v33 = vadd.f32 %v4472_v13, %v285_v25  ;;  %v348_v35 = vmax.f32 %v316_v26, 0.0 }
  0x16   : > { %409 = vst.msk [vmem:[#allocation2 + $0x29] sm:$0x1] %vm389_vm1, %v4355_v0  ;;  %410 = vst.msk [vmem:[#allocation2 + $0x41] sm:$0x1] %vm389_vm1, %v4355_v0  ;;  %780 = vrot.lane.b32.xlu0 %v3877_v18, %s4356_s26  ;;  %v350_v36 = vmax.f32 %v318_v27, 0.0  ;;  %v321_v37 = vadd.f32 %v4472_v13, %v284_v28  ;;  %v324_v38 = vadd.f32 %v4472_v13, %v287_v29  ;;  %v349_v41 = vmax.f32 %v317_v30, 0.0 }
  0x17   : > { %411 = vst.msk [vmem:[#allocation2 + $0x59] sm:$0x1] %vm389_vm1, %v4355_v0  ;;  %412 = vst.msk [vmem:[#allocation2 + $0x71] sm:$0x1] %vm389_vm1, %v4355_v0  ;;  %v352_v42 = vmax.f32 %v320_v31, 0.0  ;;  %v351_v43 = vmax.f32 %v319_v32, 0.0  ;;  %v4188_v52 = vunpack.c.h.bf16 %v4233_v34  ;;  %v4195_v53 = vunpack.c.l.bf16 %v4494_v40 }
  0x18   : > { %413 = vst.msk [vmem:[#allocation2 + $0x89] sm:$0x1] %vm389_vm1, %v4355_v0  ;;  %414 = vst.msk [vmem:[#allocation2 + $0xa1] sm:$0x1] %vm389_vm1, %v4355_v0  ;;  %v354_v44 = vmax.f32 %v322_v33, 0.0  ;;  %v353_v46 = vmax.f32 %v321_v37, 0.0  ;;  %v286_v54 = vmul.f32 %v4180_v48, %v4462_v1  ;;  %v289_v55 = vmul.f32 %v4187_v49, %v4462_v1 }
  0x19   : > { %415 = vst.msk [vmem:[#allocation2 + $0xb9] sm:$0x1] %vm389_vm1, %v4355_v0  ;;  %416 = vst.msk [vmem:[#allocation2 + $0xd1] sm:$0x1] %vm389_vm1, %v4355_v0  ;;  %v356_v47 = vmax.f32 %v324_v38, 0.0  ;;  %v4192_v56 = vunpack.c.h.bf16 %v4234_v39  ;;  %v4199_v57 = vunpack.c.l.bf16 %v4497_v45  ;;  %v288_v58 = vmul.f32 %v4184_v50, %v4462_v1  ;;  %v4239_v29 = vld [vmem:[%s4457_s21 + $0x58] sm:$0xff]  }
  0x1a   : > { %417 = vst.msk [vmem:[#allocation2 + $0xe9] sm:$0x1] %vm389_vm1, %v4355_v0  ;;  %418 = vst.msk [vmem:[#allocation2 + $0x101] sm:$0x1] %vm389_vm1, %v4355_v0  ;;  %v291_v59 = vmul.f32 %v4191_v51, %v4462_v1  ;;  %v290_v60 = vmul.f32 %v4188_v52, %v4462_v1  ;;  %v293_v61 = vmul.f32 %v4195_v53, %v4462_v1  ;;  %v4196_v28 = vunpack.c.h.bf16 %v4494_v40  ;;  %v4240_v38 = vld [vmem:[%s4457_s21 + $0x60] sm:$0xff]  }
  0x1b   : > { %419 = vst.msk [vmem:[#allocation2 + $0x119] sm:$0x1] %vm389_vm1, %v4355_v0  ;;  %420 = vst.msk [vmem:[#allocation2 + $0x131] sm:$0x1] %vm389_vm1, %v4355_v0  ;;  %v323_v62 = vadd.f32 %v4472_v13, %v286_v54  ;;  %v326_v63 = vadd.f32 %v4472_v13, %v289_v55  ;;  %v295_v2 = vmul.f32 %v4199_v57, %v4462_v1  ;;  %v4203_v33 = vunpack.c.l.bf16 %v4237_v11 }
  0x1c   : > { %421 = vst.msk [vmem:[#allocation2 + $0x149] sm:$0x1] %vm389_vm1, %v4355_v0  ;;  %422 = vst.msk [vmem:[#allocation2 + $0x161] sm:$0x1] %vm389_vm1, %v4355_v0  ;;  %v325_v3 = vadd.f32 %v4472_v13, %v288_v58  ;;  %v328_v4 = vadd.f32 %v4472_v13, %v291_v59  ;;  %v327_v5 = vadd.f32 %v4472_v13, %v290_v60  ;;  %v4204_v37 = vunpack.c.h.bf16 %v4237_v11 }
  0x1d   : > { %423 = vst.msk [vmem:[#allocation2 + $0x179] sm:$0x1] %vm389_vm1, %v4355_v0  ;;  %424 = vst.msk [vmem:[#allocation2 + $0x191] sm:$0x1] %vm389_vm1, %v4355_v0  ;;  %v330_v6 = vadd.f32 %v4472_v13, %v293_v61  ;;  %v355_v7 = vmax.f32 %v323_v62, 0.0  ;;  %v358_v8 = vmax.f32 %v326_v63, 0.0  ;;  %v332_v10 = vadd.f32 %v4472_v13, %v295_v2 }
  0x1e   : > { %384 = vst.msk [vmem:[#allocation2 + $0x10] sm:$0x3] %vm383_vm2, %v4355_v0  ;;  %388 = vst.msk [vmem:[#allocation2 + $0x1a8] sm:$0x3] %vm383_vm2, %v4355_v0  ;;  %v357_v16 = vmax.f32 %v325_v3, 0.0  ;;  %v360_v17 = vmax.f32 %v328_v4, 0.0  ;;  %v294_v34 = vmul.f32 %v4196_v28, %v4462_v1  ;;  %v297_v40 = vmul.f32 %v4203_v33, %v4462_v1 }
  0x1f   : > { %390 = vst.msk [vmem:[#allocation2] sm:$0x1] %vm389_vm1, %v4355_v0  ;;  %407 = vst.msk [vmem:[#allocation2 + $0x198] sm:$0x1] %vm389_vm1, %v4355_v0  ;;  %v359_v18 = vmax.f32 %v327_v5, 0.0  ;;  %v364_v26 = vmax.f32 %v332_v10, 0.0  ;;  %v4215_v50 = vunpack.c.l.bf16 %v4240_v38  ;;  %v4212_v60 = vunpack.c.h.bf16 %v4239_v29 }
  0x20   : > { %408 = vst.msk [vmem:[#allocation2 + $0x11] sm:$0x1] %vm389_vm1, %v4355_v0  ;;  %425 = vst.msk [vmem:[#allocation2 + $0x1a9] sm:$0x1] %vm389_vm1, %v4355_v0  ;;  %v292_v0 = vmul.f32 %v4192_v56, %v4462_v1  ;;  %v4241_v62 = vld [vmem:[%s4457_s21 + $0x68] sm:$0xff]   ;;  %v4242_v63 = vld [vmem:[%s4457_s21 + $0x70] sm:$0xff]  }
  0x21   : > { %427 = vst.msk [vmem:[#allocation2 + $0x19] sm:$0xff] %vm380_vm0, %v348_v35  ;;  %429 = vst.msk [vmem:[#allocation2 + $0x31] sm:$0xff] %vm380_vm0, %v350_v36  ;;  %v4200_v35 = vunpack.c.h.bf16 %v4497_v45  ;;  %v334_v45 = vadd.f32 %v4472_v13, %v297_v40  ;;  %v302_v10 = vmul.f32 %v4212_v60, %v4462_v1  ;;  %v4219_v11 = vunpack.c.l.bf16 %v4241_v62 }
  0x22   : > { %428 = vst.msk [vmem:[#allocation2 + $0x21] sm:$0xff] %vm380_vm0, %v349_v41  ;;  %431 = vst.msk [vmem:[#allocation2 + $0x49] sm:$0xff] %vm380_vm0, %v352_v42  ;;  %v329_v9 = vadd.f32 %v4472_v13, %v292_v0  ;;  %v4211_v41 = vunpack.c.l.bf16 %v4239_v29  ;;  %vm2890_vm6 = vcmask 1041408   ;;  %vm1390_vm7 = vcmask 126048  }
  0x23   : > { %430 = vst.msk [vmem:[#allocation2 + $0x39] sm:$0xff] %vm380_vm0, %v351_v43  ;;  %433 = vst.msk [vmem:[#allocation2 + $0x61] sm:$0xff] %vm380_vm0, %v354_v44  ;;  %v331_v43 = vadd.f32 %v4472_v13, %v294_v34  ;;  %v296_v44 = vmul.f32 %v4200_v35, %v4462_v1  ;;  %v366_v58 = vmax.f32 %v334_v45, 0.0  ;;  %vm1647_vm8 = vcmask 158848  }
  0x24   : > { %432 = vst.msk [vmem:[#allocation2 + $0x51] sm:$0xff] %vm380_vm0, %v353_v46  ;;  %435 = vst.msk [vmem:[#allocation2 + $0x79] sm:$0xff] %vm380_vm0, %v356_v47  ;;  %v361_v25 = vmax.f32 %v329_v9, 0.0  ;;  %v298_v47 = vmul.f32 %v4204_v37, %v4462_v1  ;;  %v301_v48 = vmul.f32 %v4211_v41, %v4462_v1  ;;  %v303_v9 = vmul.f32 %v4215_v50, %v4462_v1 }
  0x25   : > { %v653_v12 = vld [vmem:[#allocation2 + $0x9] sm:$0xff]  ;;  %434 = vst.msk [vmem:[#allocation2 + $0x69] sm:$0xff] %vm380_vm0, %v355_v7  ;;  %437 = vst.msk [vmem:[#allocation2 + $0x91] sm:$0xff] %vm380_vm0, %v358_v8  ;;  %v363_v54 = vmax.f32 %v331_v43, 0.0  ;;  %v333_v55 = vadd.f32 %v4472_v13, %v296_v44  ;;  %vm1904_vm9 = vcmask 191648   ;;  %vm2162_vm10 = vcmask 224448  }
  0x26   : > { %v3878_v19 = vpack.c.bf16 %v653_v12, %v653_v12  ;;  %v4238_v12 = vld [vmem:[%s4457_s21 + $0x50] sm:$0xff]   ;;  %436 = vst.msk [vmem:[#allocation2 + $0x81] sm:$0xff] %vm380_vm0, %v357_v16  ;;  %439 = vst.msk [vmem:[#allocation2 + $0xa9] sm:$0xff] %vm380_vm0, %v360_v17  ;;  %v335_v57 = vadd.f32 %v4472_v13, %v298_v47  ;;  %v338_v59 = vadd.f32 %v4472_v13, %v301_v48  ;;  %v459_v48 = vld [vmem:[#allocation2] sm:$0xff]  ;;  %vm2419_vm11 = vcmask 257248  }
  0x27   : > { %438 = vst.msk [vmem:[#allocation2 + $0x99] sm:$0xff] %vm380_vm0, %v359_v18  ;;  %440 = vst.msk [vmem:[#allocation2 + $0xb1] sm:$0xff] %vm380_vm0, %v361_v25  ;;  %v4207_v36 = vunpack.c.l.bf16 %v4238_v12  ;;  %v4208_v42 = vunpack.c.h.bf16 %v4238_v12  ;;  %v365_v61 = vmax.f32 %v333_v55, 0.0  ;;  %v4216_v12 = vunpack.c.h.bf16 %v4240_v38 }
  0x28   : > { %782 = vrot.lane.b32.xlu0 %v3878_v19, %s4356_s26  ;;  %v654_v14 = vld [vmem:[#allocation2 + $0x19] sm:$0xff]  ;;  %v656_v15 = vld [vmem:[#allocation2 + $0x31] sm:$0xff]  ;;  %v362_v19 = vmax.f32 %v330_v6, 0.0  ;;  %443 = vst.msk [vmem:[#allocation2 + $0xd9] sm:$0xff] %vm380_vm0, %v364_v26  ;;  %442 = vst.msk [vmem:[#allocation2 + $0xc9] sm:$0xff] %vm380_vm0, %v363_v54  ;;  %v367_v6 = vmax.f32 %v335_v57, 0.0  ;;  %v340_v17 = vadd.f32 %v4472_v13, %v303_v9  ;;  %v4220_v18 = vunpack.c.h.bf16 %v4241_v62 }
  0x29   : > { %v3879_v20 = vpack.c.bf16 %v654_v14, %v654_v14  ;;  %v3881_v21 = vpack.c.bf16 %v656_v15, %v656_v15  ;;  %v655_v22 = vld [vmem:[#allocation2 + $0x21] sm:$0xff]  ;;  %v658_v23 = vld [vmem:[#allocation2 + $0x49] sm:$0xff]  ;;  %v299_v46 = vmul.f32 %v4207_v36, %v4462_v1  ;;  %v300_v49 = vmul.f32 %v4208_v42, %v4462_v1  ;;  %445 = vst.msk [vmem:[#allocation2 + $0xf1] sm:$0xff] %vm380_vm0, %v366_v58  ;;  %v461_v50 = vld [vmem:[#allocation2 + $0x18] sm:$0xff] }
  0x2a   : > { %v657_v24 = vld [vmem:[#allocation2 + $0x39] sm:$0xff]  ;;  %v660_v27 = vld [vmem:[#allocation2 + $0x61] sm:$0xff]  ;;  %441 = vst.msk [vmem:[#allocation2 + $0xc1] sm:$0xff] %vm380_vm0, %v362_v19  ;;  %v4538_v30 = vpack.c.bf16 %v655_v22, %v655_v22  ;;  %v3883_v31 = vpack.c.bf16 %v658_v23, %v658_v23  ;;  %444 = vst.msk [vmem:[#allocation2 + $0xe1] sm:$0xff] %vm380_vm0, %v365_v61  ;;  %v370_v7 = vmax.f32 %v338_v59, 0.0  ;;  %v4223_v14 = vunpack.c.l.bf16 %v4242_v63 }
  0x2b   : > { %784 = vrot.lane.b32.xlu1 %v3879_v20, %s4356_s26  ;;  %v4540_v32 = vpack.c.bf16 %v657_v24, %v657_v24  ;;  %v3885_v39 = vpack.c.bf16 %v660_v27, %v660_v27  ;;  %v659_v51 = vld [vmem:[#allocation2 + $0x51] sm:$0xff]  ;;  %v662_v52 = vld [vmem:[#allocation2 + $0x79] sm:$0xff]  ;;  %v336_v56 = vadd.f32 %v4472_v13, %v299_v46  ;;  %v337_v8 = vadd.f32 %v4472_v13, %v300_v49  ;;  %v460_v49 = vld [vmem:[#allocation2 + $0x8] sm:$0xff] }
  0x2c   : > { %788 = vrot.lane.b32.xlu0 %v3881_v21, %s4356_s26  ;;  %v661_v53 = vld [vmem:[#allocation2 + $0x69] sm:$0xff]  ;;  %v3884_v0 = vpack.c.bf16 %v659_v51, %v659_v51  ;;  %v3887_v2 = vpack.c.bf16 %v662_v52, %v662_v52  ;;  %v664_v4 = vld [vmem:[#allocation2 + $0x91] sm:$0xff]  ;;  %446 = vst.msk [vmem:[#allocation2 + $0xf9] sm:$0xff] %vm380_vm0, %v367_v6  ;;  %449 = vst.msk [vmem:[#allocation2 + $0x121] sm:$0xff] %vm380_vm0, %v370_v7  ;;  %v339_v20 = vadd.f32 %v4472_v13, %v302_v10  ;;  %vm2676_vm12 = vcmask 290048  }
  0x2d   : > { %v3886_v3 = vpack.c.bf16 %v661_v53, %v661_v53  ;;  %v368_v5 = vmax.f32 %v336_v56, 0.0  ;;  %v3889_v15 = vpack.c.bf16 %v664_v4, %v664_v4  ;;  %v369_v16 = vmax.f32 %v337_v8, 0.0  ;;  %v663_v19 = vld [vmem:[#allocation2 + $0x81] sm:$0xff]  ;;  %v666_v24 = vld [vmem:[#allocation2 + $0xa9] sm:$0xff]  ;;  %v464_v59 = vld [vmem:[#allocation2 + $0x38] sm:$0xff] }
  0x2e   : > { %v305_v21 = vmul.f32 %v4219_v11, %v4462_v1  ;;  %v304_v22 = vmul.f32 %v4216_v12, %v4462_v1  ;;  %v4224_v23 = vunpack.c.h.bf16 %v4242_v63  ;;  %v372_v25 = vmax.f32 %v340_v17, 0.0  ;;  %v665_v41 = vld [vmem:[#allocation2 + $0x99] sm:$0xff]  ;;  %v463_v53 = vld [vmem:[#allocation2 + $0x30] sm:$0xff]  ;;  %v465_v55 = vld [vmem:[#allocation2 + $0x48] sm:$0xff] }
  0x2f   : > { %786 = vrot.lane.b32.xlu1 %v4538_v30, %s4356_s26  ;;  %447 = vst.msk [vmem:[#allocation2 + $0x109] sm:$0xff] %vm380_vm0, %v368_v5  ;;  %448 = vst.msk [vmem:[#allocation2 + $0x111] sm:$0xff] %vm380_vm0, %v369_v16  ;;  %v307_v26 = vmul.f32 %v4223_v14, %v4462_v1  ;;  %v306_v27 = vmul.f32 %v4220_v18, %v4462_v1  ;;  %v371_v28 = vmax.f32 %v339_v20, 0.0  ;;  %v670_v45 = vld [vmem:[#allocation2 + $0xd9] sm:$0xff]  ;;  %v669_v56 = vld [vmem:[#allocation2 + $0xc9] sm:$0xff]  ;;  %vm2841_vm13 = vcmask 293888  }
  0x30   : > { %792 = vrot.lane.b32.xlu0 %v3883_v31, %s4356_s26  ;;  %v342_v29 = vadd.f32 %v4472_v13, %v305_v21  ;;  %v341_v31 = vadd.f32 %v4472_v13, %v304_v22  ;;  %v308_v33 = vmul.f32 %v4224_v23, %v4462_v1  ;;  %v3888_v34 = vpack.c.bf16 %v663_v19, %v663_v19  ;;  %v462_v54 = vld [vmem:[#allocation2 + $0x20] sm:$0xff]  ;;  %v672_v57 = vld [vmem:[#allocation2 + $0xf1] sm:$0xff]  ;;  %v468_v4 = vld [vmem:[#allocation2 + $0x68] sm:$0xff] }
  0x31   : > { %451 = vst.msk [vmem:[#allocation2 + $0x139] sm:$0xff] %vm380_vm0, %v372_v25  ;;  %v344_v35 = vadd.f32 %v4472_v13, %v307_v26  ;;  %v343_v36 = vadd.f32 %v4472_v13, %v306_v27  ;;  %v3891_v37 = vpack.c.bf16 %v666_v24, %v666_v24  ;;  %450 = vst.msk [vmem:[#allocation2 + $0x129] sm:$0xff] %vm380_vm0, %v371_v28  ;;  %v668_v1 = vld [vmem:[#allocation2 + $0xc1] sm:$0xff]  ;;  %v466_v63 = vld [vmem:[#allocation2 + $0x50] sm:$0xff]  ;;  %vm3385_vm14 = vcmask 1040384  }
  0x32   : > { %v374_v38 = vmax.f32 %v342_v29, 0.0  ;;  %v345_v40 = vadd.f32 %v4472_v13, %v308_v33  ;;  %v3890_v46 = vpack.c.bf16 %v665_v41, %v665_v41  ;;  %v3893_v47 = vpack.c.bf16 %v668_v1, %v668_v1  ;;  %v667_v13 = vld [vmem:[#allocation2 + $0xb1] sm:$0xff]  ;;  %v467_v60 = vld [vmem:[#allocation2 + $0x60] sm:$0xff]  ;;  %v473_v10 = vld [vmem:[#allocation2 + $0xa8] sm:$0xff] }
  0x33   : > { %790 = vrot.lane.b32.xlu1 %v4540_v32, %s4356_s26  ;;  %v376_v42 = vmax.f32 %v344_v35, 0.0  ;;  %v375_v43 = vmax.f32 %v343_v36, 0.0  ;;  %v3892_v51 = vpack.c.bf16 %v667_v13, %v667_v13  ;;  %v3895_v52 = vpack.c.bf16 %v670_v45, %v670_v45  ;;  %v4604_v61 = vld [vmem:[#allocation2 + $0xe1] sm:$0xff]  ;;  %v471_v5 = vld [vmem:[#allocation2 + $0x90] sm:$0xff]  ;;  %v472_v11 = vld [vmem:[#allocation2 + $0x98] sm:$0xff] }
  0x34   : > { %796 = vrot.lane.b32.xlu0 %v3885_v39, %s4356_s26  ;;  %v373_v39 = vmax.f32 %v341_v31, 0.0  ;;  %453 = vst.msk [vmem:[#allocation2 + $0x151] sm:$0xff] %vm380_vm0, %v374_v38  ;;  %v377_v44 = vmax.f32 %v345_v40, 0.0  ;;  %v3845_v58 = vpack.c.bf16 %v459_v48, %v459_v48  ;;  %v3846_v62 = vpack.c.bf16 %v460_v49, %v460_v49  ;;  %v470_v9 = vld [vmem:[#allocation2 + $0x80] sm:$0xff]  ;;  %v474_v17 = vld [vmem:[#allocation2 + $0xb0] sm:$0xff]  ;;  %v476_v18 = vld [vmem:[#allocation2 + $0xc8] sm:$0xff] }
  0x35   : > { %455 = vst.msk [vmem:[#allocation2 + $0x169] sm:$0xff] %vm380_vm0, %v376_v42  ;;  %454 = vst.msk [vmem:[#allocation2 + $0x159] sm:$0xff] %vm380_vm0, %v375_v43  ;;  %v3894_v6 = vpack.c.bf16 %v669_v56, %v669_v56  ;;  %v3897_v7 = vpack.c.bf16 %v672_v57, %v672_v57  ;;  %v4614_v8 = vpack.c.bf16 %v463_v53, %v463_v53  ;;  %v475_v16 = vld [vmem:[#allocation2 + $0xc0] sm:$0xff]  ;;  %v477_v23 = vld [vmem:[#allocation2 + $0xd8] sm:$0xff] }
  0x36   : > { %452 = vst.msk [vmem:[#allocation2 + $0x141] sm:$0xff] %vm380_vm0, %v373_v39  ;;  %456 = vst.msk [vmem:[#allocation2 + $0x171] sm:$0xff] %vm380_vm0, %v377_v44  ;;  %v3896_v12 = vpack.c.bf16 %v4604_v61, %v4604_v61  ;;  %v4620_v14 = vpack.c.bf16 %v462_v54, %v462_v54  ;;  %v4628_v20 = vpack.c.bf16 %v464_v59, %v464_v59  ;;  %v479_v24 = vld [vmem:[#allocation2 + $0xf0] sm:$0xff]  ;;  %v478_v25 = vld [vmem:[#allocation2 + $0xe0] sm:$0xff] }
  0x37   : > { %794 = vrot.lane.b32.xlu1 %v3884_v0, %s4356_s26  ;;  %v469_v0 = vld [vmem:[#allocation2 + $0x78] sm:$0xff]  ;;  %620 = vst.msk [vmem:[#allocation3] sm:$0xf] %vm619_vm3, %v3845_v58  ;;  %621 = vst.msk [vmem:[#allocation3 + $0x4] sm:$0xf] %vm619_vm3, %v3846_v62  ;;  %v4630_v21 = vpack.c.bf16 %v467_v60, %v467_v60  ;;  %v4632_v22 = vpack.c.bf16 %v466_v63, %v466_v63  ;;  %v4640_v27 = vpack.c.bf16 %v468_v4, %v468_v4  ;;  %v481_v31 = vld [vmem:[#allocation2 + $0x108] sm:$0xff] }
  0x38   : > { %800 = vrot.lane.b32.xlu0 %v3887_v2, %s4356_s26  ;;  %v4606_v2 = vld [vmem:[#allocation2 + $0x109] sm:$0xff]  ;;  %624 = vst.msk [vmem:[#allocation3 + $0x10] sm:$0xf] %vm619_vm3, %v4614_v8  ;;  %623 = vst.msk [vmem:[#allocation3 + $0xc] sm:$0xf] %vm619_vm3, %v4620_v14  ;;  %v4638_v26 = vpack.c.bf16 %v469_v0, %v469_v0  ;;  %v4642_v28 = vpack.c.bf16 %v471_v5, %v471_v5  ;;  %v4644_v29 = vpack.c.bf16 %v470_v9, %v470_v9  ;;  %v480_v33 = vld [vmem:[#allocation2 + $0xf8] sm:$0xff] }
  0x39   : > { %v3899_v19 = vpack.c.bf16 %v4606_v2, %v4606_v2  ;;  %625 = vst.msk [vmem:[#allocation3 + $0x14] sm:$0xf] %vm619_vm3, %v4628_v20  ;;  %628 = vst.msk [vmem:[#allocation3 + $0x20] sm:$0xf] %vm619_vm3, %v4630_v21  ;;  %v4654_v35 = vpack.c.bf16 %v473_v10, %v473_v10  ;;  %v4656_v36 = vpack.c.bf16 %v472_v11, %v472_v11  ;;  %v482_v38 = vld [vmem:[#allocation2 + $0x110] sm:$0xff]  ;;  %v485_v39 = vld [vmem:[#allocation2 + $0x138] sm:$0xff] }
  0x3a   : > { %627 = vst.msk [vmem:[#allocation3 + $0x1c] sm:$0xf] %vm619_vm3, %v4632_v22  ;;  %v484_v40 = vld [vmem:[#allocation2 + $0x128] sm:$0xff]  ;;  %v673_v41 = vld [vmem:[#allocation2 + $0xf9] sm:$0xff]  ;;  %630 = vst.msk [vmem:[#allocation3 + $0x28] sm:$0xf] %vm619_vm3, %v4638_v26  ;;  %v4668_v42 = vpack.c.bf16 %v474_v17, %v474_v17  ;;  %v4670_v43 = vpack.c.bf16 %v477_v23, %v477_v23  ;;  %v4672_v44 = vpack.c.bf16 %v476_v18, %v476_v18 }
  0x3b   : > { %798 = vrot.lane.b32.xlu1 %v3886_v3, %s4356_s26  ;;  %v4609_v3 = vpack.c.bf16 %v461_v50, %v461_v50  ;;  %v676_v1 = vld [vmem:[#allocation2 + $0x121] sm:$0xff]  ;;  %629 = vst.msk [vmem:[#allocation3 + $0x24] sm:$0xf] %vm619_vm3, %v4640_v27  ;;  %632 = vst.msk [vmem:[#allocation3 + $0x30] sm:$0xf] %vm619_vm3, %v4642_v28  ;;  %v3867_v13 = vpack.c.bf16 %v481_v31, %v481_v31  ;;  %v4684_v45 = vpack.c.bf16 %v480_v33, %v480_v33  ;;  %v675_v57 = vld [vmem:[#allocation2 + $0x111] sm:$0xff] }
  0x3c   : > { %804 = vrot.lane.b32.xlu0 %v3889_v15, %s4356_s26  ;;  %v4622_v15 = vpack.c.bf16 %v465_v55, %v465_v55  ;;  %631 = vst.msk [vmem:[#allocation3 + $0x2c] sm:$0xf] %vm619_vm3, %v4644_v29  ;;  %634 = vst.msk [vmem:[#allocation3 + $0x38] sm:$0xf] %vm619_vm3, %v4654_v35  ;;  %v3868_v49 = vpack.c.bf16 %v482_v38, %v482_v38  ;;  %v3871_v50 = vpack.c.bf16 %v485_v39, %v485_v39  ;;  %v487_v55 = vld [vmem:[#allocation2 + $0x150] sm:$0xff]  ;;  %v678_v58 = vld [vmem:[#allocation2 + $0x139] sm:$0xff] }
  0x3d   : > { %622 = vst.msk [vmem:[#allocation3 + $0x8] sm:$0xf] %vm619_vm3, %v4609_v3  ;;  %633 = vst.msk [vmem:[#allocation3 + $0x34] sm:$0xf] %vm619_vm3, %v4656_v36  ;;  %v3898_v53 = vpack.c.bf16 %v673_v41, %v673_v41  ;;  %v3901_v54 = vpack.c.bf16 %v676_v1, %v676_v1  ;;  %v3873_v59 = vpack.c.bf16 %v487_v55, %v487_v55  ;;  %v488_v60 = vld [vmem:[#allocation2 + $0x158] sm:$0xff]  ;;  %v489_v63 = vld [vmem:[#allocation2 + $0x168] sm:$0xff] }
  0x3e   : > { %626 = vst.msk [vmem:[#allocation3 + $0x18] sm:$0xf] %vm619_vm3, %v4622_v15  ;;  %635 = vst.msk [vmem:[#allocation3 + $0x3c] sm:$0xf] %vm619_vm3, %v4668_v42  ;;  %v3900_v61 = vpack.c.bf16 %v675_v57, %v675_v57  ;;  %v3903_v62 = vpack.c.bf16 %v678_v58, %v678_v58  ;;  %v3874_v0 = vpack.c.bf16 %v488_v60, %v488_v60  ;;  %v677_v2 = vld [vmem:[#allocation2 + $0x129] sm:$0xff]  ;;  %v680_v4 = vld [vmem:[#allocation2 + $0x151] sm:$0xff] }
  0x3f   : > { %802 = vrot.lane.b32.xlu1 %v3888_v34, %s4356_s26  ;;  %v483_v34 = vld [vmem:[#allocation2 + $0x120] sm:$0xff]  ;;  %638 = vst.msk [vmem:[#allocation3 + $0x48] sm:$0xf] %vm619_vm3, %v4670_v43  ;;  %637 = vst.msk [vmem:[#allocation3 + $0x44] sm:$0xf] %vm619_vm3, %v4672_v44  ;;  %v3875_v5 = vpack.c.bf16 %v489_v63, %v489_v63  ;;  %v3905_v9 = vpack.c.bf16 %v680_v4, %v680_v4  ;;  %v910_v38 = vld [vmem:[#allocation2 + $0xa] sm:$0xff] }
  0x40   : > { %808 = vrot.lane.b32.xlu0 %v3891_v37, %s4356_s26  ;;  %v4658_v37 = vpack.c.bf16 %v475_v16, %v475_v16  ;;  %v3869_v48 = vpack.c.bf16 %v483_v34, %v483_v34  ;;  %642 = vst.msk [vmem:[#allocation3 + $0x58] sm:$0xf] %vm619_vm3, %v3867_v13  ;;  %641 = vst.msk [vmem:[#allocation3 + $0x54] sm:$0xf] %vm619_vm3, %v4684_v45  ;;  %v679_v11 = vld [vmem:[#allocation2 + $0x141] sm:$0xff]  ;;  %v681_v18 = vld [vmem:[#allocation2 + $0x159] sm:$0xff] }
  0x41   : > { %643 = vst.msk [vmem:[#allocation3 + $0x5c] sm:$0xf] %vm619_vm3, %v3868_v49  ;;  %646 = vst.msk [vmem:[#allocation3 + $0x68] sm:$0xf] %vm619_vm3, %v3871_v50  ;;  %v3904_v16 = vpack.c.bf16 %v679_v11, %v679_v11  ;;  %v3906_v23 = vpack.c.bf16 %v681_v18, %v681_v18  ;;  %v911_v31 = vld [vmem:[#allocation2 + $0x1a] sm:$0xff]  ;;  %v913_v39 = vld [vmem:[#allocation2 + $0x32] sm:$0xff] }
  0x42   : > { %636 = vst.msk [vmem:[#allocation3 + $0x40] sm:$0xf] %vm619_vm3, %v4658_v37  ;;  %644 = vst.msk [vmem:[#allocation3 + $0x60] sm:$0xf] %vm619_vm3, %v3869_v48  ;;  %v4720_v34 = vpack.c.bf16 %v911_v31, %v911_v31  ;;  %v4725_v41 = vpack.c.bf16 %v913_v39, %v913_v39  ;;  %v912_v1 = vld [vmem:[#allocation2 + $0x22] sm:$0xff]  ;;  %v915_v13 = vld [vmem:[#allocation2 + $0x4a] sm:$0xff] }
  0x43   : > { %806 = vrot.lane.b32.xlu1 %v3890_v46, %s4356_s26  ;;  %v4674_v46 = vpack.c.bf16 %v479_v24, %v479_v24  ;;  %648 = vst.msk [vmem:[#allocation3 + $0x70] sm:$0xf] %vm619_vm3, %v3873_v59  ;;  %649 = vst.msk [vmem:[#allocation3 + $0x74] sm:$0xf] %vm619_vm3, %v3874_v0  ;;  %v4730_v48 = vpack.c.bf16 %v912_v1, %v912_v1  ;;  %v4732_v49 = vpack.c.bf16 %v915_v13, %v915_v13  ;;  %v914_v50 = vld [vmem:[#allocation2 + $0x3a] sm:$0xff]  ;;  %v918_v58 = vld [vmem:[#allocation2 + $0x6a] sm:$0xff] }
  0x44   : > { %812 = vrot.lane.b32.xlu0 %v3893_v47, %s4356_s26  ;;  %v4682_v47 = vpack.c.bf16 %v478_v25, %v478_v25  ;;  %650 = vst.msk [vmem:[#allocation3 + $0x78] sm:$0xf] %vm619_vm3, %v3875_v5  ;;  %v683_v25 = vld [vmem:[#allocation2 + $0x171] sm:$0xff]  ;;  %v919_v55 = vld [vmem:[#allocation2 + $0x7a] sm:$0xff]  ;;  %v4754_v60 = vpack.c.bf16 %v918_v58, %v918_v58  ;;  %v925_v5 = vld [vmem:[#allocation2 + $0xc2] sm:$0xff] }
  0x45   : > { %640 = vst.msk [vmem:[#allocation3 + $0x50] sm:$0xf] %vm619_vm3, %v4674_v46  ;;  %v3908_v33 = vpack.c.bf16 %v683_v25, %v683_v25  ;;  %v4748_v57 = vpack.c.bf16 %v919_v55, %v919_v55  ;;  %v921_v59 = vld [vmem:[#allocation2 + $0x92] sm:$0xff]  ;;  %v923_v63 = vld [vmem:[#allocation2 + $0xaa] sm:$0xff]  ;;  %v922_v4 = vld [vmem:[#allocation2 + $0x9a] sm:$0xff] }
  0x46   : > { %639 = vst.msk [vmem:[#allocation3 + $0x4c] sm:$0xf] %vm619_vm3, %v4682_v47  ;;  %v932_v13 = vld [vmem:[#allocation2 + $0x112] sm:$0xff]  ;;  %v934_v58 = vld [vmem:[#allocation2 + $0x12a] sm:$0xff] }
  0x47   : > { %810 = vrot.lane.b32.xlu1 %v3892_v51, %s4356_s26  ;;  %v3870_v51 = vpack.c.bf16 %v484_v40, %v484_v40  ;;  %v3910_v40 = vpack.c.bf16 %v910_v38, %v910_v38  ;;  %v933_v38 = vld [vmem:[#allocation2 + $0x122] sm:$0xff] }
  0x48   : > { %816 = vrot.lane.b32.xlu0 %v3895_v52, %s4356_s26  ;;  %v486_v52 = vld [vmem:[#allocation2 + $0x140] sm:$0xff] }
  0x49   : > { %v3872_v56 = vpack.c.bf16 %v486_v52, %v486_v52  ;;  %645 = vst.msk [vmem:[#allocation3 + $0x64] sm:$0xf] %vm619_vm3, %v3870_v51  ;;  %v917_v51 = vld [vmem:[#allocation2 + $0x62] sm:$0xff]  ;;  %v4738_v52 = vpack.c.bf16 %v914_v50, %v914_v50  ;;  %v935_v50 = vld [vmem:[#allocation2 + $0x13a] sm:$0xff] }
  0x4b   : > { %814 = vrot.lane.b32.xlu1 %v3894_v6, %s4356_s26  ;;  %647 = vst.msk [vmem:[#allocation3 + $0x6c] sm:$0xf] %vm619_vm3, %v3872_v56  ;;  %v490_v6 = vld [vmem:[#allocation2 + $0x170] sm:$0xff] }
  0x4c   : > { %820 = vrot.lane.b32.xlu0 %v3897_v7, %s4356_s26  ;;  %v3902_v7 = vpack.c.bf16 %v677_v2, %v677_v2  ;;  %v3876_v10 = vpack.c.bf16 %v490_v6, %v490_v6  ;;  %v3923_v2 = vpack.c.bf16 %v923_v63, %v923_v63  ;;  %v4767_v6 = vpack.c.bf16 %v922_v4, %v922_v4  ;;  %v939_v4 = vld [vmem:[#allocation2 + $0x16a] sm:$0xff] }
  0x4e   : > { %651 = vst.msk [vmem:[#allocation3 + $0x7c] sm:$0xf] %vm619_vm3, %v3876_v10  ;;  %v927_v10 = vld [vmem:[#allocation2 + $0xda] sm:$0xff] }
  0x4f   : > { %818 = vrot.lane.b32.xlu1 %v3896_v12, %s4356_s26  ;;  %v682_v12 = vld [vmem:[#allocation2 + $0x169] sm:$0xff] }
  0x50   : > { %824 = vrot.lane.b32.xlu0 %v3899_v19, %s4356_s26  ;;  %v3907_v17 = vpack.c.bf16 %v682_v12, %v682_v12  ;;  %v909_v19 = vld [vmem:[#allocation2 + $0x2] sm:$0xff]  ;;  %v3927_v12 = vpack.c.bf16 %v927_v10, %v927_v10 }
  0x51   : > { %v3909_v24 = vpack.c.bf16 %v909_v19, %v909_v19 }
  0x53   : > { %822 = vrot.lane.b32.xlu1 %v3898_v53, %s4356_s26  ;;  %v4740_v53 = vpack.c.bf16 %v917_v51, %v917_v51  ;;  %v3932_v51 = vpack.c.bf16 %v932_v13, %v932_v13 }
  0x54   : > { %828 = vrot.lane.b32.xlu0 %v3901_v54, %s4356_s26  ;;  %v916_v54 = vld [vmem:[#allocation2 + $0x52] sm:$0xff] }
  0x55   : > { %v4746_v56 = vpack.c.bf16 %v916_v54, %v916_v54  ;;  %v3935_v54 = vpack.c.bf16 %v935_v50, %v935_v50 }
  0x57   : > { %826 = vrot.lane.b32.xlu1 %v3900_v61, %s4356_s26  ;;  %v4756_v61 = vpack.c.bf16 %v921_v59, %v921_v59  ;;  %v937_v59 = vld [vmem:[#allocation2 + $0x152] sm:$0xff] }
  0x58   : > { %832 = vrot.lane.b32.xlu0 %v3903_v62, %s4356_s26  ;;  %v920_v62 = vld [vmem:[#allocation2 + $0x82] sm:$0xff]  ;;  %v3937_v63 = vpack.c.bf16 %v937_v59, %v937_v59 }
  0x59   : > { %v4762_v0 = vpack.c.bf16 %v920_v62, %v920_v62  ;;  %v3934_v62 = vpack.c.bf16 %v934_v58, %v934_v58  ;;  %v1423_v58 = vld [vmem:[#allocation2 + $0x19] sm:$0xff] }
  0x5b   : > { %830 = vrot.lane.b32.xlu1 %v3902_v7, %s4356_s26  ;;  %v3925_v7 = vpack.c.bf16 %v925_v5, %v925_v5 }
  0x5c   : > { %836 = vrot.lane.b32.xlu0 %v3905_v9, %s4356_s26  ;;  %v924_v9 = vld [vmem:[#allocation2 + $0xb2] sm:$0xff] }
  0x5d   : > { %v3924_v11 = vpack.c.bf16 %v924_v9, %v924_v9  ;;  %v938_v9 = vld [vmem:[#allocation2 + $0x15a] sm:$0xff] }
  0x5f   : > { %834 = vrot.lane.b32.xlu1 %v3904_v16, %s4356_s26  ;;  %v926_v16 = vld [vmem:[#allocation2 + $0xca] sm:$0xff] }
  0x60   : > { %840 = vrot.lane.b32.xlu0 %v3907_v17, %s4356_s26  ;;  %v929_v17 = vld [vmem:[#allocation2 + $0xf2] sm:$0xff]  ;;  %v3926_v18 = vpack.c.bf16 %v926_v16, %v926_v16 }
  0x61   : > { %v3929_v19 = vpack.c.bf16 %v929_v17, %v929_v17  ;;  %v940_v16 = vld [vmem:[#allocation2 + $0x172] sm:$0xff] }
  0x63   : > { %838 = vrot.lane.b32.xlu1 %v3906_v23, %s4356_s26  ;;  %v928_v23 = vld [vmem:[#allocation2 + $0xe2] sm:$0xff] }
  0x64   : > { %1037 = vrot.lane.b32.xlu0 %v3909_v24, %s4357_s27  ;;  %v931_v24 = vld [vmem:[#allocation2 + $0x10a] sm:$0xff]  ;;  %v3928_v25 = vpack.c.bf16 %v928_v23, %v928_v23 }
  0x65   : > { %v3931_v31 = vpack.c.bf16 %v931_v24, %v931_v24 }
  0x67   : > { %842 = vrot.lane.b32.xlu1 %v3908_v33, %s4356_s26  ;;  %v930_v33 = vld [vmem:[#allocation2 + $0xfa] sm:$0xff]  ;;  %s208_s26 = scalar_lea.vmem %s5487_s4, %s3483_s18 }
  0x68   : > { %1041 = vrot.lane.b32.xlu0 %v4720_v34, %s4357_s27  ;;  %v3930_v39 = vpack.c.bf16 %v930_v33, %v930_v33 }
  0x6b   : > { %1039 = vrot.lane.b32.xlu1 %v3910_v40, %s4357_s27  ;;  %v3933_v40 = vpack.c.bf16 %v933_v38, %v933_v38 }
  0x6c   : > { %1045 = vrot.lane.b32.xlu0 %v4725_v41, %s4357_s27 }
  0x6f   : > { %1043 = vrot.lane.b32.xlu1 %v4730_v48, %s4357_s27 }
  0x70   : > { %1049 = vrot.lane.b32.xlu0 %v4732_v49, %s4357_s27 }
  0x73   : > { %1047 = vrot.lane.b32.xlu1 %v4738_v52, %s4357_s27 }
  0x74   : > { %1053 = vrot.lane.b32.xlu0 %v4740_v53, %s4357_s27 }
  0x77   : > { %1051 = vrot.lane.b32.xlu1 %v4746_v56, %s4357_s27 }
  0x78   : > { %1057 = vrot.lane.b32.xlu0 %v4748_v57, %s4357_s27 }
  0x7b   : > { %1055 = vrot.lane.b32.xlu1 %v4754_v60, %s4357_s27 }
  0x7c   : > { %1061 = vrot.lane.b32.xlu0 %v4756_v61, %s4357_s27 }
  0x7f   : > { %1059 = vrot.lane.b32.xlu1 %v4762_v0, %s4357_s27 }
  0x80   : > { %1065 = vrot.lane.b32.xlu0 %v3923_v2, %s4357_s27  ;;  %v936_v2 = vld [vmem:[#allocation2 + $0x142] sm:$0xff] }
  0x81   : > { %v3936_v5 = vpack.c.bf16 %v936_v2, %v936_v2  ;;  %v1425_v2 = vld [vmem:[#allocation2 + $0x31] sm:$0xff] }
  0x83   : > { %1063 = vrot.lane.b32.xlu1 %v4767_v6, %s4357_s27 }
  0x84   : > { %1069 = vrot.lane.b32.xlu0 %v3925_v7, %s4357_s27  ;;  %v3939_v7 = vpack.c.bf16 %v939_v4, %v939_v4 }
  0x87   : > { %1067 = vrot.lane.b32.xlu1 %v3924_v11, %s4357_s27 }
  0x88   : > { %1073 = vrot.lane.b32.xlu0 %v3927_v12, %s4357_s27  ;;  %v781_v1 = vpop.permute.xlu0 %780  ;;  %v3938_v12 = vpack.c.bf16 %v938_v9, %v938_v9 }
  0x89   : > { %877 = vst.msk [vmem:[#allocation3] sm:$0xf] %vm876_vm4, %v781_v1 }
  0x8b   : > { %1071 = vrot.lane.b32.xlu1 %v3926_v18, %s4357_s27 }
  0x8c   : > { %1077 = vrot.lane.b32.xlu0 %v3929_v19, %s4357_s27  ;;  %v3940_v19 = vpack.c.bf16 %v940_v16, %v940_v16 }
  0x8f   : > { %1075 = vrot.lane.b32.xlu1 %v3928_v25, %s4357_s27 }
  0x90   : > { %1081 = vrot.lane.b32.xlu0 %v3931_v31, %s4357_s27 }
  0x93   : > { %1079 = vrot.lane.b32.xlu1 %v3930_v39, %s4357_s27 }
  0x94   : > { %1085 = vrot.lane.b32.xlu0 %v3933_v40, %s4357_s27 }
  0x97   : > { %1083 = vrot.lane.b32.xlu1 %v3932_v51, %s4357_s27 }
  0x98   : > { %1089 = vrot.lane.b32.xlu0 %v3935_v54, %s4357_s27 }
  0x9a   : > { %v783_v55 = vpop.permute.xlu0 %782 }
  0x9b   : > { %878 = vst.msk [vmem:[#allocation3 + $0x4] sm:$0xf] %vm876_vm4, %v783_v55  ;;  %1087 = vrot.lane.b32.xlu1 %v3934_v62, %s4357_s27 }
  0x9c   : > { %1093 = vrot.lane.b32.xlu0 %v3937_v63, %s4357_s27  ;;  %v3973_v63 = vpack.c.bf16 %v1423_v58, %v1423_v58 }
  0x9d   : > { %v785_v10 = vpop.permute.xlu1 %784 }
  0x9e   : > { %v789_v11 = vpop.permute.xlu0 %788  ;;  %879 = vst.msk [vmem:[#allocation3 + $0x8] sm:$0xf] %vm876_vm4, %v785_v10 }
  0x9f   : > { %881 = vst.msk [vmem:[#allocation3 + $0x10] sm:$0xf] %vm876_vm4, %v789_v11  ;;  %1091 = vrot.lane.b32.xlu1 %v3936_v5, %s4357_s27 }
  0xa0   : > { %1097 = vrot.lane.b32.xlu0 %v3939_v7, %s4357_s27  ;;  %v3975_v7 = vpack.c.bf16 %v1425_v2, %v1425_v2 }
  0xa1   : > { %v787_v17 = vpop.permute.xlu1 %786 }
  0xa2   : > { %v793_v18 = vpop.permute.xlu0 %792  ;;  %880 = vst.msk [vmem:[#allocation3 + $0xc] sm:$0xf] %vm876_vm4, %v787_v17 }
  0xa3   : > { %883 = vst.msk [vmem:[#allocation3 + $0x18] sm:$0xf] %vm876_vm4, %v793_v18  ;;  %1095 = vrot.lane.b32.xlu1 %v3938_v12, %s4357_s27  ;;  %v2198_v18 = vld [vmem:[#allocation2 + $0x51] sm:$0xff] }
  0xa4   : > { %1294 = vrot.lane.b32.xlu0 %v4609_v3, %s4358_s28 }
  0xa5   : > { %v791_v23 = vpop.permute.xlu1 %790 }
  0xa6   : > { %v797_v24 = vpop.permute.xlu0 %796  ;;  %882 = vst.msk [vmem:[#allocation3 + $0x14] sm:$0xf] %vm876_vm4, %v791_v23 }
  0xa7   : > { %885 = vst.msk [vmem:[#allocation3 + $0x20] sm:$0xf] %vm876_vm4, %v797_v24  ;;  %1099 = vrot.lane.b32.xlu1 %v3940_v19, %s4357_s27  ;;  %v2197_v24 = vld [vmem:[#allocation2 + $0x49] sm:$0xff] }
  0xa8   : > { %1298 = vrot.lane.b32.xlu0 %v4614_v8, %s4358_s28 }
  0xa9   : > { %v795_v25 = vpop.permute.xlu1 %794 }
  0xaa   : > { %v801_v31 = vpop.permute.xlu0 %800  ;;  %884 = vst.msk [vmem:[#allocation3 + $0x1c] sm:$0xf] %vm876_vm4, %v795_v25 }
  0xab   : > { %887 = vst.msk [vmem:[#allocation3 + $0x28] sm:$0xf] %vm876_vm4, %v801_v31  ;;  %1296 = vrot.lane.b32.xlu1 %v4620_v14, %s4358_s28 }
  0xac   : > { %1302 = vrot.lane.b32.xlu0 %v4622_v15, %s4358_s28 }
  0xad   : > { %v799_v3 = vpop.permute.xlu1 %798 }
  0xae   : > { %v805_v33 = vpop.permute.xlu0 %804  ;;  %886 = vst.msk [vmem:[#allocation3 + $0x24] sm:$0xf] %vm876_vm4, %v799_v3  ;;  %v4327_v3 = vld [vmem:[%s5485_s2 + $0x8] sm:$0xff]  }
  0xaf   : > { %889 = vst.msk [vmem:[#allocation3 + $0x30] sm:$0xf] %vm876_vm4, %v805_v33  ;;  %1300 = vrot.lane.b32.xlu1 %v4628_v20, %s4358_s28 }
  0xb0   : > { %1306 = vrot.lane.b32.xlu0 %v4630_v21, %s4358_s28 }
  0xb1   : > { %v803_v38 = vpop.permute.xlu1 %802 }
  0xb2   : > { %v809_v39 = vpop.permute.xlu0 %808  ;;  %888 = vst.msk [vmem:[#allocation3 + $0x2c] sm:$0xf] %vm876_vm4, %v803_v38 }
  0xb3   : > { %891 = vst.msk [vmem:[#allocation3 + $0x38] sm:$0xf] %vm876_vm4, %v809_v39  ;;  %1304 = vrot.lane.b32.xlu1 %v4632_v22, %s4358_s28  ;;  %v4328_v39 = vld [vmem:[%s5485_s2] sm:$0xff]  }
  0xb4   : > { %1310 = vrot.lane.b32.xlu0 %v4638_v26, %s4358_s28 }
  0xb5   : > { %v807_v14 = vpop.permute.xlu1 %806 }
  0xb6   : > { %v813_v40 = vpop.permute.xlu0 %812  ;;  %890 = vst.msk [vmem:[#allocation3 + $0x34] sm:$0xf] %vm876_vm4, %v807_v14 }
  0xb7   : > { %893 = vst.msk [vmem:[#allocation3 + $0x40] sm:$0xf] %vm876_vm4, %v813_v40  ;;  %1308 = vrot.lane.b32.xlu1 %v4640_v27, %s4358_s28 }
  0xb8   : > { %1314 = vrot.lane.b32.xlu0 %v4642_v28, %s4358_s28 }
  0xb9   : > { %v811_v1 = vpop.permute.xlu1 %810 }
  0xba   : > { %v817_v13 = vpop.permute.xlu0 %816  ;;  %892 = vst.msk [vmem:[#allocation3 + $0x3c] sm:$0xf] %vm876_vm4, %v811_v1  ;;  %v1430_v1 = vld [vmem:[#allocation2 + $0x69] sm:$0xff] }
  0xbb   : > { %895 = vst.msk [vmem:[#allocation3 + $0x48] sm:$0xf] %vm876_vm4, %v817_v13  ;;  %1312 = vrot.lane.b32.xlu1 %v4644_v29, %s4358_s28 }
  0xbc   : > { %1318 = vrot.lane.b32.xlu0 %v4654_v35, %s4358_s28 }
  0xbd   : > { %v815_v50 = vpop.permute.xlu1 %814 }
  0xbe   : > { %v821_v51 = vpop.permute.xlu0 %820  ;;  %894 = vst.msk [vmem:[#allocation3 + $0x44] sm:$0xf] %vm876_vm4, %v815_v50 }
  0xbf   : > { %897 = vst.msk [vmem:[#allocation3 + $0x50] sm:$0xf] %vm876_vm4, %v821_v51  ;;  %1316 = vrot.lane.b32.xlu1 %v4656_v36, %s4358_s28  ;;  %v1429_v51 = vld [vmem:[#allocation2 + $0x61] sm:$0xff] }
  0xc0   : > { %1322 = vrot.lane.b32.xlu0 %v4658_v37, %s4358_s28 }
  0xc1   : > { %v819_v54 = vpop.permute.xlu1 %818 }
  0xc2   : > { %v825_v55 = vpop.permute.xlu0 %824  ;;  %896 = vst.msk [vmem:[#allocation3 + $0x4c] sm:$0xf] %vm876_vm4, %v819_v54 }
  0xc3   : > { %899 = vst.msk [vmem:[#allocation3 + $0x58] sm:$0xf] %vm876_vm4, %v825_v55  ;;  %1320 = vrot.lane.b32.xlu1 %v4668_v42, %s4358_s28 }
  0xc4   : > { %1326 = vrot.lane.b32.xlu0 %v4670_v43, %s4358_s28 }
  0xc5   : > { %v823_v59 = vpop.permute.xlu1 %822 }
  0xc6   : > { %v829_v62 = vpop.permute.xlu0 %828  ;;  %898 = vst.msk [vmem:[#allocation3 + $0x54] sm:$0xf] %vm876_vm4, %v823_v59 }
  0xc7   : > { %901 = vst.msk [vmem:[#allocation3 + $0x60] sm:$0xf] %vm876_vm4, %v829_v62  ;;  %1324 = vrot.lane.b32.xlu1 %v4672_v44, %s4358_s28 }
  0xc8   : > { %1553 = vrot.lane.b32.xlu0 %v4538_v30, %s4359_s29 }
  0xc9   : > { %v827_v4 = vpop.permute.xlu1 %826 }
  0xca   : > { %v833_v5 = vpop.permute.xlu0 %832  ;;  %900 = vst.msk [vmem:[#allocation3 + $0x5c] sm:$0xf] %vm876_vm4, %v827_v4 }
  0xcb   : > { %903 = vst.msk [vmem:[#allocation3 + $0x68] sm:$0xf] %vm876_vm4, %v833_v5  ;;  %1551 = vrot.lane.b32.xlu1 %v3973_v63, %s4359_s29 }
  0xcc   : > { %1557 = vrot.lane.b32.xlu0 %v4540_v32, %s4359_s29 }
  0xcd   : > { %v831_v9 = vpop.permute.xlu1 %830 }
  0xce   : > { %v837_v10 = vpop.permute.xlu0 %836  ;;  %902 = vst.msk [vmem:[#allocation3 + $0x64] sm:$0xf] %vm876_vm4, %v831_v9 }
  0xcf   : > { %905 = vst.msk [vmem:[#allocation3 + $0x70] sm:$0xf] %vm876_vm4, %v837_v10  ;;  %1555 = vrot.lane.b32.xlu1 %v3975_v7, %s4359_s29  ;;  %v2201_v10 = vld [vmem:[#allocation2 + $0x79] sm:$0xff] }
  0xd0   : > { %1810 = vrot.lane.b32.xlu0 %v4730_v48, %s4360_s30  ;;  %v2196_v48 = vld [vmem:[#allocation2 + $0x39] sm:$0xff] }
  0xd1   : > { %v835_v30 = vpop.permute.xlu1 %834  ;;  %v4070_v17 = vpack.c.bf16 %v2196_v48, %v2196_v48  ;;  %v1434_v48 = vld [vmem:[#allocation2 + $0x99] sm:$0xff] }
  0xd2   : > { %v841_v11 = vpop.permute.xlu0 %840  ;;  %904 = vst.msk [vmem:[#allocation3 + $0x6c] sm:$0xf] %vm876_vm4, %v835_v30 }
  0xd3   : > { %907 = vst.msk [vmem:[#allocation3 + $0x78] sm:$0xf] %vm876_vm4, %v841_v11  ;;  %1808 = vrot.lane.b32.xlu1 %v4720_v34, %s4360_s30 }
  0xd4   : > { %1814 = vrot.lane.b32.xlu0 %v4738_v52, %s4360_s30 }
  0xd5   : > { %v839_v32 = vpop.permute.xlu1 %838 }
  0xd6   : > { %v1038_v12 = vpop.permute.xlu0 %1037  ;;  %906 = vst.msk [vmem:[#allocation3 + $0x74] sm:$0xf] %vm876_vm4, %v839_v32 }
  0xd7   : > { %1134 = vst.msk [vmem:[#allocation3] sm:$0xf] %vm1133_vm5, %v1038_v12  ;;  %1812 = vrot.lane.b32.xlu1 %v4725_v41, %s4360_s30 }
  0xd8   : > { %2068 = vrot.lane.b32.xlu0 %v4628_v20, %s4361_s5  ;;  %v4326_v20 = vld [vmem:[%s5485_s2 + $0x10] ss:$0 sps:$4 sm:$0x33]  }
  0xd9   : > { %v843_v16 = vpop.permute.xlu1 %842  ;;  %4307 = vmatprep.subr.msk.bf16.mxu0 %vm2890_vm6, %v4326_v20  ;;  %4308 = vmatprep.subr.msk.bf16.mxu1 %vm2890_vm6, %v4326_v20 }
  0xda   : > { %v1042_v34 = vpop.permute.xlu0 %1041  ;;  %908 = vst.msk [vmem:[#allocation3 + $0x7c] sm:$0xf] %vm876_vm4, %v843_v16 }
  0xdb   : > { %1136 = vst.msk [vmem:[#allocation3 + $0x8] sm:$0xf] %vm1133_vm5, %v1042_v34  ;;  %2066 = vrot.lane.b32.xlu1 %v4614_v8, %s4361_s5  ;;  %v4072_v8 = vpack.c.bf16 %v2198_v18, %v2198_v18 }
  0xdc   : > { %2072 = vrot.lane.b32.xlu0 %v4632_v22, %s4361_s5  ;;  %v2892_v22 = vsel %vm2890_vm6, %v4326_v20, 0 }
  0xdd   : > { %v1040_v19 = vpop.permute.xlu1 %1039  ;;  %4264 = vmatpush3.bf16.msra.mxu0 %v2892_v22  ;;  %4304 = vmatpush3.bf16.msra.mxu1 %v2892_v22 }
  0xde   : > { %v1046_v23 = vpop.permute.xlu0 %1045  ;;  %1135 = vst.msk [vmem:[#allocation3 + $0x4] sm:$0xf] %vm1133_vm5, %v1040_v19  ;;  %4265 = vmatprep.subr.bf16.mxu0 %v4327_v3  ;;  %4302 = vmatprep.subr.bf16.mxu1 %v4327_v3 }
  0xdf   : > { %1138 = vst.msk [vmem:[#allocation3 + $0x10] sm:$0xf] %vm1133_vm5, %v1046_v23  ;;  %2070 = vrot.lane.b32.xlu1 %v4622_v15, %s4361_s5  ;;  %v4071_v15 = vpack.c.bf16 %v2197_v24, %v2197_v24 }
  0xe0   : > { %2325 = vrot.lane.b32.xlu0 %v4070_v17, %s4362_s8  ;;  %v1433_v17 = vld [vmem:[#allocation2 + $0x91] sm:$0xff] }
  0xe1   : > { %v1044_v25 = vpop.permute.xlu1 %1043  ;;  %4266 = vmatpush3.bf16.msra.mxu0 %v4327_v3  ;;  %4305 = vmatpush3.bf16.msra.mxu1 %v4327_v3  ;;  %v3983_v19 = vpack.c.bf16 %v1433_v17, %v1433_v17  ;;  %v2467_v17 = vld [vmem:[#allocation2 + $0xe2] sm:$0xff] }
  0xe2   : > { %v1050_v31 = vpop.permute.xlu0 %1049  ;;  %1137 = vst.msk [vmem:[#allocation3 + $0xc] sm:$0xf] %vm1133_vm5, %v1044_v25  ;;  %4267 = vmatprep.subr.bf16.mxu0 %v4328_v39  ;;  %4303 = vmatprep.subr.bf16.mxu1 %v4328_v39 }
  0xe3   : > { %1140 = vst.msk [vmem:[#allocation3 + $0x18] sm:$0xf] %vm1133_vm5, %v1050_v31  ;;  %2323 = vrot.lane.b32.xlu1 %v3975_v7, %s4362_s8 }
  0xe4   : > { %2329 = vrot.lane.b32.xlu0 %v4072_v8, %s4362_s8 }
  0xe5   : > { %v1048_v33 = vpop.permute.xlu1 %1047  ;;  %4268 = vmatpush3.bf16.msra.mxu0 %v4328_v39  ;;  %4306 = vmatpush3.bf16.msra.mxu1 %v4328_v39  ;;  %v2460_v39 = vld [vmem:[#allocation2 + $0x92] sm:$0xff] }
  0xe6   : > { %v1054_v38 = vpop.permute.xlu0 %1053  ;;  %1139 = vst.msk [vmem:[#allocation3 + $0x14] sm:$0xf] %vm1133_vm5, %v1048_v33 }
  0xe7   : > { %1142 = vst.msk [vmem:[#allocation3 + $0x20] sm:$0xf] %vm1133_vm5, %v1054_v38  ;;  %2327 = vrot.lane.b32.xlu1 %v4071_v15, %s4362_s8 }
  0xe8   : > { %2582 = vrot.lane.b32.xlu0 %v4738_v52, %s4363_s13  ;;  %v3980_v52 = vpack.c.bf16 %v1430_v1, %v1430_v1  ;;  %v4109_v1 = vpack.c.bf16 %v2460_v39, %v2460_v39 }
  0xe9   : > { %v1052_v14 = vpop.permute.xlu1 %1051 }
  0xea   : > { %v1058_v40 = vpop.permute.xlu0 %1057  ;;  %1141 = vst.msk [vmem:[#allocation3 + $0x1c] sm:$0xf] %vm1133_vm5, %v1052_v14  ;;  %v2463_v14 = vld [vmem:[#allocation2 + $0xb2] sm:$0xff] }
  0xeb   : > { %1144 = vst.msk [vmem:[#allocation3 + $0x28] sm:$0xf] %vm1133_vm5, %v1058_v40  ;;  %2580 = vrot.lane.b32.xlu1 %v4725_v41, %s4363_s13  ;;  %v3979_v41 = vpack.c.bf16 %v1429_v51, %v1429_v51 }
  0xec   : > { %2586 = vrot.lane.b32.xlu0 %v4746_v56, %s4363_s13 }
  0xed   : > { %v1056_v13 = vpop.permute.xlu1 %1055 }
  0xee   : > { %v1062_v50 = vpop.permute.xlu0 %1061  ;;  %1143 = vst.msk [vmem:[#allocation3 + $0x24] sm:$0xf] %vm1133_vm5, %v1056_v13  ;;  %v4112_v13 = vpack.c.bf16 %v2463_v14, %v2463_v14 }
  0xef   : > { %1146 = vst.msk [vmem:[#allocation3 + $0x30] sm:$0xf] %vm1133_vm5, %v1062_v50  ;;  %2584 = vrot.lane.b32.xlu1 %v4732_v49, %s4363_s13  ;;  %v2462_v50 = vld [vmem:[#allocation2 + $0xaa] sm:$0xff] }
  0xf0   : > { %1561 = vrot.lane.b32.xlu0 %v4072_v8, %s4359_s29 }
  0xf1   : > { %v1060_v54 = vpop.permute.xlu1 %1059 }
  0xf2   : > { %v1066_v55 = vpop.permute.xlu0 %1065  ;;  %1145 = vst.msk [vmem:[#allocation3 + $0x2c] sm:$0xf] %vm1133_vm5, %v1060_v54  ;;  %v4111_v54 = vpack.c.bf16 %v2462_v50, %v2462_v50 }
  0xf3   : > { %1148 = vst.msk [vmem:[#allocation3 + $0x38] sm:$0xf] %vm1133_vm5, %v1066_v55  ;;  %1559 = vrot.lane.b32.xlu1 %v4071_v15, %s4359_s29  ;;  %v2461_v15 = vld [vmem:[#allocation2 + $0x9a] sm:$0xff]  ;;  %v1438_v55 = vld [vmem:[#allocation2 + $0xc9] sm:$0xff] }
  0xf4   : > { %1565 = vrot.lane.b32.xlu0 %v3980_v52, %s4359_s29  ;;  %v4110_v38 = vpack.c.bf16 %v2461_v15, %v2461_v15 }
  0xf5   : > { %v1064_v58 = vpop.permute.xlu1 %1063 }
  0xf6   : > { %v1070_v59 = vpop.permute.xlu0 %1069  ;;  %1147 = vst.msk [vmem:[#allocation3 + $0x34] sm:$0xf] %vm1133_vm5, %v1064_v58 }
  0xf7   : > { %1150 = vst.msk [vmem:[#allocation3 + $0x40] sm:$0xf] %vm1133_vm5, %v1070_v59  ;;  %1563 = vrot.lane.b32.xlu1 %v3979_v41, %s4359_s29  ;;  %v3988_v59 = vpack.c.bf16 %v1438_v55, %v1438_v55 }
  0xf8   : > { %1818 = vrot.lane.b32.xlu0 %v4746_v56, %s4360_s30 }
  0xf9   : > { %v1068_v62 = vpop.permute.xlu1 %1067 }
  0xfa   : > { %v1074_v63 = vpop.permute.xlu0 %1073  ;;  %1149 = vst.msk [vmem:[#allocation3 + $0x3c] sm:$0xf] %vm1133_vm5, %v1068_v62  ;;  %v1437_v62 = vld [vmem:[#allocation2 + $0xc1] sm:$0xff] }
  0xfb   : > { %1152 = vst.msk [vmem:[#allocation3 + $0x48] sm:$0xf] %vm1133_vm5, %v1074_v63  ;;  %1816 = vrot.lane.b32.xlu1 %v4732_v49, %s4360_s30  ;;  %v2202_v49 = vld [vmem:[#allocation2 + $0x81] sm:$0xff] }
  0xfc   : > { %1822 = vrot.lane.b32.xlu0 %v4754_v60, %s4360_s30 }
  0xfd   : > { %v1072_v2 = vpop.permute.xlu1 %1071 }
  0xfe   : > { %v1078_v4 = vpop.permute.xlu0 %1077  ;;  %1151 = vst.msk [vmem:[#allocation3 + $0x44] sm:$0xf] %vm1133_vm5, %v1072_v2 }
  0xff   : > { %1154 = vst.msk [vmem:[#allocation3 + $0x50] sm:$0xf] %vm1133_vm5, %v1078_v4  ;;  %1820 = vrot.lane.b32.xlu1 %v4740_v53, %s4360_s30  ;;  %v3987_v4 = vpack.c.bf16 %v1437_v62, %v1437_v62 }
 0x100   : > { %2076 = vrot.lane.b32.xlu0 %v4640_v27, %s4361_s5  ;;  %v4076_v27 = vpack.c.bf16 %v2202_v49, %v2202_v49 }
 0x101   : > { %v1076_v56 = vpop.permute.xlu1 %1075 }
 0x102   : > { %v1082_v5 = vpop.permute.xlu0 %1081  ;;  %1153 = vst.msk [vmem:[#allocation3 + $0x4c] sm:$0xf] %vm1133_vm5, %v1076_v56  ;;  %v1695_v56 = vld [vmem:[#allocation2 + $0xca] sm:$0xff] }
 0x103   : > { %1156 = vst.msk [vmem:[#allocation3 + $0x58] sm:$0xf] %vm1133_vm5, %v1082_v5  ;;  %2074 = vrot.lane.b32.xlu1 %v4630_v21, %s4361_s5  ;;  %v4075_v21 = vpack.c.bf16 %v2201_v10, %v2201_v10 }
 0x104   : > { %2080 = vrot.lane.b32.xlu0 %v4644_v29, %s4361_s5 }
 0x105   : > { %v1080_v7 = vpop.permute.xlu1 %1079 }
 0x106   : > { %v1086_v9 = vpop.permute.xlu0 %1085  ;;  %1155 = vst.msk [vmem:[#allocation3 + $0x54] sm:$0xf] %vm1133_vm5, %v1080_v7  ;;  %v4020_v7 = vpack.c.bf16 %v1695_v56, %v1695_v56  ;;  %v1955_v56 = vld [vmem:[#allocation2 + $0xf8] sm:$0xff] }
 0x107   : > { %1158 = vst.msk [vmem:[#allocation3 + $0x60] sm:$0xf] %vm1133_vm5, %v1086_v9  ;;  %2078 = vrot.lane.b32.xlu1 %v4638_v26, %s4361_s5  ;;  %v1694_v9 = vld [vmem:[#allocation2 + $0xc2] sm:$0xff] }
 0x108   : > { %2333 = vrot.lane.b32.xlu0 %v3980_v52, %s4362_s8 }
 0x109   : > { %v1084_v30 = vpop.permute.xlu1 %1083 }
 0x10a   : > { %v1090_v11 = vpop.permute.xlu0 %1089  ;;  %1157 = vst.msk [vmem:[#allocation3 + $0x5c] sm:$0xf] %vm1133_vm5, %v1084_v30  ;;  %v4019_v30 = vpack.c.bf16 %v1694_v9, %v1694_v9  ;;  %v4054_v9 = vpack.c.bf16 %v1955_v56, %v1955_v56  ;;  %v2218_v56 = vld [vmem:[#allocation2 + $0x141] sm:$0xff] }
 0x10b   : > { %1160 = vst.msk [vmem:[#allocation3 + $0x68] sm:$0xf] %vm1133_vm5, %v1090_v11  ;;  %2331 = vrot.lane.b32.xlu1 %v3979_v41, %s4362_s8 }
 0x10c   : > { %2337 = vrot.lane.b32.xlu0 %v4076_v27, %s4362_s8 }
 0x10d   : > { %v1088_v29 = vpop.permute.xlu1 %1087 }
 0x10e   : > { %v1094_v32 = vpop.permute.xlu0 %1093  ;;  %1159 = vst.msk [vmem:[#allocation3 + $0x64] sm:$0xf] %vm1133_vm5, %v1088_v29 }
 0x10f   : > { %1162 = vst.msk [vmem:[#allocation3 + $0x70] sm:$0xf] %vm1133_vm5, %v1094_v32  ;;  %2335 = vrot.lane.b32.xlu1 %v4075_v21, %s4362_s8 }
 0x110   : > { %2590 = vrot.lane.b32.xlu0 %v4754_v60, %s4363_s13  ;;  %v3984_v60 = vpack.c.bf16 %v1434_v48, %v1434_v48 }
 0x111   : > { %v1092_v26 = vpop.permute.xlu1 %1091 }
 0x112   : > { %v1098_v12 = vpop.permute.xlu0 %1097  ;;  %1161 = vst.msk [vmem:[#allocation3 + $0x6c] sm:$0xf] %vm1133_vm5, %v1092_v26  ;;  %v2210_v26 = vld [vmem:[#allocation2 + $0xe1] sm:$0xff] }
 0x113   : > { %1164 = vst.msk [vmem:[#allocation3 + $0x78] sm:$0xf] %vm1133_vm5, %v1098_v12  ;;  %2588 = vrot.lane.b32.xlu1 %v4740_v53, %s4363_s13 }
 0x114   : > { %2594 = vrot.lane.b32.xlu0 %v4762_v0, %s4363_s13 }
 0x115   : > { %v1096_v16 = vpop.permute.xlu1 %1095 }
 0x116   : > { %v1295_v34 = vpop.permute.xlu0 %1294  ;;  %1163 = vst.msk [vmem:[#allocation3 + $0x74] sm:$0xf] %vm1133_vm5, %v1096_v16  ;;  %v2209_v16 = vld [vmem:[#allocation2 + $0xd9] sm:$0xff] }
 0x117   : > { %1391 = vst.msk [vmem:[#allocation3] sm:$0xf] %vm1390_vm7, %v1295_v34  ;;  %2592 = vrot.lane.b32.xlu1 %v4748_v57, %s4363_s13 }
 0x118   : > { %1569 = vrot.lane.b32.xlu0 %v4076_v27, %s4359_s29 }
 0x119   : > { %v1100_v18 = vpop.permute.xlu1 %1099 }
 0x11a   : > { %v1299_v53 = vpop.permute.xlu0 %1298  ;;  %1165 = vst.msk [vmem:[#allocation3 + $0x7c] sm:$0xf] %vm1133_vm5, %v1100_v18 }
 0x11b   : > { %1393 = vst.msk [vmem:[#allocation3 + $0x8] sm:$0xf] %vm1390_vm7, %v1299_v53  ;;  %1567 = vrot.lane.b32.xlu1 %v4075_v21, %s4359_s29  ;;  %v5049_v53 = vpack.c.bf16 %v2467_v17, %v2467_v17 }
 0x11c   : > { %1573 = vrot.lane.b32.xlu0 %v3984_v60, %s4359_s29 }
 0x11d   : > { %v1297_v23 = vpop.permute.xlu1 %1296 }
 0x11e   : > { %v1303_v20 = vpop.permute.xlu0 %1302  ;;  %1392 = vst.msk [vmem:[#allocation3 + $0x4] sm:$0xf] %vm1390_vm7, %v1297_v23 }
 0x11f   : > { %1395 = vst.msk [vmem:[#allocation3 + $0x10] sm:$0xf] %vm1390_vm7, %v1303_v20  ;;  %1571 = vrot.lane.b32.xlu1 %v3983_v19, %s4359_s29 }
 0x120   : > { %1826 = vrot.lane.b32.xlu0 %v4762_v0, %s4360_s30 }
 0x121   : > { %v1301_v8 = vpop.permute.xlu1 %1300 }
 0x122   : > { %v1307_v22 = vpop.permute.xlu0 %1306  ;;  %1394 = vst.msk [vmem:[#allocation3 + $0xc] sm:$0xf] %vm1390_vm7, %v1301_v8 }
 0x123   : > { %1397 = vst.msk [vmem:[#allocation3 + $0x18] sm:$0xf] %vm1390_vm7, %v1307_v22  ;;  %1824 = vrot.lane.b32.xlu1 %v4748_v57, %s4360_s30  ;;  %v2206_v57 = vld [vmem:[#allocation2 + $0xb1] sm:$0xff] }
 0x124   : > { %1830 = vrot.lane.b32.xlu0 %v4767_v6, %s4360_s30 }
 0x125   : > { %v1305_v24 = vpop.permute.xlu1 %1304 }
 0x126   : > { %v1311_v25 = vpop.permute.xlu0 %1310  ;;  %1396 = vst.msk [vmem:[#allocation3 + $0x14] sm:$0xf] %vm1390_vm7, %v1305_v24 }
 0x127   : > { %1399 = vst.msk [vmem:[#allocation3 + $0x20] sm:$0xf] %vm1390_vm7, %v1311_v25  ;;  %1828 = vrot.lane.b32.xlu1 %v4756_v61, %s4360_s30  ;;  %v2205_v61 = vld [vmem:[#allocation2 + $0xa9] sm:$0xff] }
 0x128   : > { %2084 = vrot.lane.b32.xlu0 %v4656_v36, %s4361_s5  ;;  %v4080_v36 = vpack.c.bf16 %v2206_v57, %v2206_v57 }
 0x129   : > { %v1309_v0 = vpop.permute.xlu1 %1308 }
 0x12a   : > { %v1315_v31 = vpop.permute.xlu0 %1314  ;;  %1398 = vst.msk [vmem:[#allocation3 + $0x1c] sm:$0xf] %vm1390_vm7, %v1309_v0 }
 0x12b   : > { %1401 = vst.msk [vmem:[#allocation3 + $0x28] sm:$0xf] %vm1390_vm7, %v1315_v31  ;;  %2082 = vrot.lane.b32.xlu1 %v4642_v28, %s4361_s5 }
 0x12c   : > { %2088 = vrot.lane.b32.xlu0 %v4668_v42, %s4361_s5  ;;  %v4079_v42 = vpack.c.bf16 %v2205_v61, %v2205_v61 }
 0x12d   : > { %v1313_v6 = vpop.permute.xlu1 %1312 }
 0x12e   : > { %v1319_v3 = vpop.permute.xlu0 %1318  ;;  %1400 = vst.msk [vmem:[#allocation3 + $0x24] sm:$0xf] %vm1390_vm7, %v1313_v6  ;;  %v1441_v6 = vld [vmem:[#allocation2 + $0xf1] sm:$0xff] }
 0x12f   : > { %1403 = vst.msk [vmem:[#allocation3 + $0x30] sm:$0xf] %vm1390_vm7, %v1319_v3  ;;  %2086 = vrot.lane.b32.xlu1 %v4654_v35, %s4361_s5  ;;  %v5068_v3 = vpack.c.bf16 %v1441_v6, %v1441_v6  ;;  %v1445_v6 = vld [vmem:[#allocation2 + $0x121] sm:$0xff] }
 0x130   : > { %2341 = vrot.lane.b32.xlu0 %v3984_v60, %s4362_s8  ;;  %v4083_v60 = vpack.c.bf16 %v2209_v16, %v2209_v16  ;;  %v2470_v16 = vld [vmem:[#allocation2 + $0x10a] sm:$0xff] }
 0x131   : > { %v1317_v33 = vpop.permute.xlu1 %1316 }
 0x132   : > { %v1323_v28 = vpop.permute.xlu0 %1322  ;;  %1402 = vst.msk [vmem:[#allocation3 + $0x2c] sm:$0xf] %vm1390_vm7, %v1317_v33 }
 0x133   : > { %1405 = vst.msk [vmem:[#allocation3 + $0x38] sm:$0xf] %vm1390_vm7, %v1323_v28  ;;  %2339 = vrot.lane.b32.xlu1 %v3983_v19, %s4362_s8  ;;  %v2466_v19 = vld [vmem:[#allocation2 + $0xda] sm:$0xff] }
 0x134   : > { %2345 = vrot.lane.b32.xlu0 %v4080_v36, %s4362_s8  ;;  %v4115_v8 = vpack.c.bf16 %v2466_v19, %v2466_v19 }
 0x135   : > { %v1321_v35 = vpop.permute.xlu1 %1320 }
 0x136   : > { %v1327_v40 = vpop.permute.xlu0 %1326  ;;  %1404 = vst.msk [vmem:[#allocation3 + $0x34] sm:$0xf] %vm1390_vm7, %v1321_v35  ;;  %v1698_v35 = vld [vmem:[#allocation2 + $0xf2] sm:$0xff] }
 0x137   : > { %1407 = vst.msk [vmem:[#allocation3 + $0x40] sm:$0xf] %vm1390_vm7, %v1327_v40  ;;  %2343 = vrot.lane.b32.xlu1 %v4079_v42, %s4362_s8  ;;  %v4346_v40 = vld [vmem:[%s5484_s1 + $0x1] ss:$0 sm:$0xff] }
 0x138   : > { %2598 = vrot.lane.b32.xlu0 %v4110_v38, %s4363_s13  ;;  %v1442_v38 = vld [vmem:[#allocation2 + $0xf9] sm:$0xff] }
 0x139   : > { %v1325_v52 = vpop.permute.xlu1 %1324 }
 0x13a   : > { %v1554_v51 = vpop.permute.xlu0 %1553  ;;  %1406 = vst.msk [vmem:[#allocation3 + $0x3c] sm:$0xf] %vm1390_vm7, %v1325_v52 }
 0x13b   : > { %1649 = vst.msk [vmem:[#allocation3 + $0x4] sm:$0xf] %vm1647_vm8, %v1554_v51  ;;  %2596 = vrot.lane.b32.xlu1 %v4109_v1, %s4363_s13  ;;  %v4023_v51 = vpack.c.bf16 %v1698_v35, %v1698_v35  ;;  %v1703_v35 = vld [vmem:[#allocation2 + $0x12a] sm:$0xff] }
 0x13c   : > { %2602 = vrot.lane.b32.xlu0 %v4112_v13, %s4363_s13 }
 0x13d   : > { %v1552_v41 = vpop.permute.xlu1 %1551 }
 0x13e   : > { %v1558_v58 = vpop.permute.xlu0 %1557  ;;  %1648 = vst.msk [vmem:[#allocation3] sm:$0xf] %vm1647_vm8, %v1552_v41  ;;  %v1954_v41 = vld [vmem:[#allocation2 + $0xf0] sm:$0xff] }
 0x13f   : > { %1651 = vst.msk [vmem:[#allocation3 + $0xc] sm:$0xf] %vm1647_vm8, %v1558_v58  ;;  %2600 = vrot.lane.b32.xlu1 %v4111_v54, %s4363_s13  ;;  %v1699_v58 = vld [vmem:[#allocation2 + $0xfa] sm:$0xff] }
 0x140   : > { %1577 = vrot.lane.b32.xlu0 %v4080_v36, %s4359_s29  ;;  %v4243_v36 = vld [vmem:[%s4457_s21 + $0x78] sm:$0xff]  }
 0x141   : > { %v1556_v63 = vpop.permute.xlu1 %1555  ;;  %v4227_v15 = vunpack.c.l.bf16 %v4243_v36  ;;  %v4228_v33 = vunpack.c.h.bf16 %v4243_v36  ;;  %v3995_v36 = vpack.c.bf16 %v1445_v6, %v1445_v6 }
 0x142   : > { %v1811_v2 = vpop.permute.xlu0 %1810  ;;  %1650 = vst.msk [vmem:[#allocation3 + $0x8] sm:$0xf] %vm1647_vm8, %v1556_v63 }
 0x143   : > { %1906 = vst.msk [vmem:[#allocation3 + $0x4] sm:$0xf] %vm1904_vm9, %v1811_v2  ;;  %1575 = vrot.lane.b32.xlu1 %v4079_v42, %s4359_s29  ;;  %v1956_v2 = vld [vmem:[#allocation2 + $0x108] sm:$0xff] }
 0x144   : > { %1581 = vrot.lane.b32.xlu0 %v3988_v59, %s4359_s29 }
 0x145   : > { %v1809_v5 = vpop.permute.xlu1 %1808 }
 0x146   : > { %v1815_v49 = vpop.permute.xlu0 %1814  ;;  %1905 = vst.msk [vmem:[#allocation3] sm:$0xf] %vm1904_vm9, %v1809_v5  ;;  %v4055_v5 = vpack.c.bf16 %v1956_v2, %v1956_v2 }
 0x147   : > { %1908 = vst.msk [vmem:[#allocation3 + $0xc] sm:$0xf] %vm1904_vm9, %v1815_v49  ;;  %1579 = vrot.lane.b32.xlu1 %v3987_v4, %s4359_s29 }
 0x148   : > { %1834 = vrot.lane.b32.xlu0 %v4112_v13, %s4360_s30 }
 0x149   : > { %v1813_v27 = vpop.permute.xlu1 %1812 }
 0x14a   : > { %v2069_v10 = vpop.permute.xlu0 %2068  ;;  %1907 = vst.msk [vmem:[#allocation3 + $0x8] sm:$0xf] %vm1904_vm9, %v1813_v27  ;;  %v1957_v27 = vld [vmem:[#allocation2 + $0x110] sm:$0xff] }
 0x14b   : > { %2164 = vst.msk [vmem:[#allocation3 + $0x4] sm:$0xf] %vm2162_vm10, %v2069_v10  ;;  %1832 = vrot.lane.b32.xlu1 %v4111_v54, %s4360_s30 }
 0x14c   : > { %1838 = vrot.lane.b32.xlu0 %v4020_v7, %s4360_s30 }
 0x14d   : > { %v2067_v11 = vpop.permute.xlu1 %2066 }
 0x14e   : > { %v2073_v21 = vpop.permute.xlu0 %2072  ;;  %2163 = vst.msk [vmem:[#allocation3] sm:$0xf] %vm2162_vm10, %v2067_v11  ;;  %v2213_v11 = vld [vmem:[#allocation2 + $0x109] sm:$0xff] }
 0x14f   : > { %2166 = vst.msk [vmem:[#allocation3 + $0xc] sm:$0xf] %vm2162_vm10, %v2073_v21  ;;  %1836 = vrot.lane.b32.xlu1 %v4019_v30, %s4360_s30  ;;  %v4056_v21 = vpack.c.bf16 %v1957_v27, %v1957_v27  ;;  %v4092_v27 = vpack.c.bf16 %v2218_v56, %v2218_v56 }
 0x150   : > { %2092 = vrot.lane.b32.xlu0 %v4672_v44, %s4361_s5  ;;  %v5038_v44 = vpack.c.bf16 %v2210_v26, %v2210_v26 }
 0x151   : > { %v2071_v29 = vpop.permute.xlu1 %2070 }
 0x152   : > { %v2326_v32 = vpop.permute.xlu0 %2325  ;;  %2165 = vst.msk [vmem:[#allocation3 + $0x8] sm:$0xf] %vm2162_vm10, %v2071_v29  ;;  %v4087_v29 = vpack.c.bf16 %v2213_v11, %v2213_v11 }
 0x153   : > { %2421 = vst.msk [vmem:[#allocation3 + $0x4] sm:$0xf] %vm2419_vm11, %v2326_v32  ;;  %2090 = vrot.lane.b32.xlu1 %v4658_v37, %s4361_s5 }
 0x154   : > { %2096 = vrot.lane.b32.xlu0 %v4682_v47, %s4361_s5 }
 0x155   : > { %v2324_v12 = vpop.permute.xlu1 %2323 }
 0x156   : > { %v2330_v48 = vpop.permute.xlu0 %2329  ;;  %2420 = vst.msk [vmem:[#allocation3] sm:$0xf] %vm2419_vm11, %v2324_v12  ;;  %v2214_v12 = vld [vmem:[#allocation2 + $0x111] sm:$0xff] }
 0x157   : > { %2423 = vst.msk [vmem:[#allocation3 + $0xc] sm:$0xf] %vm2419_vm11, %v2330_v48  ;;  %2094 = vrot.lane.b32.xlu1 %v4670_v43, %s4361_s5 }
 0x158   : > { %2349 = vrot.lane.b32.xlu0 %v3988_v59, %s4362_s8  ;;  %v4053_v59 = vpack.c.bf16 %v1954_v41, %v1954_v41 }
 0x159   : > { %v2328_v37 = vpop.permute.xlu1 %2327 }
 0x15a   : > { %v2583_v34 = vpop.permute.xlu0 %2582  ;;  %2422 = vst.msk [vmem:[#allocation3 + $0x8] sm:$0xf] %vm2419_vm11, %v2328_v37  ;;  %v4088_v37 = vpack.c.bf16 %v2214_v12, %v2214_v12 }
 0x15b   : > { %2678 = vst.msk [vmem:[#allocation3 + $0x4] sm:$0xf] %vm2676_vm12, %v2583_v34  ;;  %2347 = vrot.lane.b32.xlu1 %v3987_v4, %s4362_s8  ;;  %v4024_v4 = vpack.c.bf16 %v1699_v58, %v1699_v58  ;;  %v4119_v34 = vpack.c.bf16 %v2470_v16, %v2470_v16  ;;  %v2217_v58 = vld [vmem:[#allocation2 + $0x139] sm:$0xff] }
 0x15c   : > { %2353 = vrot.lane.b32.xlu0 %v5038_v44, %s4362_s8 }
 0x15d   : > { %v2581_v43 = vpop.permute.xlu1 %2580 }
 0x15e   : > { %v2587_v18 = vpop.permute.xlu0 %2586  ;;  %2677 = vst.msk [vmem:[#allocation3] sm:$0xf] %vm2676_vm12, %v2581_v43 }
 0x15f   : > { %2680 = vst.msk [vmem:[#allocation3 + $0xc] sm:$0xf] %vm2676_vm12, %v2587_v18  ;;  %2351 = vrot.lane.b32.xlu1 %v4083_v60, %s4362_s8  ;;  %v2471_v18 = vld [vmem:[#allocation2 + $0x112] sm:$0xff] }
 0x160   : > { %2606 = vrot.lane.b32.xlu0 %v4020_v7, %s4363_s13 }
 0x161   : > { %v2585_v23 = vpop.permute.xlu1 %2584 }
 0x162   : > { %v1562_v20 = vpop.permute.xlu0 %1561  ;;  %2679 = vst.msk [vmem:[#allocation3 + $0x8] sm:$0xf] %vm2676_vm12, %v2585_v23 }
 0x163   : > { %1653 = vst.msk [vmem:[#allocation3 + $0x14] sm:$0xf] %vm1647_vm8, %v1562_v20  ;;  %2604 = vrot.lane.b32.xlu1 %v4019_v30, %s4363_s13  ;;  %v1188_v20 = vld [vmem:[#allocation2 + $0x120] sm:$0xff] }
 0x164   : > { %2610 = vrot.lane.b32.xlu0 %v5049_v53, %s4363_s13 }
 0x165   : > { %v1560_v22 = vpop.permute.xlu1 %1559  ;;  %v4329_v24 = vld [vmem:[#allocation3] sm:$0xff]  }
 0x166   : > { %v1566_v25 = vpop.permute.xlu0 %1565  ;;  %1652 = vst.msk [vmem:[#allocation3 + $0x10] sm:$0xf] %vm1647_vm8, %v1560_v22  ;;  %4269 = vmatprep.mubr.msk.bf16.mxu0 %vm2841_vm13, %v4329_v24  ;;  %v3963_v22 = vpack.c.bf16 %v1188_v20, %v1188_v20 }
 0x167   : > { %1655 = vst.msk [vmem:[#allocation3 + $0x1c] sm:$0xf] %vm1647_vm8, %v1566_v25  ;;  %2608 = vrot.lane.b32.xlu1 %v4115_v8, %s4363_s13 }
 0x168   : > { %1330 = vrot.lane.b32.xlu0 %v4674_v46, %s4358_s28 }
 0x169   : > { %v1564_v0 = vpop.permute.xlu1 %1563  ;;  %v4330_v31 = vld [vmem:[#allocation3 + $0x8] sm:$0xff]  }
 0x16a   : > { %v1819_v57 = vpop.permute.xlu0 %1818  ;;  %1654 = vst.msk [vmem:[#allocation3 + $0x18] sm:$0xf] %vm1647_vm8, %v1564_v0  ;;  %4270 = vmatmul.mubr.msk.bf16.vlgmr.msra.gmra.mxu0 %vm2841_vm13, %v4330_v31  ;;  %v1189_v0 = vld [vmem:[#allocation2 + $0x128] sm:$0xff] }
 0x16b   : > { %1910 = vst.msk [vmem:[#allocation3 + $0x14] sm:$0xf] %vm1904_vm9, %v1819_v57  ;;  %1328 = vrot.lane.b32.xlu1 %v4682_v47, %s4358_s28  ;;  %v4345_v47 = vld [vmem:[%s5484_s1] ss:$0 sm:$0xff] }
 0x16c   : > { %1583 = vrot.lane.b32.xlu0 %v4083_v60, %s4359_s29  ;;  %v309_v28 = vmul.f32 %v4345_v47, %v4227_v15  ;;  %v310_v42 = vmul.f32 %v4345_v47, %v4228_v33  ;;  %v1446_v15 = vld [vmem:[#allocation2 + $0x129] sm:$0xff] }
 0x16d   : > { %v1817_v61 = vpop.permute.xlu1 %1816 }
 0x16e   : > { %v1823_v46 = vpop.permute.xlu0 %1822  ;;  %1909 = vst.msk [vmem:[#allocation3 + $0x10] sm:$0xf] %vm1904_vm9, %v1817_v61  ;;  %v346_v1 = vadd.f32 %v4346_v40, %v309_v28  ;;  %v347_v13 = vadd.f32 %v4346_v40, %v310_v42  ;;  %v1702_v28 = vld [vmem:[#allocation2 + $0x122] sm:$0xff]  ;;  %v3996_v42 = vpack.c.bf16 %v1446_v15, %v1446_v15 }
 0x16f   : > { %1912 = vst.msk [vmem:[#allocation3 + $0x1c] sm:$0xf] %vm1904_vm9, %v1823_v46  ;;  %1332 = vrot.lane.b32.xlu1 %v4684_v45, %s4358_s28  ;;  %v3992_v45 = vpack.c.bf16 %v1442_v38, %v1442_v38  ;;  %v4027_v38 = vpack.c.bf16 %v1702_v28, %v1702_v28  ;;  %v1965_v28 = vld [vmem:[#allocation2 + $0x170] sm:$0xff] }
 0x170   : > { %1587 = vrot.lane.b32.xlu0 %v5068_v3, %s4359_s29  ;;  %v378_v50 = vmax.f32 %v346_v1, 0.0  ;;  %v379_v52 = vmax.f32 %v347_v13, 0.0  ;;  %v1960_v13 = vld [vmem:[#allocation2 + $0x138] sm:$0xff] }
 0x171   : > { %v1821_v39 = vpop.permute.xlu1 %1820 }
 0x172   : > { %v2077_v14 = vpop.permute.xlu0 %2076  ;;  %1911 = vst.msk [vmem:[#allocation3 + $0x18] sm:$0xf] %vm1904_vm9, %v1821_v39 }
 0x173   : > { %2168 = vst.msk [vmem:[#allocation3 + $0x14] sm:$0xf] %vm2162_vm10, %v2077_v14  ;;  %1585 = vrot.lane.b32.xlu1 %v5038_v44, %s4359_s29 }
 0x174   : > { %1840 = vrot.lane.b32.xlu0 %v4115_v8, %s4360_s30  ;;  %457 = vst.msk [vmem:[#allocation2 + $0x181] sm:$0xff] %vm380_vm0, %v378_v50  ;;  %458 = vst.msk [vmem:[#allocation2 + $0x189] sm:$0xff] %vm380_vm0, %v379_v52  ;;  %v4120_v8 = vpack.c.bf16 %v2471_v18, %v2471_v18  ;;  %v4059_v50 = vpack.c.bf16 %v1960_v13, %v1960_v13 }
 0x175   : > { %v2075_v54 = vpop.permute.xlu1 %2074 }
 0x176   : > { %v2081_v55 = vpop.permute.xlu0 %2080  ;;  %2167 = vst.msk [vmem:[#allocation3 + $0x10] sm:$0xf] %vm2162_vm10, %v2075_v54  ;;  %v1961_v54 = vld [vmem:[#allocation2 + $0x140] sm:$0xff] }
 0x177   : > { %2170 = vst.msk [vmem:[#allocation3 + $0x1c] sm:$0xf] %vm2162_vm10, %v2081_v55  ;;  %1589 = vrot.lane.b32.xlu1 %v3992_v45, %s4359_s29 }
 0x178   : > { %1844 = vrot.lane.b32.xlu0 %v4023_v51, %s4360_s30 }
 0x179   : > { %v2079_v62 = vpop.permute.xlu1 %2078 }
 0x17a   : > { %v2334_v63 = vpop.permute.xlu0 %2333  ;;  %2169 = vst.msk [vmem:[#allocation3 + $0x18] sm:$0xf] %vm2162_vm10, %v2079_v62  ;;  %v4091_v62 = vpack.c.bf16 %v2217_v58, %v2217_v58 }
 0x17b   : > { %2425 = vst.msk [vmem:[#allocation3 + $0x14] sm:$0xf] %vm2419_vm11, %v2334_v63  ;;  %1842 = vrot.lane.b32.xlu1 %v5049_v53, %s4360_s30 }
 0x17c   : > { %2098 = vrot.lane.b32.xlu0 %v4053_v59, %s4361_s5  ;;  %v4060_v59 = vpack.c.bf16 %v1961_v54, %v1961_v54 }
 0x17d   : > { %v2332_v49 = vpop.permute.xlu1 %2331 }
 0x17e   : > { %v2338_v7 = vpop.permute.xlu0 %2337  ;;  %2424 = vst.msk [vmem:[#allocation3 + $0x10] sm:$0xf] %vm2419_vm11, %v2332_v49 }
 0x17f   : > { %2427 = vst.msk [vmem:[#allocation3 + $0x1c] sm:$0xf] %vm2419_vm11, %v2338_v7  ;;  %1846 = vrot.lane.b32.xlu1 %v4024_v4, %s4360_s30 }
 0x180   : > { %2102 = vrot.lane.b32.xlu0 %v4055_v5, %s4361_s5 }
 0x181   : > { %v2336_v10 = vpop.permute.xlu1 %2335 }
 0x182   : > { %v2591_v30 = vpop.permute.xlu0 %2590  ;;  %2426 = vst.msk [vmem:[#allocation3 + $0x18] sm:$0xf] %vm2419_vm11, %v2336_v10 }
 0x183   : > { %2682 = vst.msk [vmem:[#allocation3 + $0x14] sm:$0xf] %vm2676_vm12, %v2591_v30  ;;  %2100 = vrot.lane.b32.xlu1 %v4054_v9, %s4361_s5  ;;  %v2474_v9 = vld [vmem:[#allocation2 + $0x13a] sm:$0xff] }
 0x184   : > { %2355 = vrot.lane.b32.xlu0 %v5068_v3, %s4362_s8  ;;  %v3964_v3 = vpack.c.bf16 %v1189_v0, %v1189_v0  ;;  %v4123_v10 = vpack.c.bf16 %v2474_v9, %v2474_v9 }
 0x185   : > { %v2589_v32 = vpop.permute.xlu1 %2588 }
 0x186   : > { %v2595_v26 = vpop.permute.xlu0 %2594  ;;  %2681 = vst.msk [vmem:[#allocation3 + $0x10] sm:$0xf] %vm2676_vm12, %v2589_v32 }
 0x187   : > { %2684 = vst.msk [vmem:[#allocation3 + $0x1c] sm:$0xf] %vm2676_vm12, %v2595_v26  ;;  %2104 = vrot.lane.b32.xlu1 %v4056_v21, %s4361_s5  ;;  %v1192_v26 = vld [vmem:[#allocation2 + $0x150] sm:$0xff] }
 0x188   : > { %2359 = vrot.lane.b32.xlu0 %v4087_v29, %s4362_s8 }
 0x189   : > { %v2593_v48 = vpop.permute.xlu1 %2592 }
 0x18a   : > { %v1570_v44 = vpop.permute.xlu0 %1569  ;;  %2683 = vst.msk [vmem:[#allocation3 + $0x18] sm:$0xf] %vm2676_vm12, %v2593_v48  ;;  %v3967_v48 = vpack.c.bf16 %v1192_v26, %v1192_v26 }
 0x18b   : > { %1657 = vst.msk [vmem:[#allocation3 + $0x24] sm:$0xf] %vm1647_vm8, %v1570_v44  ;;  %2357 = vrot.lane.b32.xlu1 %v3992_v45, %s4362_s8  ;;  %v4028_v45 = vpack.c.bf16 %v1703_v35, %v1703_v35  ;;  %v4064_v35 = vpack.c.bf16 %v1965_v28, %v1965_v28 }
 0x18c   : > { %2612 = vrot.lane.b32.xlu0 %v4023_v51, %s4363_s13 }
 0x18d   : > { %v1568_v60 = vpop.permute.xlu1 %1567  ;;  %v4331_v17 = vld [vmem:[#allocation3 + $0x10] sm:$0xff]  }
 0x18e   : > { %v1574_v43 = vpop.permute.xlu0 %1573  ;;  %1656 = vst.msk [vmem:[#allocation3 + $0x20] sm:$0xf] %vm1647_vm8, %v1568_v60  ;;  %4273 = vmatprep.mubr.msk.bf16.mxu0 %vm2841_vm13, %v4331_v17  ;;  %v1449_v17 = vld [vmem:[#allocation2 + $0x151] sm:$0xff] }
 0x18f   : > { %1659 = vst.msk [vmem:[#allocation3 + $0x2c] sm:$0xf] %vm1647_vm8, %v1574_v43  ;;  %2361 = vrot.lane.b32.xlu1 %v4088_v37, %s4362_s8  ;;  %v3999_v18 = vpack.c.bf16 %v1449_v17, %v1449_v17 }
 0x190   : > { %2616 = vrot.lane.b32.xlu0 %v4119_v34, %s4363_s13 }
 0x191   : > { %v1572_v53 = vpop.permute.xlu1 %1571  ;;  %v4332_v19 = vld [vmem:[#allocation3 + $0x18] sm:$0xff]  }
 0x192   : > { %v1827_v23 = vpop.permute.xlu0 %1826  ;;  %1658 = vst.msk [vmem:[#allocation3 + $0x28] sm:$0xf] %vm1647_vm8, %v1572_v53  ;;  %4274 = vmatmul.mubr.msk.bf16.gmra.mxu0 %vm2841_vm13, %v4332_v19 }
 0x193   : > { %1914 = vst.msk [vmem:[#allocation3 + $0x24] sm:$0xf] %vm1904_vm9, %v1827_v23  ;;  %2614 = vrot.lane.b32.xlu1 %v4024_v4, %s4363_s13  ;;  %v1450_v23 = vld [vmem:[#allocation2 + $0x159] sm:$0xff] }
 0x194   : > { %1334 = vrot.lane.b32.xlu0 %v4055_v5, %s4358_s28 }
 0x195   : > { %v1825_v24 = vpop.permute.xlu1 %1824 }
 0x196   : > { %v1831_v25 = vpop.permute.xlu0 %1830  ;;  %1913 = vst.msk [vmem:[#allocation3 + $0x20] sm:$0xf] %vm1904_vm9, %v1825_v24  ;;  %v4000_v24 = vpack.c.bf16 %v1450_v23, %v1450_v23 }
 0x197   : > { %1916 = vst.msk [vmem:[#allocation3 + $0x2c] sm:$0xf] %vm1904_vm9, %v1831_v25  ;;  %2618 = vrot.lane.b32.xlu1 %v4120_v8, %s4363_s13 }
 0x198   : > { %1338 = vrot.lane.b32.xlu0 %v3963_v22, %s4358_s28 }
 0x199   : > { %v1829_v31 = vpop.permute.xlu1 %1828 }
 0x19a   : > { %v2085_v57 = vpop.permute.xlu0 %2084  ;;  %1915 = vst.msk [vmem:[#allocation3 + $0x28] sm:$0xf] %vm1904_vm9, %v1829_v31 }
 0x19b   : > { %2172 = vst.msk [vmem:[#allocation3 + $0x24] sm:$0xf] %vm2162_vm10, %v2085_v57  ;;  %1336 = vrot.lane.b32.xlu1 %v4056_v21, %s4358_s28  ;;  %v2475_v21 = vld [vmem:[#allocation2 + $0x142] sm:$0xff]  ;;  %v1707_v57 = vld [vmem:[#allocation2 + $0x15a] sm:$0xff] }
 0x19c   : > { %1591 = vrot.lane.b32.xlu0 %v4087_v29, %s4359_s29  ;;  %v4124_v12 = vpack.c.bf16 %v2475_v21, %v2475_v21 }
 0x19d   : > { %v2083_v61 = vpop.permute.xlu1 %2082 }
 0x19e   : > { %v2089_v46 = vpop.permute.xlu0 %2088  ;;  %2171 = vst.msk [vmem:[#allocation3 + $0x20] sm:$0xf] %vm2162_vm10, %v2083_v61  ;;  %v4032_v61 = vpack.c.bf16 %v1707_v57, %v1707_v57 }
 0x19f   : > { %2174 = vst.msk [vmem:[#allocation3 + $0x2c] sm:$0xf] %vm2162_vm10, %v2089_v46  ;;  %1340 = vrot.lane.b32.xlu1 %v3964_v3, %s4358_s28 }
 0x1a0   : > { %1595 = vrot.lane.b32.xlu0 %v3995_v36, %s4359_s29 }
 0x1a1   : > { %v2087_v33 = vpop.permute.xlu1 %2086 }
 0x1a2   : > { %v2342_v47 = vpop.permute.xlu0 %2341  ;;  %2173 = vst.msk [vmem:[#allocation3 + $0x28] sm:$0xf] %vm2162_vm10, %v2087_v33 }
 0x1a3   : > { %2429 = vst.msk [vmem:[#allocation3 + $0x24] sm:$0xf] %vm2419_vm11, %v2342_v47  ;;  %1593 = vrot.lane.b32.xlu1 %v4088_v37, %s4359_s29  ;;  %v1193_v37 = vld [vmem:[#allocation2 + $0x158] sm:$0xff] }
 0x1a4   : > { %1848 = vrot.lane.b32.xlu0 %v4119_v34, %s4360_s30  ;;  %v3968_v43 = vpack.c.bf16 %v1193_v37, %v1193_v37 }
 0x1a5   : > { %v2340_v39 = vpop.permute.xlu1 %2339 }
 0x1a6   : > { %v2346_v14 = vpop.permute.xlu0 %2345  ;;  %2428 = vst.msk [vmem:[#allocation3 + $0x20] sm:$0xf] %vm2419_vm11, %v2340_v39  ;;  %v2221_v39 = vld [vmem:[#allocation2 + $0x169] sm:$0xff] }
 0x1a7   : > { %2431 = vst.msk [vmem:[#allocation3 + $0x2c] sm:$0xf] %vm2419_vm11, %v2346_v14  ;;  %1597 = vrot.lane.b32.xlu1 %v3996_v42, %s4359_s29 }
 0x1a8   : > { %1852 = vrot.lane.b32.xlu0 %v4027_v38, %s4360_s30 }
 0x1a9   : > { %v2344_v40 = vpop.permute.xlu1 %2343 }
 0x1aa   : > { %v2599_v1 = vpop.permute.xlu0 %2598  ;;  %2430 = vst.msk [vmem:[#allocation3 + $0x28] sm:$0xf] %vm2419_vm11, %v2344_v40  ;;  %v4095_v40 = vpack.c.bf16 %v2221_v39, %v2221_v39  ;;  %v2483_v39 = vld [vmem:[#allocation2 + $0x1a2] sm:$0xff] }
 0x1ab   : > { %2686 = vst.msk [vmem:[#allocation3 + $0x24] sm:$0xf] %vm2676_vm12, %v2599_v1  ;;  %1850 = vrot.lane.b32.xlu1 %v4120_v8, %s4360_s30 }
 0x1ac   : > { %2106 = vrot.lane.b32.xlu0 %v3963_v22, %s4361_s5  ;;  %v1706_v22 = vld [vmem:[#allocation2 + $0x152] sm:$0xff] }
 0x1ad   : > { %v2597_v52 = vpop.permute.xlu1 %2596  ;;  %v4031_v25 = vpack.c.bf16 %v1706_v22, %v1706_v22  ;;  %v1969_v22 = vld [vmem:[#allocation2 + $0x1a0] sm:$0xff] }
 0x1ae   : > { %v2603_v51 = vpop.permute.xlu0 %2602  ;;  %2685 = vst.msk [vmem:[#allocation3 + $0x20] sm:$0xf] %vm2676_vm12, %v2597_v52  ;;  %v2478_v52 = vld [vmem:[#allocation2 + $0x16a] sm:$0xff]  ;;  %v4068_v57 = vpack.c.bf16 %v1969_v22, %v1969_v22 }
 0x1af   : > { %2688 = vst.msk [vmem:[#allocation3 + $0x2c] sm:$0xf] %vm2676_vm12, %v2603_v51  ;;  %1854 = vrot.lane.b32.xlu1 %v4028_v45, %s4360_s30 }
 0x1b0   : > { %2110 = vrot.lane.b32.xlu0 %v4059_v50, %s4361_s5 }
 0x1b1   : > { %v2601_v55 = vpop.permute.xlu1 %2600 }
 0x1b2   : > { %v1578_v41 = vpop.permute.xlu0 %1577  ;;  %2687 = vst.msk [vmem:[#allocation3 + $0x28] sm:$0xf] %vm2676_vm12, %v2601_v55  ;;  %v4127_v55 = vpack.c.bf16 %v2478_v52, %v2478_v52 }
 0x1b3   : > { %1661 = vst.msk [vmem:[#allocation3 + $0x34] sm:$0xf] %vm1647_vm8, %v1578_v41  ;;  %2108 = vrot.lane.b32.xlu1 %v3964_v3, %s4361_s5  ;;  %v1964_v3 = vld [vmem:[#allocation2 + $0x168] sm:$0xff] }
 0x1b4   : > { %2363 = vrot.lane.b32.xlu0 %v3995_v36, %s4362_s8  ;;  %v4063_v46 = vpack.c.bf16 %v1964_v3, %v1964_v3 }
 0x1b5   : > { %v1576_v63 = vpop.permute.xlu1 %1575  ;;  %v4333_v2 = vld [vmem:[#allocation3 + $0x20] sm:$0xff]  }
 0x1b6   : > { %v1582_v4 = vpop.permute.xlu0 %1581  ;;  %1660 = vst.msk [vmem:[#allocation3 + $0x30] sm:$0xf] %vm1647_vm8, %v1576_v63  ;;  %4277 = vmatprep.mubr.msk.bf16.mxu0 %vm2841_vm13, %v4333_v2  ;;  %v1196_v63 = vld [vmem:[#allocation2 + $0x180] sm:$0xff] }
 0x1b7   : > { %1663 = vst.msk [vmem:[#allocation3 + $0x3c] sm:$0xf] %vm1647_vm8, %v1582_v4  ;;  %2112 = vrot.lane.b32.xlu1 %v4060_v59, %s4361_s5  ;;  %v3971_v56 = vpack.c.bf16 %v1196_v63, %v1196_v63 }
 0x1b8   : > { %2367 = vrot.lane.b32.xlu0 %v4091_v62, %s4362_s8 }
 0x1b9   : > { %v1580_v5 = vpop.permute.xlu1 %1579  ;;  %v4334_v49 = vld [vmem:[#allocation3 + $0x28] sm:$0xff]  }
 0x1ba   : > { %v1835_v7 = vpop.permute.xlu0 %1834  ;;  %1662 = vst.msk [vmem:[#allocation3 + $0x38] sm:$0xf] %vm1647_vm8, %v1580_v5  ;;  %4278 = vmatmul.mubr.msk.bf16.gmra.mxu0 %vm2841_vm13, %v4334_v49 }
 0x1bb   : > { %1918 = vst.msk [vmem:[#allocation3 + $0x34] sm:$0xf] %vm1904_vm9, %v1835_v7  ;;  %2365 = vrot.lane.b32.xlu1 %v3996_v42, %s4362_s8  ;;  %v1197_v7 = vld [vmem:[#allocation2 + $0x188] sm:$0xff] }
 0x1bc   : > { %2620 = vrot.lane.b32.xlu0 %v4027_v38, %s4363_s13 }
 0x1bd   : > { %v1833_v30 = vpop.permute.xlu1 %1832 }
 0x1be   : > { %v1839_v11 = vpop.permute.xlu0 %1838  ;;  %1917 = vst.msk [vmem:[#allocation3 + $0x30] sm:$0xf] %vm1904_vm9, %v1833_v30  ;;  %v3972_v30 = vpack.c.bf16 %v1197_v7, %v1197_v7 }
 0x1bf   : > { %1920 = vst.msk [vmem:[#allocation3 + $0x3c] sm:$0xf] %vm1904_vm9, %v1839_v11  ;;  %2369 = vrot.lane.b32.xlu1 %v4092_v27, %s4362_s8 }
 0x1c0   : > { %2624 = vrot.lane.b32.xlu0 %v4123_v10, %s4363_s13 }
 0x1c1   : > { %v1837_v29 = vpop.permute.xlu1 %1836 }
 0x1c2   : > { %v2093_v32 = vpop.permute.xlu0 %2092  ;;  %1919 = vst.msk [vmem:[#allocation3 + $0x38] sm:$0xf] %vm1904_vm9, %v1837_v29 }
 0x1c3   : > { %2176 = vst.msk [vmem:[#allocation3 + $0x34] sm:$0xf] %vm2162_vm10, %v2093_v32  ;;  %2622 = vrot.lane.b32.xlu1 %v4028_v45, %s4363_s13  ;;  %v2222_v45 = vld [vmem:[#allocation2 + $0x171] sm:$0xff]  ;;  %v1454_v32 = vld [vmem:[#allocation2 + $0x189] sm:$0xff] }
 0x1c4   : > { %1342 = vrot.lane.b32.xlu0 %v4059_v50, %s4358_s28  ;;  %v4096_v54 = vpack.c.bf16 %v2222_v45, %v2222_v45 }
 0x1c5   : > { %v2091_v44 = vpop.permute.xlu1 %2090 }
 0x1c6   : > { %v2097_v16 = vpop.permute.xlu0 %2096  ;;  %2175 = vst.msk [vmem:[#allocation3 + $0x30] sm:$0xf] %vm2162_vm10, %v2091_v44  ;;  %v4004_v44 = vpack.c.bf16 %v1454_v32, %v1454_v32 }
 0x1c7   : > { %2178 = vst.msk [vmem:[#allocation3 + $0x3c] sm:$0xf] %vm2162_vm10, %v2097_v16  ;;  %2626 = vrot.lane.b32.xlu1 %v4124_v12, %s4363_s13 }
 0x1c8   : > { %1346 = vrot.lane.b32.xlu0 %v3967_v48, %s4358_s28 }
 0x1c9   : > { %v2095_v34 = vpop.permute.xlu1 %2094 }
 0x1ca   : > { %v2350_v60 = vpop.permute.xlu0 %2349  ;;  %2177 = vst.msk [vmem:[#allocation3 + $0x38] sm:$0xf] %vm2162_vm10, %v2095_v34 }
 0x1cb   : > { %2433 = vst.msk [vmem:[#allocation3 + $0x34] sm:$0xf] %vm2419_vm11, %v2350_v60  ;;  %1344 = vrot.lane.b32.xlu1 %v4060_v59, %s4358_s28  ;;  %v2479_v59 = vld [vmem:[#allocation2 + $0x172] sm:$0xff]  ;;  %v1711_v60 = vld [vmem:[#allocation2 + $0x18a] sm:$0xff] }
 0x1cc   : > { %1599 = vrot.lane.b32.xlu0 %v4091_v62, %s4359_s29  ;;  %v4128_v4 = vpack.c.bf16 %v2479_v59, %v2479_v59 }
 0x1cd   : > { %v2348_v53 = vpop.permute.xlu1 %2347 }
 0x1ce   : > { %v2354_v19 = vpop.permute.xlu0 %2353  ;;  %2432 = vst.msk [vmem:[#allocation3 + $0x30] sm:$0xf] %vm2419_vm11, %v2348_v53  ;;  %v4036_v53 = vpack.c.bf16 %v1711_v60, %v1711_v60 }
 0x1cf   : > { %2435 = vst.msk [vmem:[#allocation3 + $0x3c] sm:$0xf] %vm2419_vm11, %v2354_v19  ;;  %1348 = vrot.lane.b32.xlu1 %v3968_v43, %s4358_s28 }
 0x1d0   : > { %1603 = vrot.lane.b32.xlu0 %v3999_v18, %s4359_s29 }
 0x1d1   : > { %v2352_v20 = vpop.permute.xlu1 %2351 }
 0x1d2   : > { %v2607_v8 = vpop.permute.xlu0 %2606  ;;  %2434 = vst.msk [vmem:[#allocation3 + $0x38] sm:$0xf] %vm2419_vm11, %v2352_v20 }
 0x1d3   : > { %2690 = vst.msk [vmem:[#allocation3 + $0x34] sm:$0xf] %vm2676_vm12, %v2607_v8  ;;  %1601 = vrot.lane.b32.xlu1 %v4092_v27, %s4359_s29  ;;  %v1453_v27 = vld [vmem:[#allocation2 + $0x181] sm:$0xff] }
 0x1d4   : > { %1856 = vrot.lane.b32.xlu0 %v4123_v10, %s4360_s30  ;;  %v4003_v11 = vpack.c.bf16 %v1453_v27, %v1453_v27 }
 0x1d5   : > { %v2605_v0 = vpop.permute.xlu1 %2604 }
 0x1d6   : > { %v2611_v31 = vpop.permute.xlu0 %2610  ;;  %2689 = vst.msk [vmem:[#allocation3 + $0x30] sm:$0xf] %vm2676_vm12, %v2605_v0  ;;  %v2225_v0 = vld [vmem:[#allocation2 + $0x199] sm:$0xff] }
 0x1d7   : > { %2692 = vst.msk [vmem:[#allocation3 + $0x3c] sm:$0xf] %vm2676_vm12, %v2611_v31  ;;  %1605 = vrot.lane.b32.xlu1 %v4000_v24, %s4359_s29 }
 0x1d8   : > { %1860 = vrot.lane.b32.xlu0 %v4031_v25, %s4360_s30 }
 0x1d9   : > { %v2609_v6 = vpop.permute.xlu1 %2608 }
 0x1da   : > { %2691 = vst.msk [vmem:[#allocation3 + $0x38] sm:$0xf] %vm2676_vm12, %v2609_v6  ;;  %v1331_v36 = vpop.permute.xlu0 %1330  ;;  %v4099_v6 = vpack.c.bf16 %v2225_v0, %v2225_v0 }
 0x1db   : > { %1858 = vrot.lane.b32.xlu1 %v4124_v12, %s4360_s30  ;;  %1409 = vst.msk [vmem:[#allocation3 + $0x48] sm:$0xf] %vm1390_vm7, %v1331_v36  ;;  %v1710_v12 = vld [vmem:[#allocation2 + $0x182] sm:$0xff] }
 0x1dc   : > { %2114 = vrot.lane.b32.xlu0 %v3967_v48, %s4361_s5  ;;  %v4035_v16 = vpack.c.bf16 %v1710_v12, %v1710_v12 }
 0x1dd   : > { %v1329_v15 = vpop.permute.xlu1 %1328  ;;  %v4335_v33 = vld [vmem:[#allocation3 + $0x30] sm:$0xff]  }
 0x1de   : > { %1408 = vst.msk [vmem:[#allocation3 + $0x44] sm:$0xf] %vm1390_vm7, %v1329_v15  ;;  %v1584_v47 = vpop.permute.xlu0 %1583  ;;  %4281 = vmatprep.mubr.msk.bf16.mxu0 %vm2841_vm13, %v4335_v33  ;;  %v2482_v15 = vld [vmem:[#allocation2 + $0x19a] sm:$0xff] }
 0x1df   : > { %1862 = vrot.lane.b32.xlu1 %v4032_v61, %s4360_s30  ;;  %1664 = vst.msk [vmem:[#allocation3 + $0x40] sm:$0xf] %vm1647_vm8, %v1584_v47  ;;  %v4131_v28 = vpack.c.bf16 %v2482_v15, %v2482_v15 }
 0x1e0   : > { %2118 = vrot.lane.b32.xlu0 %v4063_v46, %s4361_s5 }
 0x1e1   : > { %v1333_v42 = vpop.permute.xlu1 %1332  ;;  %v4336_v38 = vld [vmem:[#allocation3 + $0x38] sm:$0xff]  }
 0x1e2   : > { %1410 = vst.msk [vmem:[#allocation3 + $0x4c] sm:$0xf] %vm1390_vm7, %v1333_v42  ;;  %v1588_v14 = vpop.permute.xlu0 %1587  ;;  %4282 = vmatmul.mubr.msk.bf16.gmra.mxu0 %vm2841_vm13, %v4336_v38 }
 0x1e3   : > { %2116 = vrot.lane.b32.xlu1 %v3968_v43, %s4361_s5  ;;  %1666 = vst.msk [vmem:[#allocation3 + $0x48] sm:$0xf] %vm1647_vm8, %v1588_v14  ;;  %v1968_v43 = vld [vmem:[#allocation2 + $0x198] sm:$0xff] }
 0x1e4   : > { %2371 = vrot.lane.b32.xlu0 %v3999_v18, %s4362_s8  ;;  %v4067_v19 = vpack.c.bf16 %v1968_v43, %v1968_v43 }
 0x1e5   : > { %v1586_v1 = vpop.permute.xlu1 %1585 }
 0x1e6   : > { %1665 = vst.msk [vmem:[#allocation3 + $0x44] sm:$0xf] %vm1647_vm8, %v1586_v1  ;;  %v1841_v13 = vpop.permute.xlu0 %1840 }
 0x1e7   : > { %2120 = vrot.lane.b32.xlu1 %v4064_v35, %s4361_s5  ;;  %1921 = vst.msk [vmem:[#allocation3 + $0x40] sm:$0xf] %vm1904_vm9, %v1841_v13 }
 0x1e8   : > { %2375 = vrot.lane.b32.xlu0 %v4095_v40, %s4362_s8 }
 0x1e9   : > { %v1590_v50 = vpop.permute.xlu1 %1589 }
 0x1ea   : > { %1667 = vst.msk [vmem:[#allocation3 + $0x4c] sm:$0xf] %vm1647_vm8, %v1590_v50  ;;  %v1845_v51 = vpop.permute.xlu0 %1844 }
 0x1eb   : > { %2373 = vrot.lane.b32.xlu1 %v4000_v24, %s4362_s8  ;;  %1923 = vst.msk [vmem:[#allocation3 + $0x48] sm:$0xf] %vm1904_vm9, %v1845_v51 }
 0x1ec   : > { %2628 = vrot.lane.b32.xlu0 %v4031_v25, %s4363_s13 }
 0x1ed   : > { %v1843_v41 = vpop.permute.xlu1 %1842 }
 0x1ee   : > { %1922 = vst.msk [vmem:[#allocation3 + $0x44] sm:$0xf] %vm1904_vm9, %v1843_v41  ;;  %v2099_v58 = vpop.permute.xlu0 %2098 }
 0x1ef   : > { %2377 = vrot.lane.b32.xlu1 %v4096_v54, %s4362_s8  ;;  %2179 = vst.msk [vmem:[#allocation3 + $0x40] sm:$0xf] %vm2162_vm10, %v2099_v58 }
 0x1f0   : > { %2632 = vrot.lane.b32.xlu0 %v4127_v55, %s4363_s13 }
 0x1f1   : > { %v1847_v62 = vpop.permute.xlu1 %1846 }
 0x1f2   : > { %1924 = vst.msk [vmem:[#allocation3 + $0x4c] sm:$0xf] %vm1904_vm9, %v1847_v62  ;;  %v2103_v2 = vpop.permute.xlu0 %2102 }
 0x1f3   : > { %2630 = vrot.lane.b32.xlu1 %v4032_v61, %s4363_s13  ;;  %2181 = vst.msk [vmem:[#allocation3 + $0x48] sm:$0xf] %vm2162_vm10, %v2103_v2  ;;  %v2226_v61 = vld [vmem:[#allocation2 + $0x1a1] sm:$0xff] }
 0x1f4   : > { %1350 = vrot.lane.b32.xlu0 %v4063_v46, %s4358_s28  ;;  %v4100_v47 = vpack.c.bf16 %v2226_v61, %v2226_v61 }
 0x1f5   : > { %v2101_v5 = vpop.permute.xlu1 %2100 }
 0x1f6   : > { %2180 = vst.msk [vmem:[#allocation3 + $0x44] sm:$0xf] %vm2162_vm10, %v2101_v5  ;;  %v2356_v49 = vpop.permute.xlu0 %2355 }
 0x1f7   : > { %2634 = vrot.lane.b32.xlu1 %v4128_v4, %s4363_s13  ;;  %2436 = vst.msk [vmem:[#allocation3 + $0x40] sm:$0xf] %vm2419_vm11, %v2356_v49 }
 0x1f8   : > { %1354 = vrot.lane.b32.xlu0 %v3971_v56, %s4358_s28 }
 0x1f9   : > { %v2105_v9 = vpop.permute.xlu1 %2104 }
 0x1fa   : > { %2182 = vst.msk [vmem:[#allocation3 + $0x4c] sm:$0xf] %vm2162_vm10, %v2105_v9  ;;  %v2360_v10 = vpop.permute.xlu0 %2359 }
 0x1fb   : > { %1352 = vrot.lane.b32.xlu1 %v4064_v35, %s4358_s28  ;;  %2438 = vst.msk [vmem:[#allocation3 + $0x48] sm:$0xf] %vm2419_vm11, %v2360_v10 }
 0x1fc   : > { %1607 = vrot.lane.b32.xlu0 %v4095_v40, %s4359_s29  ;;  %v4132_v40 = vpack.c.bf16 %v2483_v39, %v2483_v39 }
 0x1fd   : > { %v2358_v21 = vpop.permute.xlu1 %2357 }
 0x1fe   : > { %2437 = vst.msk [vmem:[#allocation3 + $0x44] sm:$0xf] %vm2419_vm11, %v2358_v21  ;;  %v2613_v29 = vpop.permute.xlu0 %2612 }
 0x1ff   : > { %1356 = vrot.lane.b32.xlu1 %v3972_v30, %s4358_s28  ;;  %2693 = vst.msk [vmem:[#allocation3 + $0x40] sm:$0xf] %vm2676_vm12, %v2613_v29 }
 0x200   : > { %1611 = vrot.lane.b32.xlu0 %v4003_v11, %s4359_s29 }
 0x201   : > { %v2362_v26 = vpop.permute.xlu1 %2361 }
 0x202   : > { %2439 = vst.msk [vmem:[#allocation3 + $0x4c] sm:$0xf] %vm2419_vm11, %v2362_v26  ;;  %v2617_v48 = vpop.permute.xlu0 %2616 }
 0x203   : > { %1609 = vrot.lane.b32.xlu1 %v4096_v54, %s4359_s29  ;;  %2695 = vst.msk [vmem:[#allocation3 + $0x48] sm:$0xf] %vm2676_vm12, %v2617_v48 }
 0x204   : > { %1864 = vrot.lane.b32.xlu0 %v4127_v55, %s4360_s30 }
 0x205   : > { %v2615_v37 = vpop.permute.xlu1 %2614 }
 0x206   : > { %2694 = vst.msk [vmem:[#allocation3 + $0x44] sm:$0xf] %vm2676_vm12, %v2615_v37  ;;  %v1335_v34 = vpop.permute.xlu0 %1334 }
 0x207   : > { %1613 = vrot.lane.b32.xlu1 %v4004_v44, %s4359_s29  ;;  %1411 = vst.msk [vmem:[#allocation3 + $0x50] sm:$0xf] %vm1390_vm7, %v1335_v34 }
 0x208   : > { %1868 = vrot.lane.b32.xlu0 %v4035_v16, %s4360_s30 }
 0x209   : > { %v2619_v17 = vpop.permute.xlu1 %2618 }
 0x20a   : > { %2696 = vst.msk [vmem:[#allocation3 + $0x4c] sm:$0xf] %vm2676_vm12, %v2619_v17  ;;  %v1339_v18 = vpop.permute.xlu0 %1338 }
 0x20b   : > { %1866 = vrot.lane.b32.xlu1 %v4128_v4, %s4360_s30  ;;  %1413 = vst.msk [vmem:[#allocation3 + $0x58] sm:$0xf] %vm1390_vm7, %v1339_v18 }
 0x20c   : > { %2122 = vrot.lane.b32.xlu0 %v3971_v56, %s4361_s5 }
 0x20d   : > { %v1337_v23 = vpop.permute.xlu1 %1336  ;;  %v4337_v20 = vld [vmem:[#allocation3 + $0x40] sm:$0xff]  }
 0x20e   : > { %1412 = vst.msk [vmem:[#allocation3 + $0x54] sm:$0xf] %vm1390_vm7, %v1337_v23  ;;  %v1592_v8 = vpop.permute.xlu0 %1591  ;;  %4285 = vmatprep.mubr.msk.bf16.mxu1 %vm2841_vm13, %v4337_v20 }
 0x20f   : > { %1870 = vrot.lane.b32.xlu1 %v4036_v53, %s4360_s30  ;;  %1668 = vst.msk [vmem:[#allocation3 + $0x50] sm:$0xf] %vm1647_vm8, %v1592_v8 }
 0x210   : > { %2126 = vrot.lane.b32.xlu0 %v4067_v19, %s4361_s5 }
 0x211   : > { %v1341_v24 = vpop.permute.xlu1 %1340  ;;  %v4338_v25 = vld [vmem:[#allocation3 + $0x48] sm:$0xff]  }
 0x212   : > { %1414 = vst.msk [vmem:[#allocation3 + $0x5c] sm:$0xf] %vm1390_vm7, %v1341_v24  ;;  %v1596_v31 = vpop.permute.xlu0 %1595  ;;  %4286 = vmatmul.mubr.msk.bf16.vlgmr.msra.gmra.mxu1 %vm2841_vm13, %v4338_v25 }
 0x213   : > { %2124 = vrot.lane.b32.xlu1 %v3972_v30, %s4361_s5  ;;  %1670 = vst.msk [vmem:[#allocation3 + $0x58] sm:$0xf] %vm1647_vm8, %v1596_v31 }
 0x214   : > { %2379 = vrot.lane.b32.xlu0 %v4003_v11, %s4362_s8 }
 0x215   : > { %v1594_v3 = vpop.permute.xlu1 %1593 }
 0x216   : > { %1669 = vst.msk [vmem:[#allocation3 + $0x54] sm:$0xf] %vm1647_vm8, %v1594_v3  ;;  %v1849_v36 = vpop.permute.xlu0 %1848 }
 0x217   : > { %2128 = vrot.lane.b32.xlu1 %v4068_v57, %s4361_s5  ;;  %1925 = vst.msk [vmem:[#allocation3 + $0x50] sm:$0xf] %vm1904_vm9, %v1849_v36 }
 0x218   : > { %2383 = vrot.lane.b32.xlu0 %v4099_v6, %s4362_s8 }
 0x219   : > { %v1598_v46 = vpop.permute.xlu1 %1597 }
 0x21a   : > { %1671 = vst.msk [vmem:[#allocation3 + $0x5c] sm:$0xf] %vm1647_vm8, %v1598_v46  ;;  %v1853_v33 = vpop.permute.xlu0 %1852 }
 0x21b   : > { %2381 = vrot.lane.b32.xlu1 %v4004_v44, %s4362_s8  ;;  %1927 = vst.msk [vmem:[#allocation3 + $0x58] sm:$0xf] %vm1904_vm9, %v1853_v33 }
 0x21c   : > { %2636 = vrot.lane.b32.xlu0 %v4035_v16, %s4363_s13 }
 0x21d   : > { %v1851_v42 = vpop.permute.xlu1 %1850 }
 0x21e   : > { %1926 = vst.msk [vmem:[#allocation3 + $0x54] sm:$0xf] %vm1904_vm9, %v1851_v42  ;;  %v2107_v38 = vpop.permute.xlu0 %2106 }
 0x21f   : > { %2385 = vrot.lane.b32.xlu1 %v4100_v47, %s4362_s8  ;;  %2183 = vst.msk [vmem:[#allocation3 + $0x50] sm:$0xf] %vm2162_vm10, %v2107_v38 }
 0x220   : > { %2640 = vrot.lane.b32.xlu0 %v4131_v28, %s4363_s13 }
 0x221   : > { %v1855_v14 = vpop.permute.xlu1 %1854 }
 0x222   : > { %1928 = vst.msk [vmem:[#allocation3 + $0x5c] sm:$0xf] %vm1904_vm9, %v1855_v14  ;;  %v2111_v35 = vpop.permute.xlu0 %2110 }
 0x223   : > { %2638 = vrot.lane.b32.xlu1 %v4036_v53, %s4363_s13  ;;  %2185 = vst.msk [vmem:[#allocation3 + $0x58] sm:$0xf] %vm2162_vm10, %v2111_v35 }
 0x225   : > { %v2109_v1 = vpop.permute.xlu1 %2108 }
 0x226   : > { %2184 = vst.msk [vmem:[#allocation3 + $0x54] sm:$0xf] %vm2162_vm10, %v2109_v1  ;;  %v2364_v13 = vpop.permute.xlu0 %2363 }
 0x227   : > { %2642 = vrot.lane.b32.xlu1 %v4132_v40, %s4363_s13  ;;  %2440 = vst.msk [vmem:[#allocation3 + $0x50] sm:$0xf] %vm2419_vm11, %v2364_v13 }
 0x229   : > { %v2113_v45 = vpop.permute.xlu1 %2112 }
 0x22a   : > { %2186 = vst.msk [vmem:[#allocation3 + $0x5c] sm:$0xf] %vm2162_vm10, %v2113_v45  ;;  %v2368_v50 = vpop.permute.xlu0 %2367  ;;  %v4271_v52 = vpop.f32.mrf.mxu0 }
 0x22b   : > { %2442 = vst.msk [vmem:[#allocation3 + $0x58] sm:$0xf] %vm2419_vm11, %v2368_v50  ;;  %v4135_v51 = vpack.c.bf16 %v4271_v52, %v4271_v52  ;;  %v3286_v2 = vmul.f32 %v4271_v52, %v4271_v52  ;;  %v3218_v30 = vsel %vm380_vm0, %v4271_v52, 0.0 }
 0x22c   : > { %v2928_v55 = vpop.f32.mrf.mxu0 }
 0x22d   : > { %v2366_v54 = vpop.permute.xlu1 %2365  ;;  %3185 = vst.msk [vmem:[%s5284_s23 + $0x8] sm:$0xf] %vm619_vm3, %v4135_v51  ;;  %v4133_v41 = vpack.c.bf16 %v2928_v55, %v2928_v55  ;;  %v3284_v62 = vmul.f32 %v2928_v55, %v2928_v55  ;;  %v3215_v5 = vsel %vm380_vm0, %v2928_v55, 0.0  ;;  %v3319_v48 = vsel %vm380_vm0, %v3286_v2, 0.0 }
 0x22e   : > { %2441 = vst.msk [vmem:[#allocation3 + $0x54] sm:$0xf] %vm2419_vm11, %v2366_v54  ;;  %v2621_v58 = vpop.permute.xlu0 %2620  ;;  %v4272_v59 = vpop.f32.mrf.mxu0 }
 0x22f   : > { %2697 = vst.msk [vmem:[#allocation3 + $0x50] sm:$0xf] %vm2676_vm12, %v2621_v58  ;;  %v4136_v63 = vpack.c.bf16 %v4272_v59, %v4272_v59  ;;  %v3316_v11 = vsel %vm380_vm0, %v3284_v62, 0.0  ;;  %v3287_v21 = vmul.f32 %v4272_v59, %v4272_v59  ;;  %v3220_v44 = vsel %vm380_vm0, %v4272_v59, 0.0 }
 0x230   : > { %3183 = vst.msk [vmem:[%s5284_s23] sm:$0xf] %vm619_vm3, %v4133_v41  ;;  %v2931_v56 = vpop.f32.mrf.mxu0 }
 0x231   : > { %v2370_v4 = vpop.permute.xlu1 %2369  ;;  %3186 = vst.msk [vmem:[%s5284_s23 + $0xc] sm:$0xf] %vm619_vm3, %v4136_v63  ;;  %v4134_v49 = vpack.c.bf16 %v2931_v56, %v2931_v56  ;;  %v3216_v7 = vsel %vm380_vm0, %v2931_v56, 0.0  ;;  %v3285_v9 = vmul.f32 %v2931_v56, %v2931_v56  ;;  %v3321_v60 = vsel %vm380_vm0, %v3287_v21, 0.0 }
 0x232   : > { %2443 = vst.msk [vmem:[#allocation3 + $0x5c] sm:$0xf] %vm2419_vm11, %v2370_v4  ;;  %v2625_v27 = vpop.permute.xlu0 %2624  ;;  %v3217_v10 = vadd.f32 %v3216_v7, %v3215_v5 }
 0x233   : > { %2699 = vst.msk [vmem:[#allocation3 + $0x58] sm:$0xf] %vm2676_vm12, %v2625_v27  ;;  %v3317_v29 = vsel %vm380_vm0, %v3285_v9, 0.0 }
 0x234   : > { %3184 = vst.msk [vmem:[%s5284_s23 + $0x4] sm:$0xf] %vm619_vm3, %v4134_v49  ;;  %v3219_v32 = vadd.f32 %v3218_v30, %v3217_v10  ;;  %v3318_v26 = vadd.f32 %v3317_v29, %v3316_v11 }
 0x235   : > { %v2623_v12 = vpop.permute.xlu1 %2622 }
 0x236   : > { %2698 = vst.msk [vmem:[#allocation3 + $0x54] sm:$0xf] %vm2676_vm12, %v2623_v12  ;;  %v1343_v16 = vpop.permute.xlu0 %1342  ;;  %v3320_v37 = vadd.f32 %v3319_v48, %v3318_v26  ;;  %v3221_v34 = vadd.f32 %v3220_v44, %v3219_v32 }
 0x237   : > { %1415 = vst.msk [vmem:[#allocation3 + $0x60] sm:$0xf] %vm1390_vm7, %v1343_v16 }
 0x238   : > { %v3322_v43 = vadd.f32 %v3321_v60, %v3320_v37 }
 0x239   : > { %v2627_v17 = vpop.permute.xlu1 %2626 }
 0x23a   : > { %2700 = vst.msk [vmem:[#allocation3 + $0x5c] sm:$0xf] %vm2676_vm12, %v2627_v17  ;;  %v1347_v18 = vpop.permute.xlu0 %1346 }
 0x23b   : > { %1417 = vst.msk [vmem:[#allocation3 + $0x68] sm:$0xf] %vm1390_vm7, %v1347_v18 }
 0x23d   : > { %v1345_v53 = vpop.permute.xlu1 %1344  ;;  %v4339_v19 = vld [vmem:[#allocation3 + $0x50] sm:$0xff]  }
 0x23e   : > { %1416 = vst.msk [vmem:[#allocation3 + $0x64] sm:$0xf] %vm1390_vm7, %v1345_v53  ;;  %v1600_v23 = vpop.permute.xlu0 %1599  ;;  %4289 = vmatprep.mubr.msk.bf16.mxu1 %vm2841_vm13, %v4339_v19 }
 0x23f   : > { %1672 = vst.msk [vmem:[#allocation3 + $0x60] sm:$0xf] %vm1647_vm8, %v1600_v23 }
 0x241   : > { %v1349_v20 = vpop.permute.xlu1 %1348  ;;  %v4340_v8 = vld [vmem:[#allocation3 + $0x58] sm:$0xff]  }
 0x242   : > { %1418 = vst.msk [vmem:[#allocation3 + $0x6c] sm:$0xf] %vm1390_vm7, %v1349_v20  ;;  %v1604_v22 = vpop.permute.xlu0 %1603  ;;  %4290 = vmatmul.mubr.msk.bf16.gmra.mxu1 %vm2841_vm13, %v4340_v8 }
 0x243   : > { %1674 = vst.msk [vmem:[#allocation3 + $0x68] sm:$0xf] %vm1647_vm8, %v1604_v22 }
 0x245   : > { %v1602_v24 = vpop.permute.xlu1 %1601 }
 0x246   : > { %1673 = vst.msk [vmem:[#allocation3 + $0x64] sm:$0xf] %vm1647_vm8, %v1602_v24  ;;  %v1857_v25 = vpop.permute.xlu0 %1856 }
 0x247   : > { %1929 = vst.msk [vmem:[#allocation3 + $0x60] sm:$0xf] %vm1904_vm9, %v1857_v25 }
 0x249   : > { %v1606_v0 = vpop.permute.xlu1 %1605 }
 0x24a   : > { %1675 = vst.msk [vmem:[#allocation3 + $0x6c] sm:$0xf] %vm1647_vm8, %v1606_v0  ;;  %v1861_v31 = vpop.permute.xlu0 %1860 }
 0x24b   : > { %1931 = vst.msk [vmem:[#allocation3 + $0x68] sm:$0xf] %vm1904_vm9, %v1861_v31 }
 0x24d   : > { %v1859_v57 = vpop.permute.xlu1 %1858 }
 0x24e   : > { %1930 = vst.msk [vmem:[#allocation3 + $0x64] sm:$0xf] %vm1904_vm9, %v1859_v57  ;;  %v2115_v6 = vpop.permute.xlu0 %2114 }
 0x24f   : > { %2187 = vst.msk [vmem:[#allocation3 + $0x60] sm:$0xf] %vm2162_vm10, %v2115_v6 }
 0x251   : > { %v1863_v3 = vpop.permute.xlu1 %1862 }
 0x252   : > { %1932 = vst.msk [vmem:[#allocation3 + $0x6c] sm:$0xf] %vm1904_vm9, %v1863_v3  ;;  %v2119_v36 = vpop.permute.xlu0 %2118  ;;  %v4275_v61 = vpop.f32.mrf.mxu0 }
 0x253   : > { %2189 = vst.msk [vmem:[#allocation3 + $0x68] sm:$0xf] %vm2162_vm10, %v2119_v36  ;;  %v4139_v46 = vpack.c.bf16 %v4275_v61, %v4275_v61  ;;  %v3290_v50 = vmul.f32 %v4275_v61, %v4275_v61  ;;  %v3226_v58 = vsel %vm380_vm0, %v4275_v61, 0.0 }
 0x254   : > { %v2944_v33 = vpop.f32.mrf.mxu0 }
 0x255   : > { %v2117_v15 = vpop.permute.xlu1 %2116  ;;  %3189 = vst.msk [vmem:[%s5284_s23 + $0x18] sm:$0xf] %vm619_vm3, %v4139_v46  ;;  %v4137_v47 = vpack.c.bf16 %v2944_v33, %v2944_v33  ;;  %v3222_v28 = vsel %vm380_vm0, %v2944_v33, 0.0  ;;  %v3288_v42 = vmul.f32 %v2944_v33, %v2944_v33  ;;  %v3327_v56 = vsel %vm380_vm0, %v3290_v50, 0.0 }
 0x256   : > { %2188 = vst.msk [vmem:[#allocation3 + $0x64] sm:$0xf] %vm2162_vm10, %v2117_v15  ;;  %v2372_v38 = vpop.permute.xlu0 %2371  ;;  %v3223_v39 = vadd.f32 %v3222_v28, %v3221_v34  ;;  %v4276_v14 = vpop.f32.mrf.mxu0 }
 0x257   : > { %2444 = vst.msk [vmem:[#allocation3 + $0x60] sm:$0xf] %vm2419_vm11, %v2372_v38  ;;  %v3323_v35 = vsel %vm380_vm0, %v3288_v42, 0.0  ;;  %v4140_v40 = vpack.c.bf16 %v4276_v14, %v4276_v14  ;;  %v3291_v59 = vmul.f32 %v4276_v14, %v4276_v14  ;;  %v3228_v5 = vsel %vm380_vm0, %v4276_v14, 0.0 }
 0x258   : > { %3187 = vst.msk [vmem:[%s5284_s23 + $0x10] sm:$0xf] %vm619_vm3, %v4137_v47  ;;  %v3324_v1 = vadd.f32 %v3323_v35, %v3322_v43  ;;  %v2947_v45 = vpop.f32.mrf.mxu0 }
 0x259   : > { %v2121_v13 = vpop.permute.xlu1 %2120  ;;  %3190 = vst.msk [vmem:[%s5284_s23 + $0x1c] sm:$0xf] %vm619_vm3, %v4140_v40  ;;  %v4138_v52 = vpack.c.bf16 %v2947_v45, %v2947_v45  ;;  %v3224_v51 = vsel %vm380_vm0, %v2947_v45, 0.0  ;;  %v3289_v54 = vmul.f32 %v2947_v45, %v2947_v45  ;;  %v3329_v27 = vsel %vm380_vm0, %v3291_v59, 0.0 }
 0x25a   : > { %2190 = vst.msk [vmem:[#allocation3 + $0x6c] sm:$0xf] %vm2162_vm10, %v2121_v13  ;;  %v2376_v55 = vpop.permute.xlu0 %2375  ;;  %v3225_v41 = vadd.f32 %v3224_v51, %v3223_v39 }
 0x25b   : > { %2446 = vst.msk [vmem:[#allocation3 + $0x68] sm:$0xf] %vm2419_vm11, %v2376_v55  ;;  %v3325_v62 = vsel %vm380_vm0, %v3289_v54, 0.0 }
 0x25c   : > { %3188 = vst.msk [vmem:[%s5284_s23 + $0x14] sm:$0xf] %vm619_vm3, %v4138_v52  ;;  %v3227_v63 = vadd.f32 %v3226_v58, %v3225_v41  ;;  %v3326_v2 = vadd.f32 %v3325_v62, %v3324_v1 }
 0x25d   : > { %v2374_v4 = vpop.permute.xlu1 %2373 }
 0x25e   : > { %2445 = vst.msk [vmem:[#allocation3 + $0x64] sm:$0xf] %vm2419_vm11, %v2374_v4  ;;  %v2629_v49 = vpop.permute.xlu0 %2628  ;;  %v3328_v7 = vadd.f32 %v3327_v56, %v3326_v2  ;;  %v3229_v9 = vadd.f32 %v3228_v5, %v3227_v63 }
 0x25f   : > { %2701 = vst.msk [vmem:[#allocation3 + $0x60] sm:$0xf] %vm2676_vm12, %v2629_v49 }
 0x260   : > { %v3330_v30 = vadd.f32 %v3329_v27, %v3328_v7 }
 0x261   : > { %v2378_v10 = vpop.permute.xlu1 %2377 }
 0x262   : > { %2447 = vst.msk [vmem:[#allocation3 + $0x6c] sm:$0xf] %vm2419_vm11, %v2378_v10  ;;  %v2633_v11 = vpop.permute.xlu0 %2632 }
 0x263   : > { %2703 = vst.msk [vmem:[#allocation3 + $0x68] sm:$0xf] %vm2676_vm12, %v2633_v11 }
 0x265   : > { %v2631_v21 = vpop.permute.xlu1 %2630 }
 0x266   : > { %2702 = vst.msk [vmem:[#allocation3 + $0x64] sm:$0xf] %vm2676_vm12, %v2631_v21  ;;  %v1351_v29 = vpop.permute.xlu0 %1350 }
 0x267   : > { %1419 = vst.msk [vmem:[#allocation3 + $0x70] sm:$0xf] %vm1390_vm7, %v1351_v29 }
 0x269   : > { %v2635_v32 = vpop.permute.xlu1 %2634 }
 0x26a   : > { %2704 = vst.msk [vmem:[#allocation3 + $0x6c] sm:$0xf] %vm2676_vm12, %v2635_v32  ;;  %v1355_v26 = vpop.permute.xlu0 %1354 }
 0x26b   : > { %1421 = vst.msk [vmem:[#allocation3 + $0x78] sm:$0xf] %vm1390_vm7, %v1355_v26 }
 0x26d   : > { %v1353_v12 = vpop.permute.xlu1 %1352  ;;  %v4341_v48 = vld [vmem:[#allocation3 + $0x60] sm:$0xff]  }
 0x26e   : > { %1420 = vst.msk [vmem:[#allocation3 + $0x74] sm:$0xf] %vm1390_vm7, %v1353_v12  ;;  %v1608_v44 = vpop.permute.xlu0 %1607  ;;  %4293 = vmatprep.mubr.msk.bf16.mxu1 %vm2841_vm13, %v4341_v48 }
 0x26f   : > { %1676 = vst.msk [vmem:[#allocation3 + $0x70] sm:$0xf] %vm1647_vm8, %v1608_v44 }
 0x271   : > { %v1357_v16 = vpop.permute.xlu1 %1356  ;;  %v4342_v37 = vld [vmem:[#allocation3 + $0x68] sm:$0xff]  }
 0x272   : > { %1422 = vst.msk [vmem:[#allocation3 + $0x7c] sm:$0xf] %vm1390_vm7, %v1357_v16  ;;  %v1612_v34 = vpop.permute.xlu0 %1611  ;;  %4294 = vmatmul.mubr.msk.bf16.gmra.mxu1 %vm2841_vm13, %v4342_v37 }
 0x273   : > { %1678 = vst.msk [vmem:[#allocation3 + $0x78] sm:$0xf] %vm1647_vm8, %v1612_v34 }
 0x275   : > { %v1610_v60 = vpop.permute.xlu1 %1609 }
 0x276   : > { %1677 = vst.msk [vmem:[#allocation3 + $0x74] sm:$0xf] %vm1647_vm8, %v1610_v60  ;;  %v1865_v17 = vpop.permute.xlu0 %1864 }
 0x277   : > { %1933 = vst.msk [vmem:[#allocation3 + $0x70] sm:$0xf] %vm1904_vm9, %v1865_v17 }
 0x279   : > { %v1614_v43 = vpop.permute.xlu1 %1613 }
 0x27a   : > { %1679 = vst.msk [vmem:[#allocation3 + $0x7c] sm:$0xf] %vm1647_vm8, %v1614_v43  ;;  %v1869_v18 = vpop.permute.xlu0 %1868  ;;  %v4279_v53 = vpop.f32.mrf.mxu0 }
 0x27b   : > { %1935 = vst.msk [vmem:[#allocation3 + $0x78] sm:$0xf] %vm1904_vm9, %v1869_v18  ;;  %v4143_v19 = vpack.c.bf16 %v4279_v53, %v4279_v53  ;;  %v3294_v46 = vmul.f32 %v4279_v53, %v4279_v53  ;;  %v3234_v38 = vsel %vm380_vm0, %v4279_v53, 0.0 }
 0x27c   : > { %v2960_v20 = vpop.f32.mrf.mxu0 }
 0x27d   : > { %v1867_v23 = vpop.permute.xlu1 %1866  ;;  %3193 = vst.msk [vmem:[%s5284_s23 + $0x28] sm:$0xf] %vm619_vm3, %v4143_v19  ;;  %v4141_v8 = vpack.c.bf16 %v2960_v20, %v2960_v20  ;;  %v3230_v22 = vsel %vm380_vm0, %v2960_v20, 0.0  ;;  %v3292_v24 = vmul.f32 %v2960_v20, %v2960_v20  ;;  %v3335_v13 = vsel %vm380_vm0, %v3294_v46, 0.0 }
 0x27e   : > { %1934 = vst.msk [vmem:[#allocation3 + $0x74] sm:$0xf] %vm1904_vm9, %v1867_v23  ;;  %v2123_v25 = vpop.permute.xlu0 %2122  ;;  %v3231_v0 = vadd.f32 %v3230_v22, %v3229_v9  ;;  %v4280_v31 = vpop.f32.mrf.mxu0 }
 0x27f   : > { %2191 = vst.msk [vmem:[#allocation3 + $0x70] sm:$0xf] %vm2162_vm10, %v2123_v25  ;;  %v3331_v57 = vsel %vm380_vm0, %v3292_v24, 0.0  ;;  %v4144_v6 = vpack.c.bf16 %v4280_v31, %v4280_v31  ;;  %v3295_v39 = vmul.f32 %v4280_v31, %v4280_v31  ;;  %v3236_v45 = vsel %vm380_vm0, %v4280_v31, 0.0 }
 0x280   : > { %3191 = vst.msk [vmem:[%s5284_s23 + $0x20] sm:$0xf] %vm619_vm3, %v4141_v8  ;;  %v3332_v3 = vadd.f32 %v3331_v57, %v3330_v30  ;;  %v2963_v61 = vpop.f32.mrf.mxu0 }
 0x281   : > { %v1871_v36 = vpop.permute.xlu1 %1870  ;;  %3194 = vst.msk [vmem:[%s5284_s23 + $0x2c] sm:$0xf] %vm619_vm3, %v4144_v6  ;;  %v4142_v15 = vpack.c.bf16 %v2963_v61, %v2963_v61  ;;  %v3232_v33 = vsel %vm380_vm0, %v2963_v61, 0.0  ;;  %v3293_v47 = vmul.f32 %v2963_v61, %v2963_v61  ;;  %v3337_v54 = vsel %vm380_vm0, %v3295_v39, 0.0 }
 0x282   : > { %1936 = vst.msk [vmem:[#allocation3 + $0x7c] sm:$0xf] %vm1904_vm9, %v1871_v36  ;;  %v2127_v28 = vpop.permute.xlu0 %2126  ;;  %v3233_v42 = vadd.f32 %v3232_v33, %v3231_v0 }
 0x283   : > { %2193 = vst.msk [vmem:[#allocation3 + $0x78] sm:$0xf] %vm2162_vm10, %v2127_v28  ;;  %v3333_v14 = vsel %vm380_vm0, %v3293_v47, 0.0 }
 0x284   : > { %3192 = vst.msk [vmem:[%s5284_s23 + $0x24] sm:$0xf] %vm619_vm3, %v4142_v15  ;;  %v3235_v35 = vadd.f32 %v3234_v38, %v3233_v42  ;;  %v3334_v40 = vadd.f32 %v3333_v14, %v3332_v3 }
 0x285   : > { %v2125_v1 = vpop.permute.xlu1 %2124 }
 0x286   : > { %2192 = vst.msk [vmem:[#allocation3 + $0x74] sm:$0xf] %vm2162_vm10, %v2125_v1  ;;  %v2380_v50 = vpop.permute.xlu0 %2379  ;;  %v3336_v52 = vadd.f32 %v3335_v13, %v3334_v40  ;;  %v3237_v51 = vadd.f32 %v3236_v45, %v3235_v35 }
 0x287   : > { %2448 = vst.msk [vmem:[#allocation3 + $0x70] sm:$0xf] %vm2419_vm11, %v2380_v50 }
 0x288   : > { %v3338_v41 = vadd.f32 %v3337_v54, %v3336_v52 }
 0x289   : > { %v2129_v55 = vpop.permute.xlu1 %2128 }
 0x28a   : > { %2194 = vst.msk [vmem:[#allocation3 + $0x7c] sm:$0xf] %vm2162_vm10, %v2129_v55  ;;  %v2384_v58 = vpop.permute.xlu0 %2383 }
 0x28b   : > { %2450 = vst.msk [vmem:[#allocation3 + $0x78] sm:$0xf] %vm2419_vm11, %v2384_v58 }
 0x28d   : > { %v2382_v59 = vpop.permute.xlu1 %2381 }
 0x28e   : > { %2449 = vst.msk [vmem:[#allocation3 + $0x74] sm:$0xf] %vm2419_vm11, %v2382_v59  ;;  %v2637_v62 = vpop.permute.xlu0 %2636 }
 0x28f   : > { %2705 = vst.msk [vmem:[#allocation3 + $0x70] sm:$0xf] %vm2676_vm12, %v2637_v62 }
 0x291   : > { %v2386_v63 = vpop.permute.xlu1 %2385 }
 0x292   : > { %2451 = vst.msk [vmem:[#allocation3 + $0x7c] sm:$0xf] %vm2419_vm11, %v2386_v63  ;;  %v2641_v2 = vpop.permute.xlu0 %2640 }
 0x293   : > { %2707 = vst.msk [vmem:[#allocation3 + $0x78] sm:$0xf] %vm2676_vm12, %v2641_v2 }
 0x295   : > { %v2639_v4 = vpop.permute.xlu1 %2638 }
 0x296   : > { %2706 = vst.msk [vmem:[#allocation3 + $0x74] sm:$0xf] %vm2676_vm12, %v2639_v4 }
 0x299   : > { %v2643_v56 = vpop.permute.xlu1 %2642 }
 0x29a   : > { %2708 = vst.msk [vmem:[#allocation3 + $0x7c] sm:$0xf] %vm2676_vm12, %v2643_v56 }
 0x29d   : > { %v4343_v5 = vld [vmem:[#allocation3 + $0x70] sm:$0xff]  }
 0x29e   : > { %4297 = vmatprep.mubr.msk.bf16.mxu1 %vm2841_vm13, %v4343_v5 }
 0x2a1   : > { %v4344_v49 = vld [vmem:[#allocation3 + $0x78] sm:$0xff]  }
 0x2a2   : > { %v4283_v7 = vpop.f32.mrf.mxu0  ;;  %4298 = vmatmul.mubr.msk.bf16.gmra.mxu1 %vm2841_vm13, %v4344_v49 }
 0x2a3   : > { %v4147_v9 = vpack.c.bf16 %v4283_v7, %v4283_v7  ;;  %v3298_v44 = vmul.f32 %v4283_v7, %v4283_v7  ;;  %v3242_v17 = vsel %vm380_vm0, %v4283_v7, 0.0 }
 0x2a4   : > { %v2976_v27 = vpop.f32.mrf.mxu0 }
 0x2a5   : > { %3197 = vst.msk [vmem:[%s5284_s23 + $0x38] sm:$0xf] %vm619_vm3, %v4147_v9  ;;  %v4145_v10 = vpack.c.bf16 %v2976_v27, %v2976_v27  ;;  %v3238_v30 = vsel %vm380_vm0, %v2976_v27, 0.0  ;;  %v3296_v11 = vmul.f32 %v2976_v27, %v2976_v27  ;;  %v3343_v23 = vsel %vm380_vm0, %v3298_v44, 0.0 }
 0x2a6   : > { %v3239_v21 = vadd.f32 %v3238_v30, %v3237_v51  ;;  %v4284_v29 = vpop.f32.mrf.mxu0 }
 0x2a7   : > { %3195 = vst.msk [vmem:[%s5284_s23 + $0x30] sm:$0xf] %vm619_vm3, %v4145_v10  ;;  %v3339_v32 = vsel %vm380_vm0, %v3296_v11, 0.0  ;;  %v4148_v26 = vpack.c.bf16 %v4284_v29, %v4284_v29  ;;  %v3299_v43 = vmul.f32 %v4284_v29, %v4284_v29  ;;  %v3244_v20 = vsel %vm380_vm0, %v4284_v29, 0.0 }
 0x2a8   : > { %v3340_v12 = vadd.f32 %v3339_v32, %v3338_v41  ;;  %v2979_v48 = vpop.f32.mrf.mxu0 }
 0x2a9   : > { %3198 = vst.msk [vmem:[%s5284_s23 + $0x3c] sm:$0xf] %vm619_vm3, %v4148_v26  ;;  %v4146_v16 = vpack.c.bf16 %v2979_v48, %v2979_v48  ;;  %v3240_v37 = vsel %vm380_vm0, %v2979_v48, 0.0  ;;  %v3297_v34 = vmul.f32 %v2979_v48, %v2979_v48  ;;  %v3345_v24 = vsel %vm380_vm0, %v3299_v43, 0.0 }
 0x2aa   : > { %v3241_v60 = vadd.f32 %v3240_v37, %v3239_v21 }
 0x2ab   : > { %3196 = vst.msk [vmem:[%s5284_s23 + $0x34] sm:$0xf] %vm619_vm3, %v4146_v16  ;;  %v3341_v18 = vsel %vm380_vm0, %v3297_v34, 0.0 }
 0x2ac   : > { %v3243_v53 = vadd.f32 %v3242_v17, %v3241_v60  ;;  %v3342_v19 = vadd.f32 %v3341_v18, %v3340_v12 }
 0x2ae   : > { %v3344_v8 = vadd.f32 %v3343_v23, %v3342_v19  ;;  %v3245_v22 = vadd.f32 %v3244_v20, %v3243_v53 }
 0x2b0   : > { %v3346_v25 = vadd.f32 %v3345_v24, %v3344_v8 }
 0x2d2   : > { %v4287_v0 = vpop.f32.mrf.mxu1 }
 0x2d3   : > { %v4151_v31 = vpack.c.bf16 %v4287_v0, %v4287_v0  ;;  %v3302_v42 = vmul.f32 %v4287_v0, %v4287_v0  ;;  %v3250_v40 = vsel %vm380_vm0, %v4287_v0, 0.0 }
 0x2d4   : > { %v2992_v57 = vpop.f32.mrf.mxu1 }
 0x2d5   : > { %3201 = vst.msk [vmem:[%s5284_s23 + $0x48] sm:$0xf] %vm619_vm3, %v4151_v31  ;;  %v4149_v6 = vpack.c.bf16 %v2992_v57, %v2992_v57  ;;  %v3246_v3 = vsel %vm380_vm0, %v2992_v57, 0.0  ;;  %v3300_v36 = vmul.f32 %v2992_v57, %v2992_v57  ;;  %v3351_v52 = vsel %vm380_vm0, %v3302_v42, 0.0 }
 0x2d6   : > { %v3247_v61 = vadd.f32 %v3246_v3, %v3245_v22  ;;  %v4288_v46 = vpop.f32.mrf.mxu1 }
 0x2d7   : > { %3199 = vst.msk [vmem:[%s5284_s23 + $0x40] sm:$0xf] %vm619_vm3, %v4149_v6  ;;  %v3347_v15 = vsel %vm380_vm0, %v3300_v36, 0.0  ;;  %v4152_v33 = vpack.c.bf16 %v4288_v46, %v4288_v46  ;;  %v3303_v1 = vmul.f32 %v4288_v46, %v4288_v46  ;;  %v3252_v51 = vsel %vm380_vm0, %v4288_v46, 0.0 }
 0x2d8   : > { %v3348_v47 = vadd.f32 %v3347_v15, %v3346_v25  ;;  %v2995_v28 = vpop.f32.mrf.mxu1 }
 0x2d9   : > { %3202 = vst.msk [vmem:[%s5284_s23 + $0x4c] sm:$0xf] %vm619_vm3, %v4152_v33  ;;  %v4150_v38 = vpack.c.bf16 %v2995_v28, %v2995_v28  ;;  %v3248_v39 = vsel %vm380_vm0, %v2995_v28, 0.0  ;;  %v3301_v14 = vmul.f32 %v2995_v28, %v2995_v28  ;;  %v3353_v41 = vsel %vm380_vm0, %v3303_v1, 0.0 }
 0x2da   : > { %v3249_v35 = vadd.f32 %v3248_v39, %v3247_v61 }
 0x2db   : > { %3200 = vst.msk [vmem:[%s5284_s23 + $0x44] sm:$0xf] %vm619_vm3, %v4150_v38  ;;  %v3349_v13 = vsel %vm380_vm0, %v3301_v14, 0.0 }
 0x2dc   : > { %v3251_v45 = vadd.f32 %v3250_v40, %v3249_v35  ;;  %v3350_v50 = vadd.f32 %v3349_v13, %v3348_v47 }
 0x2de   : > { %v3352_v54 = vadd.f32 %v3351_v52, %v3350_v50  ;;  %v3253_v55 = vadd.f32 %v3252_v51, %v3251_v45 }
 0x2e0   : > { %v3354_v58 = vadd.f32 %v3353_v41, %v3352_v54 }
 0x302   : > { %v4291_v59 = vpop.f32.mrf.mxu1 }
 0x303   : > { %v4155_v62 = vpack.c.bf16 %v4291_v59, %v4291_v59  ;;  %v3306_v30 = vmul.f32 %v4291_v59, %v4291_v59  ;;  %v3258_v26 = vsel %vm380_vm0, %v4291_v59, 0.0 }
 0x304   : > { %v3008_v63 = vpop.f32.mrf.mxu1 }
 0x305   : > { %3205 = vst.msk [vmem:[%s5284_s23 + $0x58] sm:$0xf] %vm619_vm3, %v4155_v62  ;;  %v4153_v2 = vpack.c.bf16 %v3008_v63, %v3008_v63  ;;  %v3254_v4 = vsel %vm380_vm0, %v3008_v63, 0.0  ;;  %v3304_v56 = vmul.f32 %v3008_v63, %v3008_v63  ;;  %v3359_v37 = vsel %vm380_vm0, %v3306_v30, 0.0 }
 0x306   : > { %v3255_v5 = vadd.f32 %v3254_v4, %v3253_v55  ;;  %v4292_v49 = vpop.f32.mrf.mxu1 }
 0x307   : > { %3203 = vst.msk [vmem:[%s5284_s23 + $0x50] sm:$0xf] %vm619_vm3, %v4153_v2  ;;  %v3355_v7 = vsel %vm380_vm0, %v3304_v56, 0.0  ;;  %v4156_v9 = vpack.c.bf16 %v4292_v49, %v4292_v49  ;;  %v3307_v12 = vmul.f32 %v4292_v49, %v4292_v49  ;;  %v3260_v34 = vsel %vm380_vm0, %v4292_v49, 0.0 }
 0x308   : > { %v3356_v27 = vadd.f32 %v3355_v7, %v3354_v58  ;;  %v3011_v10 = vpop.f32.mrf.mxu1 }
 0x309   : > { %3206 = vst.msk [vmem:[%s5284_s23 + $0x5c] sm:$0xf] %vm619_vm3, %v4156_v9  ;;  %v4154_v11 = vpack.c.bf16 %v3011_v10, %v3011_v10  ;;  %v3256_v21 = vsel %vm380_vm0, %v3011_v10, 0.0  ;;  %v3305_v29 = vmul.f32 %v3011_v10, %v3011_v10  ;;  %v3361_v43 = vsel %vm380_vm0, %v3307_v12, 0.0 }
 0x30a   : > { %v3257_v32 = vadd.f32 %v3256_v21, %v3255_v5 }
 0x30b   : > { %3204 = vst.msk [vmem:[%s5284_s23 + $0x54] sm:$0xf] %vm619_vm3, %v4154_v11  ;;  %v3357_v48 = vsel %vm380_vm0, %v3305_v29, 0.0 }
 0x30c   : > { %v3259_v44 = vadd.f32 %v3258_v26, %v3257_v32  ;;  %v3358_v16 = vadd.f32 %v3357_v48, %v3356_v27 }
 0x30e   : > { %v3360_v60 = vadd.f32 %v3359_v37, %v3358_v16  ;;  %v3261_v17 = vadd.f32 %v3260_v34, %v3259_v44 }
 0x310   : > { %v3362_v18 = vadd.f32 %v3361_v43, %v3360_v60 }
 0x332   : > { %v4295_v53 = vpop.f32.mrf.mxu1 }
 0x333   : > { %v4159_v19 = vpack.c.bf16 %v4295_v53, %v4295_v53  ;;  %v3310_v33 = vmul.f32 %v4295_v53, %v4295_v53  ;;  %v3266_v28 = vsel %vm380_vm0, %v4295_v53, 0.0 }
 0x334   : > { %v3024_v23 = vpop.f32.mrf.mxu1 }
 0x335   : > { %3209 = vst.msk [vmem:[%s5284_s23 + $0x68] sm:$0xf] %vm619_vm3, %v4159_v19  ;;  %v4157_v20 = vpack.c.bf16 %v3024_v23, %v3024_v23  ;;  %v3308_v0 = vmul.f32 %v3024_v23, %v3024_v23  ;;  %v3262_v31 = vsel %vm380_vm0, %v3024_v23, 0.0  ;;  %v3367_v39 = vsel %vm380_vm0, %v3310_v33, 0.0 }
 0x336   : > { %v4296_v8 = vpop.f32.mrf.mxu1  ;;  %v3263_v36 = vadd.f32 %v3262_v31, %v3261_v17 }
 0x337   : > { %3207 = vst.msk [vmem:[%s5284_s23 + $0x60] sm:$0xf] %vm619_vm3, %v4157_v20  ;;  %v4160_v22 = vpack.c.bf16 %v4296_v8, %v4296_v8  ;;  %v3363_v6 = vsel %vm380_vm0, %v3308_v0, 0.0  ;;  %v3311_v14 = vmul.f32 %v4296_v8, %v4296_v8  ;;  %v3268_v13 = vsel %vm380_vm0, %v4296_v8, 0.0 }
 0x338   : > { %v3027_v24 = vpop.f32.mrf.mxu1  ;;  %v3364_v46 = vadd.f32 %v3363_v6, %v3362_v18 }
 0x339   : > { %3210 = vst.msk [vmem:[%s5284_s23 + $0x6c] sm:$0xf] %vm619_vm3, %v4160_v22  ;;  %v4158_v25 = vpack.c.bf16 %v3027_v24, %v3027_v24  ;;  %v3309_v57 = vmul.f32 %v3027_v24, %v3027_v24  ;;  %v3264_v3 = vsel %vm380_vm0, %v3027_v24, 0.0  ;;  %v3369_v55 = vsel %vm380_vm0, %v3311_v14, 0.0 }
 0x33a   : > { %v3265_v15 = vadd.f32 %v3264_v3, %v3263_v36 }
 0x33b   : > { %3208 = vst.msk [vmem:[%s5284_s23 + $0x64] sm:$0xf] %vm619_vm3, %v4158_v25  ;;  %v3365_v61 = vsel %vm380_vm0, %v3309_v57, 0.0 }
 0x33c   : > { %v3366_v47 = vadd.f32 %v3365_v61, %v3364_v46  ;;  %v3267_v42 = vadd.f32 %v3266_v28, %v3265_v15 }
 0x33e   : > { %v3368_v40 = vadd.f32 %v3367_v39, %v3366_v47  ;;  %v3269_v51 = vadd.f32 %v3268_v13, %v3267_v42 }
 0x340   : > { %v3370_v62 = vadd.f32 %v3369_v55, %v3368_v40 }
 0x362   : > { %v4299_v38 = vpop.f32.mrf.mxu1 }
 0x363   : > { %v4163_v35 = vpack.c.bf16 %v4299_v38, %v4299_v38  ;;  %v3314_v2 = vmul.f32 %v4299_v38, %v4299_v38  ;;  %v3274_v9 = vsel %vm380_vm0, %v4299_v38, 0.0 }
 0x364   : > { %v3040_v1 = vpop.f32.mrf.mxu1 }
 0x365   : > { %3213 = vst.msk [vmem:[%s5284_s23 + $0x78] sm:$0xf] %vm619_vm3, %v4163_v35  ;;  %v4161_v45 = vpack.c.bf16 %v3040_v1, %v3040_v1  ;;  %v3270_v50 = vsel %vm380_vm0, %v3040_v1, 0.0  ;;  %v3312_v52 = vmul.f32 %v3040_v1, %v3040_v1  ;;  %v3375_v21 = vsel %vm380_vm0, %v3314_v2, 0.0 }
 0x366   : > { %v4300_v54 = vpop.f32.mrf.mxu1  ;;  %v3271_v59 = vadd.f32 %v3270_v50, %v3269_v51 }
 0x367   : > { %3211 = vst.msk [vmem:[%s5284_s23 + $0x70] sm:$0xf] %vm619_vm3, %v4161_v45  ;;  %v3371_v41 = vsel %vm380_vm0, %v3312_v52, 0.0  ;;  %v4164_v58 = vpack.c.bf16 %v4300_v54, %v4300_v54  ;;  %v3315_v27 = vmul.f32 %v4300_v54, %v4300_v54  ;;  %v3276_v29 = vsel %vm380_vm0, %v4300_v54, 0.0 }
 0x368   : > { %v3043_v63 = vpop.f32.mrf.mxu1  ;;  %v3372_v49 = vadd.f32 %v3371_v41, %v3370_v62 }
 0x369   : > { %3214 = vst.msk [vmem:[%s5284_s23 + $0x7c] sm:$0xf] %vm619_vm3, %v4164_v58  ;;  %v4162_v4 = vpack.c.bf16 %v3043_v63, %v3043_v63  ;;  %v3272_v56 = vsel %vm380_vm0, %v3043_v63, 0.0  ;;  %v3313_v5 = vmul.f32 %v3043_v63, %v3043_v63  ;;  %v3377_v12 = vsel %vm380_vm0, %v3315_v27, 0.0 }
 0x36a   : > { %v3273_v7 = vadd.f32 %v3272_v56, %v3271_v59 }
 0x36b   : > { %3212 = vst.msk [vmem:[%s5284_s23 + $0x74] sm:$0xf] %vm619_vm3, %v4162_v4  ;;  %v3373_v10 = vsel %vm380_vm0, %v3313_v5, 0.0 }
 0x36c   : > { %v3275_v30 = vadd.f32 %v3274_v9, %v3273_v7  ;;  %v3374_v11 = vadd.f32 %v3373_v10, %v3372_v49 }
 0x36e   : > { %v3277_v32 = vadd.f32 %v3276_v29, %v3275_v30  ;;  %v3376_v26 = vadd.f32 %v3375_v21, %v3374_v11 }
 0x370   : > { %v3278_v48 = vrot.slane %v3277_v32, 4  ;;  %v3378_v44 = vadd.f32 %v3377_v12, %v3376_v26 }
 0x372   : > { %v3279_v16 = vadd.f32 %v3278_v48, %v3277_v32  ;;  %v3379_v37 = vrot.slane %v3378_v44, 4 }
 0x374   : > { %v3280_v34 = vrot.slane %v3279_v16, 2  ;;  %v3380_v60 = vadd.f32 %v3379_v37, %v3378_v44 }
 0x376   : > { %v3281_v17 = vadd.f32 %v3280_v34, %v3279_v16  ;;  %v3381_v43 = vrot.slane %v3380_v60, 2 }
 0x378   : > { %v3282_v18 = vrot.slane %v3281_v17, 1  ;;  %v3382_v53 = vadd.f32 %v3381_v43, %v3380_v60 }
 0x37a   : > { %v3383_v19 = vrot.slane %v3382_v53, 1  ;;  %v3283_v23 = vadd.f32 %v3282_v18, %v3281_v17 }
 0x37c   : > { %v3384_v20 = vadd.f32 %v3383_v19, %v3382_v53 }
 0x37e   : > { %v3386_v8 = vsel %vm3385_vm14, %v3283_v23, %v3384_v20 }
 0x37f   : > { %3387 = vst.msk [vmem:[%s208_s26] sm:$0x3] %vm383_vm2, %v3386_v8 }
 0x380 PF: > { %s15_s15 = sadd.s32 1, %s4353_s15  }
 0x381   : > { %p12_p4 = scmp.ge.s32.totalorder %s15_s15, 4  }
 0x383   :  { %14 = sbr.rel (!%p12_p4) target bundleno = 1 (0x1), region = 77 }

</bundles_post_ra>
